<compile_context>
chip_gen: v7x
topology: tpu7x:2x2x1
jax: 0.10.0
libtpu: 0.0.40
codegen_flags: <defaults>
</compile_context>

<pallas_src>
import functools

import jax
import jax.numpy as jnp
from jax.experimental import pallas as pl
from jax.experimental.pallas import tpu as pltpu

LRELU_SLOPE = 0.2
IN_EPS = 1e-5
LANE = 128


def _round_up(x, m):
    return ((x + m - 1) // m) * m


# ----------------------------------------------------------------------------
# Fused Conv2d (+ bias) (+ InstanceNorm2d) (+ LeakyReLU) Pallas kernel
# ----------------------------------------------------------------------------
def _conv_block_kernel(x_ref, w_ref, b_ref, o_ref, *,
                       stride, KH, KW, OH, OW, Hph, Wph, mode):
    """One batch element per grid step.

    x_ref: (1, s*s*Hph*Wph, Cin)  phase-split, zero-padded input (bf16)
    w_ref: (KH*KW, Cin, Coutp)    per-tap weights (bf16, channel-padded)
    b_ref: (1, Coutp)             bias (f32)
    o_ref: (1, OH*Wph, Coutp)     full-width output rows (columns >= OW are junk
                                  and get cropped by the wrapper)
    """
    s = stride
    Coutp = o_ref.shape[-1]
    L = OH * Wph  # full-width flattened output rows

    acc = jnp.zeros((L, Coutp), jnp.float32)
    # K-reduction over the 16 conv taps, fully inside the kernel (no im2col).
    for kh in range(KH):
        for kw in range(KW):
            p = (kh % s) * s + (kw % s)      # stride phase
            qh, qw = kh // s, kw // s        # offset inside that phase
            d0 = (p * Hph + qh) * Wph + qw   # static, contiguous 2-D slice
            lhs = x_ref[0, d0:d0 + L, :].astype(jnp.bfloat16)
            rhs = w_ref[kh * KW + kw]        # (Cin, Coutp) bf16
            acc = acc + jnp.dot(lhs, rhs, preferred_element_type=jnp.float32)

    y = acc + b_ref[...]                     # bias in f32

    if mode == "in_lrelu":
        # InstanceNorm2d(affine=False, eps=1e-5, biased var) over the OH*OW valid
        # pixels (mask out the junk full-width columns), then LeakyReLU(0.2).
        ridx = jax.lax.broadcasted_iota(jnp.int32, (L, 1), 0)
        valid = (ridx % Wph) < OW
        cnt = float(OH * OW)
        mean = jnp.sum(jnp.where(valid, y, 0.0), axis=0, keepdims=True) / cnt
        diff = jnp.where(valid, y - mean, 0.0)
        var = jnp.sum(diff * diff, axis=0, keepdims=True) / cnt
        y = (y - mean) * jax.lax.rsqrt(var + IN_EPS)
        y = jnp.where(y > 0, y, LRELU_SLOPE * y)
    elif mode == "lrelu":
        y = jnp.where(y > 0, y, LRELU_SLOPE * y)

    o_ref[0] = y.astype(o_ref.dtype)


def conv_block_pallas(x, weight, bias, *, stride, pad=1, mode="linear",
                      out_dtype=jnp.bfloat16):
    """x: (N, H, W, Cx) NHWC activation; Cx >= weight Cin (extra channels are
    zero-weighted lane padding).  weight: (Cout, Cin, KH, KW) torch layout.
    Returns (N, OH, OW, Coutp) with Coutp = Cout padded to a multiple of 128."""
    N, H, W, Cx = x.shape
    Cout, Cin, KH, KW = weight.shape
    assert Cx >= Cin
    s = stride
    OH = (H + 2 * pad - KH) // s + 1
    OW = (W + 2 * pad - KW) // s + 1
    Coutp = _round_up(Cout, LANE)            # lane-dense output channels

    # Glue: zero-pad + stride-phase split so every tap is a contiguous slice
    # inside the kernel (one input-sized copy instead of a 16x im2col blowup).
    Hp = _round_up(H + 2 * pad, s) + s       # +s guard rows for full-width rows
    Wp = _round_up(W + 2 * pad, s)
    xp = jnp.pad(x, ((0, 0), (pad, Hp - H - pad), (pad, Wp - W - pad), (0, 0)))
    Hph, Wph = Hp // s, Wp // s
    xph = xp.reshape(N, Hph, s, Wph, s, Cx).transpose(0, 2, 4, 1, 3, 5)
    xph = xph.reshape(N, s * s * Hph * Wph, Cx)

    # Weights -> (KH*KW, Cx, Coutp) bf16, zero-padded on both channel dims.
    w_t = jnp.transpose(weight, (2, 3, 1, 0)).reshape(KH * KW, Cin, Cout)
    w_t = jnp.pad(w_t, ((0, 0), (0, Cx - Cin), (0, Coutp - Cout))).astype(jnp.bfloat16)
    b_t = jnp.pad(bias, (0, Coutp - Cout)).reshape(1, Coutp).astype(jnp.float32)

    kernel = functools.partial(_conv_block_kernel, stride=s, KH=KH, KW=KW,
                               OH=OH, OW=OW, Hph=Hph, Wph=Wph, mode=mode)
    out = pl.pallas_call(
        kernel,
        out_shape=jax.ShapeDtypeStruct((N, OH * Wph, Coutp), out_dtype),
        grid=(N,),
        in_specs=[
            pl.BlockSpec((1, s * s * Hph * Wph, Cx), lambda n: (n, 0, 0)),
            pl.BlockSpec((KH * KW, Cx, Coutp), lambda n: (0, 0, 0)),
            pl.BlockSpec((1, Coutp), lambda n: (0, 0)),
        ],
        out_specs=pl.BlockSpec((1, OH * Wph, Coutp), lambda n: (n, 0, 0)),
        compiler_params=pltpu.CompilerParams(dimension_semantics=("parallel",)),
    )(xph, w_t, b_t)

    # Crop the junk full-width columns; keep channel lane padding for the next
    # layer (it is consumed by zero-weight input channels).
    return out.reshape(N, OH, Wph, Coutp)[:, :, :OW, :]


# ----------------------------------------------------------------------------
# Model: parameter init + forward (mirrors NLayerDiscriminator.__init__)
# ----------------------------------------------------------------------------
def init_params(key, input_nc, ndf=64, n_layers=3):
    kw = 4
    chans = [input_nc, ndf]
    strides = [2]
    has_norm = [False]
    for n in range(1, n_layers):
        chans.append(ndf * min(2 ** n, 8))
        strides.append(2)
        has_norm.append(True)
    chans.append(ndf * min(2 ** n_layers, 8))
    strides.append(1)
    has_norm.append(True)
    chans.append(1)                       # final 1-channel prediction map
    strides.append(1)
    has_norm.append(False)

    params = []
    for i in range(len(strides)):
        cin, cout = chans[i], chans[i + 1]
        key, k_w, k_b = jax.random.split(key, 3)
        bound = 1.0 / (cin * kw * kw) ** 0.5
        w = jax.random.uniform(k_w, (cout, cin, kw, kw), jnp.float32, -bound, bound)
        b = jax.random.uniform(k_b, (cout,), jnp.float32, -bound, bound)
        params.append({"w": w, "b": b, "stride": strides[i], "norm": has_norm[i]})
    return params


def nlayer_discriminator_forward(x_nchw, params):
    # NCHW -> NHWC; bf16 activations between layers (MXU-native, halves HBM
    # traffic); all accumulation / norm statistics stay in f32 inside kernels.
    x = jnp.transpose(x_nchw, (0, 2, 3, 1)).astype(jnp.bfloat16)
    last = len(params) - 1
    for i, p in enumerate(params):
        if p["norm"]:
            mode = "in_lrelu"            # conv + InstanceNorm + LeakyReLU fused
        elif i != last:
            mode = "lrelu"               # first layer: conv + LeakyReLU fused
        else:
            mode = "linear"              # final 1-channel conv
        out_dtype = jnp.float32 if i == last else jnp.bfloat16
        x = conv_block_pallas(x, p["w"], p["b"], stride=p["stride"], pad=1,
                              mode=mode, out_dtype=out_dtype)
    x = x[..., :1]                       # drop channel lane padding of final conv
    return jnp.transpose(x, (0, 3, 1, 2))  # NHWC -> NCHW


# ----------------------------------------------------------------------------
# Pure-JAX reference (sanity check only)
# ----------------------------------------------------------------------------
def _reference_forward(x_nchw, params):
    x = jnp.transpose(x_nchw, (0, 2, 3, 1)).astype(jnp.float32)
    last = len(params) - 1
    for i, p in enumerate(params):
        w = jnp.transpose(p["w"], (2, 3, 1, 0))  # HWIO
        s = p["stride"]
        x = jax.lax.conv_general_dilated(
            x, w, (s, s), [(1, 1), (1, 1)],
            dimension_numbers=("NHWC", "HWIO", "NHWC"),
            precision=jax.lax.Precision.HIGHEST) + p["b"]
        if p["norm"]:
            mean = jnp.mean(x, axis=(1, 2), keepdims=True)
            var = jnp.mean(jnp.square(x - mean), axis=(1, 2), keepdims=True)
            x = (x - mean) * jax.lax.rsqrt(var + IN_EPS)
            x = jnp.where(x > 0, x, LRELU_SLOPE * x)
        elif i != last:
            x = jnp.where(x > 0, x, LRELU_SLOPE * x)
    return jnp.transpose(x, (0, 3, 1, 2))


if __name__ == "__main__":
    key = jax.random.PRNGKey(0)
    key, k_x, k_p = jax.random.split(key, 3)

    input_nc, ndf, n_layers = 4, 8, 3
    x = jax.random.normal(k_x, (2, input_nc, 32, 32), jnp.float32)
    params = init_params(k_p, input_nc, ndf=ndf, n_layers=n_layers)

    out = nlayer_discriminator_forward(x, params)
    out = jax.block_until_ready(out)
    assert out.shape == (2, 1, 2, 2), out.shape

    ref = jax.block_until_ready(_reference_forward(x, params))
    # bf16 MXU operands / bf16 inter-layer activations vs the f32 reference.
    assert jnp.allclose(out, ref, atol=5e-2, rtol=5e-2), \
        float(jnp.max(jnp.abs(out - ref)))

    print("KERNEL_OK")
</pallas_src>

<mosaic_0001>
module attributes {stable_mosaic.version = 11 : i64} {
  func.func @_conv_block_kernel(%arg0: i32, %arg1: memref<1x1224x4xbf16, #tpu.memory_space<vmem>>, %arg2: memref<16x4x128xbf16, #tpu.memory_space<vmem>>, %arg3: memref<1x128xf32, #tpu.memory_space<vmem>>, %arg4: memref<1x272x128xbf16, #tpu.memory_space<vmem>>) attributes {dimension_semantics = [#tpu.dimension_semantics<parallel>], iteration_bounds = array<i64: 2>, scalar_prefetch = 0 : i64, scratch_operands = 0 : i64, tpu.core_type = #tpu.core_type<tc>, window_params = [{transform_indices = @transform_0, window_bounds = array<i64: 1, 1224, 4>}, {pipeline_mode = #tpu.pipeline_mode<synchronous>, transform_indices = @transform_1, window_bounds = array<i64: 16, 4, 128>}, {pipeline_mode = #tpu.pipeline_mode<synchronous>, transform_indices = @transform_2, window_bounds = array<i64: 1, 128>}, {transform_indices = @transform_3, window_bounds = array<i64: 1, 272, 128>}]} {
    %cst = arith.constant 0.000000e+00 : f32
    %0 = vector.broadcast %cst : f32 to vector<272x128xf32>
    %c0 = arith.constant 0 : index
    %c0_0 = arith.constant 0 : index
    %c0_1 = arith.constant 0 : index
    %1 = vector.load %arg1[%c0, %c0_0, %c0_1] : memref<1x1224x4xbf16, #tpu.memory_space<vmem>>, vector<1x272x4xbf16>
    %2 = vector.shape_cast %1 : vector<1x272x4xbf16> to vector<272x4xbf16>
    %c0_2 = arith.constant 0 : index
    %c0_3 = arith.constant 0 : index
    %c0_4 = arith.constant 0 : index
    %3 = vector.load %arg2[%c0_2, %c0_3, %c0_4] : memref<16x4x128xbf16, #tpu.memory_space<vmem>>, vector<1x4x128xbf16>
    %4 = vector.shape_cast %3 : vector<1x4x128xbf16> to vector<4x128xbf16>
    %cst_5 = arith.constant dense<0.000000e+00> : vector<272x128xf32>
    %5 = tpu.matmul %2, %4, %cst_5 {dimension_numbers = #tpu.dot_dimension_numbers<[1], [0], [0], [1], [0, 0, 1, 1], [], []>} : vector<272x4xbf16>, vector<4x128xbf16>, vector<272x128xf32> -> vector<272x128xf32>
    %6 = arith.addf %0, %5 : vector<272x128xf32>
    %c0_6 = arith.constant 0 : index
    %c306 = arith.constant 306 : index
    %c0_7 = arith.constant 0 : index
    %7 = vector.load %arg1[%c0_6, %c306, %c0_7] : memref<1x1224x4xbf16, #tpu.memory_space<vmem>>, vector<1x272x4xbf16>
    %8 = vector.shape_cast %7 : vector<1x272x4xbf16> to vector<272x4xbf16>
    %c1 = arith.constant 1 : index
    %c0_8 = arith.constant 0 : index
    %c0_9 = arith.constant 0 : index
    %9 = vector.load %arg2[%c1, %c0_8, %c0_9] : memref<16x4x128xbf16, #tpu.memory_space<vmem>>, vector<1x4x128xbf16>
    %10 = vector.shape_cast %9 : vector<1x4x128xbf16> to vector<4x128xbf16>
    %cst_10 = arith.constant dense<0.000000e+00> : vector<272x128xf32>
    %11 = tpu.matmul %8, %10, %cst_10 {dimension_numbers = #tpu.dot_dimension_numbers<[1], [0], [0], [1], [0, 0, 1, 1], [], []>} : vector<272x4xbf16>, vector<4x128xbf16>, vector<272x128xf32> -> vector<272x128xf32>
    %12 = arith.addf %6, %11 : vector<272x128xf32>
    %c0_11 = arith.constant 0 : index
    %c1_12 = arith.constant 1 : index
    %c0_13 = arith.constant 0 : index
    %13 = vector.load %arg1[%c0_11, %c1_12, %c0_13] : memref<1x1224x4xbf16, #tpu.memory_space<vmem>>, vector<1x272x4xbf16>
    %14 = vector.shape_cast %13 : vector<1x272x4xbf16> to vector<272x4xbf16>
    %c2 = arith.constant 2 : index
    %c0_14 = arith.constant 0 : index
    %c0_15 = arith.constant 0 : index
    %15 = vector.load %arg2[%c2, %c0_14, %c0_15] : memref<16x4x128xbf16, #tpu.memory_space<vmem>>, vector<1x4x128xbf16>
    %16 = vector.shape_cast %15 : vector<1x4x128xbf16> to vector<4x128xbf16>
    %cst_16 = arith.constant dense<0.000000e+00> : vector<272x128xf32>
    %17 = tpu.matmul %14, %16, %cst_16 {dimension_numbers = #tpu.dot_dimension_numbers<[1], [0], [0], [1], [0, 0, 1, 1], [], []>} : vector<272x4xbf16>, vector<4x128xbf16>, vector<272x128xf32> -> vector<272x128xf32>
    %18 = arith.addf %12, %17 : vector<272x128xf32>
    %c0_17 = arith.constant 0 : index
    %c307 = arith.constant 307 : index
    %c0_18 = arith.constant 0 : index
    %19 = vector.load %arg1[%c0_17, %c307, %c0_18] : memref<1x1224x4xbf16, #tpu.memory_space<vmem>>, vector<1x272x4xbf16>
    %20 = vector.shape_cast %19 : vector<1x272x4xbf16> to vector<272x4xbf16>
    %c3 = arith.constant 3 : index
    %c0_19 = arith.constant 0 : index
    %c0_20 = arith.constant 0 : index
    %21 = vector.load %arg2[%c3, %c0_19, %c0_20] : memref<16x4x128xbf16, #tpu.memory_space<vmem>>, vector<1x4x128xbf16>
    %22 = vector.shape_cast %21 : vector<1x4x128xbf16> to vector<4x128xbf16>
    %cst_21 = arith.constant dense<0.000000e+00> : vector<272x128xf32>
    %23 = tpu.matmul %20, %22, %cst_21 {dimension_numbers = #tpu.dot_dimension_numbers<[1], [0], [0], [1], [0, 0, 1, 1], [], []>} : vector<272x4xbf16>, vector<4x128xbf16>, vector<272x128xf32> -> vector<272x128xf32>
    %24 = arith.addf %18, %23 : vector<272x128xf32>
    %c0_22 = arith.constant 0 : index
    %c612 = arith.constant 612 : index
    %c0_23 = arith.constant 0 : index
    %25 = vector.load %arg1[%c0_22, %c612, %c0_23] : memref<1x1224x4xbf16, #tpu.memory_space<vmem>>, vector<1x272x4xbf16>
    %26 = vector.shape_cast %25 : vector<1x272x4xbf16> to vector<272x4xbf16>
    %c4 = arith.constant 4 : index
    %c0_24 = arith.constant 0 : index
    %c0_25 = arith.constant 0 : index
    %27 = vector.load %arg2[%c4, %c0_24, %c0_25] : memref<16x4x128xbf16, #tpu.memory_space<vmem>>, vector<1x4x128xbf16>
    %28 = vector.shape_cast %27 : vector<1x4x128xbf16> to vector<4x128xbf16>
    %cst_26 = arith.constant dense<0.000000e+00> : vector<272x128xf32>
    %29 = tpu.matmul %26, %28, %cst_26 {dimension_numbers = #tpu.dot_dimension_numbers<[1], [0], [0], [1], [0, 0, 1, 1], [], []>} : vector<272x4xbf16>, vector<4x128xbf16>, vector<272x128xf32> -> vector<272x128xf32>
    %30 = arith.addf %24, %29 : vector<272x128xf32>
    %c0_27 = arith.constant 0 : index
    %c918 = arith.constant 918 : index
    %c0_28 = arith.constant 0 : index
    %31 = vector.load %arg1[%c0_27, %c918, %c0_28] : memref<1x1224x4xbf16, #tpu.memory_space<vmem>>, vector<1x272x4xbf16>
    %32 = vector.shape_cast %31 : vector<1x272x4xbf16> to vector<272x4xbf16>
    %c5 = arith.constant 5 : index
    %c0_29 = arith.constant 0 : index
    %c0_30 = arith.constant 0 : index
    %33 = vector.load %arg2[%c5, %c0_29, %c0_30] : memref<16x4x128xbf16, #tpu.memory_space<vmem>>, vector<1x4x128xbf16>
    %34 = vector.shape_cast %33 : vector<1x4x128xbf16> to vector<4x128xbf16>
    %cst_31 = arith.constant dense<0.000000e+00> : vector<272x128xf32>
    %35 = tpu.matmul %32, %34, %cst_31 {dimension_numbers = #tpu.dot_dimension_numbers<[1], [0], [0], [1], [0, 0, 1, 1], [], []>} : vector<272x4xbf16>, vector<4x128xbf16>, vector<272x128xf32> -> vector<272x128xf32>
    %36 = arith.addf %30, %35 : vector<272x128xf32>
    %c0_32 = arith.constant 0 : index
    %c613 = arith.constant 613 : index
    %c0_33 = arith.constant 0 : index
    %37 = vector.load %arg1[%c0_32, %c613, %c0_33] : memref<1x1224x4xbf16, #tpu.memory_space<vmem>>, vector<1x272x4xbf16>
    %38 = vector.shape_cast %37 : vector<1x272x4xbf16> to vector<272x4xbf16>
    %c6 = arith.constant 6 : index
    %c0_34 = arith.constant 0 : index
    %c0_35 = arith.constant 0 : index
    %39 = vector.load %arg2[%c6, %c0_34, %c0_35] : memref<16x4x128xbf16, #tpu.memory_space<vmem>>, vector<1x4x128xbf16>
    %40 = vector.shape_cast %39 : vector<1x4x128xbf16> to vector<4x128xbf16>
    %cst_36 = arith.constant dense<0.000000e+00> : vector<272x128xf32>
    %41 = tpu.matmul %38, %40, %cst_36 {dimension_numbers = #tpu.dot_dimension_numbers<[1], [0], [0], [1], [0, 0, 1, 1], [], []>} : vector<272x4xbf16>, vector<4x128xbf16>, vector<272x128xf32> -> vector<272x128xf32>
    %42 = arith.addf %36, %41 : vector<272x128xf32>
    %c0_37 = arith.constant 0 : index
    %c919 = arith.constant 919 : index
    %c0_38 = arith.constant 0 : index
    %43 = vector.load %arg1[%c0_37, %c919, %c0_38] : memref<1x1224x4xbf16, #tpu.memory_space<vmem>>, vector<1x272x4xbf16>
    %44 = vector.shape_cast %43 : vector<1x272x4xbf16> to vector<272x4xbf16>
    %c7 = arith.constant 7 : index
    %c0_39 = arith.constant 0 : index
    %c0_40 = arith.constant 0 : index
    %45 = vector.load %arg2[%c7, %c0_39, %c0_40] : memref<16x4x128xbf16, #tpu.memory_space<vmem>>, vector<1x4x128xbf16>
    %46 = vector.shape_cast %45 : vector<1x4x128xbf16> to vector<4x128xbf16>
    %cst_41 = arith.constant dense<0.000000e+00> : vector<272x128xf32>
    %47 = tpu.matmul %44, %46, %cst_41 {dimension_numbers = #tpu.dot_dimension_numbers<[1], [0], [0], [1], [0, 0, 1, 1], [], []>} : vector<272x4xbf16>, vector<4x128xbf16>, vector<272x128xf32> -> vector<272x128xf32>
    %48 = arith.addf %42, %47 : vector<272x128xf32>
    %c0_42 = arith.constant 0 : index
    %c17 = arith.constant 17 : index
    %c0_43 = arith.constant 0 : index
    %49 = vector.load %arg1[%c0_42, %c17, %c0_43] : memref<1x1224x4xbf16, #tpu.memory_space<vmem>>, vector<1x272x4xbf16>
    %50 = vector.shape_cast %49 : vector<1x272x4xbf16> to vector<272x4xbf16>
    %c8 = arith.constant 8 : index
    %c0_44 = arith.constant 0 : index
    %c0_45 = arith.constant 0 : index
    %51 = vector.load %arg2[%c8, %c0_44, %c0_45] : memref<16x4x128xbf16, #tpu.memory_space<vmem>>, vector<1x4x128xbf16>
    %52 = vector.shape_cast %51 : vector<1x4x128xbf16> to vector<4x128xbf16>
    %cst_46 = arith.constant dense<0.000000e+00> : vector<272x128xf32>
    %53 = tpu.matmul %50, %52, %cst_46 {dimension_numbers = #tpu.dot_dimension_numbers<[1], [0], [0], [1], [0, 0, 1, 1], [], []>} : vector<272x4xbf16>, vector<4x128xbf16>, vector<272x128xf32> -> vector<272x128xf32>
    %54 = arith.addf %48, %53 : vector<272x128xf32>
    %c0_47 = arith.constant 0 : index
    %c323 = arith.constant 323 : index
    %c0_48 = arith.constant 0 : index
    %55 = vector.load %arg1[%c0_47, %c323, %c0_48] : memref<1x1224x4xbf16, #tpu.memory_space<vmem>>, vector<1x272x4xbf16>
    %56 = vector.shape_cast %55 : vector<1x272x4xbf16> to vector<272x4xbf16>
    %c9 = arith.constant 9 : index
    %c0_49 = arith.constant 0 : index
    %c0_50 = arith.constant 0 : index
    %57 = vector.load %arg2[%c9, %c0_49, %c0_50] : memref<16x4x128xbf16, #tpu.memory_space<vmem>>, vector<1x4x128xbf16>
    %58 = vector.shape_cast %57 : vector<1x4x128xbf16> to vector<4x128xbf16>
    %cst_51 = arith.constant dense<0.000000e+00> : vector<272x128xf32>
    %59 = tpu.matmul %56, %58, %cst_51 {dimension_numbers = #tpu.dot_dimension_numbers<[1], [0], [0], [1], [0, 0, 1, 1], [], []>} : vector<272x4xbf16>, vector<4x128xbf16>, vector<272x128xf32> -> vector<272x128xf32>
    %60 = arith.addf %54, %59 : vector<272x128xf32>
    %c0_52 = arith.constant 0 : index
    %c18 = arith.constant 18 : index
    %c0_53 = arith.constant 0 : index
    %61 = vector.load %arg1[%c0_52, %c18, %c0_53] : memref<1x1224x4xbf16, #tpu.memory_space<vmem>>, vector<1x272x4xbf16>
    %62 = vector.shape_cast %61 : vector<1x272x4xbf16> to vector<272x4xbf16>
    %c10 = arith.constant 10 : index
    %c0_54 = arith.constant 0 : index
    %c0_55 = arith.constant 0 : index
    %63 = vector.load %arg2[%c10, %c0_54, %c0_55] : memref<16x4x128xbf16, #tpu.memory_space<vmem>>, vector<1x4x128xbf16>
    %64 = vector.shape_cast %63 : vector<1x4x128xbf16> to vector<4x128xbf16>
    %cst_56 = arith.constant dense<0.000000e+00> : vector<272x128xf32>
    %65 = tpu.matmul %62, %64, %cst_56 {dimension_numbers = #tpu.dot_dimension_numbers<[1], [0], [0], [1], [0, 0, 1, 1], [], []>} : vector<272x4xbf16>, vector<4x128xbf16>, vector<272x128xf32> -> vector<272x128xf32>
    %66 = arith.addf %60, %65 : vector<272x128xf32>
    %c0_57 = arith.constant 0 : index
    %c324 = arith.constant 324 : index
    %c0_58 = arith.constant 0 : index
    %67 = vector.load %arg1[%c0_57, %c324, %c0_58] : memref<1x1224x4xbf16, #tpu.memory_space<vmem>>, vector<1x272x4xbf16>
    %68 = vector.shape_cast %67 : vector<1x272x4xbf16> to vector<272x4xbf16>
    %c11 = arith.constant 11 : index
    %c0_59 = arith.constant 0 : index
    %c0_60 = arith.constant 0 : index
    %69 = vector.load %arg2[%c11, %c0_59, %c0_60] : memref<16x4x128xbf16, #tpu.memory_space<vmem>>, vector<1x4x128xbf16>
    %70 = vector.shape_cast %69 : vector<1x4x128xbf16> to vector<4x128xbf16>
    %cst_61 = arith.constant dense<0.000000e+00> : vector<272x128xf32>
    %71 = tpu.matmul %68, %70, %cst_61 {dimension_numbers = #tpu.dot_dimension_numbers<[1], [0], [0], [1], [0, 0, 1, 1], [], []>} : vector<272x4xbf16>, vector<4x128xbf16>, vector<272x128xf32> -> vector<272x128xf32>
    %72 = arith.addf %66, %71 : vector<272x128xf32>
    %c0_62 = arith.constant 0 : index
    %c629 = arith.constant 629 : index
    %c0_63 = arith.constant 0 : index
    %73 = vector.load %arg1[%c0_62, %c629, %c0_63] : memref<1x1224x4xbf16, #tpu.memory_space<vmem>>, vector<1x272x4xbf16>
    %74 = vector.shape_cast %73 : vector<1x272x4xbf16> to vector<272x4xbf16>
    %c12 = arith.constant 12 : index
    %c0_64 = arith.constant 0 : index
    %c0_65 = arith.constant 0 : index
    %75 = vector.load %arg2[%c12, %c0_64, %c0_65] : memref<16x4x128xbf16, #tpu.memory_space<vmem>>, vector<1x4x128xbf16>
    %76 = vector.shape_cast %75 : vector<1x4x128xbf16> to vector<4x128xbf16>
    %cst_66 = arith.constant dense<0.000000e+00> : vector<272x128xf32>
    %77 = tpu.matmul %74, %76, %cst_66 {dimension_numbers = #tpu.dot_dimension_numbers<[1], [0], [0], [1], [0, 0, 1, 1], [], []>} : vector<272x4xbf16>, vector<4x128xbf16>, vector<272x128xf32> -> vector<272x128xf32>
    %78 = arith.addf %72, %77 : vector<272x128xf32>
    %c0_67 = arith.constant 0 : index
    %c935 = arith.constant 935 : index
    %c0_68 = arith.constant 0 : index
    %79 = vector.load %arg1[%c0_67, %c935, %c0_68] : memref<1x1224x4xbf16, #tpu.memory_space<vmem>>, vector<1x272x4xbf16>
    %80 = vector.shape_cast %79 : vector<1x272x4xbf16> to vector<272x4xbf16>
    %c13 = arith.constant 13 : index
    %c0_69 = arith.constant 0 : index
    %c0_70 = arith.constant 0 : index
    %81 = vector.load %arg2[%c13, %c0_69, %c0_70] : memref<16x4x128xbf16, #tpu.memory_space<vmem>>, vector<1x4x128xbf16>
    %82 = vector.shape_cast %81 : vector<1x4x128xbf16> to vector<4x128xbf16>
    %cst_71 = arith.constant dense<0.000000e+00> : vector<272x128xf32>
    %83 = tpu.matmul %80, %82, %cst_71 {dimension_numbers = #tpu.dot_dimension_numbers<[1], [0], [0], [1], [0, 0, 1, 1], [], []>} : vector<272x4xbf16>, vector<4x128xbf16>, vector<272x128xf32> -> vector<272x128xf32>
    %84 = arith.addf %78, %83 : vector<272x128xf32>
    %c0_72 = arith.constant 0 : index
    %c630 = arith.constant 630 : index
    %c0_73 = arith.constant 0 : index
    %85 = vector.load %arg1[%c0_72, %c630, %c0_73] : memref<1x1224x4xbf16, #tpu.memory_space<vmem>>, vector<1x272x4xbf16>
    %86 = vector.shape_cast %85 : vector<1x272x4xbf16> to vector<272x4xbf16>
    %c14 = arith.constant 14 : index
    %c0_74 = arith.constant 0 : index
    %c0_75 = arith.constant 0 : index
    %87 = vector.load %arg2[%c14, %c0_74, %c0_75] : memref<16x4x128xbf16, #tpu.memory_space<vmem>>, vector<1x4x128xbf16>
    %88 = vector.shape_cast %87 : vector<1x4x128xbf16> to vector<4x128xbf16>
    %cst_76 = arith.constant dense<0.000000e+00> : vector<272x128xf32>
    %89 = tpu.matmul %86, %88, %cst_76 {dimension_numbers = #tpu.dot_dimension_numbers<[1], [0], [0], [1], [0, 0, 1, 1], [], []>} : vector<272x4xbf16>, vector<4x128xbf16>, vector<272x128xf32> -> vector<272x128xf32>
    %90 = arith.addf %84, %89 : vector<272x128xf32>
    %c0_77 = arith.constant 0 : index
    %c936 = arith.constant 936 : index
    %c0_78 = arith.constant 0 : index
    %91 = vector.load %arg1[%c0_77, %c936, %c0_78] : memref<1x1224x4xbf16, #tpu.memory_space<vmem>>, vector<1x272x4xbf16>
    %92 = vector.shape_cast %91 : vector<1x272x4xbf16> to vector<272x4xbf16>
    %c15 = arith.constant 15 : index
    %c0_79 = arith.constant 0 : index
    %c0_80 = arith.constant 0 : index
    %93 = vector.load %arg2[%c15, %c0_79, %c0_80] : memref<16x4x128xbf16, #tpu.memory_space<vmem>>, vector<1x4x128xbf16>
    %94 = vector.shape_cast %93 : vector<1x4x128xbf16> to vector<4x128xbf16>
    %cst_81 = arith.constant dense<0.000000e+00> : vector<272x128xf32>
    %95 = tpu.matmul %92, %94, %cst_81 {dimension_numbers = #tpu.dot_dimension_numbers<[1], [0], [0], [1], [0, 0, 1, 1], [], []>} : vector<272x4xbf16>, vector<4x128xbf16>, vector<272x128xf32> -> vector<272x128xf32>
    %96 = arith.addf %90, %95 : vector<272x128xf32>
    %c0_82 = arith.constant 0 : index
    %c0_83 = arith.constant 0 : index
    %97 = vector.load %arg3[%c0_82, %c0_83] : memref<1x128xf32, #tpu.memory_space<vmem>>, vector<1x128xf32>
    %98 = vector.broadcast %97 : vector<1x128xf32> to vector<272x128xf32>
    %99 = arith.addf %96, %98 : vector<272x128xf32>
    %cst_84 = arith.constant 0.000000e+00 : f32
    %100 = vector.broadcast %cst_84 : f32 to vector<272x128xf32>
    %101 = arith.cmpf ogt, %99, %100 : vector<272x128xf32>
    %cst_85 = arith.constant 2.000000e-01 : f32
    %102 = vector.broadcast %cst_85 : f32 to vector<272x128xf32>
    %103 = arith.mulf %102, %99 : vector<272x128xf32>
    %104 = arith.select %101, %99, %103 : vector<272x128xi1>, vector<272x128xf32>
    %105 = arith.truncf %104 : vector<272x128xf32> to vector<272x128xbf16>
    %c0_86 = arith.constant 0 : index
    %c0_87 = arith.constant 0 : index
    %c0_88 = arith.constant 0 : index
    %106 = vector.load %arg4[%c0_86, %c0_87, %c0_88] : memref<1x272x128xbf16, #tpu.memory_space<vmem>>, vector<1x272x128xbf16>
    %107 = vector.shape_cast %106 : vector<1x272x128xbf16> to vector<272x128xbf16>
    %108 = vector.shape_cast %105 : vector<272x128xbf16> to vector<1x272x128xbf16>
    tpu.vector_store %arg4[%c0_86, %c0_87, %c0_88], %108 {strides = array<i32>} : memref<1x272x128xbf16, #tpu.memory_space<vmem>>, vector<1x272x128xbf16>,
    return
  }
  func.func @transform_0(%arg0: i32) -> (i32, i32, i32) {
    %c0_i32 = arith.constant 0 : i32
    %c0_i32_0 = arith.constant 0 : i32
    %c0_i32_1 = arith.constant 0 : i32
    return %arg0, %c0_i32, %c0_i32_0 : i32, i32, i32
  }
  func.func @transform_1(%arg0: i32) -> (i32, i32, i32) {
    %c0_i32 = arith.constant 0 : i32
    %c0_i32_0 = arith.constant 0 : i32
    %c0_i32_1 = arith.constant 0 : i32
    %c0_i32_2 = arith.constant 0 : i32
    return %c0_i32, %c0_i32_0, %c0_i32_1 : i32, i32, i32
  }
  func.func @transform_2(%arg0: i32) -> (i32, i32) {
    %c0_i32 = arith.constant 0 : i32
    %c0_i32_0 = arith.constant 0 : i32
    %c0_i32_1 = arith.constant 0 : i32
    return %c0_i32, %c0_i32_0 : i32, i32
  }
  func.func @transform_3(%arg0: i32) -> (i32, i32, i32) {
    %c0_i32 = arith.constant 0 : i32
    %c0_i32_0 = arith.constant 0 : i32
    %c0_i32_1 = arith.constant 0 : i32
    return %arg0, %c0_i32, %c0_i32_0 : i32, i32, i32
  }
}

</mosaic_0001>

<bundles_post_ra>
// kernel: tpu_custom_call.1
= control target key start
LH: loop header
LB: loop body
LE: loop exit
PB: predicated region body
PF: predicated region fallthrough
CT: control target
= control target key end

     0   :  { %8 = vsyncpa [#allocation3], 0  ;;  %s12531_s0 = inlined_call_operand.vmem [shape: bf16[2,1224,4], index: 0, kind: input, shape index: {}]   ;;  %s12532_s1 = inlined_call_operand.vmem [shape: bf16[16,4,128], index: 1, kind: input, shape index: {}]   ;;  %s12533_s2 = inlined_call_operand.vmem [shape: f32[1,128], index: 2, kind: input, shape index: {}]   ;;  %s12534_s3 = inlined_call_operand.hbm [shape: bf16[2,272,128], index: 3, kind: output, shape index: {}]  }
   0x1   :  { %10 = vsyncpa [#allocation3 + $0x1], 0  ;;  %s9631_s12 = smov 0   ;;  %s9633_s13 = smov 0  }
   0x2   :  { %s9635_s14 = smov 0   ;;  %s9637_s15 = smov 0  }
   0x3 LB: > { %s9652_s16 = sadd.s32 4294967295, %s9604_s15   ;;  %s7243_s17 = sadd.s32 4294967294, %s9604_s15   ;;  %s9604_s15 = sphi %s9637_s15, %s12887_s15   ;;  %s9600_s14 = sphi %s9635_s14, %s12886_s14   ;;  %s9596_s13 = sphi %s9633_s13, %s12885_s13   ;;  %s9592_s12 = sphi %s9631_s12, %s12884_s12  }
   0x4   : > { %s9656_s18 = sadd.s32 1, %s9604_s15   ;;  %s91_s19 = sadd.s32 1, %s9600_s14 }
   0x5   : > { %s88_s20 = ssub.s32 %s9604_s15, %s9656_s18  ;;  %p101_p0 = scmp.ne.s32.totalorder %s9600_s14, %s9596_s13 }
   0x6   : > { %p89_p1 = scmp.eq.s32.totalorder %s88_s20, 0  ;;  %p102_p2 = scmp.eq.s32.totalorder %s9652_s16, 1 }
   0x7   : > { %p107_p3 = scmp.ne.s32.totalorder %s9596_s13, %s9592_s12  ;;  %p108_p4 = scmp.eq.s32.totalorder %s7243_s17, 1 }
   0x8   : > { %s9667_s21 = scalar_select %p89_p1, %s9600_s14, %s91_s19  }
   0x9   : > { %p9669_p5 = por %p102_p2, %p101_p0  ;;  %p9673_p6 = por %p108_p4, %p107_p3 }
   0xa   : > { %p7246_p7 = scmp.ge.s32.totalorder %s9604_s15, 1  ;;  %p140_p8 = scmp.lt.s32.totalorder %s9604_s15, 3 }
   0xc   : > { %p141_p9 = pnand %p7246_p7, %p140_p8 }
   0xe   : > { %144 = sbr.rel (%p141_p9) target bundleno = 1354 (0x54a), region = 32 }
  0x15   : > { %v7248_v0 = vld [vmem:[%s12532_s1 + $0x2] sm:$0x3]  ;;  %vm418_vm0 = vcmask 1041408   ;;  %v204_v1 = vld [vmem:[%s12532_s1] sm:$0x3]  ;;  %v12547_v2 = vmov 0.0  }
  0x16   : > { %8180 = vmatprep.subr.bf16.mxu0 %v12547_v2  ;;  %8250 = vmatprep.subr.bf16.mxu1 %v12547_v2  ;;  %v420_v3 = vsel %vm418_vm0, %v7248_v0, 0  ;;  %v728_v4 = vsel %vm418_vm0, %v204_v1, 0  ;;  %p164_p10 = scmp.lt.s32.totalorder %s9652_s16, 1  ;;  %vm9607_vm1 = vmmov 0   ;;  %v7354_v5 = vld [vmem:[%s12532_s1 + $0x6] sm:$0x3] }
  0x17   : > { %8181 = vmatpush3.bf16.msra.mxu0 %v420_v3  ;;  %8251 = vmatpush3.bf16.msra.mxu1 %v728_v4  ;;  %vm366_vm2 = vcmask 31744   ;;  %v7318_v7 = vld [vmem:[%s12532_s1 + $0x4] sm:$0x3]  ;;  %v1642_v8 = vsel %vm418_vm0, %v7354_v5, 0  ;;  %vm330_vm3 = vcmask 1046528   ;;  %vm2390_vm6 = vcmask 1044480  }
  0x18   : > { %8252 = vmatprep.mubr.msk.bf16.mxu1 %vm9607_vm1, %v12547_v2  ;;  %8182 = vmatprep.mubr.msk.bf16.mxu0 %vm9607_vm1, %v12547_v2  ;;  %s165_s28 = scalar_select %p164_p10, %s9652_s16, 1  ;;  %v1217_v13 = vsel %vm418_vm0, %v7318_v7, 0  ;;  %vm1428_vm4 = vsmask.f32 6400  ;;  %vm1024_vm5 = vsmask.f32 7424 }
  0x19   : > { %8320 = vmatprep.subr.bf16.mxu0 %v12547_v2  ;;  %8390 = vmatprep.subr.bf16.mxu1 %v12547_v2  ;;  %vm1972_vm7 = vcmask 1045504   ;;  %vm3114_vm8 = vsmask.f32 4352  ;;  %vm2689_vm9 = vsmask.f32 5376  ;;  %s161_s27 = sand.u32 1, %s9596_s13  }
  0x1a   : > { %s9301_s29 = smul.u32 612, %s165_s28  ;;  %s9608_s10 = smov [#allocation2]  }
  0x1b   : > { %s9300_s28 = smul.u32 136, %s161_s27  ;;  %s9546_s11 = sshll.u32 %s9608_s10, 4  ;;  %s9547_s11 = int_to_ptr.vmem [resolvable:$false] %s9546_s11 }
  0x1c   : > { %s9703_s7 = scalar_lea.vmem %s12531_s0, %s9301_s29  ;;  %s9302_s30 = smul.u32 2176, %s9652_s16 }
  0x1d   : > { %v9346_v6 = vld [vmem:[%s9703_s7] sm:$0xff]   ;;  %v9347_v9 = vld [vmem:[%s9703_s7 + $0x98] sm:$0xfe]   ;;  %v9350_v14 = vld [vmem:[%s9703_s7 + $0xa8] sm:$0xff]   ;;  %s12399_s29 = scalar_lea.vmem [#allocation2], %s9300_s28  ;;  %s12490_s16 = scalar_lea.sflag [#allocation3], %s161_s27 }
  0x1e   : > { %8253 = vmatmul.mubr.msk.bf16.vlgmr.msra.gmra.mrb[0].mxu1 %vm366_vm2, %v9346_v6  ;;  %v9348_v10 = vld [vmem:[%s9703_s7 + $0xa0] sm:$0xff]   ;;  %v331_v11 = vrot.slane %v9347_v9, 1  ;;  %v9349_v16 = vld [vmem:[%s9703_s7 + $0x8] sm:$0xff]   ;;  %v334_v17 = vrot.slane %v9350_v14, 1  ;;  %v9352_v19 = vld [vmem:[%s9703_s7 + $0xb0] sm:$0xff]   ;;  %v1430_v24 = vshrl.u32 %v9347_v9, 16  ;;  %s12483_s8 = scalar_lea.hbm %s12534_s3, %s9302_s30 }
  0x1f   : > { %8391 = vmatpush3.bf16.msra.mxu1 %v1642_v8  ;;  %8256 = vmatprep.mubr.msk.bf16.mxu1 %vm9607_vm1, %v12547_v2  ;;  %v332_v12 = vrot.slane %v9348_v10, 1  ;;  %v9351_v20 = vld [vmem:[%s9703_s7 + $0x10] sm:$0xff]   ;;  %v336_v21 = vrot.slane %v9352_v19, 1  ;;  %v9354_v23 = vld [vmem:[%s9703_s7 + $0xb8] sm:$0xff]   ;;  %v1433_v26 = vshll.u32 %v9347_v9, 16  ;;  %v1438_v27 = vshrl.u32 %v9348_v10, 16 }
  0x20   : > { %8530 = vmatprep.subr.bf16.mxu1 %v12547_v2  ;;  %v9353_v25 = vld [vmem:[%s9703_s7 + $0x18] sm:$0xff]   ;;  %v1441_v28 = vshll.u32 %v9348_v10, 16  ;;  %v338_v29 = vrot.slane %v9354_v23, 1  ;;  %v1447_v30 = vshrl.u32 %v9350_v14, 16  ;;  %v1432_v31 = vrot.slane %v1430_v24, 1  ;;  %v9356_v32 = vld [vmem:[%s9703_s7 + $0xc0] sm:$0xff]  }
  0x21   : > { %v333_v15 = vsel %vm330_vm3, %v331_v11, %v332_v12  ;;  %v335_v18 = vsel %vm330_vm3, %v332_v12, %v334_v17  ;;  %v337_v22 = vsel %vm330_vm3, %v334_v17, %v336_v21  ;;  %v1435_v33 = vrot.slane %v1433_v26, 2  ;;  %v9355_v39 = vld [vmem:[%s9703_s7 + $0x20] sm:$0xff]   ;;  %v9358_v46 = vld [vmem:[%s9703_s7 + $0xc8] sm:$0xff]   ;;  %v9360_v58 = vld [vmem:[%s9703_s7 + $0xd0] sm:$0xff]   ;;  %s7181_s4 = sshll.u32 %s12399_s29, 4  ;;  %s9548_s17 = scalar_lea.vmem %s9547_s11, 4352  ;;  %s12485_s4 = int_to_ptr.vmem [resolvable:$true] %s7181_s4 }
  0x22   : > { %8183 = vmatmul.mubr.msk.bf16.vlgmr.msra.gmra.mrb[0].mxu0 %vm366_vm2, %v333_v15  ;;  %v1440_v34 = vrot.slane %v1438_v27, 1  ;;  %v1443_v35 = vrot.slane %v1441_v28, 2  ;;  %v339_v36 = vsel %vm330_vm3, %v336_v21, %v338_v29  ;;  %v1449_v37 = vrot.slane %v1447_v30, 1  ;;  %v9357_v50 = vld [vmem:[%s9703_s7 + $0x28] sm:$0xff]   ;;  %v9359_v63 = vld [vmem:[%s9703_s7 + $0x30] sm:$0xff]   ;;  %v9362_v15 = vld [vmem:[%s9703_s7 + $0xd8] sm:$0xff]   ;;  %p9549_p0 = scmp.lt.s32.totalorder %s12485_s4, %s9547_s11 }
  0x23   : > { %8321 = vmatpush3.bf16.msra.mxu0 %v1217_v13  ;;  %8186 = vmatprep.mubr.msk.bf16.mxu0 %vm9607_vm1, %v12547_v2  ;;  %v1450_v38 = vshll.u32 %v9350_v14, 16  ;;  %v340_v41 = vrot.slane %v9356_v32, 1  ;;  %v1436_v42 = vor.u32 %v1435_v33, %v1432_v31  ;;  %v1456_v49 = vshrl.u32 %v9352_v19, 16  ;;  %v9361_v14 = vld [vmem:[%s9703_s7 + $0x38] sm:$0xff]   ;;  %v9363_v26 = vld [vmem:[%s9703_s7 + $0x40] sm:$0xff]   ;;  %s9542_s9 = scalar_lea.vmem %s12485_s4, 2176 }
  0x24   : > { %8460 = vmatprep.subr.bf16.mxu0 %v12547_v2  ;;  %v1444_v43 = vor.u32 %v1443_v35, %v1440_v34  ;;  %v342_v51 = vrot.slane %v9358_v46, 1  ;;  %v1459_v53 = vshll.u32 %v9352_v19, 16  ;;  %v1465_v55 = vshrl.u32 %v9354_v23, 16  ;;  %v9364_v27 = vld [vmem:[%s9703_s7 + $0xe0] sm:$0xff]   ;;  %p9543_p11 = scmp.ne.s32.totalorder %s12485_s4, %s9542_s9  ;;  %p9550_p1 = scmp.lt.s32.totalorder %s9548_s17, %s9542_s9 }
  0x25   : > { %v1452_v40 = vrot.slane %v1450_v38, 2  ;;  %v341_v45 = vsel %vm330_vm3, %v338_v29, %v340_v41  ;;  %v1458_v52 = vrot.slane %v1456_v49, 1  ;;  %v1468_v56 = vshll.u32 %v9354_v23, 16  ;;  %v9368_v49 = vld [vmem:[%s9703_s7 + $0xf0] sm:$0xff]  }
  0x26   : > { %8257 = vmatmul.mubr.msk.bf16.gmra.mrb[4].mxu1 %vm366_vm2, %v9349_v16  ;;  %v9757_v47 = vsel %vm1428_vm4, %v1436_v42, %v1444_v43  ;;  %v1461_v54 = vrot.slane %v1459_v53, 2  ;;  %v343_v57 = vsel %vm330_vm3, %v340_v41, %v342_v51  ;;  %v1467_v60 = vrot.slane %v1465_v55, 1  ;;  %p9544_p12 = pnand %p9543_p11, %p9669_p5  ;;  %p9551_p2 = por %p9550_p1, %p9549_p0 }
  0x27   : > { %8260 = vmatprep.mubr.msk.bf16.mxu1 %vm9607_vm1, %v12547_v2  ;;  %v1453_v44 = vor.u32 %v1452_v40, %v1449_v37  ;;  %v1470_v61 = vrot.slane %v1468_v56, 2  ;;  %v1474_v62 = vshrl.u32 %v9356_v32, 16  ;;  %v1477_v1 = vshll.u32 %v9356_v32, 16  ;;  %v9366_v37 = vld [vmem:[%s9703_s7 + $0xe8] sm:$0xff]  }
  0x28   : > { %v1462_v59 = vor.u32 %v1461_v54, %v1458_v52  ;;  %v344_v4 = vrot.slane %v9360_v58, 1  ;;  %v1483_v7 = vshrl.u32 %v9358_v46, 16  ;;  %v1486_v9 = vshll.u32 %v9358_v46, 16  ;;  %v9367_v46 = vld [vmem:[%s9703_s7 + $0x50] sm:$0xff]   ;;  %p9545_p13 = pneg %p9544_p12 }
  0x29   : > { %v9760_v48 = vsel %vm1428_vm4, %v1444_v43, %v1453_v44  ;;  %v1471_v3 = vor.u32 %v1470_v61, %v1467_v60  ;;  %v1476_v5 = vrot.slane %v1474_v62, 1  ;;  %v1479_v6 = vrot.slane %v1477_v1, 2 }
  0x2a   : > { %8187 = vmatmul.mubr.msk.bf16.gmra.mrb[4].mxu0 %vm366_vm2, %v335_v18  ;;  %v9773_v0 = vsel %vm1428_vm4, %v1453_v44, %v1462_v59  ;;  %v1485_v11 = vrot.slane %v1483_v7, 1  ;;  %v1488_v12 = vrot.slane %v1486_v9, 2  ;;  %v345_v13 = vsel %vm330_vm3, %v342_v51, %v344_v4  ;;  %v9855_v7 = vld [vmem:[%s9703_s7 + $0x100] sm:$0xff]   ;;  %p9552_p3 = pnand %p9551_p2, %p9545_p13 }
  0x2b   : > { %8190 = vmatprep.mubr.msk.bf16.mxu0 %vm9607_vm1, %v12547_v2  ;;  %v9779_v8 = vsel %vm1428_vm4, %v1462_v59, %v1471_v3  ;;  %v1480_v10 = vor.u32 %v1479_v6, %v1476_v5  ;;  %v1492_v19 = vshrl.u32 %v9360_v58, 16  ;;  %v346_v21 = vrot.slane %v9362_v15, 1  ;;  %v9838_v59 = vld [vmem:[%s9703_s7 + $0xf8] sm:$0xff]   ;;  %v9371_v6 = vld [vmem:[%s9703_s7 + $0x60] sm:$0xff]  }
  0x2c   : > { %v1489_v17 = vor.u32 %v1488_v12, %v1485_v11  ;;  %v1501_v29 = vshrl.u32 %v9362_v15, 16  ;;  %v1504_v30 = vshll.u32 %v9362_v15, 16  ;;  %v348_v31 = vrot.slane %v9364_v27, 1  ;;  %v9373_v12 = vld [vmem:[%s9703_s7 + $0x68] sm:$0xff]  }
  0x2d   : > { %v9788_v16 = vsel %vm1428_vm4, %v1471_v3, %v1480_v10  ;;  %v1513_v40 = vshll.u32 %v9364_v27, 16  ;;  %v350_v41 = vrot.slane %v9366_v37, 1  ;;  %v1519_v51 = vshrl.u32 %v9366_v37, 16 }
  0x2e   : > { %8261 = vmatmul.mubr.msk.bf16.gmra.mrb[8].mxu1 %vm366_vm2, %v9351_v20  ;;  %v9792_v18 = vsel %vm1428_vm4, %v1480_v10, %v1489_v17  ;;  %v1495_v20 = vshll.u32 %v9360_v58, 16  ;;  %v1503_v32 = vrot.slane %v1501_v29, 1  ;;  %v1506_v33 = vrot.slane %v1504_v30, 2  ;;  %v9369_v58 = vld [vmem:[%s9703_s7 + $0x58] sm:$0xff]   ;;  %v9381_v29 = vld [vmem:[%s9703_s7] sm:$0xff]  }
  0x2f   : > { %8264 = vmatprep.mubr.msk.bf16.mxu1 %vm9607_vm1, %v12547_v2  ;;  %v349_v35 = vsel %vm330_vm3, %v346_v21, %v348_v31  ;;  %v1515_v43 = vrot.slane %v1513_v40, 2  ;;  %v1522_v52 = vshll.u32 %v9366_v37, 16  ;;  %v352_v53 = vrot.slane %v9368_v49, 1  ;;  %v7409_v37 = vld [vmem:[%s12532_s1 + $0xa] sm:$0x3] }
  0x30   : > { %v1497_v23 = vrot.slane %v1495_v20, 2  ;;  %v1507_v34 = vor.u32 %v1506_v33, %v1503_v32  ;;  %v1521_v54 = vrot.slane %v1519_v51, 1  ;;  %v1528_v61 = vshrl.u32 %v9368_v49, 16 }
  0x31   : > { %v1524_v55 = vrot.slane %v1522_v52, 2  ;;  %v1531_v62 = vshll.u32 %v9368_v49, 16  ;;  %v356_v10 = vrot.slane %v9855_v7, 1  ;;  %v1028_v32 = vshll.u32 %v9381_v29, 16  ;;  %v9384_v52 = vld [vmem:[%s9703_s7 + $0x18] sm:$0xff]  }
  0x32   : > { %8191 = vmatmul.mubr.msk.bf16.gmra.mrb[8].mxu0 %vm366_vm2, %v337_v22  ;;  %v1494_v22 = vrot.slane %v1492_v19, 1  ;;  %v1530_v1 = vrot.slane %v1528_v61, 1  ;;  %v9883_v19 = vld [vmem:[%s9703_s7 + $0x110] sm:$0xff]   ;;  %v1053_v61 = vshrl.u32 %v9384_v52, 16 }
  0x33   : > { %8194 = vmatprep.mubr.msk.bf16.mxu0 %vm9607_vm1, %v12547_v2  ;;  %v1525_v56 = vor.u32 %v1524_v55, %v1521_v54  ;;  %v1533_v3 = vrot.slane %v1531_v62, 2  ;;  %v360_v20 = vrot.slane %v9883_v19, 1  ;;  %v1049_v55 = vshll.u32 %v9384_v52, 16 }
  0x34   : > { %v1498_v24 = vor.u32 %v1497_v23, %v1494_v22  ;;  %v9377_v22 = vld [vmem:[%s9703_s7 + $0x78] sm:$0xff]  }
  0x35   : > { %v9895_v23 = vld [vmem:[%s9703_s7 + $0x118] sm:$0xff]  }
  0x36   : > { %8265 = vmatmul.mubr.msk.bf16.gmra.mrb[12].mxu1 %vm366_vm2, %v9353_v25  ;;  %v347_v25 = vsel %vm330_vm3, %v344_v4, %v346_v21  ;;  %v9803_v28 = vsel %vm1428_vm4, %v1489_v17, %v1498_v24  ;;  %v9815_v38 = vsel %vm1428_vm4, %v1498_v24, %v1507_v34  ;;  %v9850_v4 = vor.u32 %v1533_v3, %v1530_v1  ;;  %v9375_v17 = vld [vmem:[%s9703_s7 + $0x70] sm:$0xff]   ;;  %v9386_v3 = vld [vmem:[%s9703_s7 + $0x28] sm:$0xff]  }
  0x37   : > { %8268 = vmatprep.mubr.msk.bf16.mxu1 %vm9607_vm1, %v12547_v2  ;;  %v362_v24 = vrot.slane %v9895_v23, 1 }
  0x38   : > { %v9859_v9 = vsel %vm1428_vm4, %v1525_v56, %v9850_v4 }
  0x3a   : > { %8195 = vmatmul.mubr.msk.bf16.gmra.mrb[12].mxu0 %vm366_vm2, %v339_v36  ;;  %v9365_v36 = vld [vmem:[%s9703_s7 + $0x48] sm:$0xff]  }
  0x3b   : > { %8198 = vmatprep.mubr.msk.bf16.mxu0 %vm9607_vm1, %v12547_v2 }
  0x3e   : > { %8269 = vmatmul.mubr.msk.bf16.gmra.mrb[16].mxu1 %vm366_vm2, %v9355_v39  ;;  %v1510_v39 = vshrl.u32 %v9364_v27, 16  ;;  %v9379_v27 = vld [vmem:[%s9703_s7 + $0x80] sm:$0xff]  }
  0x3f   : > { %8272 = vmatprep.mubr.msk.bf16.mxu1 %vm9607_vm1, %v12547_v2 }
  0x40   : > { %v1512_v42 = vrot.slane %v1510_v39, 1 }
  0x42   : > { %8199 = vmatmul.mubr.msk.bf16.gmra.mrb[16].mxu0 %vm366_vm2, %v341_v45  ;;  %v1516_v44 = vor.u32 %v1515_v43, %v1512_v42  ;;  %v351_v45 = vsel %vm330_vm3, %v348_v31, %v350_v41  ;;  %v9382_v31 = vld [vmem:[%s9703_s7 + $0x8] sm:$0xff]   ;;  %v9383_v42 = vld [vmem:[%s9703_s7 + $0x10] sm:$0xff]  }
  0x43   : > { %8202 = vmatprep.mubr.msk.bf16.mxu0 %vm9607_vm1, %v12547_v2  ;;  %v7373_v43 = vld [vmem:[%s12532_s1 + $0x8] sm:$0x3]  ;;  %v1045_v54 = vshrl.u32 %v9383_v42, 16 }
  0x44   : > { %v9841_v60 = vsel %vm1428_vm4, %v1516_v44, %v1525_v56  ;;  %v2060_v49 = vsel %vm418_vm0, %v7373_v43, 0 }
  0x46   : > { %8273 = vmatmul.mubr.msk.bf16.gmra.mrb[20].mxu1 %vm366_vm2, %v9357_v50  ;;  %v9827_v50 = vsel %vm1428_vm4, %v1507_v34, %v1516_v44  ;;  %v1026_v34 = vshrl.u32 %v9381_v29, 16 }
  0x47   : > { %8276 = vmatprep.mubr.msk.bf16.mxu1 %vm9607_vm1, %v12547_v2 }
  0x4a   : > { %8203 = vmatmul.mubr.msk.bf16.gmra.mrb[20].mxu0 %vm366_vm2, %v343_v57  ;;  %v353_v57 = vsel %vm330_vm3, %v350_v41, %v352_v53  ;;  %v2478_v41 = vsel %vm418_vm0, %v7409_v37, 0 }
  0x4b   : > { %8206 = vmatprep.mubr.msk.bf16.mxu0 %vm9607_vm1, %v12547_v2 }
  0x4e   : > { %8277 = vmatmul.mubr.msk.bf16.gmra.mrb[24].mxu1 %vm366_vm2, %v9359_v63  ;;  %v354_v63 = vrot.slane %v9838_v59, 1 }
  0x4f   : > { %8280 = vmatprep.mubr.msk.bf16.mxu1 %vm9607_vm1, %v12547_v2 }
  0x50   : > { %v355_v5 = vsel %vm330_vm3, %v352_v53, %v354_v63  ;;  %v357_v11 = vsel %vm330_vm3, %v354_v63, %v356_v10 }
  0x52   : > { %8207 = vmatmul.mubr.msk.bf16.gmra.mrb[24].mxu0 %vm366_vm2, %v345_v13  ;;  %v9871_v13 = vld [vmem:[%s9703_s7 + $0x108] sm:$0xff]  }
  0x53   : > { %8210 = vmatprep.mubr.msk.bf16.mxu0 %vm9607_vm1, %v12547_v2 }
  0x56   : > { %8281 = vmatmul.mubr.msk.bf16.gmra.mrb[28].mxu1 %vm366_vm2, %v9361_v14  ;;  %v358_v14 = vrot.slane %v9871_v13, 1 }
  0x57   : > { %8284 = vmatprep.mubr.msk.bf16.mxu1 %vm9607_vm1, %v12547_v2 }
  0x58   : > { %v359_v15 = vsel %vm330_vm3, %v356_v10, %v358_v14  ;;  %v361_v21 = vsel %vm330_vm3, %v358_v14, %v360_v20  ;;  %v1069_v14 = vshrl.u32 %v9386_v3, 16 }
  0x5a   : > { %8211 = vmatmul.mubr.msk.bf16.gmra.mrb[28].mxu0 %vm366_vm2, %v347_v25  ;;  %v9380_v25 = vld [vmem:[%s9703_s7 + $0x120] ss:$0 sps:$4 sm:$0x11]  }
  0x5b   : > { %8214 = vmatprep.mubr.msk.bf16.mxu0 %vm9607_vm1, %v12547_v2  ;;  %v364_v30 = vrot.slane %v9380_v25, 1 }
  0x5d   : > { %v365_v33 = vsel %vm330_vm3, %v362_v24, %v364_v30 }
  0x5e   : > { %8285 = vmatmul.mubr.msk.bf16.gmra.mrb[32].mxu1 %vm366_vm2, %v9363_v26  ;;  %v363_v26 = vsel %vm330_vm3, %v360_v20, %v362_v24 }
  0x5f   : > { %8288 = vmatprep.mubr.msk.bf16.mxu1 %vm9607_vm1, %v12547_v2 }
  0x62   : > { %8215 = vmatmul.mubr.msk.bf16.gmra.mrb[32].mxu0 %vm366_vm2, %v349_v35  ;;  %v1030_v35 = vrot.slane %v1028_v32, 1 }
  0x63   : > { %8218 = vmatprep.mubr.msk.bf16.mxu0 %vm9607_vm1, %v12547_v2 }
  0x64   : > { %v1031_v39 = vor.u32 %v1030_v35, %v1026_v34 }
  0x66   : > { %8289 = vmatmul.mubr.msk.bf16.gmra.mrb[36].mxu1 %vm366_vm2, %v9365_v36  ;;  %v1033_v36 = vshll.u32 %v9382_v31, 16 }
  0x67   : > { %8292 = vmatprep.mubr.msk.bf16.mxu1 %vm9607_vm1, %v12547_v2 }
  0x68   : > { %v1035_v40 = vrot.slane %v1033_v36, 1 }
  0x6a   : > { %8219 = vmatmul.mubr.msk.bf16.gmra.mrb[36].mxu0 %vm366_vm2, %v351_v45  ;;  %v1036_v44 = vsel %vm1024_vm5, %v1031_v39, %v1035_v40  ;;  %v1037_v45 = vshrl.u32 %v9382_v31, 16  ;;  %v9391_v39 = vld [vmem:[%s9703_s7 + $0x50] sm:$0xff]  }
  0x6b   : > { %8222 = vmatprep.mubr.msk.bf16.mxu0 %vm9607_vm1, %v12547_v2 }
  0x6e   : > { %8293 = vmatmul.mubr.msk.bf16.gmra.mrb[40].mxu1 %vm366_vm2, %v9367_v46  ;;  %v1041_v46 = vshll.u32 %v9383_v42, 16 }
  0x6f   : > { %8296 = vmatprep.mubr.msk.bf16.mxu1 %vm9607_vm1, %v12547_v2 }
  0x70   : > { %v1043_v51 = vrot.slane %v1041_v46, 1 }
  0x72   : > { %8223 = vmatmul.mubr.msk.bf16.gmra.mrb[40].mxu0 %vm366_vm2, %v353_v57  ;;  %v1047_v56 = vor.u32 %v1045_v54, %v1043_v51  ;;  %v1051_v57 = vrot.slane %v1049_v55, 1 }
  0x73   : > { %8226 = vmatprep.mubr.msk.bf16.mxu0 %vm9607_vm1, %v12547_v2 }
  0x74   : > { %v1055_v63 = vor.u32 %v1053_v61, %v1051_v57 }
  0x76   : > { %8297 = vmatmul.mubr.msk.bf16.gmra.mrb[44].mxu1 %vm366_vm2, %v9369_v58  ;;  %v9385_v58 = vld [vmem:[%s9703_s7 + $0x20] sm:$0xff]  }
  0x77   : > { %8300 = vmatprep.mubr.msk.bf16.mxu1 %vm9607_vm1, %v12547_v2  ;;  %v1057_v62 = vshll.u32 %v9385_v58, 16 }
  0x79   : > { %v1059_v1 = vrot.slane %v1057_v62, 1 }
  0x7a   : > { %8227 = vmatmul.mubr.msk.bf16.gmra.mrb[44].mxu0 %vm366_vm2, %v355_v5  ;;  %v1061_v5 = vshrl.u32 %v9385_v58, 16  ;;  %v9393_v58 = vld [vmem:[%s9703_s7 + $0x60] sm:$0xff]  }
  0x7b   : > { %8230 = vmatprep.mubr.msk.bf16.mxu0 %vm9607_vm1, %v12547_v2 }
  0x7c   : > { %v1063_v10 = vor.u32 %v1061_v5, %v1059_v1 }
  0x7e   : > { %8301 = vmatmul.mubr.msk.bf16.gmra.mrb[48].mxu1 %vm366_vm2, %v9371_v6  ;;  %v1065_v6 = vshll.u32 %v9386_v3, 16 }
  0x7f   : > { %8304 = vmatprep.mubr.msk.bf16.mxu1 %vm9607_vm1, %v12547_v2 }
  0x82   : > { %8231 = vmatmul.mubr.msk.bf16.gmra.mrb[48].mxu0 %vm366_vm2, %v357_v11  ;;  %v1067_v11 = vrot.slane %v1065_v6, 1  ;;  %v1121_v6 = vshll.u32 %v9393_v58, 16 }
  0x83   : > { %8234 = vmatprep.mubr.msk.bf16.mxu0 %vm9607_vm1, %v12547_v2 }
  0x86   : > { %8305 = vmatmul.mubr.msk.bf16.gmra.mrb[52].mxu1 %vm366_vm2, %v9373_v12  ;;  %v9387_v12 = vld [vmem:[%s9703_s7 + $0x30] sm:$0xff]  }
  0x87   : > { %8308 = vmatprep.mubr.msk.bf16.mxu1 %vm9607_vm1, %v12547_v2 }
  0x8a   : > { %8235 = vmatmul.mubr.msk.bf16.gmra.mrb[52].mxu0 %vm366_vm2, %v359_v15  ;;  %v1073_v15 = vshll.u32 %v9387_v12, 16 }
  0x8b   : > { %8238 = vmatprep.mubr.msk.bf16.mxu0 %vm9607_vm1, %v12547_v2 }
  0x8c   : > { %v1075_v20 = vrot.slane %v1073_v15, 1 }
  0x8e   : > { %8309 = vmatmul.mubr.msk.bf16.gmra.mrb[56].mxu1 %vm366_vm2, %v9375_v17  ;;  %v1071_v17 = vor.u32 %v1069_v14, %v1067_v11 }
  0x8f   : > { %8312 = vmatprep.mubr.msk.bf16.mxu1 %vm9607_vm1, %v12547_v2 }
  0x92   : > { %8239 = vmatmul.mubr.msk.bf16.gmra.mrb[56].mxu0 %vm366_vm2, %v361_v21  ;;  %v9388_v21 = vld [vmem:[%s9703_s7 + $0x38] sm:$0xff]  }
  0x93   : > { %8242 = vmatprep.mubr.msk.bf16.mxu0 %vm9607_vm1, %v12547_v2  ;;  %v1081_v24 = vshll.u32 %v9388_v21, 16  ;;  %v1085_v29 = vshrl.u32 %v9388_v21, 16  ;;  %v1123_v21 = vrot.slane %v1121_v6, 1  ;;  %v1573_v6 = vshrl.u32 %v9895_v23, 16 }
  0x96   : > { %8313 = vmatmul.mubr.msk.bf16.gmra.mrb[60].mxu1 %vm366_vm2, %v9377_v22  ;;  %v1077_v22 = vshrl.u32 %v9387_v12, 16 }
  0x97   : > { %8316 = vmatprep.mubr.msk.bf16.mxu1 %vm9607_vm1, %v12547_v2 }
  0x98   : > { %v1079_v25 = vor.u32 %v1077_v22, %v1075_v20 }
  0x9a   : > { %8243 = vmatmul.mubr.msk.bf16.gmra.mrb[60].mxu0 %vm366_vm2, %v363_v26  ;;  %v1083_v26 = vrot.slane %v1081_v24, 1 }
  0x9b   : > { %8246 = vmatprep.mubr.msk.bf16.mxu0 %vm9607_vm1, %v12547_v2 }
  0x9c   : > { %v1087_v31 = vor.u32 %v1085_v29, %v1083_v26 }
  0x9e   : > { %8317 = vmatmul.mubr.msk.bf16.gmra.mrb[64].mxu1 %vm366_vm2, %v9379_v27  ;;  %v9389_v27 = vld [vmem:[%s9703_s7 + $0x40] sm:$0xff]  }
  0x9f   : > { %8392 = vmatprep.mubr.msk.bf16.mxu1 %vm9607_vm1, %v12547_v2  ;;  %v1089_v30 = vshll.u32 %v9389_v27, 16  ;;  %v1093_v34 = vshrl.u32 %v9389_v27, 16  ;;  %v1558_v27 = vshll.u32 %v9871_v13, 16 }
  0xa1   : > { %v1091_v32 = vrot.slane %v1089_v30, 1  ;;  %v1125_v30 = vshrl.u32 %v9393_v58, 16 }
  0xa2   : > { %8247 = vmatmul.mubr.msk.bf16.gmra.mrb[64].mxu0 %vm366_vm2, %v365_v33  ;;  %v9390_v33 = vld [vmem:[%s9703_s7 + $0x48] sm:$0xff]  }
  0xa3   : > { %8322 = vmatprep.mubr.msk.bf16.mxu0 %vm9607_vm1, %v12547_v2  ;;  %v1097_v35 = vshll.u32 %v9390_v33, 16  ;;  %v1095_v36 = vor.u32 %v1093_v34, %v1091_v32 }
  0xa5   : > { %v1099_v37 = vrot.slane %v1097_v35, 1 }
  0xa6   : > { %8393 = vmatmul.mubr.msk.bf16.vlgmr.msra.gmra.mrb[68].mxu1 %vm366_vm2, %v9757_v47  ;;  %v1039_v47 = vor.u32 %v1037_v45, %v1035_v40  ;;  %v1101_v40 = vshrl.u32 %v9390_v33, 16  ;;  %v1540_v45 = vshll.u32 %v9838_v59, 16 }
  0xa7   : > { %8531 = vmatpush3.bf16.msra.mxu1 %v2478_v41  ;;  %8396 = vmatprep.mubr.msk.bf16.mxu1 %vm9607_vm1, %v12547_v2  ;;  %v1105_v41 = vshll.u32 %v9391_v39, 16 }
  0xa8   : > { %8670 = vmatprep.subr.bf16.mxu1 %v12547_v2  ;;  %v1044_v53 = vsel %vm1024_vm5, %v1039_v47, %v1043_v51  ;;  %v1103_v42 = vor.u32 %v1101_v40, %v1099_v37  ;;  %v1542_v55 = vrot.slane %v1540_v45, 2  ;;  %v1564_v45 = vshrl.u32 %v9883_v19, 16 }
  0xa9   : > { %v1107_v43 = vrot.slane %v1105_v41, 1  ;;  %v9395_v41 = vld [vmem:[%s9703_s7 + $0x70] sm:$0xff]  }
  0xaa   : > { %8323 = vmatmul.mubr.msk.bf16.vlgmr.msra.gmra.mrb[68].mxu0 %vm366_vm2, %v1036_v44  ;;  %v9392_v44 = vld [vmem:[%s9703_s7 + $0x58] sm:$0xff]   ;;  %v1566_v58 = vrot.slane %v1564_v45, 1 }
  0xab   : > { %8461 = vmatpush3.bf16.msra.mxu0 %v2060_v49  ;;  %8326 = vmatprep.mubr.msk.bf16.mxu0 %vm9607_vm1, %v12547_v2  ;;  %v1108_v46 = vsel %vm1024_vm5, %v1103_v42, %v1107_v43  ;;  %v1109_v49 = vshrl.u32 %v9391_v39, 16  ;;  %v1113_v47 = vshll.u32 %v9392_v44, 16  ;;  %v1117_v5 = vshrl.u32 %v9392_v44, 16 }
  0xac   : > { %8600 = vmatprep.subr.bf16.mxu0 %v12547_v2  ;;  %v1560_v39 = vrot.slane %v1558_v27, 2 }
  0xae   : > { %8397 = vmatmul.mubr.msk.bf16.gmra.mrb[72].mxu1 %vm366_vm2, %v9760_v48  ;;  %v1052_v48 = vsel %vm1024_vm5, %v1047_v56, %v1051_v57  ;;  %v1111_v56 = vor.u32 %v1109_v49, %v1107_v43  ;;  %v1115_v57 = vrot.slane %v1113_v47, 1 }
  0xaf   : > { %8400 = vmatprep.mubr.msk.bf16.mxu1 %vm9607_vm1, %v12547_v2 }
  0xb2   : > { %8327 = vmatmul.mubr.msk.bf16.gmra.mrb[72].mxu0 %vm366_vm2, %v1044_v53 }
  0xb3   : > { %8330 = vmatprep.mubr.msk.bf16.mxu0 %vm9607_vm1, %v12547_v2 }
  0xb6   : > { %8401 = vmatmul.mubr.msk.bf16.gmra.mrb[76].mxu1 %vm366_vm2, %v9773_v0  ;;  %v1060_v0 = vsel %vm1024_vm5, %v1055_v63, %v1059_v1  ;;  %v1546_v63 = vshrl.u32 %v9855_v7, 16  ;;  %v1549_v1 = vshll.u32 %v9855_v7, 16 }
  0xb7   : > { %8404 = vmatprep.mubr.msk.bf16.mxu1 %vm9607_vm1, %v12547_v2 }
  0xb8   : > { %v1548_v15 = vrot.slane %v1546_v63, 1  ;;  %v9396_v63 = vld [vmem:[%s9703_s7 + $0x78] sm:$0xff]  }
  0xba   : > { %8331 = vmatmul.mubr.msk.bf16.gmra.mrb[76].mxu0 %vm366_vm2, %v1052_v48 }
  0xbb   : > { %8334 = vmatprep.mubr.msk.bf16.mxu0 %vm9607_vm1, %v12547_v2 }
  0xbe   : > { %8405 = vmatmul.mubr.msk.bf16.gmra.mrb[80].mxu1 %vm366_vm2, %v9779_v8  ;;  %v1068_v8 = vsel %vm1024_vm5, %v1063_v10, %v1067_v11 }
  0xbf   : > { %8408 = vmatprep.mubr.msk.bf16.mxu1 %vm9607_vm1, %v12547_v2 }
  0xc2   : > { %8335 = vmatmul.mubr.msk.bf16.gmra.mrb[80].mxu0 %vm366_vm2, %v1060_v0  ;;  %v1116_v0 = vsel %vm1024_vm5, %v1111_v56, %v1115_v57 }
  0xc3   : > { %8338 = vmatprep.mubr.msk.bf16.mxu0 %vm9607_vm1, %v12547_v2 }
  0xc6   : > { %8409 = vmatmul.mubr.msk.bf16.gmra.mrb[84].mxu1 %vm366_vm2, %v9788_v16  ;;  %v1076_v16 = vsel %vm1024_vm5, %v1071_v17, %v1075_v20  ;;  %v1551_v17 = vrot.slane %v1549_v1, 2  ;;  %v1119_v20 = vor.u32 %v1117_v5, %v1115_v57 }
  0xc7   : > { %8412 = vmatprep.mubr.msk.bf16.mxu1 %vm9607_vm1, %v12547_v2 }
  0xc8   : > { %v1124_v29 = vsel %vm1024_vm5, %v1119_v20, %v1123_v21 }
  0xca   : > { %8339 = vmatmul.mubr.msk.bf16.gmra.mrb[84].mxu0 %vm366_vm2, %v1068_v8 }
  0xcb   : > { %8342 = vmatprep.mubr.msk.bf16.mxu0 %vm9607_vm1, %v12547_v2 }
  0xce   : > { %8413 = vmatmul.mubr.msk.bf16.gmra.mrb[88].mxu1 %vm366_vm2, %v9792_v18  ;;  %v1084_v18 = vsel %vm1024_vm5, %v1079_v25, %v1083_v26  ;;  %v1552_v26 = vor.u32 %v1551_v17, %v1548_v15 }
  0xcf   : > { %8416 = vmatprep.mubr.msk.bf16.mxu1 %vm9607_vm1, %v12547_v2 }
  0xd2   : > { %8343 = vmatmul.mubr.msk.bf16.gmra.mrb[88].mxu0 %vm366_vm2, %v1076_v16  ;;  %v9394_v16 = vld [vmem:[%s9703_s7 + $0x68] sm:$0xff]  }
  0xd3   : > { %8346 = vmatprep.mubr.msk.bf16.mxu0 %vm9607_vm1, %v12547_v2 }
  0xd6   : > { %8417 = vmatmul.mubr.msk.bf16.gmra.mrb[92].mxu1 %vm366_vm2, %v9803_v28  ;;  %v1092_v28 = vsel %vm1024_vm5, %v1087_v31, %v1091_v32  ;;  %v1129_v31 = vshll.u32 %v9394_v16, 16 }
  0xd7   : > { %8420 = vmatprep.mubr.msk.bf16.mxu1 %vm9607_vm1, %v12547_v2 }
  0xd8   : > { %v1131_v40 = vrot.slane %v1129_v31, 1 }
  0xda   : > { %8347 = vmatmul.mubr.msk.bf16.gmra.mrb[92].mxu0 %vm366_vm2, %v1084_v18 }
  0xdb   : > { %8350 = vmatprep.mubr.msk.bf16.mxu0 %vm9607_vm1, %v12547_v2 }
  0xde   : > { %8421 = vmatmul.mubr.msk.bf16.gmra.mrb[96].mxu1 %vm366_vm2, %v9815_v38  ;;  %v1100_v38 = vsel %vm1024_vm5, %v1095_v36, %v1099_v37 }
  0xdf   : > { %8424 = vmatprep.mubr.msk.bf16.mxu1 %vm9607_vm1, %v12547_v2 }
  0xe2   : > { %8351 = vmatmul.mubr.msk.bf16.gmra.mrb[96].mxu0 %vm366_vm2, %v1092_v28 }
  0xe3   : > { %8354 = vmatprep.mubr.msk.bf16.mxu0 %vm9607_vm1, %v12547_v2 }
  0xe6   : > { %8425 = vmatmul.mubr.msk.bf16.gmra.mrb[100].mxu1 %vm366_vm2, %v9827_v50  ;;  %v1537_v50 = vshrl.u32 %v9838_v59, 16 }
  0xe7   : > { %8428 = vmatprep.mubr.msk.bf16.mxu1 %vm9607_vm1, %v12547_v2 }
  0xe8   : > { %v1539_v54 = vrot.slane %v1537_v50, 1 }
  0xea   : > { %8355 = vmatmul.mubr.msk.bf16.gmra.mrb[100].mxu0 %vm366_vm2, %v1100_v38  ;;  %v1543_v62 = vor.u32 %v1542_v55, %v1539_v54 }
  0xeb   : > { %8358 = vmatprep.mubr.msk.bf16.mxu0 %vm9607_vm1, %v12547_v2 }
  0xec   : > { %v1544_v14 = vsel %vm1428_vm4, %v9850_v4, %v1543_v62  ;;  %v1555_v4 = vshrl.u32 %v9871_v13, 16  ;;  %v1553_v36 = vsel %vm1428_vm4, %v1543_v62, %v1552_v26  ;;  %v1127_v13 = vor.u32 %v1125_v30, %v1123_v21 }
  0xee   : > { %8429 = vmatmul.mubr.msk.bf16.gmra.mrb[104].mxu1 %vm366_vm2, %v9841_v60  ;;  %v1557_v37 = vrot.slane %v1555_v4, 1  ;;  %v1132_v47 = vsel %vm1024_vm5, %v1127_v13, %v1131_v40 }
  0xef   : > { %8432 = vmatprep.mubr.msk.bf16.mxu1 %vm9607_vm1, %v12547_v2 }
  0xf0   : > { %v1561_v50 = vor.u32 %v1560_v39, %v1557_v37  ;;  %v1149_v37 = vshrl.u32 %v9396_v63, 16 }
  0xf1   : > { %v764_v51 = vpop.f32.mrb[0].mxu1 }
  0xf2   : > { %v8254_v52 = vpop.f32.mrb[1].mxu1  ;;  %8359 = vmatmul.mubr.msk.bf16.gmra.mrb[104].mxu0 %vm366_vm2, %v1108_v46  ;;  %v1567_v46 = vshll.u32 %v9883_v19, 16  ;;  %v1562_v57 = vsel %vm1428_vm4, %v1552_v26, %v1561_v50  ;;  %v9398_v26 = vld [vmem:[%s9703_s7 + $0x120] ss:$0 sps:$4 sm:$0x33]  }
  0xf3   : > { %v767_v53 = vpop.f32.mrb[2].mxu1  ;;  %8362 = vmatprep.mubr.msk.bf16.mxu0 %vm9607_vm1, %v12547_v2  ;;  %v1137_v52 = vshll.u32 %v9395_v41, 16 }
  0xf4   : > { %v8255_v60 = vpop.f32.mrb[3].mxu1 }
  0xf5   : > { %v456_v48 = vpop.f32.mrb[0].mxu0  ;;  %v1139_v62 = vrot.slane %v1137_v52, 1 }
  0xf6   : > { %8433 = vmatmul.mubr.msk.bf16.gmra.mrb[108].mxu1 %vm366_vm2, %v9859_v9  ;;  %v10024_v59 = vadd.f32 %v764_v51, %v456_v48  ;;  %v8184_v61 = vpop.f32.mrb[1].mxu0  ;;  %v1133_v51 = vshrl.u32 %v9394_v16, 16  ;;  %v1569_v48 = vrot.slane %v1567_v46, 2 }
  0xf7   : > { %8436 = vmatprep.mubr.msk.bf16.mxu1 %vm9607_vm1, %v12547_v2  ;;  %v459_v3 = vpop.f32.mrb[2].mxu0 }
  0xf8   : > { %v10031_v10 = vadd.f32 %v767_v53, %v459_v3  ;;  %v8185_v9 = vpop.f32.mrb[3].mxu0  ;;  %v1135_v19 = vor.u32 %v1133_v51, %v1131_v40  ;;  %v1570_v5 = vor.u32 %v1569_v48, %v1566_v58  ;;  %v9399_v51 = vld [vmem:[%s9703_s7 + $0x88] ss:$0 sps:$4 sm:$0x11]  }
  0xf9   : > { %v772_v11 = vpop.f32.mrb[4].mxu1  ;;  %v1576_v9 = vshll.u32 %v9895_v23, 16  ;;  %v1161_v48 = vshll.u32 %v9399_v51, 16 }
  0xfa   : > { %v8258_v12 = vpop.f32.mrb[5].mxu1  ;;  %8363 = vmatmul.mubr.msk.bf16.gmra.mrb[108].mxu0 %vm366_vm2, %v1116_v0  ;;  %v1571_v16 = vsel %vm1428_vm4, %v1561_v50, %v1570_v5 }
  0xfb   : > { %v775_v8 = vpop.f32.mrb[6].mxu1  ;;  %8366 = vmatprep.mubr.msk.bf16.mxu0 %vm9607_vm1, %v12547_v2  ;;  %v1140_v12 = vsel %vm1024_vm5, %v1135_v19, %v1139_v62 }
  0xfc   : > { %v8259_v7 = vpop.f32.mrb[7].mxu1 }
  0xfd   : > { %v464_v22 = vpop.f32.mrb[4].mxu0 }
  0xfe   : > { %8437 = vmatmul.mubr.msk.bf16.gmra.mrb[112].mxu1 %vm366_vm2, %v1544_v14  ;;  %v10040_v24 = vadd.f32 %v772_v11, %v464_v22  ;;  %v8188_v25 = vpop.f32.mrb[5].mxu0  ;;  %v1145_v14 = vshll.u32 %v9396_v63, 16  ;;  %v1575_v22 = vrot.slane %v1573_v6, 1  ;;  %v10112_v6 = vld [vmem:[%s9703_s7 + $0x1d0] sm:$0xff]  }
  0xff   : > { %8440 = vmatprep.mubr.msk.bf16.mxu1 %vm9607_vm1, %v12547_v2  ;;  %v467_v18 = vpop.f32.mrb[6].mxu0  ;;  %v1578_v25 = vrot.slane %v1576_v9, 2 }
 0x100   : > { %v10047_v32 = vadd.f32 %v775_v8, %v467_v18  ;;  %v8189_v33 = vpop.f32.mrb[7].mxu0  ;;  %v1141_v8 = vshrl.u32 %v9395_v41, 16  ;;  %v1147_v27 = vrot.slane %v1145_v14, 1  ;;  %v9397_v18 = vld [vmem:[%s9703_s7 + $0x80] sm:$0xff]  }
 0x101   : > { %v780_v28 = vpop.f32.mrb[8].mxu1  ;;  %v1579_v33 = vor.u32 %v1578_v25, %v1575_v22  ;;  %v1153_v39 = vshll.u32 %v9397_v18, 16  ;;  %v1157_v58 = vshrl.u32 %v9397_v18, 16  ;;  %v10125_v22 = vld [vmem:[%s9703_s7 + $0x130] sm:$0xfc]   ;;  %v10128_v25 = vld [vmem:[%s9703_s7 + $0x138] sm:$0xff]  }
 0x102   : > { %v8262_v34 = vpop.f32.mrb[9].mxu1  ;;  %8367 = vmatmul.mubr.msk.bf16.gmra.mrb[112].mxu0 %vm366_vm2, %v1124_v29  ;;  %v1143_v4 = vor.u32 %v1141_v8, %v1139_v62 }
 0x103   : > { %v783_v35 = vpop.f32.mrb[10].mxu1  ;;  %8370 = vmatprep.mubr.msk.bf16.mxu0 %vm9607_vm1, %v12547_v2  ;;  %v1585_v34 = vshll.u32 %v9398_v26, 16 }
 0x104   : > { %v8263_v38 = vpop.f32.mrb[11].mxu1 }
 0x105   : > { %v472_v42 = vpop.f32.mrb[8].mxu0  ;;  %v1587_v45 = vrot.slane %v1585_v34, 2  ;;  %v1973_v34 = vrot.slane %v10125_v22, 2 }
 0x106   : > { %8441 = vmatmul.mubr.msk.bf16.gmra.mrb[116].mxu1 %vm366_vm2, %v1553_v36  ;;  %v10055_v43 = vadd.f32 %v780_v28, %v472_v42  ;;  %v8192_v44 = vpop.f32.mrb[9].mxu0  ;;  %v1582_v28 = vshrl.u32 %v9398_v26, 16  ;;  %v1148_v36 = vsel %vm1024_vm5, %v1143_v4, %v1147_v27 }
 0x107   : > { %8444 = vmatprep.mubr.msk.bf16.mxu1 %vm9607_vm1, %v12547_v2  ;;  %v475_v49 = vpop.f32.mrb[10].mxu0  ;;  %v1580_v44 = vsel %vm1428_vm4, %v1570_v5, %v1579_v33  ;;  %v10109_v5 = vld [vmem:[%s9703_s7 + $0x1c8] sm:$0xf8]  }
 0x108   : > { %v10062_v53 = vadd.f32 %v783_v35, %v475_v49  ;;  %v8193_v54 = vpop.f32.mrb[11].mxu0  ;;  %v1584_v50 = vrot.slane %v1582_v28, 1  ;;  %v1151_v49 = vor.u32 %v1149_v37, %v1147_v27  ;;  %v7464_v27 = vld [vmem:[%s12532_s1 + $0xe] sm:$0x3] }
 0x109   : > { %v788_v55 = vpop.f32.mrb[12].mxu1 }
 0x10a   : > { %v8266_v60 = vpop.f32.mrb[13].mxu1  ;;  %8371 = vmatmul.mubr.msk.bf16.gmra.mrb[116].mxu0 %vm366_vm2, %v1132_v47  ;;  %v1155_v47 = vrot.slane %v1153_v39, 1  ;;  %v7445_v39 = vld [vmem:[%s12532_s1 + $0xc] sm:$0x3] }
 0x10b   : > { %v791_v56 = vpop.f32.mrb[14].mxu1  ;;  %8374 = vmatprep.mubr.msk.bf16.mxu0 %vm9607_vm1, %v12547_v2  ;;  %v1588_v60 = vor.u32 %v1587_v45, %v1584_v50  ;;  %v10156_v50 = vld [vmem:[%s9703_s7 + $0x140] sm:$0xff]  }
 0x10c   : > { %v8267_v61 = vpop.f32.mrb[15].mxu1 }
 0x10d   : > { %v480_v1 = vpop.f32.mrb[12].mxu0 }
 0x10e   : > { %8445 = vmatmul.mubr.msk.bf16.gmra.mrb[120].mxu1 %vm366_vm2, %v1562_v57  ;;  %v10070_v3 = vadd.f32 %v788_v55, %v480_v1  ;;  %v8196_v0 = vpop.f32.mrb[13].mxu0  ;;  %v1156_v57 = vsel %vm1024_vm5, %v1151_v49, %v1155_v47  ;;  %v2903_v49 = vsel %vm418_vm0, %v7445_v39, 0 }
 0x10f   : > { %8448 = vmatprep.mubr.msk.bf16.mxu1 %vm9607_vm1, %v12547_v2  ;;  %v483_v11 = vpop.f32.mrb[14].mxu0  ;;  %v1589_v0 = vsel %vm1428_vm4, %v1579_v33, %v1588_v60  ;;  %v10138_v33 = vld [vmem:[%s9703_s7 + $0x1d8] sm:$0xff]   ;;  %v10165_v60 = vld [vmem:[%s9703_s7 + $0x1e0] sm:$0xff]  }
 0x110   : > { %v10077_v15 = vadd.f32 %v791_v56, %v483_v11  ;;  %v8197_v17 = vpop.f32.mrb[15].mxu0  ;;  %v1159_v11 = vor.u32 %v1157_v58, %v1155_v47 }
 0x111   : > { %v796_v7 = vpop.f32.mrb[16].mxu1 }
 0x112   : > { %v8270_v20 = vpop.f32.mrb[17].mxu1  ;;  %8375 = vmatmul.mubr.msk.bf16.gmra.mrb[120].mxu0 %vm366_vm2, %v1140_v12  ;;  %v1163_v12 = vrot.slane %v1161_v48, 1 }
 0x113   : > { %v799_v21 = vpop.f32.mrb[18].mxu1  ;;  %8378 = vmatprep.mubr.msk.bf16.mxu0 %vm9607_vm1, %v12547_v2  ;;  %v2392_v20 = vrot.slane %v10112_v6, 3 }
 0x114   : > { %v8271_v23 = vpop.f32.mrb[19].mxu1 }
 0x115   : > { %v488_v29 = vpop.f32.mrb[16].mxu0 }
 0x116   : > { %8449 = vmatmul.mubr.msk.bf16.gmra.mrb[124].mxu1 %vm366_vm2, %v1571_v16  ;;  %v10086_v30 = vadd.f32 %v796_v7, %v488_v29  ;;  %v8200_v31 = vpop.f32.mrb[17].mxu0  ;;  %v2391_v7 = vrot.slane %v10109_v5, 3  ;;  %v1164_v16 = vsel %vm1024_vm5, %v1159_v11, %v1163_v12 }
 0x117   : > { %8452 = vmatprep.mubr.msk.bf16.mxu1 %vm9607_vm1, %v12547_v2  ;;  %v491_v35 = vpop.f32.mrb[18].mxu0 }
 0x118   : > { %v10091_v38 = vadd.f32 %v799_v21, %v491_v35  ;;  %v8201_v13 = vpop.f32.mrb[19].mxu0  ;;  %v2393_v31 = vsel %vm2390_vm6, %v2391_v7, %v2392_v20  ;;  %v1974_v35 = vrot.slane %v10128_v25, 2 }
 0x119   : > { %v804_v40 = vpop.f32.mrb[20].mxu1 }
 0x11a   : > { %v8274_v41 = vpop.f32.mrb[21].mxu1  ;;  %8379 = vmatmul.mubr.msk.bf16.gmra.mrb[124].mxu0 %vm366_vm2, %v1148_v36  ;;  %v3328_v36 = vsel %vm418_vm0, %v7464_v27, 0 }
 0x11b   : > { %v807_v42 = vpop.f32.mrb[22].mxu1  ;;  %8382 = vmatprep.mubr.msk.bf16.mxu0 %vm9607_vm1, %v12547_v2  ;;  %v2394_v41 = vrot.slane %v10138_v33, 3 }
 0x11c   : > { %v8275_v46 = vpop.f32.mrb[23].mxu1 }
 0x11d   : > { %v496_v52 = vpop.f32.mrb[20].mxu0 }
 0x11e   : > { %8453 = vmatmul.mubr.msk.bf16.gmra.mrb[128].mxu1 %vm366_vm2, %v1580_v44  ;;  %v10099_v54 = vadd.f32 %v804_v40, %v496_v52  ;;  %v8204_v55 = vpop.f32.mrb[21].mxu0  ;;  %v1975_v44 = vsel %vm1972_vm7, %v1973_v34, %v1974_v35 }
 0x11f   : > { %8456 = vmatprep.mubr.msk.bf16.mxu1 %vm9607_vm1, %v12547_v2  ;;  %v499_v56 = vpop.f32.mrb[22].mxu0  ;;  %v2395_v55 = vsel %vm2390_vm6, %v2392_v20, %v2394_v41  ;;  %v10186_v20 = vld [vmem:[%s9703_s7 + $0x1e8] sm:$0xff]  }
 0x120   : > { %v10104_v61 = vadd.f32 %v807_v42, %v499_v56  ;;  %v8205_v19 = vpop.f32.mrb[23].mxu0 }
 0x121   : > { %v812_v62 = vpop.f32.mrb[24].mxu1 }
 0x122   : > { %v8278_v63 = vpop.f32.mrb[25].mxu1  ;;  %8383 = vmatmul.mubr.msk.bf16.gmra.mrb[128].mxu0 %vm366_vm2, %v1156_v57  ;;  %v1976_v57 = vrot.slane %v10156_v50, 2 }
 0x123   : > { %v815_v1 = vpop.f32.mrb[26].mxu1  ;;  %8386 = vmatprep.mubr.msk.bf16.mxu0 %vm9607_vm1, %v12547_v2 }
 0x124   : > { %v8279_v9 = vpop.f32.mrb[27].mxu1 }
 0x125   : > { %v504_v8 = vpop.f32.mrb[24].mxu0 }
 0x126   : > { %8457 = vmatmul.mubr.msk.bf16.gmra.mrb[132].mxu1 %vm366_vm2, %v1589_v0  ;;  %v10117_v14 = vadd.f32 %v812_v62, %v504_v8  ;;  %v8208_v17 = vpop.f32.mrb[25].mxu0  ;;  %v2396_v62 = vrot.slane %v10165_v60, 3  ;;  %v10179_v0 = vld [vmem:[%s9703_s7 + $0x148] sm:$0xff]  }
 0x127   : > { %8532 = vmatprep.mubr.msk.bf16.mxu1 %vm9607_vm1, %v12547_v2  ;;  %v507_v21 = vpop.f32.mrb[26].mxu0 }
 0x128   : > { %v10130_v26 = vadd.f32 %v815_v1, %v507_v21  ;;  %v8209_v23 = vpop.f32.mrb[27].mxu0  ;;  %v1977_v1 = vsel %vm1972_vm7, %v1974_v35, %v1976_v57  ;;  %v2397_v7 = vsel %vm2390_vm6, %v2394_v41, %v2396_v62  ;;  %v10206_v41 = vld [vmem:[%s9703_s7 + $0x1f0] sm:$0xff]  }
 0x129   : > { %v820_v4 = vpop.f32.mrb[28].mxu1 }
 0x12a   : > { %v8282_v18 = vpop.f32.mrb[29].mxu1  ;;  %8387 = vmatmul.mubr.msk.bf16.gmra.mrb[132].mxu0 %vm366_vm2, %v1164_v16  ;;  %v1978_v16 = vrot.slane %v10179_v0, 2 }
 0x12b   : > { %v823_v29 = vpop.f32.mrb[30].mxu1  ;;  %8462 = vmatprep.mubr.msk.bf16.mxu0 %vm9607_vm1, %v12547_v2  ;;  %v2398_v18 = vrot.slane %v10186_v20, 3 }
 0x12c   : > { %v8283_v28 = vpop.f32.mrb[31].mxu1 }
 0x12d   : > { %v512_v37 = vpop.f32.mrb[28].mxu0  ;;  %v10199_v28 = vld [vmem:[%s9703_s7 + $0x150] sm:$0xff]  }
 0x12e   : > { %8533 = vmatmul.mubr.msk.bf16.vlgmr.msra.gmra.mrb[136].mxu1 %vm366_vm2, %v2393_v31  ;;  %v10149_v13 = vadd.f32 %v820_v4, %v512_v37  ;;  %v8212_v40 = vpop.f32.mrb[29].mxu0  ;;  %v1979_v31 = vsel %vm1972_vm7, %v1976_v57, %v1978_v16 }
 0x12f   : > { %8671 = vmatpush3.bf16.msra.mxu1 %v3328_v36  ;;  %8536 = vmatprep.mubr.msk.bf16.mxu1 %vm9607_vm1, %v12547_v2  ;;  %v515_v42 = vpop.f32.mrb[30].mxu0  ;;  %v2399_v40 = vsel %vm2390_vm6, %v2396_v62, %v2398_v18 }
 0x130   : > { %8810 = vmatprep.subr.bf16.mxu1 %v12547_v2  ;;  %v10159_v45 = vadd.f32 %v823_v29, %v515_v42  ;;  %v8213_v46 = vpop.f32.mrb[31].mxu0 }
 0x131   : > { %v828_v47 = vpop.f32.mrb[32].mxu1 }
 0x132   : > { %v8286_v51 = vpop.f32.mrb[33].mxu1  ;;  %8463 = vmatmul.mubr.msk.bf16.vlgmr.msra.gmra.mrb[136].mxu0 %vm366_vm2, %v1975_v44  ;;  %v1980_v44 = vrot.slane %v10199_v28, 2 }
 0x133   : > { %v831_v52 = vpop.f32.mrb[34].mxu1  ;;  %8601 = vmatpush3.bf16.msra.mxu0 %v2903_v49  ;;  %8466 = vmatprep.mubr.msk.bf16.mxu0 %vm9607_vm1, %v12547_v2  ;;  %v2400_v51 = vrot.slane %v10206_v41, 3 }
 0x134   : > { %v8287_v56 = vpop.f32.mrb[35].mxu1  ;;  %8740 = vmatprep.subr.bf16.mxu0 %v12547_v2 }
 0x135   : > { %v520_v58 = vpop.f32.mrb[32].mxu0  ;;  %v10219_v56 = vld [vmem:[%s9703_s7 + $0x158] sm:$0xff]  }
 0x136   : > { %8537 = vmatmul.mubr.msk.bf16.gmra.mrb[140].mxu1 %vm366_vm2, %v2395_v55  ;;  %v10172_v48 = vadd.f32 %v828_v47, %v520_v58  ;;  %v8216_v19 = vpop.f32.mrb[33].mxu0  ;;  %v1981_v55 = vsel %vm1972_vm7, %v1978_v16, %v1980_v44 }
 0x137   : > { %8540 = vmatprep.mubr.msk.bf16.mxu1 %vm9607_vm1, %v12547_v2  ;;  %v523_v63 = vpop.f32.mrb[34].mxu0 }
 0x138   : > { %v10181_v9 = vadd.f32 %v831_v52, %v523_v63  ;;  %v8217_v11 = vpop.f32.mrb[35].mxu0 }
 0x139   : > { %v836_v12 = vpop.f32.mrb[36].mxu1  ;;  %v10226_v11 = vld [vmem:[%s9703_s7 + $0x1f8] sm:$0xff]  }
 0x13a   : > { %v8290_v8 = vpop.f32.mrb[37].mxu1  ;;  %8467 = vmatmul.mubr.msk.bf16.gmra.mrb[140].mxu0 %vm366_vm2, %v1977_v1  ;;  %v2401_v1 = vsel %vm2390_vm6, %v2398_v18, %v2400_v51  ;;  %v2402_v16 = vrot.slane %v10226_v11, 3  ;;  %v10239_v18 = vld [vmem:[%s9703_s7 + $0x160] sm:$0xff]  }
 0x13b   : > { %v839_v17 = vpop.f32.mrb[38].mxu1  ;;  %8470 = vmatprep.mubr.msk.bf16.mxu0 %vm9607_vm1, %v12547_v2  ;;  %v1982_v8 = vrot.slane %v10219_v56, 2 }
 0x13c   : > { %v8291_v21 = vpop.f32.mrb[39].mxu1 }
 0x13d   : > { %v528_v23 = vpop.f32.mrb[36].mxu0 }
 0x13e   : > { %8541 = vmatmul.mubr.msk.bf16.gmra.mrb[144].mxu1 %vm366_vm2, %v2397_v7  ;;  %v10192_v4 = vadd.f32 %v836_v12, %v528_v23  ;;  %v8220_v27 = vpop.f32.mrb[37].mxu0 }
 0x13f   : > { %8544 = vmatprep.mubr.msk.bf16.mxu1 %vm9607_vm1, %v12547_v2  ;;  %v531_v29 = vpop.f32.mrb[38].mxu0  ;;  %v1983_v27 = vsel %vm1972_vm7, %v1980_v44, %v1982_v8  ;;  %v1984_v44 = vrot.slane %v10239_v18, 2 }
 0x140   : > { %v10201_v34 = vadd.f32 %v839_v17, %v531_v29  ;;  %v8221_v35 = vpop.f32.mrb[39].mxu0 }
 0x141   : > { %v844_v36 = vpop.f32.mrb[40].mxu1 }
 0x142   : > { %v8294_v37 = vpop.f32.mrb[41].mxu1  ;;  %8471 = vmatmul.mubr.msk.bf16.gmra.mrb[144].mxu0 %vm366_vm2, %v1979_v31 }
 0x143   : > { %v847_v39 = vpop.f32.mrb[42].mxu1  ;;  %8474 = vmatprep.mubr.msk.bf16.mxu0 %vm9607_vm1, %v12547_v2 }
 0x144   : > { %v8295_v42 = vpop.f32.mrb[43].mxu1 }
 0x145   : > { %v536_v46 = vpop.f32.mrb[40].mxu0 }
 0x146   : > { %8545 = vmatmul.mubr.msk.bf16.gmra.mrb[148].mxu1 %vm366_vm2, %v2399_v40  ;;  %v10212_v49 = vadd.f32 %v844_v36, %v536_v46  ;;  %v8224_v47 = vpop.f32.mrb[41].mxu0  ;;  %v10246_v40 = vld [vmem:[%s9703_s7 + $0x200] sm:$0xff]  }
 0x147   : > { %8548 = vmatprep.mubr.msk.bf16.mxu1 %vm9607_vm1, %v12547_v2  ;;  %v539_v52 = vpop.f32.mrb[42].mxu0 }
 0x148   : > { %v10221_v57 = vadd.f32 %v847_v39, %v539_v52  ;;  %v8225_v58 = vpop.f32.mrb[43].mxu0  ;;  %v2403_v39 = vsel %vm2390_vm6, %v2400_v51, %v2402_v16  ;;  %v2404_v51 = vrot.slane %v10246_v40, 3 }
 0x149   : > { %v852_v19 = vpop.f32.mrb[44].mxu1  ;;  %v1985_v58 = vsel %vm1972_vm7, %v1982_v8, %v1984_v44 }
 0x14a   : > { %v8298_v62 = vpop.f32.mrb[45].mxu1  ;;  %8475 = vmatmul.mubr.msk.bf16.gmra.mrb[148].mxu0 %vm366_vm2, %v1981_v55 }
 0x14b   : > { %v855_v63 = vpop.f32.mrb[46].mxu1  ;;  %8478 = vmatprep.mubr.msk.bf16.mxu0 %vm9607_vm1, %v12547_v2 }
 0x14c   : > { %v8299_v12 = vpop.f32.mrb[47].mxu1 }
 0x14d   : > { %v544_v17 = vpop.f32.mrb[44].mxu0 }
 0x14e   : > { %8549 = vmatmul.mubr.msk.bf16.gmra.mrb[152].mxu1 %vm366_vm2, %v2401_v1  ;;  %v10232_v7 = vadd.f32 %v852_v19, %v544_v17  ;;  %v8228_v21 = vpop.f32.mrb[45].mxu0  ;;  %v10259_v19 = vld [vmem:[%s9703_s7 + $0x168] sm:$0xff]  }
 0x14f   : > { %8552 = vmatprep.mubr.msk.bf16.mxu1 %vm9607_vm1, %v12547_v2  ;;  %v547_v23 = vpop.f32.mrb[46].mxu0  ;;  %12629 = vst [vmem:[#allocation6_spill] sm:$0xff] %v10259_v19  ;;  %v2405_v21 = vsel %vm2390_vm6, %v2402_v16, %v2404_v51  ;;  %v1986_v8 = vrot.slane %v10259_v19, 2 }
 0x150   : > { %v10241_v29 = vadd.f32 %v855_v63, %v547_v23  ;;  %v8229_v31 = vpop.f32.mrb[47].mxu0  ;;  %v10266_v23 = vld [vmem:[%s9703_s7 + $0x208] sm:$0xff]  }
 0x151   : > { %v860_v35 = vpop.f32.mrb[48].mxu1  ;;  %12631 = vst [vmem:[#allocation8_spill] sm:$0xff] %v10266_v23  ;;  %v2406_v16 = vrot.slane %v10266_v23, 3  ;;  %v9434_v23 = vld [vmem:[%s9703_s7 + $0x250] ss:$0 sps:$4 sm:$0x77]  }
 0x152   : > { %v8302_v36 = vpop.f32.mrb[49].mxu1  ;;  %8479 = vmatmul.mubr.msk.bf16.gmra.mrb[152].mxu0 %vm366_vm2, %v1983_v27 }
 0x153   : > { %v863_v37 = vpop.f32.mrb[50].mxu1  ;;  %8482 = vmatprep.mubr.msk.bf16.mxu0 %vm9607_vm1, %v12547_v2 }
 0x154   : > { %v8303_v42 = vpop.f32.mrb[51].mxu1 }
 0x155   : > { %v552_v46 = vpop.f32.mrb[48].mxu0  ;;  %v10279_v42 = vld [vmem:[%s9703_s7 + $0x170] sm:$0xff]  }
 0x156   : > { %8553 = vmatmul.mubr.msk.bf16.gmra.mrb[156].mxu1 %vm366_vm2, %v2403_v39  ;;  %v10252_v47 = vadd.f32 %v860_v35, %v552_v46  ;;  %v8232_v52 = vpop.f32.mrb[49].mxu0  ;;  %v1987_v39 = vsel %vm1972_vm7, %v1984_v44, %v1986_v8  ;;  %12633 = vst [vmem:[#allocation10_spill] sm:$0xff] %v10279_v42  ;;  %v1988_v44 = vrot.slane %v10279_v42, 2 }
 0x157   : > { %8556 = vmatprep.mubr.msk.bf16.mxu1 %vm9607_vm1, %v12547_v2  ;;  %v555_v55 = vpop.f32.mrb[50].mxu0 }
 0x158   : > { %12628 = vst [vmem:[#allocation5_spill] sm:$0xff] %v10252_v47  ;;  %v10261_v62 = vadd.f32 %v863_v37, %v555_v55  ;;  %v8233_v63 = vpop.f32.mrb[51].mxu0 }
 0x159   : > { %v868_v1 = vpop.f32.mrb[52].mxu1 }
 0x15a   : > { %12630 = vst [vmem:[#allocation7_spill] sm:$0xff] %v10261_v62  ;;  %v8306_v12 = vpop.f32.mrb[53].mxu1  ;;  %8483 = vmatmul.mubr.msk.bf16.gmra.mrb[156].mxu0 %vm366_vm2, %v1985_v58 }
 0x15b   : > { %v871_v17 = vpop.f32.mrb[54].mxu1  ;;  %8486 = vmatprep.mubr.msk.bf16.mxu0 %vm9607_vm1, %v12547_v2  ;;  %v10286_v12 = vld [vmem:[%s9703_s7 + $0x210] sm:$0xff]  }
 0x15c   : > { %v8307_v27 = vpop.f32.mrb[55].mxu1  ;;  %12635 = vst [vmem:[#allocation12_spill] sm:$0xff] %v10286_v12 }
 0x15d   : > { %v560_v31 = vpop.f32.mrb[52].mxu0 }
 0x15e   : > { %8557 = vmatmul.mubr.msk.bf16.gmra.mrb[160].mxu1 %vm366_vm2, %v2405_v21  ;;  %v10272_v35 = vadd.f32 %v868_v1, %v560_v31  ;;  %v8236_v36 = vpop.f32.mrb[53].mxu0  ;;  %v2407_v1 = vsel %vm2390_vm6, %v2404_v51, %v2406_v16  ;;  %v2408_v51 = vrot.slane %v10286_v12, 3 }
 0x15f   : > { %8560 = vmatprep.mubr.msk.bf16.mxu1 %vm9607_vm1, %v12547_v2  ;;  %v563_v37 = vpop.f32.mrb[54].mxu0 }
 0x160   : > { %12632 = vst [vmem:[#allocation9_spill] sm:$0xff] %v10272_v35  ;;  %v10281_v46 = vadd.f32 %v871_v17, %v563_v37  ;;  %v8237_v52 = vpop.f32.mrb[55].mxu0  ;;  %v1989_v37 = vsel %vm1972_vm7, %v1986_v8, %v1988_v44 }
 0x161   : > { %v876_v55 = vpop.f32.mrb[56].mxu1 }
 0x162   : > { %12634 = vst [vmem:[#allocation11_spill] sm:$0xff] %v10281_v46  ;;  %v8310_v58 = vpop.f32.mrb[57].mxu1  ;;  %8487 = vmatmul.mubr.msk.bf16.gmra.mrb[160].mxu0 %vm366_vm2, %v1987_v39  ;;  %v10299_v39 = vld [vmem:[%s9703_s7 + $0x178] sm:$0xff]  }
 0x163   : > { %v879_v63 = vpop.f32.mrb[58].mxu1  ;;  %8490 = vmatprep.mubr.msk.bf16.mxu0 %vm9607_vm1, %v12547_v2  ;;  %12637 = vst [vmem:[#allocation14_spill] sm:$0xff] %v10299_v39  ;;  %v1990_v8 = vrot.slane %v10299_v39, 2 }
 0x164   : > { %v8311_v21 = vpop.f32.mrb[59].mxu1 }
 0x165   : > { %v568_v27 = vpop.f32.mrb[56].mxu0 }
 0x166   : > { %8561 = vmatmul.mubr.msk.bf16.gmra.mrb[164].mxu1 %vm366_vm2, %v2407_v1  ;;  %v10292_v17 = vadd.f32 %v876_v55, %v568_v27  ;;  %v8240_v31 = vpop.f32.mrb[57].mxu0  ;;  %v2409_v1 = vsel %vm2390_vm6, %v2406_v16, %v2408_v51  ;;  %v10306_v27 = vld [vmem:[%s9703_s7 + $0x218] sm:$0xff]  }
 0x167   : > { %8564 = vmatprep.mubr.msk.bf16.mxu1 %vm9607_vm1, %v12547_v2  ;;  %v571_v36 = vpop.f32.mrb[58].mxu0  ;;  %12639 = vst [vmem:[#allocation16_spill] sm:$0xff] %v10306_v27  ;;  %v2410_v16 = vrot.slane %v10306_v27, 3 }
 0x168   : > { %12636 = vst [vmem:[#allocation13_spill] sm:$0xff] %v10292_v17  ;;  %v10301_v52 = vadd.f32 %v879_v63, %v571_v36  ;;  %v8241_v58 = vpop.f32.mrb[59].mxu0 }
 0x169   : > { %v884_v21 = vpop.f32.mrb[60].mxu1  ;;  %v10319_v58 = vld [vmem:[%s9703_s7 + $0x180] sm:$0xff]  }
 0x16a   : > { %12638 = vst [vmem:[#allocation15_spill] sm:$0xff] %v10301_v52  ;;  %v8314_v46 = vpop.f32.mrb[61].mxu1  ;;  %8491 = vmatmul.mubr.msk.bf16.gmra.mrb[164].mxu0 %vm366_vm2, %v1989_v37  ;;  %v1991_v37 = vsel %vm1972_vm7, %v1988_v44, %v1990_v8  ;;  %12641 = vst [vmem:[#allocation18_spill] sm:$0xff] %v10319_v58  ;;  %v1992_v44 = vrot.slane %v10319_v58, 2 }
 0x16b   : > { %v887_v55 = vpop.f32.mrb[62].mxu1  ;;  %8494 = vmatprep.mubr.msk.bf16.mxu0 %vm9607_vm1, %v12547_v2 }
 0x16c   : > { %v8315_v31 = vpop.f32.mrb[63].mxu1 }
 0x16d   : > { %v576_v17 = vpop.f32.mrb[60].mxu0 }
 0x16e   : > { %8565 = vmatmul.mubr.msk.bf16.gmra.mrb[168].mxu1 %vm366_vm2, %v2409_v1  ;;  %v10312_v63 = vadd.f32 %v884_v21, %v576_v17  ;;  %v8244_v46 = vpop.f32.mrb[61].mxu0  ;;  %v2411_v21 = vsel %vm2390_vm6, %v2408_v51, %v2410_v16  ;;  %v10326_v1 = vld [vmem:[%s9703_s7 + $0x220] sm:$0xff]  }
 0x16f   : > { %8568 = vmatprep.mubr.msk.bf16.mxu1 %vm9607_vm1, %v12547_v2  ;;  %v579_v36 = vpop.f32.mrb[62].mxu0  ;;  %12643 = vst [vmem:[#allocation20_spill] sm:$0xff] %v10326_v1  ;;  %v2412_v51 = vrot.slane %v10326_v1, 3 }
 0x170   : > { %12640 = vst [vmem:[#allocation17_spill] sm:$0xff] %v10312_v63  ;;  %v10321_v31 = vadd.f32 %v887_v55, %v579_v36  ;;  %v8245_v52 = vpop.f32.mrb[63].mxu0  ;;  %v1993_v36 = vsel %vm1972_vm7, %v1990_v8, %v1992_v44 }
 0x171   : > { %v892_v39 = vpop.f32.mrb[64].mxu1 }
 0x172   : > { %12642 = vst [vmem:[#allocation19_spill] sm:$0xff] %v10321_v31  ;;  %v8318_v12 = vpop.f32.mrb[65].mxu1  ;;  %8495 = vmatmul.mubr.msk.bf16.gmra.mrb[168].mxu0 %vm366_vm2, %v1991_v37  ;;  %v10339_v37 = vld [vmem:[%s9703_s7 + $0x188] sm:$0xff]  }
 0x173   : > { %v895_v17 = vpop.f32.mrb[66].mxu1  ;;  %8498 = vmatprep.mubr.msk.bf16.mxu0 %vm9607_vm1, %v12547_v2  ;;  %12645 = vst [vmem:[#allocation22_spill] sm:$0xff] %v10339_v37  ;;  %v1994_v8 = vrot.slane %v10339_v37, 2 }
 0x174   : > { %v8319_v46 = vpop.f32.mrb[67].mxu1 }
 0x175   : > { %v584_v63 = vpop.f32.mrb[64].mxu0 }
 0x176   : > { %8569 = vmatmul.mubr.msk.bf16.gmra.mrb[172].mxu1 %vm366_vm2, %v2411_v21  ;;  %v10332_v52 = vadd.f32 %v892_v39, %v584_v63  ;;  %v8248_v12 = vpop.f32.mrb[65].mxu0  ;;  %v2413_v63 = vsel %vm2390_vm6, %v2410_v16, %v2412_v51  ;;  %v10346_v21 = vld [vmem:[%s9703_s7 + $0x228] sm:$0xff]  }
 0x177   : > { %8572 = vmatprep.mubr.msk.bf16.mxu1 %vm9607_vm1, %v12547_v2  ;;  %v587_v55 = vpop.f32.mrb[66].mxu0  ;;  %12647 = vst [vmem:[#allocation24_spill] sm:$0xff] %v10346_v21  ;;  %v2414_v16 = vrot.slane %v10346_v21, 3  ;;  %v12652_v21 = vmov 0.0  }
 0x178   : > { %12644 = vst [vmem:[#allocation21_spill] sm:$0xff] %v10332_v52  ;;  %v10341_v46 = vadd.f32 %v895_v17, %v587_v55  ;;  %v8249_v31 = vpop.f32.mrb[67].mxu0  ;;  %v1995_v55 = vsel %vm1972_vm7, %v1992_v44, %v1994_v8 }
 0x179   : > { %v1678_v58 = vpop.f32.mrb[68].mxu1 }
 0x17a   : > { %12646 = vst [vmem:[#allocation23_spill] sm:$0xff] %v10341_v46  ;;  %v8394_v27 = vpop.f32.mrb[69].mxu1  ;;  %8499 = vmatmul.mubr.msk.bf16.gmra.mrb[172].mxu0 %vm366_vm2, %v1993_v36  ;;  %v10358_v36 = vld [vmem:[%s9703_s7 + $0x190] sm:$0xff]  }
 0x17b   : > { %v1681_v39 = vpop.f32.mrb[70].mxu1  ;;  %8502 = vmatprep.mubr.msk.bf16.mxu0 %vm9607_vm1, %v12547_v2  ;;  %12648 = vst [vmem:[#allocation25_spill] sm:$0xff] %v10358_v36 }
 0x17c   : > { %v8395_v12 = vpop.f32.mrb[71].mxu1 }
 0x17d   : > { %v1253_v52 = vpop.f32.mrb[68].mxu0 }
 0x17e   : > { %8573 = vmatmul.mubr.msk.bf16.gmra.mrb[176].mxu1 %vm366_vm2, %v2413_v63  ;;  %v1388_v27 = vadd.f32 %v1253_v52, %v10024_v59  ;;  %v8324_v31 = vpop.f32.mrb[69].mxu0  ;;  %v2415_v52 = vsel %vm2390_vm6, %v2412_v51, %v2414_v16 }
 0x17f   : > { %8576 = vmatprep.mubr.msk.bf16.mxu1 %vm9607_vm1, %v12547_v2  ;;  %v1256_v17 = vpop.f32.mrb[70].mxu0  ;;  %v10366_v31 = vld [vmem:[%s9703_s7 + $0x230] sm:$0xff]  }
 0x180   : > { %v1389_v12 = vadd.f32 %v1256_v17, %v10031_v10  ;;  %v8325_v46 = vpop.f32.mrb[71].mxu0  ;;  %v10361_v1 = vadd.f32 %v1678_v58, %v1388_v27  ;;  %12650 = vst [vmem:[#allocation27_spill] sm:$0xff] %v10366_v31  ;;  %v1996_v10 = vrot.slane %v10358_v36, 2  ;;  %v2416_v51 = vrot.slane %v10366_v31, 3 }
 0x181   : > { %v1686_v37 = vpop.f32.mrb[72].mxu1 }
 0x182   : > { %12649 = vst [vmem:[#allocation26_spill] sm:$0xff] %v10361_v1  ;;  %v8398_v63 = vpop.f32.mrb[73].mxu1  ;;  %8503 = vmatmul.mubr.msk.bf16.gmra.mrb[176].mxu0 %vm366_vm2, %v1995_v55  ;;  %v10368_v2 = vadd.f32 %v1681_v39, %v1389_v12  ;;  %v1997_v17 = vsel %vm1972_vm7, %v1994_v8, %v1996_v10  ;;  %v10380_v55 = vld [vmem:[%s9703_s7 + $0x198] sm:$0xff]  }
 0x183   : > { %v1689_v59 = vpop.f32.mrb[74].mxu1  ;;  %8506 = vmatprep.mubr.msk.bf16.mxu0 %vm9607_vm1, %v12652_v21  ;;  %12653 = vst [vmem:[#allocation29_spill] sm:$0xff] %v10380_v55 }
 0x184   : > { %12651 = vst [vmem:[#allocation28_spill] sm:$0xff] %v10368_v2  ;;  %v8399_v44 = vpop.f32.mrb[75].mxu1 }
 0x185   : > { %v1261_v46 = vpop.f32.mrb[72].mxu0 }
 0x186   : > { %8577 = vmatmul.mubr.msk.bf16.gmra.mrb[180].mxu1 %vm366_vm2, %v2415_v52  ;;  %v1390_v58 = vadd.f32 %v1261_v46, %v10040_v24  ;;  %v8328_v27 = vpop.f32.mrb[73].mxu0  ;;  %v2417_v46 = vsel %vm2390_vm6, %v2414_v16, %v2416_v51 }
 0x187   : > { %8580 = vmatprep.mubr.msk.bf16.mxu1 %vm9607_vm1, %v12652_v21  ;;  %v1264_v39 = vpop.f32.mrb[74].mxu0  ;;  %v10388_v27 = vld [vmem:[%s9703_s7 + $0x238] sm:$0xff]  }
 0x188   : > { %v1391_v12 = vadd.f32 %v1264_v39, %v10047_v32  ;;  %v8329_v63 = vpop.f32.mrb[75].mxu0  ;;  %v10383_v2 = vadd.f32 %v1686_v37, %v1390_v58  ;;  %v1998_v32 = vrot.slane %v10380_v55, 2  ;;  %v2418_v16 = vrot.slane %v10388_v27, 3  ;;  %v10434_v55 = vld [vmem:[%s9703_s7 + $0x248] sm:$0xff]  }
 0x189   : > { %v1694_v44 = vpop.f32.mrb[76].mxu1 }
 0x18a   : > { %12654 = vst [vmem:[#allocation30_spill] sm:$0xff] %v10383_v2  ;;  %v8402_v52 = vpop.f32.mrb[77].mxu1  ;;  %8507 = vmatmul.mubr.msk.bf16.gmra.mrb[180].mxu0 %vm366_vm2, %v1997_v17  ;;  %v10390_v31 = vadd.f32 %v1689_v59, %v1391_v12  ;;  %v1999_v17 = vsel %vm1972_vm7, %v1996_v10, %v1998_v32  ;;  %v10402_v12 = vld [vmem:[%s9703_s7 + $0x1a0] sm:$0xff]  }
 0x18b   : > { %v1697_v24 = vpop.f32.mrb[78].mxu1  ;;  %8510 = vmatprep.mubr.msk.bf16.mxu0 %vm9607_vm1, %v12652_v21 }
 0x18c   : > { %12655 = vst [vmem:[#allocation31_spill] sm:$0xff] %v10390_v31  ;;  %v8403_v8 = vpop.f32.mrb[79].mxu1 }
 0x18d   : > { %v1269_v39 = vpop.f32.mrb[76].mxu0 }
 0x18e   : > { %8581 = vmatmul.mubr.msk.bf16.gmra.mrb[184].mxu1 %vm366_vm2, %v2417_v46  ;;  %v1392_v37 = vadd.f32 %v1269_v39, %v10055_v43  ;;  %v8332_v58 = vpop.f32.mrb[77].mxu0  ;;  %v2419_v39 = vsel %vm2390_vm6, %v2416_v51, %v2418_v16 }
 0x18f   : > { %8584 = vmatprep.mubr.msk.bf16.mxu1 %vm9607_vm1, %v12652_v21  ;;  %v1272_v59 = vpop.f32.mrb[78].mxu0  ;;  %v10410_v58 = vld [vmem:[%s9703_s7 + $0x240] sm:$0xff]  }
 0x190   : > { %v1393_v63 = vadd.f32 %v1272_v59, %v10062_v53  ;;  %v8333_v52 = vpop.f32.mrb[79].mxu0  ;;  %v10405_v31 = vadd.f32 %v1694_v44, %v1392_v37  ;;  %v2000_v53 = vrot.slane %v10402_v12, 2  ;;  %v2420_v51 = vrot.slane %v10410_v58, 3 }
 0x191   : > { %v1702_v8 = vpop.f32.mrb[80].mxu1 }
 0x192   : > { %12656 = vst [vmem:[#allocation32_spill] sm:$0xff] %v10405_v31  ;;  %v8406_v46 = vpop.f32.mrb[81].mxu1  ;;  %8511 = vmatmul.mubr.msk.bf16.gmra.mrb[184].mxu0 %vm366_vm2, %v1999_v17  ;;  %v10412_v2 = vadd.f32 %v1697_v24, %v1393_v63  ;;  %v10423_v24 = vld [vmem:[%s9703_s7 + $0x1a8] sm:$0xff]   ;;  %v2001_v63 = vsel %vm1972_vm7, %v1998_v32, %v2000_v53 }
 0x193   : > { %v1705_v43 = vpop.f32.mrb[82].mxu1  ;;  %8514 = vmatprep.mubr.msk.bf16.mxu0 %vm9607_vm1, %v12652_v21  ;;  %v12557_v31 = vrot.slane %v10423_v24, 2 }
 0x194   : > { %12657 = vst [vmem:[#allocation33_spill] sm:$0xff] %v10412_v2  ;;  %v8407_v10 = vpop.f32.mrb[83].mxu1 }
 0x195   : > { %v1277_v59 = vpop.f32.mrb[80].mxu0 }
 0x196   : > { %8585 = vmatmul.mubr.msk.bf16.gmra.mrb[188].mxu1 %vm366_vm2, %v2419_v39  ;;  %v1394_v44 = vadd.f32 %v1277_v59, %v10070_v3  ;;  %v8336_v37 = vpop.f32.mrb[81].mxu0  ;;  %v2421_v59 = vsel %vm2390_vm6, %v2418_v16, %v2420_v51  ;;  %v3241_v16 = vshrl.u32 %v10388_v27, 16 }
 0x197   : > { %8588 = vmatprep.mubr.msk.bf16.mxu1 %vm9607_vm1, %v12652_v21  ;;  %v1280_v17 = vpop.f32.mrb[82].mxu0  ;;  %v3250_v37 = vshrl.u32 %v10410_v58, 16 }
 0x198   : > { %v1395_v52 = vadd.f32 %v1280_v17, %v10077_v15  ;;  %v8337_v46 = vpop.f32.mrb[83].mxu0  ;;  %v10427_v39 = vadd.f32 %v1702_v8, %v1394_v44  ;;  %v2825_v15 = vshrl.u32 %v10423_v24, 16  ;;  %v2828_v8 = vshll.u32 %v10423_v24, 16 }
 0x199   : > { %v1710_v10 = vpop.f32.mrb[84].mxu1  ;;  %v3244_v44 = vshll.u32 %v10388_v27, 16  ;;  %v2816_v17 = vshrl.u32 %v10402_v12, 16  ;;  %v3243_v27 = vrot.slane %v3241_v16, 3 }
 0x19a   : > { %v8410_v2 = vpop.f32.mrb[85].mxu1  ;;  %12658 = vst [vmem:[#allocation34_spill] sm:$0xff] %v10427_v39  ;;  %8515 = vmatmul.mubr.msk.bf16.gmra.mrb[188].mxu0 %vm366_vm2, %v2001_v63  ;;  %v10436_v1 = vadd.f32 %v1705_v43, %v1395_v52  ;;  %v2819_v43 = vshll.u32 %v10402_v12, 16  ;;  %v2827_v36 = vrot.slane %v2825_v15, 2 }
 0x19b   : > { %v1713_v3 = vpop.f32.mrb[86].mxu1  ;;  %8518 = vmatprep.mubr.msk.bf16.mxu0 %vm9607_vm1, %v12652_v21  ;;  %v3253_v2 = vshll.u32 %v10410_v58, 16  ;;  %v2003_v58 = vsel %vm1972_vm7, %v2000_v53, %v12557_v31  ;;  %v3262_v53 = vshll.u32 %v10434_v55, 16  ;;  %v3246_v42 = vrot.slane %v3244_v44, 4 }
 0x19c   : > { %12659 = vst [vmem:[#allocation35_spill] sm:$0xff] %v10436_v1  ;;  %v8411_v32 = vpop.f32.mrb[87].mxu1  ;;  %v10456_v1 = vld [vmem:[%s9703_s7 + $0x1b0] sm:$0xff]   ;;  %v2818_v47 = vrot.slane %v2816_v17, 2 }
 0x19d   : > { %v1285_v63 = vpop.f32.mrb[84].mxu0  ;;  %v3252_v32 = vrot.slane %v3250_v37, 3  ;;  %v3255_v39 = vrot.slane %v3253_v2, 4  ;;  %v2834_v31 = vshrl.u32 %v10456_v1, 16  ;;  %v2821_v2 = vrot.slane %v2819_v43, 3 }
 0x19e   : > { %8589 = vmatmul.mubr.msk.bf16.gmra.mrb[192].mxu1 %vm366_vm2, %v2421_v59  ;;  %v1396_v52 = vadd.f32 %v1285_v63, %v10086_v30  ;;  %v8340_v46 = vpop.f32.mrb[85].mxu0  ;;  %v2830_v59 = vrot.slane %v2828_v8, 3  ;;  %v3259_v30 = vshrl.u32 %v10434_v55, 16  ;;  %v12660_v8 = vrot.slane %v10434_v55, 3 }
 0x19f   : > { %8592 = vmatprep.mubr.msk.bf16.mxu1 %vm9607_vm1, %v12652_v21  ;;  %v1288_v12 = vpop.f32.mrb[86].mxu0  ;;  %v3264_v17 = vrot.slane %v3262_v53, 4  ;;  %v2836_v43 = vrot.slane %v2834_v31, 2  ;;  %v10488_v31 = vor.u32 %v3246_v42, %v3243_v27 }
 0x1a0   : > { %v1397_v37 = vadd.f32 %v1288_v12, %v10091_v38  ;;  %v8341_v63 = vpop.f32.mrb[87].mxu0  ;;  %v10462_v35 = vadd.f32 %v1710_v10, %v1396_v52  ;;  %v2423_v38 = vsel %vm2390_vm6, %v2420_v51, %v12660_v8  ;;  %v2837_v10 = vshll.u32 %v10456_v1, 16 }
 0x1a1   : > { %v1718_v46 = vpop.f32.mrb[88].mxu1  ;;  %v10471_v63 = vor.u32 %v3255_v39, %v3252_v32  ;;  %v10477_v16 = vor.u32 %v2830_v59, %v2827_v36  ;;  %v3261_v44 = vrot.slane %v3259_v30, 3  ;;  %v2424_v51 = vrot.slane %v9434_v23, 3 }
 0x1a2   : > { %v8414_v62 = vpop.f32.mrb[89].mxu1  ;;  %8519 = vmatmul.mubr.msk.bf16.gmra.mrb[192].mxu0 %vm366_vm2, %v2003_v58  ;;  %v10469_v12 = vadd.f32 %v1713_v3, %v1397_v37  ;;  %v3116_v39 = vshrl.u32 %v10109_v5, 16  ;;  %v3124_v3 = vshrl.u32 %v10112_v6, 16  ;;  %v3127_v36 = vshll.u32 %v10112_v6, 16 }
 0x1a3   : > { %v1721_v15 = vpop.f32.mrb[90].mxu1  ;;  %8522 = vmatprep.mubr.msk.bf16.mxu0 %vm9607_vm1, %v12652_v21  ;;  %v2004_v62 = vrot.slane %v10456_v1, 2  ;;  %v9435_v1 = vld [vmem:[%s9703_s7 + $0x1b8] ss:$0 sps:$4 sm:$0x33]   ;;  %v10490_v59 = vor.u32 %v2821_v2, %v2818_v47  ;;  %v12661_v30 = vrot.slane %v10423_v24, 2  ;;  %v10499_v6 = vsel %vm3114_vm8, %v10488_v31, %v10471_v63 }
 0x1a4   : > { %v8415_v19 = vpop.f32.mrb[91].mxu1  ;;  %v2839_v37 = vrot.slane %v2837_v10, 3  ;;  %v3118_v27 = vrot.slane %v3116_v39, 3  ;;  %v2006_v39 = vrot.slane %v9435_v1, 2 }
 0x1a5   : > { %v1293_v52 = vpop.f32.mrb[88].mxu0  ;;  %v3119_v19 = vshll.u32 %v10109_v5, 16  ;;  %v2005_v5 = vsel %vm1972_vm7, %v12661_v30, %v2004_v62  ;;  %v10504_v47 = vsel %vm2689_vm9, %v10490_v59, %v10477_v16  ;;  %v3129_v30 = vrot.slane %v3127_v36, 4 }
 0x1a6   : > { %8593 = vmatmul.mubr.msk.bf16.gmra.mrb[196].mxu1 %vm366_vm2, %v2423_v38  ;;  %v1398_v32 = vadd.f32 %v1293_v52, %v10099_v54  ;;  %v8344_v58 = vpop.f32.mrb[89].mxu0  ;;  %v2691_v38 = vshrl.u32 %v10125_v22, 16  ;;  %v12662_v52 = vrot.slane %v10434_v55, 3 }
 0x1a7   : > { %8596 = vmatprep.mubr.msk.bf16.mxu1 %vm9607_vm1, %v12652_v21  ;;  %v1296_v23 = vpop.f32.mrb[90].mxu0  ;;  %v3121_v2 = vrot.slane %v3119_v19, 4  ;;  %v2699_v19 = vshrl.u32 %v10128_v25, 16 }
 0x1a8   : > { %v1399_v54 = vadd.f32 %v1296_v23, %v10104_v61  ;;  %v8345_v53 = vpop.f32.mrb[91].mxu0  ;;  %v10506_v42 = vadd.f32 %v1718_v46, %v1398_v32  ;;  %v2694_v61 = vshll.u32 %v10125_v22, 16  ;;  %v2425_v58 = vsel %vm2390_vm6, %v12662_v52, %v2424_v51 }
 0x1a9   : > { %v1726_v8 = vpop.f32.mrb[92].mxu1  ;;  %v3126_v23 = vrot.slane %v3124_v3, 3  ;;  %v2702_v22 = vshll.u32 %v10128_v25, 16  ;;  %v10520_v32 = vor.u32 %v3264_v17, %v3261_v44  ;;  %v3122_v51 = vor.u32 %v3121_v2, %v3118_v27 }
 0x1aa   : > { %v8418_v24 = vpop.f32.mrb[93].mxu1  ;;  %8523 = vmatmul.mubr.msk.bf16.gmra.mrb[196].mxu0 %vm366_vm2, %v2005_v5  ;;  %v10514_v53 = vadd.f32 %v1721_v15, %v1399_v54  ;;  %v10522_v5 = vor.u32 %v2839_v37, %v2836_v43  ;;  %v2693_v3 = vrot.slane %v2691_v38, 2  ;;  %v2696_v15 = vrot.slane %v2694_v61, 3 }
 0x1ab   : > { %v1729_v10 = vpop.f32.mrb[94].mxu1  ;;  %8526 = vmatprep.mubr.msk.bf16.mxu0 %vm9607_vm1, %v12652_v21  ;;  %v3130_v1 = vor.u32 %v3129_v30, %v3126_v23  ;;  %v3133_v24 = vshrl.u32 %v10138_v33, 16  ;;  %v3136_v25 = vshll.u32 %v10138_v33, 16  ;;  %v2007_v17 = vsel %vm1972_vm7, %v2004_v62, %v2006_v39 }
 0x1ac   : > { %v8419_v46 = vpop.f32.mrb[95].mxu1  ;;  %v2701_v43 = vrot.slane %v2699_v19, 2  ;;  %v2704_v37 = vrot.slane %v2702_v22, 3  ;;  %v10538_v61 = vsel %vm3114_vm8, %v10471_v63, %v10520_v32  ;;  %v10543_v33 = vsel %vm2689_vm9, %v10477_v16, %v10522_v5 }
 0x1ad   : > { %v1301_v55 = vpop.f32.mrb[92].mxu0  ;;  %v3131_v23 = vsel %vm3114_vm8, %v3122_v51, %v3130_v1  ;;  %v3135_v30 = vrot.slane %v3133_v24, 3  ;;  %v3138_v46 = vrot.slane %v3136_v25, 4  ;;  %v2711_v22 = vshll.u32 %v10156_v50, 16  ;;  %v7483_v51 = vld [vmem:[%s12532_s1 + $0x10] sm:$0x3] }
 0x1ae   : > { %8597 = vmatmul.mubr.msk.bf16.gmra.mrb[200].mxu1 %vm366_vm2, %v2425_v58  ;;  %v1400_v36 = vadd.f32 %v1301_v55, %v10117_v14  ;;  %v8348_v54 = vpop.f32.mrb[93].mxu0  ;;  %v7519_v14 = vld [vmem:[%s12532_s1 + $0x12] sm:$0x3]  ;;  %v2705_v19 = vor.u32 %v2704_v37, %v2701_v43  ;;  %v3850_v43 = vsel %vm418_vm0, %v7483_v51, 0 }
 0x1af   : > { %8672 = vmatprep.mubr.msk.bf16.mxu1 %vm9607_vm1, %v12652_v21  ;;  %v1304_v44 = vpop.f32.mrb[94].mxu0  ;;  %v4393_v16 = vsel %vm418_vm0, %v7519_v14, 0  ;;  %v3145_v54 = vshll.u32 %v10165_v60, 16 }
 0x1b0   : > { %v1401_v27 = vadd.f32 %v1304_v44, %v10130_v26  ;;  %v8349_v2 = vpop.f32.mrb[95].mxu0  ;;  %v10545_v62 = vadd.f32 %v1726_v8, %v1400_v36  ;;  %v2697_v26 = vor.u32 %v2696_v15, %v2693_v3  ;;  %v2708_v8 = vshrl.u32 %v10156_v50, 16 }
 0x1b1   : > { %v1734_v38 = vpop.f32.mrb[96].mxu1  ;;  %v3139_v15 = vor.u32 %v3138_v46, %v3135_v30  ;;  %v3142_v36 = vshrl.u32 %v10165_v60, 16  ;;  %v2713_v44 = vrot.slane %v2711_v22, 3  ;;  %v2717_v46 = vshrl.u32 %v10179_v0, 16 }
 0x1b2   : > { %v8422_v52 = vpop.f32.mrb[97].mxu1  ;;  %8527 = vmatmul.mubr.msk.bf16.gmra.mrb[200].mxu0 %vm366_vm2, %v2007_v17  ;;  %v10549_v39 = vadd.f32 %v1729_v10, %v1401_v27  ;;  %v2706_v24 = vsel %vm2689_vm9, %v2697_v26, %v2705_v19  ;;  %v2710_v25 = vrot.slane %v2708_v8, 2  ;;  %v3147_v26 = vrot.slane %v3145_v54, 4 }
 0x1b3   : > { %v1737_v58 = vpop.f32.mrb[98].mxu1  ;;  %8602 = vmatprep.mubr.msk.bf16.mxu0 %vm9607_vm1, %v12652_v21  ;;  %v3140_v60 = vsel %vm3114_vm8, %v3130_v1, %v3139_v15  ;;  %v3144_v52 = vrot.slane %v3142_v36, 3  ;;  %v3151_v8 = vshrl.u32 %v10186_v20, 16  ;;  %v3154_v22 = vshll.u32 %v10186_v20, 16 }
 0x1b4   : > { %v8423_v63 = vpop.f32.mrb[99].mxu1 }
 0x1b5   : > { %v1309_v55 = vpop.f32.mrb[96].mxu0 }
 0x1b6   : > { %8673 = vmatmul.mubr.msk.bf16.vlgmr.msra.gmra.mrb[204].mxu1 %vm366_vm2, %v3131_v23  ;;  %v1402_v10 = vadd.f32 %v1309_v55, %v10149_v13  ;;  %v8352_v3 = vpop.f32.mrb[97].mxu0 }
 0x1b7   : > { %8811 = vmatpush3.bf16.msra.mxu1 %v4393_v16  ;;  %8676 = vmatprep.mubr.msk.bf16.mxu1 %vm9607_vm1, %v12652_v21  ;;  %v1312_v50 = vpop.f32.mrb[98].mxu0 }
 0x1b8   : > { %8950 = vmatprep.subr.bf16.mxu1 %v12652_v21  ;;  %v1403_v17 = vadd.f32 %v1312_v50, %v10159_v45  ;;  %v8353_v13 = vpop.f32.mrb[99].mxu0  ;;  %v10569_v27 = vadd.f32 %v1734_v38, %v1402_v10  ;;  %v2714_v45 = vor.u32 %v2713_v44, %v2710_v25  ;;  %v2720_v38 = vshll.u32 %v10179_v0, 16 }
 0x1b9   : > { %v1742_v37 = vpop.f32.mrb[100].mxu1  ;;  %v2719_v0 = vrot.slane %v2717_v46, 2  ;;  %v3153_v44 = vrot.slane %v3151_v8, 3 }
 0x1ba   : > { %v8426_v2 = vpop.f32.mrb[101].mxu1  ;;  %8603 = vmatmul.mubr.msk.bf16.vlgmr.msra.gmra.mrb[204].mxu0 %vm366_vm2, %v2706_v24  ;;  %v10573_v23 = vadd.f32 %v1737_v58, %v1403_v17  ;;  %v3148_v58 = vor.u32 %v3147_v26, %v3144_v52  ;;  %v2715_v51 = vsel %vm2689_vm9, %v2705_v19, %v2714_v45  ;;  %v2722_v10 = vrot.slane %v2720_v38, 3 }
 0x1bb   : > { %v1745_v14 = vpop.f32.mrb[102].mxu1  ;;  %8741 = vmatpush3.bf16.msra.mxu0 %v3850_v43  ;;  %8606 = vmatprep.mubr.msk.bf16.mxu0 %vm9607_vm1, %v12652_v21  ;;  %v3156_v17 = vrot.slane %v3154_v22, 4  ;;  %v2729_v43 = vshll.u32 %v10199_v28, 16  ;;  %v3163_v52 = vshll.u32 %v10206_v41, 16 }
 0x1bc   : > { %v8427_v30 = vpop.f32.mrb[103].mxu1  ;;  %8880 = vmatprep.subr.bf16.mxu0 %v12652_v21  ;;  %v3149_v25 = vsel %vm3114_vm8, %v3139_v15, %v3148_v58  ;;  %v2723_v19 = vor.u32 %v2722_v10, %v2719_v0  ;;  %v2738_v10 = vshll.u32 %v10219_v56, 16 }
 0x1bd   : > { %v1317_v63 = vpop.f32.mrb[100].mxu0  ;;  %v3157_v15 = vor.u32 %v3156_v17, %v3153_v44  ;;  %v2731_v38 = vrot.slane %v2729_v43, 3 }
 0x1be   : > { %8677 = vmatmul.mubr.msk.bf16.gmra.mrb[208].mxu1 %vm366_vm2, %v3140_v60  ;;  %v1404_v1 = vadd.f32 %v1317_v63, %v10172_v48  ;;  %v8356_v16 = vpop.f32.mrb[101].mxu0  ;;  %v2724_v30 = vsel %vm2689_vm9, %v2714_v45, %v2723_v19 }
 0x1bf   : > { %8680 = vmatprep.mubr.msk.bf16.mxu1 %vm9607_vm1, %v12652_v21  ;;  %v1320_v55 = vpop.f32.mrb[102].mxu0  ;;  %v3158_v22 = vsel %vm3114_vm8, %v3148_v58, %v3157_v15 }
 0x1c0   : > { %v1405_v3 = vadd.f32 %v1320_v55, %v10181_v9  ;;  %v8357_v36 = vpop.f32.mrb[103].mxu0  ;;  %v10588_v50 = vadd.f32 %v1742_v37, %v1404_v1  ;;  %v2726_v9 = vshrl.u32 %v10199_v28, 16 }
 0x1c1   : > { %v1750_v54 = vpop.f32.mrb[104].mxu1 }
 0x1c2   : > { %v8430_v48 = vpop.f32.mrb[105].mxu1  ;;  %8607 = vmatmul.mubr.msk.bf16.gmra.mrb[208].mxu0 %vm366_vm2, %v2715_v51  ;;  %v10592_v20 = vadd.f32 %v1745_v14, %v1405_v3  ;;  %v3160_v14 = vshrl.u32 %v10206_v41, 16  ;;  %v2728_v46 = vrot.slane %v2726_v9, 2  ;;  %v3165_v51 = vrot.slane %v3163_v52, 4 }
 0x1c3   : > { %v1753_v24 = vpop.f32.mrb[106].mxu1  ;;  %8610 = vmatprep.mubr.msk.bf16.mxu0 %vm9607_vm1, %v12652_v21  ;;  %v3169_v48 = vshrl.u32 %v10226_v11, 16 }
 0x1c4   : > { %v8431_v13 = vpop.f32.mrb[107].mxu1  ;;  %v3162_v55 = vrot.slane %v3160_v14, 3  ;;  %v2732_v45 = vor.u32 %v2731_v38, %v2728_v46 }
 0x1c5   : > { %v1325_v37 = vpop.f32.mrb[104].mxu0  ;;  %v2740_v13 = vrot.slane %v2738_v10, 3  ;;  %v3171_v14 = vrot.slane %v3169_v48, 3 }
 0x1c6   : > { %8681 = vmatmul.mubr.msk.bf16.gmra.mrb[212].mxu1 %vm366_vm2, %v3149_v25  ;;  %v1406_v2 = vadd.f32 %v1325_v37, %v10192_v4  ;;  %v8360_v60 = vpop.f32.mrb[105].mxu0  ;;  %v3166_v58 = vor.u32 %v3165_v51, %v3162_v55  ;;  %v2733_v44 = vsel %vm2689_vm9, %v2723_v19, %v2732_v45 }
 0x1c7   : > { %8684 = vmatprep.mubr.msk.bf16.mxu1 %vm9607_vm1, %v12652_v21  ;;  %v1328_v26 = vpop.f32.mrb[106].mxu0 }
 0x1c8   : > { %v1407_v28 = vadd.f32 %v1328_v26, %v10201_v34  ;;  %v8361_v63 = vpop.f32.mrb[107].mxu0  ;;  %v10606_v16 = vadd.f32 %v1750_v54, %v1406_v2  ;;  %v2735_v34 = vshrl.u32 %v10219_v56, 16  ;;  %v3167_v60 = vsel %vm3114_vm8, %v3157_v15, %v3166_v58 }
 0x1c9   : > { %v1758_v1 = vpop.f32.mrb[108].mxu1  ;;  %v3178_v63 = vshrl.u32 %v10246_v40, 16 }
 0x1ca   : > { %v8434_v4 = vpop.f32.mrb[109].mxu1  ;;  %8611 = vmatmul.mubr.msk.bf16.gmra.mrb[212].mxu0 %vm366_vm2, %v2724_v30  ;;  %v10610_v41 = vadd.f32 %v1753_v24, %v1407_v28  ;;  %v3172_v24 = vshll.u32 %v10226_v11, 16  ;;  %v2737_v17 = vrot.slane %v2735_v34, 2  ;;  %v2747_v30 = vshll.u32 %v10239_v18, 16 }
 0x1cb   : > { %v1761_v8 = vpop.f32.mrb[110].mxu1  ;;  %8614 = vmatprep.mubr.msk.bf16.mxu0 %vm9607_vm1, %v12652_v21 }
 0x1cc   : > { %v8435_v0 = vpop.f32.mrb[111].mxu1  ;;  %v3174_v52 = vrot.slane %v3172_v24, 4  ;;  %v2741_v19 = vor.u32 %v2740_v13, %v2737_v17  ;;  %v2749_v55 = vrot.slane %v2747_v30, 3  ;;  %v12664_v17 = vld [vmem:[#allocation5_spill] sm:$0xff] }
 0x1cd   : > { %v1333_v3 = vpop.f32.mrb[108].mxu0 }
 0x1ce   : > { %8685 = vmatmul.mubr.msk.bf16.gmra.mrb[216].mxu1 %vm366_vm2, %v3158_v22  ;;  %v1408_v36 = vadd.f32 %v1333_v3, %v10212_v49  ;;  %v8364_v54 = vpop.f32.mrb[109].mxu0  ;;  %v3175_v15 = vor.u32 %v3174_v52, %v3171_v14 }
 0x1cf   : > { %8688 = vmatprep.mubr.msk.bf16.mxu1 %vm9607_vm1, %v12652_v21  ;;  %v1336_v25 = vpop.f32.mrb[110].mxu0 }
 0x1d0   : > { %v1409_v56 = vadd.f32 %v1336_v25, %v10221_v57  ;;  %v8365_v9 = vpop.f32.mrb[111].mxu0  ;;  %v10624_v37 = vadd.f32 %v1758_v1, %v1408_v36  ;;  %v2744_v57 = vshrl.u32 %v10239_v18, 16  ;;  %v3181_v1 = vshll.u32 %v10246_v40, 16 }
 0x1d1   : > { %v1766_v43 = vpop.f32.mrb[112].mxu1  ;;  %v3176_v3 = vsel %vm3114_vm8, %v3166_v58, %v3175_v15  ;;  %v3180_v36 = vrot.slane %v3178_v63, 3  ;;  %v12665_v9 = vld [vmem:[#allocation8_spill] sm:$0xff] }
 0x1d2   : > { %v8438_v49 = vpop.f32.mrb[113].mxu1  ;;  %8615 = vmatmul.mubr.msk.bf16.gmra.mrb[216].mxu0 %vm366_vm2, %v2733_v44  ;;  %v10628_v11 = vadd.f32 %v1761_v8, %v1409_v56  ;;  %v2742_v8 = vsel %vm2689_vm9, %v2732_v45, %v2741_v19  ;;  %v2746_v22 = vrot.slane %v2744_v57, 2  ;;  %v3183_v54 = vrot.slane %v3181_v1, 4 }
 0x1d3   : > { %v1769_v2 = vpop.f32.mrb[114].mxu1  ;;  %8618 = vmatprep.mubr.msk.bf16.mxu0 %vm9607_vm1, %v12652_v21  ;;  %v3190_v49 = vshll.u32 %v12665_v9, 16 }
 0x1d4   : > { %v8439_v26 = vpop.f32.mrb[115].mxu1  ;;  %v2750_v45 = vor.u32 %v2749_v55, %v2746_v22  ;;  %v3184_v58 = vor.u32 %v3183_v54, %v3180_v36 }
 0x1d5   : > { %v1341_v46 = vpop.f32.mrb[112].mxu0  ;;  %v12666_v26 = vld [vmem:[#allocation7_spill] sm:$0xff] }
 0x1d6   : > { %8689 = vmatmul.mubr.msk.bf16.gmra.mrb[220].mxu1 %vm366_vm2, %v3167_v60  ;;  %v1410_v38 = vadd.f32 %v1341_v46, %v10232_v7  ;;  %v8368_v28 = vpop.f32.mrb[113].mxu0  ;;  %v2751_v60 = vsel %vm2689_vm9, %v2741_v19, %v2750_v45  ;;  %v3185_v1 = vsel %vm3114_vm8, %v3175_v15, %v3184_v58 }
 0x1d7   : > { %8692 = vmatprep.mubr.msk.bf16.mxu1 %vm9607_vm1, %v12652_v21  ;;  %v1344_v4 = vpop.f32.mrb[114].mxu0 }
 0x1d8   : > { %v1411_v18 = vadd.f32 %v1344_v4, %v10241_v29  ;;  %v8369_v51 = vpop.f32.mrb[115].mxu0  ;;  %v10642_v34 = vadd.f32 %v1766_v43, %v1410_v38  ;;  %v12663_v29 = vld [vmem:[#allocation6_spill] sm:$0xff]  ;;  %v3187_v43 = vshrl.u32 %v12665_v9, 16 }
 0x1d9   : > { %v1774_v0 = vpop.f32.mrb[116].mxu1  ;;  %v2753_v24 = vshrl.u32 %v12663_v29, 16  ;;  %v2756_v25 = vshll.u32 %v12663_v29, 16 }
 0x1da   : > { %v8442_v7 = vpop.f32.mrb[117].mxu1  ;;  %8619 = vmatmul.mubr.msk.bf16.gmra.mrb[220].mxu0 %vm366_vm2, %v2742_v8  ;;  %v10646_v40 = vadd.f32 %v1769_v2, %v1411_v18  ;;  %v3189_v4 = vrot.slane %v3187_v43, 3  ;;  %v3192_v8 = vrot.slane %v3190_v49, 4  ;;  %v12667_v18 = vld [vmem:[#allocation10_spill] sm:$0xff] }
 0x1db   : > { %v1777_v10 = vpop.f32.mrb[118].mxu1  ;;  %8622 = vmatprep.mubr.msk.bf16.mxu0 %vm9607_vm1, %v12652_v21  ;;  %v2755_v14 = vrot.slane %v2753_v24, 2  ;;  %v2758_v52 = vrot.slane %v2756_v25, 3  ;;  %v2762_v51 = vshrl.u32 %v12667_v18, 16 }
 0x1dc   : > { %v8443_v48 = vpop.f32.mrb[119].mxu1  ;;  %v3193_v15 = vor.u32 %v3192_v8, %v3189_v4  ;;  %v12672_v8 = vld [vmem:[#allocation13_spill] sm:$0xff] }
 0x1dd   : > { %v1349_v44 = vpop.f32.mrb[116].mxu0  ;;  %v2759_v19 = vor.u32 %v2758_v52, %v2755_v14 }
 0x1de   : > { %8693 = vmatmul.mubr.msk.bf16.gmra.mrb[224].mxu1 %vm366_vm2, %v3176_v3  ;;  %v1412_v13 = vadd.f32 %v1349_v44, %v12664_v17  ;;  %v8372_v56 = vpop.f32.mrb[117].mxu0  ;;  %v12668_v3 = vld [vmem:[#allocation9_spill] sm:$0xff]  ;;  %v2764_v44 = vrot.slane %v2762_v51, 2  ;;  %v3194_v14 = vsel %vm3114_vm8, %v3184_v58, %v3193_v15 }
 0x1df   : > { %8696 = vmatprep.mubr.msk.bf16.mxu1 %vm9607_vm1, %v12652_v21  ;;  %v1352_v2 = vpop.f32.mrb[118].mxu0  ;;  %v2760_v25 = vsel %vm2689_vm9, %v2750_v45, %v2759_v19 }
 0x1e0   : > { %v1413_v57 = vadd.f32 %v1352_v2, %v12666_v26  ;;  %v8373_v30 = vpop.f32.mrb[119].mxu0  ;;  %v10660_v38 = vadd.f32 %v1774_v0, %v1412_v13  ;;  %v2765_v0 = vshll.u32 %v12667_v18, 16  ;;  %v12670_v13 = vld [vmem:[#allocation11_spill] sm:$0xff] }
 0x1e1   : > { %v1782_v46 = vpop.f32.mrb[120].mxu1 }
 0x1e2   : > { %v8446_v28 = vpop.f32.mrb[121].mxu1  ;;  %8623 = vmatmul.mubr.msk.bf16.gmra.mrb[224].mxu0 %vm366_vm2, %v2751_v60  ;;  %v10664_v22 = vadd.f32 %v1777_v10, %v1413_v57  ;;  %v12669_v10 = vld [vmem:[#allocation12_spill] sm:$0xff]  ;;  %v2767_v17 = vrot.slane %v2765_v0, 3 }
 0x1e3   : > { %v1785_v63 = vpop.f32.mrb[122].mxu1  ;;  %8626 = vmatprep.mubr.msk.bf16.mxu0 %vm9607_vm1, %v12652_v21  ;;  %v3196_v48 = vshrl.u32 %v12669_v10, 16  ;;  %v3199_v29 = vshll.u32 %v12669_v10, 16  ;;  %v12671_v28 = vld [vmem:[#allocation14_spill] sm:$0xff]  ;;  %v12674_v10 = vld [vmem:[#allocation15_spill] sm:$0xff] }
 0x1e4   : > { %v8447_v55 = vpop.f32.mrb[123].mxu1  ;;  %v2768_v45 = vor.u32 %v2767_v17, %v2764_v44 }
 0x1e5   : > { %v1357_v7 = vpop.f32.mrb[120].mxu0  ;;  %v3198_v52 = vrot.slane %v3196_v48, 3  ;;  %v3201_v26 = vrot.slane %v3199_v29, 4 }
 0x1e6   : > { %8697 = vmatmul.mubr.msk.bf16.gmra.mrb[228].mxu1 %vm366_vm2, %v3185_v1  ;;  %v1414_v36 = vadd.f32 %v1357_v7, %v12668_v3  ;;  %v8376_v54 = vpop.f32.mrb[121].mxu0  ;;  %v2771_v1 = vshrl.u32 %v12671_v28, 16  ;;  %v2769_v3 = vsel %vm2689_vm9, %v2759_v19, %v2768_v45 }
 0x1e7   : > { %8700 = vmatprep.mubr.msk.bf16.mxu1 %vm9607_vm1, %v12652_v21  ;;  %v1360_v24 = vpop.f32.mrb[122].mxu0  ;;  %v3202_v58 = vor.u32 %v3201_v26, %v3198_v52  ;;  %v12675_v52 = vld [vmem:[#allocation18_spill] sm:$0xff] }
 0x1e8   : > { %v1415_v56 = vadd.f32 %v1360_v24, %v12670_v13  ;;  %v8377_v9 = vpop.f32.mrb[123].mxu0  ;;  %v10678_v49 = vadd.f32 %v1782_v46, %v1414_v36  ;;  %v2774_v46 = vshll.u32 %v12671_v28, 16  ;;  %v2773_v36 = vrot.slane %v2771_v1, 2  ;;  %v12676_v28 = vld [vmem:[#allocation17_spill] sm:$0xff] }
 0x1e9   : > { %v1790_v43 = vpop.f32.mrb[124].mxu1  ;;  %v3203_v13 = vsel %vm3114_vm8, %v3193_v15, %v3202_v58  ;;  %v2780_v26 = vshrl.u32 %v12675_v52, 16 }
 0x1ea   : > { %v8450_v2 = vpop.f32.mrb[125].mxu1  ;;  %8627 = vmatmul.mubr.msk.bf16.gmra.mrb[228].mxu0 %vm366_vm2, %v2760_v25  ;;  %v10682_v57 = vadd.f32 %v1785_v63, %v1415_v56  ;;  %v12673_v63 = vld [vmem:[#allocation16_spill] sm:$0xff]  ;;  %v2776_v54 = vrot.slane %v2774_v46, 3 }
 0x1eb   : > { %v1793_v60 = vpop.f32.mrb[126].mxu1  ;;  %8630 = vmatprep.mubr.msk.bf16.mxu0 %vm9607_vm1, %v12652_v21  ;;  %v3205_v51 = vshrl.u32 %v12673_v63, 16  ;;  %v3208_v0 = vshll.u32 %v12673_v63, 16  ;;  %v2782_v63 = vrot.slane %v2780_v26, 2 }
 0x1ec   : > { %v8451_v30 = vpop.f32.mrb[127].mxu1  ;;  %v2777_v19 = vor.u32 %v2776_v54, %v2773_v36 }
 0x1ed   : > { %v1365_v4 = vpop.f32.mrb[124].mxu0  ;;  %v3207_v56 = vrot.slane %v3205_v51, 3  ;;  %v3210_v9 = vrot.slane %v3208_v0, 4  ;;  %v12678_v0 = vld [vmem:[#allocation19_spill] sm:$0xff] }
 0x1ee   : > { %8701 = vmatmul.mubr.msk.bf16.gmra.mrb[232].mxu1 %vm366_vm2, %v3194_v14  ;;  %v1416_v55 = vadd.f32 %v1365_v4, %v12672_v8  ;;  %v8380_v18 = vpop.f32.mrb[125].mxu0 }
 0x1ef   : > { %8704 = vmatprep.mubr.msk.bf16.mxu1 %vm9607_vm1, %v12652_v21  ;;  %v1368_v7 = vpop.f32.mrb[126].mxu0  ;;  %v3211_v15 = vor.u32 %v3210_v9, %v3207_v56  ;;  %v2778_v18 = vsel %vm2689_vm9, %v2768_v45, %v2777_v19 }
 0x1f0   : > { %v1417_v48 = vadd.f32 %v1368_v7, %v12674_v10  ;;  %v8381_v29 = vpop.f32.mrb[127].mxu0  ;;  %v10696_v25 = vadd.f32 %v1790_v43, %v1416_v55  ;;  %v2783_v43 = vshll.u32 %v12675_v52, 16 }
 0x1f1   : > { %v1798_v24 = vpop.f32.mrb[128].mxu1  ;;  %v3212_v29 = vsel %vm3114_vm8, %v3202_v58, %v3211_v15 }
 0x1f2   : > { %v8454_v44 = vpop.f32.mrb[129].mxu1  ;;  %8631 = vmatmul.mubr.msk.bf16.gmra.mrb[232].mxu0 %vm366_vm2, %v2769_v3  ;;  %v10700_v2 = vadd.f32 %v1793_v60, %v1417_v48  ;;  %v12677_v60 = vld [vmem:[#allocation20_spill] sm:$0xff]  ;;  %v2785_v51 = vrot.slane %v2783_v43, 3  ;;  %v12680_v43 = vld [vmem:[#allocation21_spill] sm:$0xff] }
 0x1f3   : > { %v1801_v17 = vpop.f32.mrb[130].mxu1  ;;  %8634 = vmatprep.mubr.msk.bf16.mxu0 %vm9607_vm1, %v12652_v21  ;;  %v3214_v4 = vshrl.u32 %v12677_v60, 16  ;;  %v3217_v8 = vshll.u32 %v12677_v60, 16 }
 0x1f4   : > { %v8455_v14 = vpop.f32.mrb[131].mxu1  ;;  %v2786_v45 = vor.u32 %v2785_v51, %v2782_v63 }
 0x1f5   : > { %v1373_v30 = vpop.f32.mrb[128].mxu0  ;;  %v3216_v44 = vrot.slane %v3214_v4, 3  ;;  %v12679_v14 = vld [vmem:[#allocation22_spill] sm:$0xff] }
 0x1f6   : > { %8705 = vmatmul.mubr.msk.bf16.gmra.mrb[236].mxu1 %vm366_vm2, %v3203_v13  ;;  %v1418_v1 = vadd.f32 %v1373_v30, %v12676_v28  ;;  %v8384_v46 = vpop.f32.mrb[129].mxu0  ;;  %v3219_v13 = vrot.slane %v3217_v8, 4  ;;  %v2789_v52 = vshrl.u32 %v12679_v14, 16  ;;  %v2787_v4 = vsel %vm2689_vm9, %v2777_v19, %v2786_v45 }
 0x1f7   : > { %8708 = vmatprep.mubr.msk.bf16.mxu1 %vm9607_vm1, %v12652_v21  ;;  %v1376_v55 = vpop.f32.mrb[130].mxu0 }
 0x1f8   : > { %v1419_v7 = vadd.f32 %v1376_v55, %v12678_v0  ;;  %v8385_v3 = vpop.f32.mrb[131].mxu0  ;;  %v10714_v54 = vadd.f32 %v1798_v24, %v1418_v1  ;;  %v2792_v24 = vshll.u32 %v12679_v14, 16  ;;  %v3220_v58 = vor.u32 %v3219_v13, %v3216_v44 }
 0x1f9   : > { %v1806_v36 = vpop.f32.mrb[132].mxu1  ;;  %v2791_v8 = vrot.slane %v2789_v52, 2  ;;  %v12683_v52 = vld [vmem:[#allocation25_spill] sm:$0xff] }
 0x1fa   : > { %v8458_v10 = vpop.f32.mrb[133].mxu1  ;;  %8635 = vmatmul.mubr.msk.bf16.gmra.mrb[236].mxu0 %vm366_vm2, %v2778_v18  ;;  %v10718_v56 = vadd.f32 %v1801_v17, %v1419_v7  ;;  %v12681_v17 = vld [vmem:[#allocation24_spill] sm:$0xff]  ;;  %v2794_v55 = vrot.slane %v2792_v24, 3  ;;  %v12682_v18 = vld [vmem:[#allocation23_spill] sm:$0xff]  ;;  %v2798_v24 = vshrl.u32 %v12683_v52, 16 }
 0x1fb   : > { %v1809_v48 = vpop.f32.mrb[134].mxu1  ;;  %8638 = vmatprep.mubr.msk.bf16.mxu0 %vm9607_vm1, %v12652_v21  ;;  %v3223_v1 = vshrl.u32 %v12681_v17, 16  ;;  %v3226_v46 = vshll.u32 %v12681_v17, 16 }
 0x1fc   : > { %v8459_v9 = vpop.f32.mrb[135].mxu1  ;;  %v2795_v19 = vor.u32 %v2794_v55, %v2791_v8  ;;  %v12686_v55 = vld [vmem:[#allocation28_spill] sm:$0xff] }
 0x1fd   : > { %v1381_v26 = vpop.f32.mrb[132].mxu0  ;;  %v3225_v44 = vrot.slane %v3223_v1, 3  ;;  %v3228_v13 = vrot.slane %v3226_v46, 4 }
 0x1fe   : > { %8709 = vmatmul.mubr.msk.bf16.gmra.mrb[240].mxu1 %vm366_vm2, %v3212_v29  ;;  %v1420_v30 = vadd.f32 %v1381_v26, %v12680_v43  ;;  %v8388_v28 = vpop.f32.mrb[133].mxu0  ;;  %v3221_v29 = vsel %vm3114_vm8, %v3211_v15, %v3220_v58  ;;  %v12684_v43 = vld [vmem:[#allocation26_spill] sm:$0xff] }
 0x1ff   : > { %8712 = vmatprep.mubr.msk.bf16.mxu1 %vm9607_vm1, %v12652_v21  ;;  %v1384_v60 = vpop.f32.mrb[134].mxu0  ;;  %v3229_v15 = vor.u32 %v3228_v13, %v3225_v44 }
 0x200   : > { %v1421_v63 = vadd.f32 %v1384_v60, %v12682_v18  ;;  %v8389_v51 = vpop.f32.mrb[135].mxu0  ;;  %v10732_v7 = vadd.f32 %v1806_v36, %v1420_v30  ;;  %v2801_v36 = vshll.u32 %v12683_v52, 16  ;;  %v2796_v60 = vsel %vm2689_vm9, %v2786_v45, %v2795_v19 }
 0x201   : > { %v2514_v0 = vpop.f32.mrb[136].mxu1  ;;  %v3230_v44 = vsel %vm3114_vm8, %v3220_v58, %v3229_v15 }
 0x202   : > { %v8534_v3 = vpop.f32.mrb[137].mxu1  ;;  %8639 = vmatmul.mubr.msk.bf16.gmra.mrb[240].mxu0 %vm366_vm2, %v2787_v4  ;;  %v10736_v9 = vadd.f32 %v1809_v48, %v1421_v63  ;;  %v12685_v48 = vld [vmem:[#allocation27_spill] sm:$0xff]  ;;  %v2800_v4 = vrot.slane %v2798_v24, 2  ;;  %v2803_v8 = vrot.slane %v2801_v36, 3  ;;  %v12687_v24 = vld [vmem:[#allocation29_spill] sm:$0xff] }
 0x203   : > { %v2517_v10 = vpop.f32.mrb[138].mxu1  ;;  %8642 = vmatprep.mubr.msk.bf16.mxu0 %vm9607_vm1, %v12652_v21  ;;  %v3232_v17 = vshrl.u32 %v12685_v48, 16  ;;  %v3235_v1 = vshll.u32 %v12685_v48, 16  ;;  %v2807_v36 = vshrl.u32 %v12687_v24, 16 }
 0x204   : > { %v8535_v14 = vpop.f32.mrb[139].mxu1  ;;  %v2804_v45 = vor.u32 %v2803_v8, %v2800_v4  ;;  %v12689_v4 = vld [vmem:[#allocation31_spill] sm:$0xff] }
 0x205   : > { %v2096_v26 = vpop.f32.mrb[136].mxu0  ;;  %v3234_v13 = vrot.slane %v3232_v17, 3  ;;  %v3237_v52 = vrot.slane %v3235_v1, 4  ;;  %v2809_v1 = vrot.slane %v2807_v36, 2  ;;  %v12690_v36 = vld [vmem:[#allocation32_spill] sm:$0xff] }
 0x206   : > { %8713 = vmatmul.mubr.msk.bf16.gmra.mrb[244].mxu1 %vm366_vm2, %v3221_v29  ;;  %v2231_v30 = vadd.f32 %v2096_v26, %v12684_v43  ;;  %v8464_v28 = vpop.f32.mrb[137].mxu0  ;;  %v2805_v17 = vsel %vm2689_vm9, %v2795_v19, %v2804_v45 }
 0x207   : > { %8716 = vmatprep.mubr.msk.bf16.mxu1 %vm9607_vm1, %v12652_v21  ;;  %v2099_v46 = vpop.f32.mrb[138].mxu0  ;;  %v12688_v28 = vld [vmem:[#allocation30_spill] sm:$0xff]  ;;  %v3238_v58 = vor.u32 %v3237_v52, %v3234_v13 }
 0x208   : > { %v2232_v18 = vadd.f32 %v2099_v46, %v12686_v55  ;;  %v8465_v63 = vpop.f32.mrb[139].mxu0  ;;  %v10750_v3 = vadd.f32 %v2514_v0, %v2231_v30  ;;  %v2810_v0 = vshll.u32 %v12687_v24, 16 }
 0x209   : > { %v2522_v51 = vpop.f32.mrb[140].mxu1 }
 0x20a   : > { %v8538_v29 = vpop.f32.mrb[141].mxu1  ;;  %8643 = vmatmul.mubr.msk.bf16.gmra.mrb[244].mxu0 %vm366_vm2, %v2796_v60  ;;  %v10754_v26 = vadd.f32 %v2517_v10, %v2232_v18  ;;  %v2812_v60 = vrot.slane %v2810_v0, 3 }
 0x20b   : > { %v2525_v14 = vpop.f32.mrb[142].mxu1  ;;  %8646 = vmatprep.mubr.msk.bf16.mxu0 %vm9607_vm1, %v12652_v21 }
 0x20c   : > { %v8539_v43 = vpop.f32.mrb[143].mxu1  ;;  %v2813_v19 = vor.u32 %v2812_v60, %v2809_v1  ;;  %v3248_v1 = vsel %vm3114_vm8, %v3238_v58, %v10488_v31 }
 0x20d   : > { %v2104_v30 = vpop.f32.mrb[140].mxu0  ;;  %v3239_v43 = vsel %vm3114_vm8, %v3229_v15, %v3238_v58  ;;  %v12691_v15 = vld [vmem:[#allocation33_spill] sm:$0xff] }
 0x20e   : > { %8717 = vmatmul.mubr.msk.bf16.gmra.mrb[248].mxu1 %vm366_vm2, %v3230_v44  ;;  %v2233_v48 = vadd.f32 %v2104_v30, %v12688_v28  ;;  %v8468_v46 = vpop.f32.mrb[141].mxu0  ;;  %v2814_v28 = vsel %vm2689_vm9, %v2804_v45, %v2813_v19  ;;  %v2823_v31 = vsel %vm2689_vm9, %v2813_v19, %v10490_v59 }
 0x20f   : > { %8720 = vmatprep.mubr.msk.bf16.mxu1 %vm9607_vm1, %v12652_v21  ;;  %v2107_v10 = vpop.f32.mrb[142].mxu0 }
 0x210   : > { %v2234_v8 = vadd.f32 %v2107_v10, %v12689_v4  ;;  %v8469_v55 = vpop.f32.mrb[143].mxu0  ;;  %v10766_v63 = vadd.f32 %v2522_v51, %v2233_v48 }
 0x211   : > { %v2530_v18 = vpop.f32.mrb[144].mxu1  ;;  %v12692_v55 = vld [vmem:[#allocation34_spill] sm:$0xff] }
 0x212   : > { %v8542_v29 = vpop.f32.mrb[145].mxu1  ;;  %8647 = vmatmul.mubr.msk.bf16.gmra.mrb[248].mxu0 %vm366_vm2, %v2805_v17  ;;  %v10770_v24 = vadd.f32 %v2525_v14, %v2234_v8 }
 0x213   : > { %v2533_v44 = vpop.f32.mrb[146].mxu1  ;;  %8650 = vmatprep.mubr.msk.bf16.mxu0 %vm9607_vm1, %v12652_v21 }
 0x214   : > { %v8543_v13 = vpop.f32.mrb[147].mxu1 }
 0x215   : > { %v2112_v52 = vpop.f32.mrb[144].mxu0 }
 0x216   : > { %8721 = vmatmul.mubr.msk.bf16.gmra.mrb[252].mxu1 %vm366_vm2, %v3239_v43  ;;  %v2235_v0 = vadd.f32 %v2112_v52, %v12690_v36  ;;  %v8472_v51 = vpop.f32.mrb[145].mxu0  ;;  %v12693_v43 = vld [vmem:[#allocation35_spill] sm:$0xff] }
 0x217   : > { %8724 = vmatprep.mubr.msk.bf16.mxu1 %vm9607_vm1, %v12652_v21  ;;  %v2115_v30 = vpop.f32.mrb[146].mxu0  ;;  %v9436_v51 = vld [vmem:[%s9703_s7 + $0x250] ss:$0 sps:$4 sm:$0xff]  }
 0x218   : > { %v2236_v14 = vadd.f32 %v2115_v30, %v12691_v15  ;;  %v8473_v48 = vpop.f32.mrb[147].mxu0  ;;  %v10780_v10 = vadd.f32 %v2530_v18, %v2235_v0  ;;  %v3268_v19 = vshrl.u32 %v9436_v51, 16 }
 0x219   : > { %v2538_v46 = vpop.f32.mrb[148].mxu1 }
 0x21a   : > { %v8546_v17 = vpop.f32.mrb[149].mxu1  ;;  %8651 = vmatmul.mubr.msk.bf16.gmra.mrb[252].mxu0 %vm366_vm2, %v2814_v28  ;;  %v10785_v4 = vadd.f32 %v2533_v44, %v2236_v14 }
 0x21b   : > { %v2541_v60 = vpop.f32.mrb[150].mxu1  ;;  %8654 = vmatprep.mubr.msk.bf16.mxu0 %vm9607_vm1, %v12652_v21  ;;  %v4055_v17 = vld [vmem:[%s9703_s7 + $0xa0] sm:$0xe] }
 0x21c   : > { %v8547_v8 = vpop.f32.mrb[151].mxu1 }
 0x21d   : > { %v2120_v45 = vpop.f32.mrb[148].mxu0  ;;  %v9437_v8 = vld [vmem:[%s9703_s7 + $0x1b8] ss:$0 sps:$4 sm:$0x77]  }
 0x21e   : > { %8725 = vmatmul.mubr.msk.bf16.gmra.mrb[0].mxu1 %vm366_vm2, %v3248_v1  ;;  %v2237_v18 = vadd.f32 %v2120_v45, %v12692_v55  ;;  %v8476_v29 = vpop.f32.mrb[149].mxu0  ;;  %v4056_v1 = vld [vmem:[%s9703_s7 + $0xa4] sm:$0xf] }
 0x21f   : > { %8728 = vmatprep.mubr.msk.bf16.mxu1 %vm9607_vm1, %v12652_v21  ;;  %v2123_v58 = vpop.f32.mrb[150].mxu0 }
 0x220   : > { %v2238_v44 = vadd.f32 %v2123_v58, %v12693_v43  ;;  %v8477_v13 = vpop.f32.mrb[151].mxu0  ;;  %v10796_v36 = vadd.f32 %v2538_v46, %v2237_v18  ;;  %v3271_v46 = vshll.u32 %v9436_v51, 16  ;;  %v3270_v58 = vrot.slane %v3268_v19, 3 }
 0x221   : > { %v2546_v52 = vpop.f32.mrb[152].mxu1  ;;  %v2846_v51 = vshll.u32 %v9437_v8, 16 }
 0x222   : > { %v8550_v0 = vpop.f32.mrb[153].mxu1  ;;  %8655 = vmatmul.mubr.msk.bf16.gmra.mrb[0].mxu0 %vm366_vm2, %v2823_v31  ;;  %v10800_v28 = vadd.f32 %v2541_v60, %v2238_v44  ;;  %v3273_v43 = vrot.slane %v3271_v46, 4  ;;  %v9439_v44 = vld [vmem:[%s9703_s7 + $0xa8] sm:$0xff]  }
 0x223   : > { %v2549_v30 = vpop.f32.mrb[154].mxu1  ;;  %8658 = vmatprep.mubr.msk.bf16.mxu0 %vm9607_vm1, %v12652_v21  ;;  %v4189_v46 = vshrl.u32 %v9439_v44, 16 }
 0x224   : > { %v8551_v15 = vpop.f32.mrb[155].mxu1 }
 0x225   : > { %v2128_v59 = vpop.f32.mrb[152].mxu0  ;;  %v3533_v15 = vld [vmem:[%s9703_s7 + $0x8] sm:$0xf] }
 0x226   : > { %8729 = vmatmul.mubr.msk.bf16.gmra.mrb[4].mxu1 %vm366_vm2, %v10499_v6  ;;  %v2239_v14 = vadd.f32 %v2128_v59, %v10462_v35  ;;  %v8480_v48 = vpop.f32.mrb[153].mxu0  ;;  %v7520_v35 = vcombine.low %v4055_v17, %v4056_v1  ;;  %v4192_v17 = vshll.u32 %v9439_v44, 16  ;;  %v4191_v44 = vrot.slane %v4189_v46, 1 }
 0x227   : > { %8732 = vmatprep.mubr.msk.bf16.mxu1 %vm9607_vm1, %v12652_v21  ;;  %v2131_v60 = vpop.f32.mrb[154].mxu0 }
 0x228   : > { %v2240_v45 = vadd.f32 %v2131_v60, %v10469_v12  ;;  %v8481_v55 = vpop.f32.mrb[155].mxu0  ;;  %v10813_v6 = vadd.f32 %v2546_v52, %v2239_v14  ;;  %v2843_v12 = vshrl.u32 %v9437_v8, 16  ;;  %v3534_v52 = vld [vmem:[%s9703_s7 + $0xc] sm:$0xf]  ;;  %v4181_v14 = vshrl.u32 %v7520_v35, 16 }
 0x229   : > { %v2554_v18 = vpop.f32.mrb[156].mxu1  ;;  %v2848_v8 = vrot.slane %v2846_v51, 3  ;;  %v9442_v51 = vld [vmem:[%s9703_s7 + $0xb0] sm:$0xff]  }
 0x22a   : > { %v8554_v29 = vpop.f32.mrb[157].mxu1  ;;  %8659 = vmatmul.mubr.msk.bf16.gmra.mrb[4].mxu0 %vm366_vm2, %v10504_v47  ;;  %v10818_v13 = vadd.f32 %v2549_v30, %v2240_v45  ;;  %v4184_v47 = vshll.u32 %v7520_v35, 16  ;;  %v3274_v30 = vor.u32 %v3273_v43, %v3270_v58  ;;  %v2845_v60 = vrot.slane %v2843_v12, 2 }
 0x22b   : > { %v2557_v31 = vpop.f32.mrb[158].mxu1  ;;  %8662 = vmatprep.mubr.msk.bf16.mxu0 %vm9607_vm1, %v12652_v21  ;;  %v7484_v45 = vcombine.low %v3533_v15, %v3534_v52  ;;  %v4194_v12 = vrot.slane %v4192_v17, 2  ;;  %v10842_v52 = vld [vmem:[%s9703_s7 + $0x10] sm:$0xff]  }
 0x22c   : > { %v8555_v0 = vpop.f32.mrb[159].mxu1  ;;  %v3275_v43 = vsel %vm3114_vm8, %v10520_v32, %v3274_v30  ;;  %v4201_v30 = vshll.u32 %v9442_v51, 16 }
 0x22d   : > { %v2136_v59 = vpop.f32.mrb[156].mxu0  ;;  %v4183_v0 = vrot.slane %v4181_v14, 1  ;;  %v3661_v14 = vshll.u32 %v7484_v45, 16 }
 0x22e   : > { %8733 = vmatmul.mubr.msk.bf16.gmra.mrb[8].mxu1 %vm366_vm2, %v10538_v61  ;;  %v2241_v19 = vadd.f32 %v2136_v59, %v10506_v42  ;;  %v8484_v48 = vpop.f32.mrb[157].mxu0  ;;  %v4186_v59 = vrot.slane %v4184_v47, 2 }
 0x22f   : > { %8736 = vmatprep.mubr.msk.bf16.mxu1 %vm9607_vm1, %v12652_v21  ;;  %v2139_v1 = vpop.f32.mrb[158].mxu0  ;;  %v4198_v48 = vshrl.u32 %v9442_v51, 16 }
 0x230   : > { %v2242_v55 = vadd.f32 %v2139_v1, %v10514_v53  ;;  %v8485_v29 = vpop.f32.mrb[159].mxu0  ;;  %v10830_v35 = vadd.f32 %v2554_v18, %v2241_v19  ;;  %v2849_v18 = vor.u32 %v2848_v8, %v2845_v60  ;;  %v3659_v1 = vshrl.u32 %v7484_v45, 16 }
 0x231   : > { %v2562_v61 = vpop.f32.mrb[160].mxu1  ;;  %v3663_v60 = vrot.slane %v3661_v14, 1  ;;  %v3666_v8 = vshll.u32 %v10842_v52, 16  ;;  %v4200_v45 = vrot.slane %v4198_v48, 1  ;;  %v10866_v14 = vld [vmem:[%s9703_s7 + $0x18] sm:$0xff]  }
 0x232   : > { %v8558_v42 = vpop.f32.mrb[161].mxu1  ;;  %8663 = vmatmul.mubr.msk.bf16.gmra.mrb[8].mxu0 %vm366_vm2, %v10543_v33  ;;  %v10837_v15 = vadd.f32 %v2557_v31, %v2242_v55  ;;  %v4187_v33 = vor.u32 %v4186_v59, %v4183_v0  ;;  %v4195_v31 = vor.u32 %v4194_v12, %v4191_v44  ;;  %v2850_v17 = vsel %vm2689_vm9, %v10522_v5, %v2849_v18  ;;  %v9444_v12 = vld [vmem:[%s9703_s7 + $0xb8] sm:$0xff]  }
 0x233   : > { %v2565_v58 = vpop.f32.mrb[162].mxu1  ;;  %8666 = vmatprep.mubr.msk.bf16.mxu0 %vm9607_vm1, %v12652_v21  ;;  %v7574_v42 = vld [vmem:[%s12532_s1 + $0x16] sm:$0x3]  ;;  %v4203_v44 = vrot.slane %v4201_v30, 2  ;;  %v3668_v18 = vrot.slane %v3666_v8, 1  ;;  %v4207_v48 = vshrl.u32 %v9444_v12, 16 }
 0x234   : > { %v8559_v53 = vpop.f32.mrb[163].mxu1  ;;  %v4196_v5 = vsel %vm1428_vm4, %v4187_v33, %v4195_v31  ;;  %v7555_v33 = vld [vmem:[%s12532_s1 + $0x14] sm:$0x3]  ;;  %v4210_v30 = vshll.u32 %v9444_v12, 16  ;;  %v9446_v12 = vld [vmem:[%s9703_s7 + $0xc0] sm:$0xff]  }
 0x235   : > { %v2144_v47 = vpop.f32.mrb[160].mxu0  ;;  %v3664_v53 = vor.u32 %v3663_v60, %v3659_v1  ;;  %v3670_v1 = vshrl.u32 %v10842_v52, 16  ;;  %v3674_v60 = vshll.u32 %v10866_v14, 16  ;;  %v4209_v52 = vrot.slane %v4207_v48, 1 }
 0x236   : > { %8737 = vmatmul.mubr.msk.bf16.gmra.mrb[12].mxu1 %vm366_vm2, %v3275_v43  ;;  %v2243_v19 = vadd.f32 %v2144_v47, %v10545_v62  ;;  %v8488_v32 = vpop.f32.mrb[161].mxu0 }
 0x237   : > { %8812 = vmatprep.mubr.msk.bf16.mxu1 %vm9607_vm1, %v12652_v21  ;;  %v2147_v46 = vpop.f32.mrb[162].mxu0  ;;  %v4204_v32 = vor.u32 %v4203_v44, %v4200_v45  ;;  %v4212_v44 = vrot.slane %v4210_v30, 2  ;;  %v3678_v30 = vshrl.u32 %v10866_v14, 16 }
 0x238   : > { %v2244_v55 = vadd.f32 %v2147_v46, %v10549_v39  ;;  %v8489_v29 = vpop.f32.mrb[163].mxu0  ;;  %v10855_v0 = vadd.f32 %v2562_v61, %v2243_v19  ;;  %v4989_v61 = vsel %vm418_vm0, %v7574_v42, 0 }
 0x239   : > { %v2570_v62 = vpop.f32.mrb[164].mxu1  ;;  %v4205_v45 = vsel %vm1428_vm4, %v4195_v31, %v4204_v32 }
 0x23a   : > { %v8562_v59 = vpop.f32.mrb[165].mxu1  ;;  %8667 = vmatmul.mubr.msk.bf16.gmra.mrb[12].mxu0 %vm366_vm2, %v2850_v17  ;;  %v10860_v51 = vadd.f32 %v2565_v58, %v2244_v55  ;;  %v3669_v17 = vsel %vm1024_vm5, %v3664_v53, %v3668_v18  ;;  %v4691_v55 = vsel %vm418_vm0, %v7555_v33, 0  ;;  %v3672_v53 = vor.u32 %v3670_v1, %v3668_v18 }
 0x23b   : > { %v2573_v43 = vpop.f32.mrb[166].mxu1  ;;  %8742 = vmatprep.mubr.msk.bf16.mxu0 %vm9607_vm1, %v12652_v21 }
 0x23c   : > { %v8563_v39 = vpop.f32.mrb[167].mxu1 }
 0x23d   : > { %v2152_v47 = vpop.f32.mrb[164].mxu0 }
 0x23e   : > { %8813 = vmatmul.mubr.msk.bf16.vlgmr.msra.gmra.mrb[16].mxu1 %vm366_vm2, %v4196_v5  ;;  %v2245_v58 = vadd.f32 %v2152_v47, %v10569_v27  ;;  %v8492_v19 = vpop.f32.mrb[165].mxu0 }
 0x23f   : > { %8951 = vmatpush3.bf16.msra.mxu1 %v4989_v61  ;;  %8816 = vmatprep.mubr.msk.bf16.mxu1 %vm9607_vm1, %v12652_v21  ;;  %v2155_v46 = vpop.f32.mrb[166].mxu0  ;;  %v3676_v61 = vrot.slane %v3674_v60, 1  ;;  %v4219_v19 = vshll.u32 %v9446_v12, 16 }
 0x240   : > { %9090 = vmatprep.subr.bf16.mxu1 %v12652_v21  ;;  %v2246_v27 = vadd.f32 %v2155_v46, %v10573_v23  ;;  %v8493_v8 = vpop.f32.mrb[167].mxu0  ;;  %v10881_v42 = vadd.f32 %v2570_v62, %v2245_v58  ;;  %v10891_v62 = vld [vmem:[%s9703_s7 + $0x20] sm:$0xff]   ;;  %v4216_v58 = vshrl.u32 %v9446_v12, 16 }
 0x241   : > { %v2578_v29 = vpop.f32.mrb[168].mxu1  ;;  %v3677_v18 = vsel %vm1024_vm5, %v3672_v53, %v3676_v61  ;;  %v3682_v46 = vshll.u32 %v10891_v62, 16 }
 0x242   : > { %v8566_v59 = vpop.f32.mrb[169].mxu1  ;;  %8743 = vmatmul.mubr.msk.bf16.vlgmr.msra.gmra.mrb[16].mxu0 %vm366_vm2, %v3669_v17  ;;  %v10886_v39 = vadd.f32 %v2573_v43, %v2246_v27  ;;  %v4213_v43 = vor.u32 %v4212_v44, %v4209_v52  ;;  %v10907_v52 = vld [vmem:[%s9703_s7 + $0xc8] sm:$0xff]  }
 0x243   : > { %v2581_v5 = vpop.f32.mrb[170].mxu1  ;;  %8881 = vmatpush3.bf16.msra.mxu0 %v4691_v55  ;;  %8746 = vmatprep.mubr.msk.bf16.mxu0 %vm9607_vm1, %v12652_v21  ;;  %v4218_v59 = vrot.slane %v4216_v58, 1  ;;  %v3684_v12 = vrot.slane %v3682_v46, 1  ;;  %v3686_v58 = vshrl.u32 %v10891_v62, 16 }
 0x244   : > { %v8567_v23 = vpop.f32.mrb[171].mxu1  ;;  %9020 = vmatprep.subr.bf16.mxu0 %v12652_v21  ;;  %v4214_v55 = vsel %vm1428_vm4, %v4204_v32, %v4213_v43 }
 0x245   : > { %v2160_v47 = vpop.f32.mrb[168].mxu0 }
 0x246   : > { %8817 = vmatmul.mubr.msk.bf16.gmra.mrb[20].mxu1 %vm366_vm2, %v4205_v45  ;;  %v2247_v31 = vadd.f32 %v2160_v47, %v10588_v50  ;;  %v8496_v33 = vpop.f32.mrb[169].mxu0  ;;  %v4221_v45 = vrot.slane %v4219_v19, 2 }
 0x247   : > { %8820 = vmatprep.mubr.msk.bf16.mxu1 %vm9607_vm1, %v12652_v21  ;;  %v2163_v48 = vpop.f32.mrb[170].mxu0 }
 0x248   : > { %v2248_v17 = vadd.f32 %v2163_v48, %v10592_v20  ;;  %v8497_v1 = vpop.f32.mrb[171].mxu0  ;;  %v10902_v60 = vadd.f32 %v2578_v29, %v2247_v31  ;;  %v3680_v20 = vor.u32 %v3678_v30, %v3676_v61  ;;  %v10914_v29 = vld [vmem:[%s9703_s7 + $0x28] sm:$0xff]   ;;  %v4222_v47 = vor.u32 %v4221_v45, %v4218_v59  ;;  %v10931_v59 = vld [vmem:[%s9703_s7 + $0xd0] sm:$0xff]  }
 0x249   : > { %v2586_v50 = vpop.f32.mrb[172].mxu1  ;;  %v4228_v31 = vshll.u32 %v10907_v52, 16  ;;  %v3690_v19 = vshll.u32 %v10914_v29, 16 }
 0x24a   : > { %v8570_v27 = vpop.f32.mrb[173].mxu1  ;;  %8747 = vmatmul.mubr.msk.bf16.gmra.mrb[20].mxu0 %vm366_vm2, %v3677_v18  ;;  %v10909_v14 = vadd.f32 %v2581_v5, %v2248_v17  ;;  %v4225_v5 = vshrl.u32 %v10907_v52, 16  ;;  %v3685_v61 = vsel %vm1024_vm5, %v3680_v20, %v3684_v12  ;;  %v4223_v1 = vsel %vm1428_vm4, %v4213_v43, %v4222_v47 }
 0x24b   : > { %v2589_v8 = vpop.f32.mrb[174].mxu1  ;;  %8750 = vmatprep.mubr.msk.bf16.mxu0 %vm9607_vm1, %v12652_v21  ;;  %v3692_v20 = vrot.slane %v3690_v19, 1 }
 0x24c   : > { %v8571_v44 = vpop.f32.mrb[175].mxu1  ;;  %v4227_v27 = vrot.slane %v4225_v5, 1  ;;  %v4237_v5 = vshll.u32 %v10931_v59, 16 }
 0x24d   : > { %v2168_v23 = vpop.f32.mrb[172].mxu0 }
 0x24e   : > { %8821 = vmatmul.mubr.msk.bf16.gmra.mrb[24].mxu1 %vm366_vm2, %v4214_v55  ;;  %v2249_v53 = vadd.f32 %v2168_v23, %v10606_v16  ;;  %v8500_v32 = vpop.f32.mrb[173].mxu0  ;;  %v4230_v55 = vrot.slane %v4228_v31, 2 }
 0x24f   : > { %8824 = vmatprep.mubr.msk.bf16.mxu1 %vm9607_vm1, %v12652_v21  ;;  %v2171_v33 = vpop.f32.mrb[174].mxu0 }
 0x250   : > { %v2250_v48 = vadd.f32 %v2171_v33, %v10610_v41  ;;  %v8501_v16 = vpop.f32.mrb[175].mxu0  ;;  %v10926_v30 = vadd.f32 %v2586_v50, %v2249_v53  ;;  %v3688_v41 = vor.u32 %v3686_v58, %v3684_v12  ;;  %v10938_v50 = vld [vmem:[%s9703_s7 + $0x30] sm:$0xff]   ;;  %v4231_v32 = vor.u32 %v4230_v55, %v4227_v27 }
 0x251   : > { %v2594_v18 = vpop.f32.mrb[176].mxu1  ;;  %v3694_v33 = vshrl.u32 %v10914_v29, 16  ;;  %v4239_v55 = vrot.slane %v4237_v5, 2 }
 0x252   : > { %v8574_v46 = vpop.f32.mrb[177].mxu1  ;;  %8751 = vmatmul.mubr.msk.bf16.gmra.mrb[24].mxu0 %vm366_vm2, %v3685_v61  ;;  %v10933_v45 = vadd.f32 %v2589_v8, %v2250_v48  ;;  %v4234_v8 = vshrl.u32 %v10931_v59, 16  ;;  %v3693_v12 = vsel %vm1024_vm5, %v3688_v41, %v3692_v20  ;;  %v3698_v61 = vshll.u32 %v10938_v50, 16 }
 0x253   : > { %v2597_v17 = vpop.f32.mrb[178].mxu1  ;;  %8754 = vmatprep.mubr.msk.bf16.mxu0 %vm9607_vm1, %v12652_v21 }
 0x254   : > { %v8575_v44 = vpop.f32.mrb[179].mxu1  ;;  %v4236_v27 = vrot.slane %v4234_v8, 1 }
 0x255   : > { %v2176_v23 = vpop.f32.mrb[176].mxu0  ;;  %v10955_v44 = vld [vmem:[%s9703_s7 + $0xd8] sm:$0xff]  }
 0x256   : > { %8825 = vmatmul.mubr.msk.bf16.gmra.mrb[28].mxu1 %vm366_vm2, %v4223_v1  ;;  %v2251_v53 = vadd.f32 %v2176_v23, %v10624_v37  ;;  %v8504_v43 = vpop.f32.mrb[177].mxu0  ;;  %v4232_v1 = vsel %vm1428_vm4, %v4222_v47, %v4231_v32  ;;  %12694 = vst [vmem:[#allocation6_spill] sm:$0xff] %v10955_v44  ;;  %v4240_v8 = vor.u32 %v4239_v55, %v4236_v27  ;;  %v4246_v5 = vshll.u32 %v10955_v44, 16 }
 0x257   : > { %8828 = vmatprep.mubr.msk.bf16.mxu1 %vm9607_vm1, %v12652_v21  ;;  %v2179_v31 = vpop.f32.mrb[178].mxu0  ;;  %v3700_v43 = vrot.slane %v3698_v61, 1 }
 0x258   : > { %v2252_v58 = vadd.f32 %v2179_v31, %v10628_v11  ;;  %v8505_v37 = vpop.f32.mrb[179].mxu0  ;;  %v10950_v48 = vadd.f32 %v2594_v18, %v2251_v53  ;;  %v3696_v11 = vor.u32 %v3694_v33, %v3692_v20  ;;  %v10962_v18 = vld [vmem:[%s9703_s7 + $0x38] sm:$0xff]   ;;  %v3702_v33 = vshrl.u32 %v10938_v50, 16 }
 0x259   : > { %v2602_v19 = vpop.f32.mrb[180].mxu1  ;;  %12695 = vst [vmem:[#allocation5_spill] sm:$0xff] %v10962_v18  ;;  %v3706_v61 = vshll.u32 %v10962_v18, 16  ;;  %v4241_v55 = vsel %vm1428_vm4, %v4231_v32, %v4240_v8 }
 0x25a   : > { %v8578_v16 = vpop.f32.mrb[181].mxu1  ;;  %8755 = vmatmul.mubr.msk.bf16.gmra.mrb[28].mxu0 %vm366_vm2, %v3693_v12  ;;  %v10957_v41 = vadd.f32 %v2597_v17, %v2252_v58  ;;  %v4243_v17 = vshrl.u32 %v10955_v44, 16  ;;  %v3701_v20 = vsel %vm1024_vm5, %v3696_v11, %v3700_v43  ;;  %v10979_v11 = vld [vmem:[%s9703_s7 + $0xe0] sm:$0xff]  }
 0x25b   : > { %v2605_v46 = vpop.f32.mrb[182].mxu1  ;;  %8758 = vmatprep.mubr.msk.bf16.mxu0 %vm9607_vm1, %v12652_v21  ;;  %12696 = vst [vmem:[#allocation8_spill] sm:$0xff] %v10979_v11 }
 0x25c   : > { %v8579_v23 = vpop.f32.mrb[183].mxu1 }
 0x25d   : > { %v2184_v53 = vpop.f32.mrb[180].mxu0  ;;  %v4245_v23 = vrot.slane %v4243_v17, 1 }
 0x25e   : > { %8829 = vmatmul.mubr.msk.bf16.gmra.mrb[32].mxu1 %vm366_vm2, %v4232_v1  ;;  %v2253_v31 = vadd.f32 %v2184_v53, %v10642_v34  ;;  %v8508_v47 = vpop.f32.mrb[181].mxu0  ;;  %v4248_v53 = vrot.slane %v4246_v5, 2 }
 0x25f   : > { %8832 = vmatprep.mubr.msk.bf16.mxu1 %vm9607_vm1, %v12652_v21  ;;  %v2187_v12 = vpop.f32.mrb[182].mxu0 }
 0x260   : > { %v2254_v58 = vadd.f32 %v2187_v12, %v10646_v40  ;;  %v8509_v34 = vpop.f32.mrb[183].mxu0  ;;  %v10974_v16 = vadd.f32 %v2602_v19, %v2253_v31  ;;  %v3704_v40 = vor.u32 %v3702_v33, %v3700_v43  ;;  %v3708_v12 = vrot.slane %v3706_v61, 1  ;;  %v10986_v19 = vld [vmem:[%s9703_s7 + $0x40] sm:$0xff]  }
 0x261   : > { %v2610_v37 = vpop.f32.mrb[184].mxu1  ;;  %12697 = vst [vmem:[#allocation7_spill] sm:$0xff] %v10986_v19  ;;  %v4249_v17 = vor.u32 %v4248_v53, %v4245_v23  ;;  %v3710_v33 = vshrl.u32 %v10962_v18, 16  ;;  %v3714_v61 = vshll.u32 %v10986_v19, 16 }
 0x262   : > { %v8582_v1 = vpop.f32.mrb[185].mxu1  ;;  %8759 = vmatmul.mubr.msk.bf16.gmra.mrb[32].mxu0 %vm366_vm2, %v3701_v20  ;;  %v10981_v47 = vadd.f32 %v2605_v46, %v2254_v58  ;;  %v4252_v46 = vshrl.u32 %v10979_v11, 16  ;;  %v3709_v43 = vsel %vm1024_vm5, %v3704_v40, %v3708_v12  ;;  %v11003_v40 = vld [vmem:[%s9703_s7 + $0xe8] sm:$0xff]  }
 0x263   : > { %v2613_v27 = vpop.f32.mrb[186].mxu1  ;;  %8762 = vmatprep.mubr.msk.bf16.mxu0 %vm9607_vm1, %v12652_v21  ;;  %v4250_v53 = vsel %vm1428_vm4, %v4240_v8, %v4249_v17  ;;  %12698 = vst [vmem:[#allocation10_spill] sm:$0xff] %v11003_v40 }
 0x264   : > { %v8583_v44 = vpop.f32.mrb[187].mxu1 }
 0x265   : > { %v2192_v31 = vpop.f32.mrb[184].mxu0  ;;  %v4255_v44 = vshll.u32 %v10979_v11, 16 }
 0x266   : > { %8833 = vmatmul.mubr.msk.bf16.gmra.mrb[36].mxu1 %vm366_vm2, %v4241_v55  ;;  %v2255_v20 = vadd.f32 %v2192_v31, %v10660_v38  ;;  %v8512_v32 = vpop.f32.mrb[185].mxu0  ;;  %v4254_v31 = vrot.slane %v4252_v46, 1 }
 0x267   : > { %8836 = vmatprep.mubr.msk.bf16.mxu1 %vm9607_vm1, %v12652_v21  ;;  %v2195_v5 = vpop.f32.mrb[186].mxu0  ;;  %v4257_v32 = vrot.slane %v4255_v44, 2 }
 0x268   : > { %v2256_v58 = vadd.f32 %v2195_v5, %v10664_v22  ;;  %v8513_v38 = vpop.f32.mrb[187].mxu0  ;;  %v10998_v1 = vadd.f32 %v2610_v37, %v2255_v20  ;;  %v3712_v22 = vor.u32 %v3710_v33, %v3708_v12  ;;  %v3716_v5 = vrot.slane %v3714_v61, 1  ;;  %v11010_v37 = vld [vmem:[%s9703_s7 + $0x48] sm:$0xff]  }
 0x269   : > { %v2618_v34 = vpop.f32.mrb[188].mxu1  ;;  %12699 = vst [vmem:[#allocation9_spill] sm:$0xff] %v11010_v37  ;;  %v4258_v46 = vor.u32 %v4257_v32, %v4254_v31  ;;  %v3718_v33 = vshrl.u32 %v10986_v19, 16  ;;  %v3722_v61 = vshll.u32 %v11010_v37, 16 }
 0x26a   : > { %v8586_v55 = vpop.f32.mrb[189].mxu1  ;;  %8763 = vmatmul.mubr.msk.bf16.gmra.mrb[36].mxu0 %vm366_vm2, %v3709_v43  ;;  %v11005_v11 = vadd.f32 %v2613_v27, %v2256_v58  ;;  %v4261_v27 = vshrl.u32 %v11003_v40, 16  ;;  %v3717_v12 = vsel %vm1024_vm5, %v3712_v22, %v3716_v5  ;;  %v11027_v22 = vld [vmem:[%s9703_s7 + $0xf0] sm:$0xff]  }
 0x26b   : > { %v2621_v23 = vpop.f32.mrb[190].mxu1  ;;  %8766 = vmatprep.mubr.msk.bf16.mxu0 %vm9607_vm1, %v12652_v21  ;;  %v4259_v32 = vsel %vm1428_vm4, %v4249_v17, %v4258_v46  ;;  %12700 = vst [vmem:[#allocation12_spill] sm:$0xff] %v11027_v22 }
 0x26c   : > { %v8587_v18 = vpop.f32.mrb[191].mxu1 }
 0x26d   : > { %v2200_v20 = vpop.f32.mrb[188].mxu0  ;;  %v4264_v18 = vshll.u32 %v11003_v40, 16 }
 0x26e   : > { %8837 = vmatmul.mubr.msk.bf16.gmra.mrb[40].mxu1 %vm366_vm2, %v4250_v53  ;;  %v2257_v43 = vadd.f32 %v2200_v20, %v10678_v49  ;;  %v8516_v8 = vpop.f32.mrb[189].mxu0  ;;  %v4263_v20 = vrot.slane %v4261_v27, 1 }
 0x26f   : > { %8840 = vmatprep.mubr.msk.bf16.mxu1 %vm9607_vm1, %v12652_v21  ;;  %v2203_v44 = vpop.f32.mrb[190].mxu0  ;;  %v4266_v8 = vrot.slane %v4264_v18, 2 }
 0x270   : > { %v2258_v58 = vadd.f32 %v2203_v44, %v10682_v57  ;;  %v8517_v49 = vpop.f32.mrb[191].mxu0  ;;  %v11022_v55 = vadd.f32 %v2618_v34, %v2257_v43  ;;  %v3720_v57 = vor.u32 %v3718_v33, %v3716_v5  ;;  %v3724_v44 = vrot.slane %v3722_v61, 1  ;;  %v11034_v34 = vld [vmem:[%s9703_s7 + $0x50] sm:$0xff]  }
 0x271   : > { %v2626_v38 = vpop.f32.mrb[192].mxu1  ;;  %12701 = vst [vmem:[#allocation11_spill] sm:$0xff] %v11034_v34  ;;  %v4267_v27 = vor.u32 %v4266_v8, %v4263_v20  ;;  %v3726_v33 = vshrl.u32 %v11010_v37, 16  ;;  %v3730_v61 = vshll.u32 %v11034_v34, 16 }
 0x272   : > { %v8590_v53 = vpop.f32.mrb[193].mxu1  ;;  %8767 = vmatmul.mubr.msk.bf16.gmra.mrb[40].mxu0 %vm366_vm2, %v3717_v12  ;;  %v11029_v40 = vadd.f32 %v2621_v23, %v2258_v58  ;;  %v4270_v23 = vshrl.u32 %v11027_v22, 16  ;;  %v3725_v5 = vsel %vm1024_vm5, %v3720_v57, %v3724_v44  ;;  %v11051_v57 = vld [vmem:[%s9703_s7 + $0xf8] sm:$0xff]  }
 0x273   : > { %v2629_v31 = vpop.f32.mrb[194].mxu1  ;;  %8770 = vmatprep.mubr.msk.bf16.mxu0 %vm9607_vm1, %v12652_v21  ;;  %v4268_v8 = vsel %vm1428_vm4, %v4258_v46, %v4267_v27  ;;  %12702 = vst [vmem:[#allocation14_spill] sm:$0xff] %v11051_v57 }
 0x274   : > { %v8591_v19 = vpop.f32.mrb[195].mxu1 }
 0x275   : > { %v2208_v43 = vpop.f32.mrb[192].mxu0  ;;  %v4273_v19 = vshll.u32 %v11027_v22, 16 }
 0x276   : > { %8841 = vmatmul.mubr.msk.bf16.gmra.mrb[44].mxu1 %vm366_vm2, %v4259_v32  ;;  %v2259_v12 = vadd.f32 %v2208_v43, %v10696_v25  ;;  %v8520_v17 = vpop.f32.mrb[193].mxu0  ;;  %v4272_v43 = vrot.slane %v4270_v23, 1 }
 0x277   : > { %8844 = vmatprep.mubr.msk.bf16.mxu1 %vm9607_vm1, %v12652_v21  ;;  %v2211_v18 = vpop.f32.mrb[194].mxu0  ;;  %v4275_v17 = vrot.slane %v4273_v19, 2 }
 0x278   : > { %v2260_v58 = vadd.f32 %v2211_v18, %v10700_v2  ;;  %v8521_v25 = vpop.f32.mrb[195].mxu0  ;;  %v11046_v53 = vadd.f32 %v2626_v38, %v2259_v12  ;;  %v3728_v2 = vor.u32 %v3726_v33, %v3724_v44  ;;  %v3732_v18 = vrot.slane %v3730_v61, 1  ;;  %v11058_v38 = vld [vmem:[%s9703_s7 + $0x58] sm:$0xff]  }
 0x279   : > { %v2634_v49 = vpop.f32.mrb[196].mxu1  ;;  %12703 = vst [vmem:[#allocation13_spill] sm:$0xff] %v11058_v38  ;;  %v4276_v23 = vor.u32 %v4275_v17, %v4272_v43  ;;  %v3734_v33 = vshrl.u32 %v11034_v34, 16  ;;  %v3738_v61 = vshll.u32 %v11058_v38, 16 }
 0x27a   : > { %v8594_v32 = vpop.f32.mrb[197].mxu1  ;;  %8771 = vmatmul.mubr.msk.bf16.gmra.mrb[44].mxu0 %vm366_vm2, %v3725_v5  ;;  %v11053_v22 = vadd.f32 %v2629_v31, %v2260_v58  ;;  %v4279_v31 = vshrl.u32 %v11051_v57, 16  ;;  %v3733_v44 = vsel %vm1024_vm5, %v3728_v2, %v3732_v18  ;;  %v11075_v2 = vld [vmem:[%s9703_s7 + $0x100] sm:$0xff]  }
 0x27b   : > { %v2637_v20 = vpop.f32.mrb[198].mxu1  ;;  %8774 = vmatprep.mubr.msk.bf16.mxu0 %vm9607_vm1, %v12652_v21  ;;  %v4277_v17 = vsel %vm1428_vm4, %v4267_v27, %v4276_v23  ;;  %12704 = vst [vmem:[#allocation16_spill] sm:$0xff] %v11075_v2 }
 0x27c   : > { %v8595_v37 = vpop.f32.mrb[199].mxu1 }
 0x27d   : > { %v2216_v12 = vpop.f32.mrb[196].mxu0  ;;  %v4282_v37 = vshll.u32 %v11051_v57, 16 }
 0x27e   : > { %8845 = vmatmul.mubr.msk.bf16.gmra.mrb[48].mxu1 %vm366_vm2, %v4268_v8  ;;  %v2261_v5 = vadd.f32 %v2216_v12, %v10714_v54  ;;  %v8524_v46 = vpop.f32.mrb[197].mxu0  ;;  %v4281_v12 = vrot.slane %v4279_v31, 1 }
 0x27f   : > { %8848 = vmatprep.mubr.msk.bf16.mxu1 %vm9607_vm1, %v12652_v21  ;;  %v2219_v19 = vpop.f32.mrb[198].mxu0  ;;  %v4284_v46 = vrot.slane %v4282_v37, 2 }
 0x280   : > { %v2262_v58 = vadd.f32 %v2219_v19, %v10718_v56  ;;  %v8525_v54 = vpop.f32.mrb[199].mxu0  ;;  %v11070_v32 = vadd.f32 %v2634_v49, %v2261_v5  ;;  %v3736_v56 = vor.u32 %v3734_v33, %v3732_v18  ;;  %v3740_v19 = vrot.slane %v3738_v61, 1  ;;  %v11082_v49 = vld [vmem:[%s9703_s7 + $0x60] sm:$0xff]  }
 0x281   : > { %v2642_v25 = vpop.f32.mrb[200].mxu1  ;;  %12705 = vst [vmem:[#allocation15_spill] sm:$0xff] %v11082_v49  ;;  %v4285_v31 = vor.u32 %v4284_v46, %v4281_v12  ;;  %v3742_v33 = vshrl.u32 %v11058_v38, 16  ;;  %v3746_v61 = vshll.u32 %v11082_v49, 16 }
 0x282   : > { %v8598_v8 = vpop.f32.mrb[201].mxu1  ;;  %8775 = vmatmul.mubr.msk.bf16.gmra.mrb[48].mxu0 %vm366_vm2, %v3733_v44  ;;  %v11077_v57 = vadd.f32 %v2637_v20, %v2262_v58  ;;  %v4288_v20 = vshrl.u32 %v11075_v2, 16  ;;  %v3741_v18 = vsel %vm1024_vm5, %v3736_v56, %v3740_v19  ;;  %v11099_v56 = vld [vmem:[%s9703_s7 + $0x108] sm:$0xff]  }
 0x283   : > { %v2645_v43 = vpop.f32.mrb[202].mxu1  ;;  %8778 = vmatprep.mubr.msk.bf16.mxu0 %vm9607_vm1, %v12652_v21  ;;  %v4286_v46 = vsel %vm1428_vm4, %v4276_v23, %v4285_v31  ;;  %12706 = vst [vmem:[#allocation18_spill] sm:$0xff] %v11099_v56 }
 0x284   : > { %v8599_v34 = vpop.f32.mrb[203].mxu1 }
 0x285   : > { %v2224_v5 = vpop.f32.mrb[200].mxu0  ;;  %v4291_v34 = vshll.u32 %v11075_v2, 16 }
 0x286   : > { %8849 = vmatmul.mubr.msk.bf16.gmra.mrb[52].mxu1 %vm366_vm2, %v4277_v17  ;;  %v2263_v44 = vadd.f32 %v2224_v5, %v10732_v7  ;;  %v8528_v27 = vpop.f32.mrb[201].mxu0  ;;  %v4290_v5 = vrot.slane %v4288_v20, 1 }
 0x287   : > { %8852 = vmatprep.mubr.msk.bf16.mxu1 %vm9607_vm1, %v12652_v21  ;;  %v2227_v37 = vpop.f32.mrb[202].mxu0  ;;  %v4293_v27 = vrot.slane %v4291_v34, 2 }
 0x288   : > { %v2264_v58 = vadd.f32 %v2227_v37, %v10736_v9  ;;  %v8529_v7 = vpop.f32.mrb[203].mxu0  ;;  %v11094_v8 = vadd.f32 %v2642_v25, %v2263_v44  ;;  %v3744_v9 = vor.u32 %v3742_v33, %v3740_v19  ;;  %v3748_v37 = vrot.slane %v3746_v61, 1  ;;  %v11106_v25 = vld [vmem:[%s9703_s7 + $0x68] sm:$0xff]  }
 0x289   : > { %v3364_v54 = vpop.f32.mrb[204].mxu1  ;;  %12707 = vst [vmem:[#allocation17_spill] sm:$0xff] %v11106_v25  ;;  %v4294_v20 = vor.u32 %v4293_v27, %v4290_v5  ;;  %v3750_v33 = vshrl.u32 %v11082_v49, 16  ;;  %v3754_v61 = vshll.u32 %v11106_v25, 16 }
 0x28a   : > { %v8674_v17 = vpop.f32.mrb[205].mxu1  ;;  %8779 = vmatmul.mubr.msk.bf16.gmra.mrb[52].mxu0 %vm366_vm2, %v3741_v18  ;;  %v11101_v2 = vadd.f32 %v2645_v43, %v2264_v58  ;;  %v4297_v43 = vshrl.u32 %v11099_v56, 16  ;;  %v3749_v19 = vsel %vm1024_vm5, %v3744_v9, %v3748_v37  ;;  %v11123_v9 = vld [vmem:[%s9703_s7 + $0x110] sm:$0xff]  }
 0x28b   : > { %v3367_v12 = vpop.f32.mrb[206].mxu1  ;;  %8782 = vmatprep.mubr.msk.bf16.mxu0 %vm9607_vm1, %v12652_v21  ;;  %v4295_v27 = vsel %vm1428_vm4, %v4285_v31, %v4294_v20  ;;  %12708 = vst [vmem:[#allocation20_spill] sm:$0xff] %v11123_v9 }
 0x28c   : > { %v8675_v38 = vpop.f32.mrb[207].mxu1 }
 0x28d   : > { %v2939_v44 = vpop.f32.mrb[204].mxu0  ;;  %v4300_v38 = vshll.u32 %v11099_v56, 16 }
 0x28e   : > { %8853 = vmatmul.mubr.msk.bf16.gmra.mrb[56].mxu1 %vm366_vm2, %v4286_v46  ;;  %v3074_v18 = vadd.f32 %v2939_v44, %v10750_v3  ;;  %v8604_v23 = vpop.f32.mrb[205].mxu0  ;;  %v4299_v44 = vrot.slane %v4297_v43, 1 }
 0x28f   : > { %8856 = vmatprep.mubr.msk.bf16.mxu1 %vm9607_vm1, %v12652_v21  ;;  %v2942_v34 = vpop.f32.mrb[206].mxu0  ;;  %v4302_v23 = vrot.slane %v4300_v38, 2 }
 0x290   : > { %v3075_v58 = vadd.f32 %v2942_v34, %v10754_v26  ;;  %v8605_v3 = vpop.f32.mrb[207].mxu0  ;;  %v11118_v17 = vadd.f32 %v3364_v54, %v3074_v18  ;;  %v3752_v26 = vor.u32 %v3750_v33, %v3748_v37  ;;  %v3756_v34 = vrot.slane %v3754_v61, 1  ;;  %v11130_v54 = vld [vmem:[%s9703_s7 + $0x70] sm:$0xff]  }
 0x291   : > { %v3372_v7 = vpop.f32.mrb[208].mxu1  ;;  %12709 = vst [vmem:[#allocation19_spill] sm:$0xff] %v11130_v54  ;;  %v4303_v43 = vor.u32 %v4302_v23, %v4299_v44  ;;  %v3758_v33 = vshrl.u32 %v11106_v25, 16  ;;  %v3762_v61 = vshll.u32 %v11130_v54, 16 }
 0x292   : > { %v8678_v46 = vpop.f32.mrb[209].mxu1  ;;  %8783 = vmatmul.mubr.msk.bf16.gmra.mrb[56].mxu0 %vm366_vm2, %v3749_v19  ;;  %v11125_v56 = vadd.f32 %v3367_v12, %v3075_v58  ;;  %v4306_v12 = vshrl.u32 %v11123_v9, 16  ;;  %v3757_v37 = vsel %vm1024_vm5, %v3752_v26, %v3756_v34  ;;  %v11147_v26 = vld [vmem:[%s9703_s7 + $0x118] sm:$0xff]  }
 0x293   : > { %v3375_v5 = vpop.f32.mrb[210].mxu1  ;;  %8786 = vmatprep.mubr.msk.bf16.mxu0 %vm9607_vm1, %v12652_v21  ;;  %v4304_v23 = vsel %vm1428_vm4, %v4294_v20, %v4303_v43  ;;  %12710 = vst [vmem:[#allocation22_spill] sm:$0xff] %v11147_v26 }
 0x294   : > { %v8679_v49 = vpop.f32.mrb[211].mxu1 }
 0x295   : > { %v2947_v18 = vpop.f32.mrb[208].mxu0  ;;  %v4309_v49 = vshll.u32 %v11123_v9, 16 }
 0x296   : > { %8857 = vmatmul.mubr.msk.bf16.gmra.mrb[60].mxu1 %vm366_vm2, %v4295_v27  ;;  %v3076_v19 = vadd.f32 %v2947_v18, %v10766_v63  ;;  %v8608_v31 = vpop.f32.mrb[209].mxu0  ;;  %v4308_v18 = vrot.slane %v4306_v12, 1 }
 0x297   : > { %8860 = vmatprep.mubr.msk.bf16.mxu1 %vm9607_vm1, %v12652_v21  ;;  %v2950_v38 = vpop.f32.mrb[210].mxu0  ;;  %v4311_v31 = vrot.slane %v4309_v49, 2 }
 0x298   : > { %v3077_v58 = vadd.f32 %v2950_v38, %v10770_v24  ;;  %v8609_v63 = vpop.f32.mrb[211].mxu0  ;;  %v11142_v46 = vadd.f32 %v3372_v7, %v3076_v19  ;;  %v3760_v24 = vor.u32 %v3758_v33, %v3756_v34  ;;  %v3764_v38 = vrot.slane %v3762_v61, 1  ;;  %v11154_v7 = vld [vmem:[%s9703_s7 + $0x78] sm:$0xff]  }
 0x299   : > { %v3380_v3 = vpop.f32.mrb[212].mxu1  ;;  %12711 = vst [vmem:[#allocation21_spill] sm:$0xff] %v11154_v7  ;;  %v4312_v12 = vor.u32 %v4311_v31, %v4308_v18  ;;  %v3766_v33 = vshrl.u32 %v11130_v54, 16  ;;  %v3770_v61 = vshll.u32 %v11154_v7, 16 }
 0x29a   : > { %v8682_v27 = vpop.f32.mrb[213].mxu1  ;;  %8787 = vmatmul.mubr.msk.bf16.gmra.mrb[60].mxu0 %vm366_vm2, %v3757_v37  ;;  %v11149_v9 = vadd.f32 %v3375_v5, %v3077_v58  ;;  %v4315_v5 = vshrl.u32 %v11147_v26, 16  ;;  %v3765_v34 = vsel %vm1024_vm5, %v3760_v24, %v3764_v38  ;;  %v11171_v24 = vld [vmem:[%s9703_s7 + $0x120] sm:$0xff]  }
 0x29b   : > { %v3383_v44 = vpop.f32.mrb[214].mxu1  ;;  %8790 = vmatprep.mubr.msk.bf16.mxu0 %vm9607_vm1, %v12652_v21  ;;  %v4313_v31 = vsel %vm1428_vm4, %v4303_v43, %v4312_v12  ;;  %12712 = vst [vmem:[#allocation24_spill] sm:$0xff] %v11171_v24 }
 0x29c   : > { %v8683_v25 = vpop.f32.mrb[215].mxu1 }
 0x29d   : > { %v2955_v19 = vpop.f32.mrb[212].mxu0  ;;  %v4318_v25 = vshll.u32 %v11147_v26, 16 }
 0x29e   : > { %8861 = vmatmul.mubr.msk.bf16.gmra.mrb[64].mxu1 %vm366_vm2, %v4304_v23  ;;  %v3078_v37 = vadd.f32 %v2955_v19, %v10780_v10  ;;  %v8612_v20 = vpop.f32.mrb[213].mxu0  ;;  %v4317_v19 = vrot.slane %v4315_v5, 1 }
 0x29f   : > { %8864 = vmatprep.mubr.msk.bf16.mxu1 %vm9607_vm1, %v12652_v21  ;;  %v2958_v49 = vpop.f32.mrb[214].mxu0  ;;  %v4320_v20 = vrot.slane %v4318_v25, 2 }
 0x2a0   : > { %v3079_v58 = vadd.f32 %v2958_v49, %v10785_v4  ;;  %v8613_v10 = vpop.f32.mrb[215].mxu0  ;;  %v11166_v27 = vadd.f32 %v3380_v3, %v3078_v37  ;;  %v3768_v4 = vor.u32 %v3766_v33, %v3764_v38  ;;  %v3772_v49 = vrot.slane %v3770_v61, 1  ;;  %v11178_v3 = vld [vmem:[%s9703_s7 + $0x80] sm:$0xff]  }
 0x2a1   : > { %v3388_v63 = vpop.f32.mrb[216].mxu1  ;;  %v4321_v5 = vor.u32 %v4320_v20, %v4317_v19  ;;  %v3774_v33 = vshrl.u32 %v11154_v7, 16  ;;  %v3778_v61 = vshll.u32 %v11178_v3, 16 }
 0x2a2   : > { %v8686_v23 = vpop.f32.mrb[217].mxu1  ;;  %8791 = vmatmul.mubr.msk.bf16.gmra.mrb[64].mxu0 %vm366_vm2, %v3765_v34  ;;  %v11173_v26 = vadd.f32 %v3383_v44, %v3079_v58  ;;  %v4324_v44 = vshrl.u32 %v11171_v24, 16  ;;  %v3773_v38 = vsel %vm1024_vm5, %v3768_v4, %v3772_v49  ;;  %v11195_v4 = vld [vmem:[%s9703_s7 + $0x128] ss:$0 sps:$4 sm:$0x33]  }
 0x2a3   : > { %v3391_v18 = vpop.f32.mrb[218].mxu1  ;;  %8794 = vmatprep.mubr.msk.bf16.mxu0 %vm9607_vm1, %v12652_v21  ;;  %v4322_v20 = vsel %vm1428_vm4, %v4312_v12, %v4321_v5  ;;  %12713 = vst [vmem:[#allocation23_spill] sm:$0xff] %v11195_v4 }
 0x2a4   : > { %v8687_v54 = vpop.f32.mrb[219].mxu1 }
 0x2a5   : > { %v2963_v37 = vpop.f32.mrb[216].mxu0  ;;  %v4327_v54 = vshll.u32 %v11171_v24, 16 }
 0x2a6   : > { %8865 = vmatmul.mubr.msk.bf16.gmra.mrb[68].mxu1 %vm366_vm2, %v4313_v31  ;;  %v3080_v34 = vadd.f32 %v2963_v37, %v10796_v36  ;;  %v8616_v43 = vpop.f32.mrb[217].mxu0  ;;  %v4326_v37 = vrot.slane %v4324_v44, 1 }
 0x2a7   : > { %8868 = vmatprep.mubr.msk.bf16.mxu1 %vm9607_vm1, %v12652_v21  ;;  %v2966_v25 = vpop.f32.mrb[218].mxu0  ;;  %v4329_v43 = vrot.slane %v4327_v54, 2 }
 0x2a8   : > { %v3081_v58 = vadd.f32 %v2966_v25, %v10800_v28  ;;  %v8617_v36 = vpop.f32.mrb[219].mxu0  ;;  %v11190_v23 = vadd.f32 %v3388_v63, %v3080_v34  ;;  %v3776_v28 = vor.u32 %v3774_v33, %v3772_v49  ;;  %v3780_v25 = vrot.slane %v3778_v61, 1  ;;  %v11202_v63 = vld [vmem:[%s9703_s7 + $0x88] sm:$0xff]  }
 0x2a9   : > { %v3396_v10 = vpop.f32.mrb[220].mxu1  ;;  %v4330_v44 = vor.u32 %v4329_v43, %v4326_v37  ;;  %v3782_v33 = vshrl.u32 %v11178_v3, 16  ;;  %v3786_v61 = vshll.u32 %v11202_v63, 16 }
 0x2aa   : > { %v8690_v31 = vpop.f32.mrb[221].mxu1  ;;  %8795 = vmatmul.mubr.msk.bf16.gmra.mrb[68].mxu0 %vm366_vm2, %v3773_v38  ;;  %v11197_v24 = vadd.f32 %v3391_v18, %v3081_v58  ;;  %v4333_v18 = vshrl.u32 %v11195_v4, 16  ;;  %v3781_v49 = vsel %vm1024_vm5, %v3776_v28, %v3780_v25 }
 0x2ab   : > { %v3399_v19 = vpop.f32.mrb[222].mxu1  ;;  %8798 = vmatprep.mubr.msk.bf16.mxu0 %vm9607_vm1, %v12652_v21  ;;  %v4331_v43 = vsel %vm1428_vm4, %v4321_v5, %v4330_v44 }
 0x2ac   : > { %v8691_v7 = vpop.f32.mrb[223].mxu1 }
 0x2ad   : > { %v2971_v34 = vpop.f32.mrb[220].mxu0  ;;  %v4336_v7 = vshll.u32 %v11195_v4, 16 }
 0x2ae   : > { %8869 = vmatmul.mubr.msk.bf16.gmra.mrb[72].mxu1 %vm366_vm2, %v4322_v20  ;;  %v3082_v38 = vadd.f32 %v2971_v34, %v10813_v6  ;;  %v8620_v12 = vpop.f32.mrb[221].mxu0  ;;  %v4335_v34 = vrot.slane %v4333_v18, 1  ;;  %v3790_v18 = vshrl.u32 %v11202_v63, 16 }
 0x2af   : > { %8872 = vmatprep.mubr.msk.bf16.mxu1 %vm9607_vm1, %v12652_v21  ;;  %v2974_v54 = vpop.f32.mrb[222].mxu0  ;;  %v4338_v12 = vrot.slane %v4336_v7, 2  ;;  %v4896_v7 = vld [vmem:[%s9703_s7 + $0xa0] sm:$0xc] }
 0x2b0   : > { %v3083_v58 = vadd.f32 %v2974_v54, %v10818_v13  ;;  %v8621_v6 = vpop.f32.mrb[223].mxu0  ;;  %v11214_v31 = vadd.f32 %v3396_v10, %v3082_v38  ;;  %v3784_v13 = vor.u32 %v3782_v33, %v3780_v25  ;;  %v3788_v54 = vrot.slane %v3786_v61, 1 }
 0x2b1   : > { %v3404_v36 = vpop.f32.mrb[224].mxu1  ;;  %v11223_v6 = vld [vmem:[%s9703_s7 + $0x90] ss:$0 sps:$4 sm:$0x11]   ;;  %v4339_v5 = vor.u32 %v4338_v12, %v4335_v34  ;;  %v9530_v12 = vld [vmem:[%s9703_s7 + $0xa4] sm:$0xf] }
 0x2b2   : > { %v8694_v20 = vpop.f32.mrb[225].mxu1  ;;  %8799 = vmatmul.mubr.msk.bf16.gmra.mrb[72].mxu0 %vm366_vm2, %v3781_v49  ;;  %v11218_v28 = vadd.f32 %v3399_v19, %v3083_v58  ;;  %v3794_v25 = vshll.u32 %v11223_v6, 16 }
 0x2b3   : > { %v3407_v37 = vpop.f32.mrb[226].mxu1  ;;  %8802 = vmatprep.mubr.msk.bf16.mxu0 %vm9607_vm1, %v12652_v21  ;;  %v4340_v34 = vsel %vm1428_vm4, %v4330_v44, %v4339_v5 }
 0x2b4   : > { %v8695_v4 = vpop.f32.mrb[227].mxu1 }
 0x2b5   : > { %v2979_v10 = vpop.f32.mrb[224].mxu0  ;;  %v3789_v4 = vsel %vm1024_vm5, %v3784_v13, %v3788_v54  ;;  %v7575_v13 = vcombine.low %v4896_v7, %v9530_v12 }
 0x2b6   : > { %8873 = vmatmul.mubr.msk.bf16.gmra.mrb[76].mxu1 %vm366_vm2, %v4331_v43  ;;  %v3084_v38 = vadd.f32 %v2979_v10, %v10830_v35  ;;  %v8624_v49 = vpop.f32.mrb[225].mxu0 }
 0x2b7   : > { %8876 = vmatprep.mubr.msk.bf16.mxu1 %vm9607_vm1, %v12652_v21  ;;  %v2982_v19 = vpop.f32.mrb[226].mxu0  ;;  %v4902_v44 = vrot.slane %v7575_v13, 2 }
 0x2b8   : > { %v3085_v33 = vadd.f32 %v2982_v19, %v10837_v15  ;;  %v8625_v61 = vpop.f32.mrb[227].mxu0  ;;  %v11234_v35 = vadd.f32 %v3404_v36, %v3084_v38  ;;  %v3792_v15 = vor.u32 %v3790_v18, %v3788_v54  ;;  %v3796_v19 = vrot.slane %v3794_v25, 1  ;;  %v4598_v36 = vld [vmem:[%s9703_s7 + $0x8] sm:$0xe] }
 0x2b9   : > { %v3412_v58 = vpop.f32.mrb[228].mxu1 }
 0x2ba   : > { %v8698_v20 = vpop.f32.mrb[229].mxu1  ;;  %8803 = vmatmul.mubr.msk.bf16.gmra.mrb[76].mxu0 %vm366_vm2, %v3789_v4  ;;  %v11239_v10 = vadd.f32 %v3407_v37, %v3085_v33  ;;  %v9531_v37 = vld [vmem:[%s9703_s7 + $0xa8] sm:$0xff]   ;;  %v3797_v33 = vsel %vm1024_vm5, %v3792_v15, %v3796_v19 }
 0x2bb   : > { %v3415_v43 = vpop.f32.mrb[230].mxu1  ;;  %8806 = vmatprep.mubr.msk.bf16.mxu0 %vm9607_vm1, %v12652_v21  ;;  %v4903_v5 = vrot.slane %v9531_v37, 2  ;;  %v9532_v20 = vld [vmem:[%s9703_s7 + $0xc] sm:$0xf] }
 0x2bc   : > { %v8699_v49 = vpop.f32.mrb[231].mxu1  ;;  %v7556_v54 = vcombine.low %v4598_v36, %v9532_v20 }
 0x2bd   : > { %v2987_v38 = vpop.f32.mrb[228].mxu0  ;;  %v4904_v15 = vsel %vm1972_vm7, %v4902_v44, %v4903_v5 }
 0x2be   : > { %8877 = vmatmul.mubr.msk.bf16.gmra.mrb[80].mxu1 %vm366_vm2, %v4340_v34  ;;  %v3086_v4 = vadd.f32 %v2987_v38, %v10855_v0  ;;  %v8628_v61 = vpop.f32.mrb[229].mxu0  ;;  %v7629_v0 = vld [vmem:[%s12532_s1 + $0x1a] sm:$0x3]  ;;  %v9533_v38 = vld [vmem:[%s9703_s7 + $0x10] sm:$0xff]  }
 0x2bf   : > { %8952 = vmatprep.mubr.msk.bf16.mxu1 %vm9607_vm1, %v12652_v21  ;;  %v2990_v7 = vpop.f32.mrb[230].mxu0  ;;  %v4605_v61 = vrot.slane %v9533_v38, 1  ;;  %v6075_v37 = vsel %vm418_vm0, %v7629_v0, 0 }
 0x2c0   : > { %v3087_v18 = vadd.f32 %v2990_v7, %v10860_v51  ;;  %v8629_v25 = vpop.f32.mrb[231].mxu0  ;;  %v11255_v34 = vadd.f32 %v3412_v58, %v3086_v4  ;;  %v4604_v51 = vrot.slane %v7556_v54, 1  ;;  %v7593_v4 = vld [vmem:[%s12532_s1 + $0x18] sm:$0x3]  ;;  %v9534_v7 = vld [vmem:[%s9703_s7 + $0xb0] sm:$0xff]  }
 0x2c1   : > { %v3420_v12 = vpop.f32.mrb[232].mxu1  ;;  %v5532_v0 = vsel %vm418_vm0, %v7593_v4, 0 }
 0x2c2   : > { %v8702_v49 = vpop.f32.mrb[233].mxu1  ;;  %8807 = vmatmul.mubr.msk.bf16.gmra.mrb[80].mxu0 %vm366_vm2, %v3797_v33  ;;  %v11259_v19 = vadd.f32 %v3415_v43, %v3087_v18  ;;  %v4905_v33 = vrot.slane %v9534_v7, 2  ;;  %v4606_v54 = vsel %vm330_vm3, %v4604_v51, %v4605_v61 }
 0x2c3   : > { %v3423_v13 = vpop.f32.mrb[234].mxu1  ;;  %8882 = vmatprep.mubr.msk.bf16.mxu0 %vm9607_vm1, %v12652_v21 }
 0x2c4   : > { %v8703_v36 = vpop.f32.mrb[235].mxu1  ;;  %v4906_v38 = vsel %vm1972_vm7, %v4903_v5, %v4905_v33  ;;  %v9536_v5 = vld [vmem:[%s9703_s7 + $0xb8] sm:$0xff]  }
 0x2c5   : > { %v2995_v58 = vpop.f32.mrb[232].mxu0 }
 0x2c6   : > { %8953 = vmatmul.mubr.msk.bf16.vlgmr.msra.gmra.mrb[84].mxu1 %vm366_vm2, %v4904_v15  ;;  %v3088_v44 = vadd.f32 %v2995_v58, %v10881_v42  ;;  %v8632_v43 = vpop.f32.mrb[233].mxu0 }
 0x2c7   : > { %9091 = vmatpush3.bf16.msra.mxu1 %v6075_v37  ;;  %8956 = vmatprep.mubr.msk.bf16.mxu1 %vm9607_vm1, %v12652_v21  ;;  %v2998_v20 = vpop.f32.mrb[234].mxu0 }
 0x2c8   : > { %9230 = vmatprep.subr.bf16.mxu1 %v12652_v21  ;;  %v3089_v18 = vadd.f32 %v2998_v20, %v10886_v39  ;;  %v8633_v25 = vpop.f32.mrb[235].mxu0  ;;  %v11277_v42 = vadd.f32 %v3420_v12, %v3088_v44  ;;  %v9535_v39 = vld [vmem:[%s9703_s7 + $0x18] sm:$0xff]   ;;  %v11294_v20 = vld [vmem:[%s9703_s7 + $0x1d4] sm:$0xf] }
 0x2c9   : > { %v3428_v49 = vpop.f32.mrb[236].mxu1  ;;  %v4607_v58 = vrot.slane %v9535_v39, 1  ;;  %12714 = vst [vmem:[#allocation25_spill] sm:$0xff] %v11294_v20 }
 0x2ca   : > { %v8706_v15 = vpop.f32.mrb[237].mxu1  ;;  %8883 = vmatmul.mubr.msk.bf16.vlgmr.msra.gmra.mrb[84].mxu0 %vm366_vm2, %v4606_v54  ;;  %v11281_v37 = vadd.f32 %v3423_v13, %v3089_v18  ;;  %v4907_v13 = vrot.slane %v9536_v5, 2  ;;  %v11297_v54 = vld [vmem:[%s9703_s7 + $0x1d8] sm:$0xf]  ;;  %v9537_v5 = vld [vmem:[%s9703_s7 + $0xc0] sm:$0xff]  }
 0x2cb   : > { %v3431_v36 = vpop.f32.mrb[238].mxu1  ;;  %9021 = vmatpush3.bf16.msra.mxu0 %v5532_v0  ;;  %8886 = vmatprep.mubr.msk.bf16.mxu0 %vm9607_vm1, %v12652_v21  ;;  %v4608_v7 = vsel %vm330_vm3, %v4605_v61, %v4607_v58  ;;  %12715 = vst [vmem:[#allocation26_spill] sm:$0xff] %v11297_v54 }
 0x2cc   : > { %v8707_v51 = vpop.f32.mrb[239].mxu1  ;;  %9160 = vmatprep.subr.bf16.mxu0 %v12652_v21  ;;  %v4908_v61 = vsel %vm1972_vm7, %v4905_v33, %v4907_v13 }
 0x2cd   : > { %v3003_v12 = vpop.f32.mrb[236].mxu0 }
 0x2ce   : > { %8957 = vmatmul.mubr.msk.bf16.gmra.mrb[88].mxu1 %vm366_vm2, %v4906_v38  ;;  %v3090_v4 = vadd.f32 %v3003_v12, %v10902_v60  ;;  %v8636_v44 = vpop.f32.mrb[237].mxu0 }
 0x2cf   : > { %8960 = vmatprep.mubr.msk.bf16.mxu1 %vm9607_vm1, %v12652_v21  ;;  %v3006_v43 = vpop.f32.mrb[238].mxu0 }
 0x2d0   : > { %v3091_v18 = vadd.f32 %v3006_v43, %v10909_v14  ;;  %v8637_v25 = vpop.f32.mrb[239].mxu0  ;;  %v11302_v38 = vadd.f32 %v3428_v49, %v3090_v4  ;;  %v4609_v14 = vrot.slane %v10891_v62, 1  ;;  %v4909_v43 = vrot.slane %v9537_v5, 2 }
 0x2d1   : > { %v3436_v0 = vpop.f32.mrb[240].mxu1 }
 0x2d2   : > { %v8710_v15 = vpop.f32.mrb[241].mxu1  ;;  %8887 = vmatmul.mubr.msk.bf16.gmra.mrb[88].mxu0 %vm366_vm2, %v4608_v7  ;;  %v11306_v39 = vadd.f32 %v3431_v36, %v3091_v18  ;;  %v4610_v36 = vsel %vm330_vm3, %v4607_v58, %v4609_v14  ;;  %v11318_v7 = vld [vmem:[%s9703_s7 + $0x1dc] sm:$0xf]  ;;  %v11321_v18 = vld [vmem:[%s9703_s7 + $0x1e0] sm:$0xf]  ;;  %v4910_v58 = vsel %vm1972_vm7, %v4907_v13, %v4909_v43 }
 0x2d3   : > { %v3439_v51 = vpop.f32.mrb[242].mxu1  ;;  %8890 = vmatprep.mubr.msk.bf16.mxu0 %vm9607_vm1, %v12652_v21  ;;  %12716 = vst [vmem:[#allocation27_spill] sm:$0xff] %v11318_v7 }
 0x2d4   : > { %v8711_v12 = vpop.f32.mrb[243].mxu1 }
 0x2d5   : > { %v3011_v44 = vpop.f32.mrb[240].mxu0 }
 0x2d6   : > { %8961 = vmatmul.mubr.msk.bf16.gmra.mrb[92].mxu1 %vm366_vm2, %v4908_v61  ;;  %v3092_v49 = vadd.f32 %v3011_v44, %v10926_v30  ;;  %v8640_v4 = vpop.f32.mrb[241].mxu0 }
 0x2d7   : > { %8964 = vmatprep.mubr.msk.bf16.mxu1 %vm9607_vm1, %v12652_v21  ;;  %v3014_v33 = vpop.f32.mrb[242].mxu0 }
 0x2d8   : > { %v3093_v62 = vadd.f32 %v3014_v33, %v10933_v45  ;;  %v8641_v25 = vpop.f32.mrb[243].mxu0  ;;  %v11326_v61 = vadd.f32 %v3436_v0, %v3092_v49  ;;  %v4611_v45 = vrot.slane %v10914_v29, 1 }
 0x2d9   : > { %v3444_v15 = vpop.f32.mrb[244].mxu1  ;;  %v11345_v25 = vld [vmem:[%s9703_s7 + $0x1e8] sm:$0xf] }
 0x2da   : > { %v8714_v12 = vpop.f32.mrb[245].mxu1  ;;  %8891 = vmatmul.mubr.msk.bf16.gmra.mrb[92].mxu0 %vm366_vm2, %v4610_v36  ;;  %v11330_v4 = vadd.f32 %v3439_v51, %v3093_v62  ;;  %v4911_v36 = vrot.slane %v10907_v52, 2  ;;  %v4612_v51 = vsel %vm330_vm3, %v4609_v14, %v4611_v45  ;;  %v11342_v62 = vld [vmem:[%s9703_s7 + $0x1e4] sm:$0xf] }
 0x2db   : > { %v3447_v44 = vpop.f32.mrb[246].mxu1  ;;  %8894 = vmatprep.mubr.msk.bf16.mxu0 %vm9607_vm1, %v12652_v21 }
 0x2dc   : > { %v8715_v5 = vpop.f32.mrb[247].mxu1  ;;  %v4912_v14 = vsel %vm1972_vm7, %v4909_v43, %v4911_v36 }
 0x2dd   : > { %v3019_v33 = vpop.f32.mrb[244].mxu0 }
 0x2de   : > { %8965 = vmatmul.mubr.msk.bf16.gmra.mrb[96].mxu1 %vm366_vm2, %v4910_v58  ;;  %v3094_v0 = vadd.f32 %v3019_v33, %v10950_v48  ;;  %v8644_v49 = vpop.f32.mrb[245].mxu0 }
 0x2df   : > { %8968 = vmatprep.mubr.msk.bf16.mxu1 %vm9607_vm1, %v12652_v21  ;;  %v3022_v13 = vpop.f32.mrb[246].mxu0 }
 0x2e0   : > { %v3095_v29 = vadd.f32 %v3022_v13, %v10957_v41  ;;  %v8645_v12 = vpop.f32.mrb[247].mxu0  ;;  %v11350_v58 = vadd.f32 %v3444_v15, %v3094_v0  ;;  %v4613_v41 = vrot.slane %v10938_v50, 1 }
 0x2e1   : > { %v3452_v5 = vpop.f32.mrb[248].mxu1 }
 0x2e2   : > { %v8718_v33 = vpop.f32.mrb[249].mxu1  ;;  %8895 = vmatmul.mubr.msk.bf16.gmra.mrb[96].mxu0 %vm366_vm2, %v4612_v51  ;;  %v11354_v49 = vadd.f32 %v3447_v44, %v3095_v29  ;;  %v4913_v51 = vrot.slane %v10931_v59, 2  ;;  %v4614_v44 = vsel %vm330_vm3, %v4611_v45, %v4613_v41  ;;  %v11369_v29 = vld [vmem:[%s9703_s7 + $0x1f0] sm:$0xf] }
 0x2e3   : > { %v3455_v52 = vpop.f32.mrb[250].mxu1  ;;  %8898 = vmatprep.mubr.msk.bf16.mxu0 %vm9607_vm1, %v12652_v21 }
 0x2e4   : > { %v8719_v30 = vpop.f32.mrb[251].mxu1  ;;  %v4914_v45 = vsel %vm1972_vm7, %v4911_v36, %v4913_v51 }
 0x2e5   : > { %v3027_v13 = vpop.f32.mrb[248].mxu0  ;;  %v11366_v30 = vld [vmem:[%s9703_s7 + $0x1ec] sm:$0xf] }
 0x2e6   : > { %8969 = vmatmul.mubr.msk.bf16.gmra.mrb[100].mxu1 %vm366_vm2, %v4912_v14  ;;  %v3096_v15 = vadd.f32 %v3027_v13, %v10974_v16  ;;  %v8648_v0 = vpop.f32.mrb[249].mxu0 }
 0x2e7   : > { %8972 = vmatprep.mubr.msk.bf16.mxu1 %vm9607_vm1, %v12652_v21  ;;  %v3030_v43 = vpop.f32.mrb[250].mxu0 }
 0x2e8   : > { %v3097_v50 = vadd.f32 %v3030_v43, %v10981_v47  ;;  %v8649_v12 = vpop.f32.mrb[251].mxu0  ;;  %v11374_v14 = vadd.f32 %v3452_v5, %v3096_v15  ;;  %v12718_v47 = vld [vmem:[#allocation5_spill] sm:$0xff] }
 0x2e9   : > { %v3460_v33 = vpop.f32.mrb[252].mxu1  ;;  %v4615_v43 = vrot.slane %v12718_v47, 1 }
 0x2ea   : > { %v8722_v13 = vpop.f32.mrb[253].mxu1  ;;  %8899 = vmatmul.mubr.msk.bf16.gmra.mrb[100].mxu0 %vm366_vm2, %v4614_v44  ;;  %v11378_v0 = vadd.f32 %v3455_v52, %v3097_v50  ;;  %v12719_v44 = vld [vmem:[#allocation6_spill] sm:$0xff]  ;;  %v11393_v50 = vld [vmem:[%s9703_s7 + $0x1f8] sm:$0xf] }
 0x2eb   : > { %v3463_v59 = vpop.f32.mrb[254].mxu1  ;;  %8902 = vmatprep.mubr.msk.bf16.mxu0 %vm9607_vm1, %v12652_v21  ;;  %v4915_v13 = vrot.slane %v12719_v44, 2  ;;  %v4616_v52 = vsel %vm330_vm3, %v4613_v41, %v4615_v43  ;;  %12720 = vst [vmem:[#allocation29_spill] sm:$0xff] %v11393_v50 }
 0x2ec   : > { %12717 = vst [vmem:[#allocation28_spill] sm:$0xff] %v11378_v0  ;;  %v8723_v48 = vpop.f32.mrb[255].mxu1 }
 0x2ed   : > { %v3035_v12 = vpop.f32.mrb[252].mxu0  ;;  %v11390_v48 = vld [vmem:[%s9703_s7 + $0x1f4] sm:$0xf]  ;;  %v4916_v41 = vsel %vm1972_vm7, %v4913_v51, %v4915_v13 }
 0x2ee   : > { %8973 = vmatmul.mubr.msk.bf16.gmra.mrb[104].mxu1 %vm366_vm2, %v4914_v45  ;;  %v3098_v5 = vadd.f32 %v3035_v12, %v10998_v1  ;;  %v8652_v15 = vpop.f32.mrb[253].mxu0 }
 0x2ef   : > { %8976 = vmatprep.mubr.msk.bf16.mxu1 %vm9607_vm1, %v12652_v21  ;;  %v3038_v36 = vpop.f32.mrb[254].mxu0 }
 0x2f0   : > { %v3099_v47 = vadd.f32 %v3038_v36, %v11005_v11  ;;  %v8653_v16 = vpop.f32.mrb[255].mxu0  ;;  %v11398_v45 = vadd.f32 %v3460_v33, %v3098_v5  ;;  %v12723_v11 = vld [vmem:[#allocation7_spill] sm:$0xff] }
 0x2f1   : > { %v3468_v60 = vpop.f32.mrb[0].mxu1  ;;  %v4617_v16 = vrot.slane %v12723_v11, 1 }
 0x2f2   : > { %12721 = vst [vmem:[#allocation30_spill] sm:$0xff] %v11398_v45  ;;  %v8726_v12 = vpop.f32.mrb[1].mxu1  ;;  %8903 = vmatmul.mubr.msk.bf16.gmra.mrb[104].mxu0 %vm366_vm2, %v4616_v52  ;;  %v11402_v44 = vadd.f32 %v3463_v59, %v3099_v47  ;;  %v12724_v52 = vld [vmem:[#allocation8_spill] sm:$0xff]  ;;  %v11417_v47 = vld [vmem:[%s9703_s7 + $0x200] sm:$0xf] }
 0x2f3   : > { %v3471_v15 = vpop.f32.mrb[2].mxu1  ;;  %8906 = vmatprep.mubr.msk.bf16.mxu0 %vm9607_vm1, %v12652_v21  ;;  %v4917_v12 = vrot.slane %v12724_v52, 2  ;;  %v4618_v59 = vsel %vm330_vm3, %v4615_v43, %v4617_v16 }
 0x2f4   : > { %12722 = vst [vmem:[#allocation31_spill] sm:$0xff] %v11402_v44  ;;  %v8727_v0 = vpop.f32.mrb[3].mxu1 }
 0x2f5   : > { %v3043_v36 = vpop.f32.mrb[0].mxu0  ;;  %v11414_v0 = vld [vmem:[%s9703_s7 + $0x1fc] sm:$0xf]  ;;  %v4918_v43 = vsel %vm1972_vm7, %v4915_v13, %v4917_v12 }
 0x2f6   : > { %8977 = vmatmul.mubr.msk.bf16.gmra.mrb[108].mxu1 %vm366_vm2, %v4916_v41  ;;  %v3100_v33 = vadd.f32 %v3043_v36, %v11022_v55  ;;  %v8656_v5 = vpop.f32.mrb[1].mxu0  ;;  %12725 = vst [vmem:[#allocation32_spill] sm:$0xff] %v11414_v0 }
 0x2f7   : > { %8980 = vmatprep.mubr.msk.bf16.mxu1 %vm9607_vm1, %v12652_v21  ;;  %v3046_v51 = vpop.f32.mrb[2].mxu0 }
 0x2f8   : > { %v3101_v11 = vadd.f32 %v3046_v51, %v11029_v40  ;;  %v8657_v1 = vpop.f32.mrb[3].mxu0  ;;  %v11422_v41 = vadd.f32 %v3468_v60, %v3100_v33  ;;  %v12728_v40 = vld [vmem:[#allocation9_spill] sm:$0xff] }
 0x2f9   : > { %v3476_v44 = vpop.f32.mrb[4].mxu1  ;;  %v4619_v1 = vrot.slane %v12728_v40, 1 }
 0x2fa   : > { %12726 = vst [vmem:[#allocation33_spill] sm:$0xff] %v11422_v41  ;;  %v8730_v36 = vpop.f32.mrb[5].mxu1  ;;  %8907 = vmatmul.mubr.msk.bf16.gmra.mrb[108].mxu0 %vm366_vm2, %v4618_v59  ;;  %v11426_v52 = vadd.f32 %v3471_v15, %v3101_v11  ;;  %v12729_v59 = vld [vmem:[#allocation10_spill] sm:$0xff]  ;;  %v11441_v11 = vld [vmem:[%s9703_s7 + $0x208] sm:$0xf] }
 0x2fb   : > { %v3479_v5 = vpop.f32.mrb[6].mxu1  ;;  %8910 = vmatprep.mubr.msk.bf16.mxu0 %vm9607_vm1, %v12652_v21  ;;  %v4919_v36 = vrot.slane %v12729_v59, 2  ;;  %v4620_v15 = vsel %vm330_vm3, %v4617_v16, %v4619_v1  ;;  %12731 = vst [vmem:[#allocation5_spill] sm:$0xff] %v11441_v11 }
 0x2fc   : > { %12727 = vst [vmem:[#allocation34_spill] sm:$0xff] %v11426_v52  ;;  %v8731_v45 = vpop.f32.mrb[7].mxu1 }
 0x2fd   : > { %v3051_v51 = vpop.f32.mrb[4].mxu0  ;;  %v11438_v45 = vld [vmem:[%s9703_s7 + $0x204] sm:$0xf]  ;;  %v4920_v16 = vsel %vm1972_vm7, %v4917_v12, %v4919_v36 }
 0x2fe   : > { %8981 = vmatmul.mubr.msk.bf16.gmra.mrb[112].mxu1 %vm366_vm2, %v4918_v43  ;;  %v3102_v60 = vadd.f32 %v3051_v51, %v11046_v53  ;;  %v8660_v33 = vpop.f32.mrb[5].mxu0  ;;  %12730 = vst [vmem:[#allocation35_spill] sm:$0xff] %v11438_v45 }
 0x2ff   : > { %8984 = vmatprep.mubr.msk.bf16.mxu1 %vm9607_vm1, %v12652_v21  ;;  %v3054_v13 = vpop.f32.mrb[6].mxu0 }
 0x300   : > { %v3103_v40 = vadd.f32 %v3054_v13, %v11053_v22  ;;  %v8661_v55 = vpop.f32.mrb[7].mxu0  ;;  %v11446_v43 = vadd.f32 %v3476_v44, %v3102_v60  ;;  %v12734_v22 = vld [vmem:[#allocation11_spill] sm:$0xff] }
 0x301   : > { %v3484_v52 = vpop.f32.mrb[8].mxu1  ;;  %v4621_v55 = vrot.slane %v12734_v22, 1 }
 0x302   : > { %12732 = vst [vmem:[#allocation6_spill] sm:$0xff] %v11446_v43  ;;  %v8734_v51 = vpop.f32.mrb[9].mxu1  ;;  %8911 = vmatmul.mubr.msk.bf16.gmra.mrb[112].mxu0 %vm366_vm2, %v4620_v15  ;;  %v11450_v59 = vadd.f32 %v3479_v5, %v3103_v40  ;;  %v12735_v15 = vld [vmem:[#allocation12_spill] sm:$0xff] }
 0x303   : > { %v3487_v33 = vpop.f32.mrb[10].mxu1  ;;  %8914 = vmatprep.mubr.msk.bf16.mxu0 %vm9607_vm1, %v12652_v21  ;;  %v4921_v51 = vrot.slane %v12735_v15, 2  ;;  %v4622_v5 = vsel %vm330_vm3, %v4619_v1, %v4621_v55  ;;  %v11465_v40 = vld [vmem:[%s9703_s7 + $0x210] sm:$0xf] }
 0x304   : > { %12733 = vst [vmem:[#allocation7_spill] sm:$0xff] %v11450_v59  ;;  %v8735_v41 = vpop.f32.mrb[11].mxu1  ;;  %12737 = vst [vmem:[#allocation9_spill] sm:$0xff] %v11465_v40 }
 0x305   : > { %v3059_v13 = vpop.f32.mrb[8].mxu0  ;;  %v11462_v41 = vld [vmem:[%s9703_s7 + $0x20c] sm:$0xf]  ;;  %v4922_v1 = vsel %vm1972_vm7, %v4919_v36, %v4921_v51 }
 0x306   : > { %8985 = vmatmul.mubr.msk.bf16.gmra.mrb[116].mxu1 %vm366_vm2, %v4920_v16  ;;  %v3104_v44 = vadd.f32 %v3059_v13, %v11070_v32  ;;  %v8664_v60 = vpop.f32.mrb[9].mxu0  ;;  %12736 = vst [vmem:[#allocation8_spill] sm:$0xff] %v11462_v41 }
 0x307   : > { %8988 = vmatprep.mubr.msk.bf16.mxu1 %vm9607_vm1, %v12652_v21  ;;  %v3062_v12 = vpop.f32.mrb[10].mxu0 }
 0x308   : > { %v3105_v22 = vadd.f32 %v3062_v12, %v11077_v57  ;;  %v8665_v53 = vpop.f32.mrb[11].mxu0  ;;  %v11470_v16 = vadd.f32 %v3484_v52, %v3104_v44  ;;  %v12740_v57 = vld [vmem:[#allocation13_spill] sm:$0xff] }
 0x309   : > { %v3492_v59 = vpop.f32.mrb[12].mxu1  ;;  %v4623_v53 = vrot.slane %v12740_v57, 1 }
 0x30a   : > { %12738 = vst [vmem:[#allocation10_spill] sm:$0xff] %v11470_v16  ;;  %v8738_v13 = vpop.f32.mrb[13].mxu1  ;;  %8915 = vmatmul.mubr.msk.bf16.gmra.mrb[116].mxu0 %vm366_vm2, %v4622_v5  ;;  %v11474_v15 = vadd.f32 %v3487_v33, %v3105_v22  ;;  %v12741_v5 = vld [vmem:[#allocation14_spill] sm:$0xff]  ;;  %v11489_v22 = vld [vmem:[%s9703_s7 + $0x218] sm:$0xf] }
 0x30b   : > { %v3495_v60 = vpop.f32.mrb[14].mxu1  ;;  %8918 = vmatprep.mubr.msk.bf16.mxu0 %vm9607_vm1, %v12652_v21  ;;  %v4923_v13 = vrot.slane %v12741_v5, 2  ;;  %v4624_v33 = vsel %vm330_vm3, %v4621_v55, %v4623_v53  ;;  %12743 = vst [vmem:[#allocation13_spill] sm:$0xff] %v11489_v22 }
 0x30c   : > { %12739 = vst [vmem:[#allocation11_spill] sm:$0xff] %v11474_v15  ;;  %v8739_v43 = vpop.f32.mrb[15].mxu1 }
 0x30d   : > { %v3067_v12 = vpop.f32.mrb[12].mxu0  ;;  %v11486_v43 = vld [vmem:[%s9703_s7 + $0x214] sm:$0xf]  ;;  %v4924_v55 = vsel %vm1972_vm7, %v4921_v51, %v4923_v13 }
 0x30e   : > { %8989 = vmatmul.mubr.msk.bf16.gmra.mrb[120].mxu1 %vm366_vm2, %v4922_v1  ;;  %v3106_v52 = vadd.f32 %v3067_v12, %v11094_v8  ;;  %v8668_v44 = vpop.f32.mrb[13].mxu0  ;;  %12742 = vst [vmem:[#allocation12_spill] sm:$0xff] %v11486_v43 }
 0x30f   : > { %8992 = vmatprep.mubr.msk.bf16.mxu1 %vm9607_vm1, %v12652_v21  ;;  %v3070_v36 = vpop.f32.mrb[14].mxu0 }
 0x310   : > { %v3107_v57 = vadd.f32 %v3070_v36, %v11101_v2  ;;  %v8669_v32 = vpop.f32.mrb[15].mxu0  ;;  %v11494_v1 = vadd.f32 %v3492_v59, %v3106_v52  ;;  %v12746_v2 = vld [vmem:[#allocation15_spill] sm:$0xff] }
 0x311   : > { %v4429_v15 = vpop.f32.mrb[16].mxu1  ;;  %v4625_v32 = vrot.slane %v12746_v2, 1 }
 0x312   : > { %12744 = vst [vmem:[#allocation14_spill] sm:$0xff] %v11494_v1  ;;  %v8814_v12 = vpop.f32.mrb[17].mxu1  ;;  %8919 = vmatmul.mubr.msk.bf16.gmra.mrb[120].mxu0 %vm366_vm2, %v4624_v33  ;;  %v11498_v5 = vadd.f32 %v3495_v60, %v3107_v57  ;;  %v12747_v33 = vld [vmem:[#allocation16_spill] sm:$0xff]  ;;  %v11513_v57 = vld [vmem:[%s9703_s7 + $0x220] sm:$0xf] }
 0x313   : > { %v4432_v44 = vpop.f32.mrb[18].mxu1  ;;  %8922 = vmatprep.mubr.msk.bf16.mxu0 %vm9607_vm1, %v12652_v21  ;;  %v4925_v12 = vrot.slane %v12747_v33, 2  ;;  %v4626_v60 = vsel %vm330_vm3, %v4623_v53, %v4625_v32  ;;  %12749 = vst [vmem:[#allocation16_spill] sm:$0xff] %v11513_v57 }
 0x314   : > { %12745 = vst [vmem:[#allocation36_spill] sm:$0xff] %v11498_v5  ;;  %v8815_v16 = vpop.f32.mrb[19].mxu1 }
 0x315   : > { %v3886_v36 = vpop.f32.mrb[16].mxu0  ;;  %v11510_v16 = vld [vmem:[%s9703_s7 + $0x21c] sm:$0xf]  ;;  %v4926_v53 = vsel %vm1972_vm7, %v4923_v13, %v4925_v12 }
 0x316   : > { %8993 = vmatmul.mubr.msk.bf16.gmra.mrb[124].mxu1 %vm366_vm2, %v4924_v55  ;;  %v4021_v59 = vadd.f32 %v3886_v36, %v11118_v17  ;;  %v8744_v52 = vpop.f32.mrb[17].mxu0  ;;  %12748 = vst [vmem:[#allocation15_spill] sm:$0xff] %v11510_v16 }
 0x317   : > { %8996 = vmatprep.mubr.msk.bf16.mxu1 %vm9607_vm1, %v12652_v21  ;;  %v3889_v51 = vpop.f32.mrb[18].mxu0 }
 0x318   : > { %v4022_v2 = vadd.f32 %v3889_v51, %v11125_v56  ;;  %v8745_v8 = vpop.f32.mrb[19].mxu0  ;;  %v11518_v55 = vadd.f32 %v4429_v15, %v4021_v59  ;;  %v12752_v56 = vld [vmem:[#allocation17_spill] sm:$0xff] }
 0x319   : > { %v4437_v5 = vpop.f32.mrb[20].mxu1  ;;  %v4627_v8 = vrot.slane %v12752_v56, 1 }
 0x31a   : > { %12750 = vst [vmem:[#allocation37_spill] sm:$0xff] %v11518_v55  ;;  %v8818_v36 = vpop.f32.mrb[21].mxu1  ;;  %8923 = vmatmul.mubr.msk.bf16.gmra.mrb[124].mxu0 %vm366_vm2, %v4626_v60  ;;  %v11522_v33 = vadd.f32 %v4432_v44, %v4022_v2  ;;  %v12753_v60 = vld [vmem:[#allocation18_spill] sm:$0xff]  ;;  %v11537_v2 = vld [vmem:[%s9703_s7 + $0x228] sm:$0xf] }
 0x31b   : > { %v4440_v52 = vpop.f32.mrb[22].mxu1  ;;  %8926 = vmatprep.mubr.msk.bf16.mxu0 %vm9607_vm1, %v12652_v21  ;;  %v4927_v36 = vrot.slane %v12753_v60, 2  ;;  %v4628_v44 = vsel %vm330_vm3, %v4625_v32, %v4627_v8  ;;  %12755 = vst [vmem:[#allocation18_spill] sm:$0xff] %v11537_v2 }
 0x31c   : > { %12751 = vst [vmem:[#allocation38_spill] sm:$0xff] %v11522_v33  ;;  %v8819_v1 = vpop.f32.mrb[23].mxu1 }
 0x31d   : > { %v3894_v51 = vpop.f32.mrb[20].mxu0  ;;  %v11534_v1 = vld [vmem:[%s9703_s7 + $0x224] sm:$0xf]  ;;  %v4928_v32 = vsel %vm1972_vm7, %v4925_v12, %v4927_v36 }
 0x31e   : > { %8997 = vmatmul.mubr.msk.bf16.gmra.mrb[128].mxu1 %vm366_vm2, %v4926_v53  ;;  %v4023_v15 = vadd.f32 %v3894_v51, %v11142_v46  ;;  %v8748_v59 = vpop.f32.mrb[21].mxu0  ;;  %12754 = vst [vmem:[#allocation17_spill] sm:$0xff] %v11534_v1 }
 0x31f   : > { %9000 = vmatprep.mubr.msk.bf16.mxu1 %vm9607_vm1, %v12652_v21  ;;  %v3897_v13 = vpop.f32.mrb[22].mxu0 }
 0x320   : > { %v4024_v56 = vadd.f32 %v3897_v13, %v11149_v9  ;;  %v8749_v17 = vpop.f32.mrb[23].mxu0  ;;  %v11542_v53 = vadd.f32 %v4437_v5, %v4023_v15  ;;  %v12758_v9 = vld [vmem:[#allocation19_spill] sm:$0xff] }
 0x321   : > { %v4445_v33 = vpop.f32.mrb[24].mxu1  ;;  %v4629_v17 = vrot.slane %v12758_v9, 1 }
 0x322   : > { %12756 = vst [vmem:[#allocation39_spill] sm:$0xff] %v11542_v53  ;;  %v8822_v51 = vpop.f32.mrb[25].mxu1  ;;  %8927 = vmatmul.mubr.msk.bf16.gmra.mrb[128].mxu0 %vm366_vm2, %v4628_v44  ;;  %v11546_v60 = vadd.f32 %v4440_v52, %v4024_v56  ;;  %v12759_v44 = vld [vmem:[#allocation20_spill] sm:$0xff] }
 0x323   : > { %v4448_v59 = vpop.f32.mrb[26].mxu1  ;;  %8930 = vmatprep.mubr.msk.bf16.mxu0 %vm9607_vm1, %v12652_v21  ;;  %v4929_v51 = vrot.slane %v12759_v44, 2  ;;  %v4630_v52 = vsel %vm330_vm3, %v4627_v8, %v4629_v17  ;;  %v11561_v56 = vld [vmem:[%s9703_s7 + $0x230] sm:$0xf] }
 0x324   : > { %12757 = vst [vmem:[#allocation40_spill] sm:$0xff] %v11546_v60  ;;  %v8823_v55 = vpop.f32.mrb[27].mxu1  ;;  %12761 = vst [vmem:[#allocation20_spill] sm:$0xff] %v11561_v56 }
 0x325   : > { %v3902_v13 = vpop.f32.mrb[24].mxu0  ;;  %v11558_v55 = vld [vmem:[%s9703_s7 + $0x22c] sm:$0xf]  ;;  %v4930_v8 = vsel %vm1972_vm7, %v4927_v36, %v4929_v51 }
 0x326   : > { %9001 = vmatmul.mubr.msk.bf16.gmra.mrb[132].mxu1 %vm366_vm2, %v4928_v32  ;;  %v4025_v5 = vadd.f32 %v3902_v13, %v11166_v27  ;;  %v8752_v15 = vpop.f32.mrb[25].mxu0  ;;  %12760 = vst [vmem:[#allocation19_spill] sm:$0xff] %v11558_v55 }
 0x327   : > { %9004 = vmatprep.mubr.msk.bf16.mxu1 %vm9607_vm1, %v12652_v21  ;;  %v3905_v12 = vpop.f32.mrb[26].mxu0 }
 0x328   : > { %v4026_v9 = vadd.f32 %v3905_v12, %v11173_v26  ;;  %v8753_v46 = vpop.f32.mrb[27].mxu0  ;;  %v11566_v32 = vadd.f32 %v4445_v33, %v4025_v5  ;;  %v12764_v26 = vld [vmem:[#allocation21_spill] sm:$0xff] }
 0x329   : > { %v4453_v60 = vpop.f32.mrb[28].mxu1  ;;  %v4631_v46 = vrot.slane %v12764_v26, 1 }
 0x32a   : > { %12762 = vst [vmem:[#allocation41_spill] sm:$0xff] %v11566_v32  ;;  %v8826_v13 = vpop.f32.mrb[29].mxu1  ;;  %8931 = vmatmul.mubr.msk.bf16.gmra.mrb[132].mxu0 %vm366_vm2, %v4630_v52  ;;  %v11570_v44 = vadd.f32 %v4448_v59, %v4026_v9  ;;  %v12765_v52 = vld [vmem:[#allocation22_spill] sm:$0xff]  ;;  %v11585_v9 = vld [vmem:[%s9703_s7 + $0x238] sm:$0xf] }
 0x32b   : > { %v4456_v15 = vpop.f32.mrb[30].mxu1  ;;  %8934 = vmatprep.mubr.msk.bf16.mxu0 %vm9607_vm1, %v12652_v21  ;;  %v4931_v13 = vrot.slane %v12765_v52, 2  ;;  %v4632_v59 = vsel %vm330_vm3, %v4629_v17, %v4631_v46  ;;  %12767 = vst [vmem:[#allocation22_spill] sm:$0xff] %v11585_v9 }
 0x32c   : > { %12763 = vst [vmem:[#allocation42_spill] sm:$0xff] %v11570_v44  ;;  %v8827_v53 = vpop.f32.mrb[31].mxu1 }
 0x32d   : > { %v3910_v12 = vpop.f32.mrb[28].mxu0  ;;  %v11582_v53 = vld [vmem:[%s9703_s7 + $0x234] sm:$0xf]  ;;  %v4932_v17 = vsel %vm1972_vm7, %v4929_v51, %v4931_v13 }
 0x32e   : > { %9005 = vmatmul.mubr.msk.bf16.gmra.mrb[136].mxu1 %vm366_vm2, %v4930_v8  ;;  %v4027_v33 = vadd.f32 %v3910_v12, %v11190_v23  ;;  %v8756_v5 = vpop.f32.mrb[29].mxu0  ;;  %12766 = vst [vmem:[#allocation21_spill] sm:$0xff] %v11582_v53 }
 0x32f   : > { %9008 = vmatprep.mubr.msk.bf16.mxu1 %vm9607_vm1, %v12652_v21  ;;  %v3913_v36 = vpop.f32.mrb[30].mxu0 }
 0x330   : > { %v4028_v26 = vadd.f32 %v3913_v36, %v11197_v24  ;;  %v8757_v27 = vpop.f32.mrb[31].mxu0  ;;  %v11590_v12 = vadd.f32 %v4453_v60, %v4027_v33  ;;  %v4633_v24 = vrot.slane %v11178_v3, 1  ;;  %v5737_v60 = vld [vmem:[%s9703_s7 + $0x1d0] sm:$0x8]  ;;  %v11610_v3 = vld [vmem:[%s9703_s7 + $0x240] sm:$0xf] }
 0x331   : > { %v4461_v8 = vpop.f32.mrb[32].mxu1  ;;  %12772 = vst [vmem:[#allocation45_spill] sm:$0xff] %v11610_v3  ;;  %v11640_v3 = vld [vmem:[%s9703_s7 + $0x248] sm:$0xf] }
 0x332   : > { %12768 = vst [vmem:[#allocation43_spill] sm:$0xff] %v11590_v12  ;;  %v8830_v5 = vpop.f32.mrb[33].mxu1  ;;  %8935 = vmatmul.mubr.msk.bf16.gmra.mrb[136].mxu0 %vm366_vm2, %v4632_v59  ;;  %v11594_v44 = vadd.f32 %v4456_v15, %v4028_v26  ;;  %v12770_v59 = vld [vmem:[#allocation24_spill] sm:$0xff]  ;;  %v11607_v26 = vld [vmem:[%s9703_s7 + $0x23c] sm:$0xf]  ;;  %12777 = vst [vmem:[#allocation48_spill] sm:$0xff] %v11640_v3 }
 0x333   : > { %v4464_v52 = vpop.f32.mrb[34].mxu1  ;;  %8938 = vmatprep.mubr.msk.bf16.mxu0 %vm9607_vm1, %v12652_v21  ;;  %v4933_v51 = vrot.slane %v12770_v59, 2  ;;  %12771 = vst [vmem:[#allocation24_spill] sm:$0xff] %v11607_v26 }
 0x334   : > { %12769 = vst [vmem:[#allocation44_spill] sm:$0xff] %v11594_v44  ;;  %v8831_v32 = vpop.f32.mrb[35].mxu1 }
 0x335   : > { %v3918_v27 = vpop.f32.mrb[32].mxu0  ;;  %v4634_v32 = vsel %vm330_vm3, %v4631_v46, %v4633_v24  ;;  %v7631_v46 = vcombine.low %v11297_v54, %v11318_v7  ;;  %v4934_v12 = vsel %vm1972_vm7, %v4931_v13, %v4933_v51 }
 0x336   : > { %9009 = vmatmul.mubr.msk.bf16.gmra.mrb[140].mxu1 %vm366_vm2, %v4932_v17  ;;  %v4029_v33 = vadd.f32 %v3918_v27, %v11214_v31  ;;  %v8760_v36 = vpop.f32.mrb[33].mxu0  ;;  %v7630_v27 = vcombine.low %v5737_v60, %v11294_v20 }
 0x337   : > { %9012 = vmatprep.mubr.msk.bf16.mxu1 %vm9607_vm1, %v12652_v21  ;;  %v3921_v15 = vpop.f32.mrb[34].mxu0  ;;  %v5871_v36 = vshrl.u32 %v7631_v46, 16  ;;  %v5874_v13 = vshll.u32 %v7631_v46, 16 }
 0x338   : > { %v4030_v5 = vadd.f32 %v3921_v15, %v11218_v28  ;;  %v8761_v17 = vpop.f32.mrb[35].mxu0  ;;  %v11616_v59 = vadd.f32 %v4461_v8, %v4029_v33  ;;  %v5194_v28 = vld [vmem:[%s9703_s7 + $0x138] sm:$0xc]  ;;  %v5195_v15 = vld [vmem:[%s9703_s7 + $0x13c] sm:$0xf]  ;;  %v4635_v8 = vrot.slane %v11202_v63, 1 }
 0x339   : > { %v4469_v31 = vpop.f32.mrb[36].mxu1  ;;  %v5863_v60 = vshrl.u32 %v7630_v27, 16  ;;  %v7594_v7 = vcombine.low %v5194_v28, %v5195_v15  ;;  %v5876_v26 = vrot.slane %v5874_v13, 4  ;;  %v9483_v13 = vld [vmem:[%s9703_s7 + $0x148] sm:$0xff]  }
 0x33a   : > { %12773 = vst [vmem:[#allocation46_spill] sm:$0xff] %v11616_v59  ;;  %v8834_v23 = vpop.f32.mrb[37].mxu1  ;;  %8939 = vmatmul.mubr.msk.bf16.gmra.mrb[140].mxu0 %vm366_vm2, %v4634_v32  ;;  %v11624_v17 = vadd.f32 %v4464_v52, %v4030_v5  ;;  %v5866_v32 = vshll.u32 %v7630_v27, 16  ;;  %v4636_v20 = vsel %vm330_vm3, %v4633_v24, %v4635_v8  ;;  %v11637_v59 = vld [vmem:[%s9703_s7 + $0x244] sm:$0xf] }
 0x33b   : > { %v4472_v44 = vpop.f32.mrb[38].mxu1  ;;  %8942 = vmatprep.mubr.msk.bf16.mxu0 %vm9607_vm1, %v12652_v21  ;;  %v9480_v23 = vld [vmem:[%s9703_s7 + $0x140] sm:$0xff]   ;;  %v5865_v28 = vrot.slane %v5863_v60, 3  ;;  %v5320_v24 = vshrl.u32 %v7594_v7, 16  ;;  %v7632_v60 = vcombine.low %v11321_v18, %v11342_v62 }
 0x33c   : > { %12774 = vst [vmem:[#allocation47_spill] sm:$0xff] %v11624_v17  ;;  %v8835_v9 = vpop.f32.mrb[39].mxu1  ;;  %v5328_v17 = vshrl.u32 %v9480_v23, 16 }
 0x33d   : > { %v3926_v33 = vpop.f32.mrb[36].mxu0  ;;  %v12775_v9 = vld [vmem:[#allocation23_spill] sm:$0xff] }
 0x33e   : > { %9013 = vmatmul.mubr.msk.bf16.gmra.mrb[144].mxu1 %vm366_vm2, %v4934_v12  ;;  %v4031_v52 = vadd.f32 %v3926_v33, %v11234_v35  ;;  %v8764_v5 = vpop.f32.mrb[37].mxu0  ;;  %v4935_v54 = vrot.slane %v12775_v9, 2  ;;  %12776 = vst [vmem:[#allocation23_spill] sm:$0xff] %v11637_v59  ;;  %v5873_v9 = vrot.slane %v5871_v36, 3  ;;  %v5331_v36 = vshll.u32 %v9480_v23, 16 }
 0x33f   : > { %9016 = vmatprep.mubr.msk.bf16.mxu1 %vm9607_vm1, %v12652_v21  ;;  %v3929_v63 = vpop.f32.mrb[38].mxu0  ;;  %v5868_v5 = vrot.slane %v5866_v32, 4  ;;  %v5883_v23 = vshll.u32 %v7632_v60, 16  ;;  %v11665_v35 = vld [vmem:[%s9703_s7 + $0x24c] sm:$0xf] }
 0x340   : > { %v4032_v12 = vadd.f32 %v3929_v63, %v11239_v10  ;;  %v8765_v27 = vpop.f32.mrb[39].mxu0  ;;  %v11645_v15 = vadd.f32 %v4469_v31, %v4031_v52  ;;  %v4936_v53 = vsel %vm1972_vm7, %v4933_v51, %v4935_v54  ;;  %v5323_v10 = vshll.u32 %v7594_v7, 16  ;;  %12778 = vst [vmem:[#allocation49_spill] sm:$0xff] %v11665_v35 }
 0x341   : > { %v4477_v46 = vpop.f32.mrb[40].mxu1  ;;  %v4637_v31 = vrot.slane %v11223_v6, 1  ;;  %v11657_v54 = vor.u32 %v5876_v26, %v5873_v9  ;;  %v5322_v7 = vrot.slane %v5320_v24, 2  ;;  %v5330_v51 = vrot.slane %v5328_v17, 2  ;;  %v11668_v26 = vld [vmem:[%s9703_s7 + $0x250] sm:$0xf] }
 0x342   : > { %v8838_v33 = vpop.f32.mrb[41].mxu1  ;;  %8943 = vmatmul.mubr.msk.bf16.gmra.mrb[144].mxu0 %vm366_vm2, %v4636_v20  ;;  %v11651_v63 = vadd.f32 %v4472_v44, %v4032_v12  ;;  %v5869_v20 = vor.u32 %v5868_v5, %v5865_v28  ;;  %v5325_v12 = vrot.slane %v5323_v10, 3  ;;  %v5880_v6 = vshrl.u32 %v7632_v60, 16  ;;  %12779 = vst [vmem:[#allocation50_spill] sm:$0xff] %v11668_v26 }
 0x343   : > { %v4480_v56 = vpop.f32.mrb[42].mxu1  ;;  %8946 = vmatprep.mubr.msk.bf16.mxu0 %vm9607_vm1, %v12652_v21  ;;  %v5337_v60 = vshrl.u32 %v9483_v13, 16 }
 0x344   : > { %v8839_v27 = vpop.f32.mrb[43].mxu1 }
 0x345   : > { %v3934_v32 = vpop.f32.mrb[40].mxu0  ;;  %v4638_v27 = vsel %vm330_vm3, %v4635_v8, %v4637_v31  ;;  %v5878_v8 = vsel %vm3114_vm8, %v5869_v20, %v11657_v54  ;;  %v7633_v31 = vcombine.low %v11345_v25, %v11366_v30 }
 0x346   : > { %9017 = vmatmul.mubr.msk.bf16.gmra.mrb[148].mxu1 %vm366_vm2, %v4936_v53  ;;  %v4033_v44 = vadd.f32 %v3934_v32, %v11255_v34  ;;  %v8768_v52 = vpop.f32.mrb[41].mxu0  ;;  %v5333_v53 = vrot.slane %v5331_v36, 3  ;;  %v7684_v34 = vld [vmem:[%s12532_s1 + $0x1e] sm:$0x3]  ;;  %v5882_v36 = vrot.slane %v5880_v6, 3  ;;  %v5885_v32 = vrot.slane %v5883_v23, 4 }
 0x347   : > { %9092 = vmatprep.mubr.msk.bf16.mxu1 %vm9607_vm1, %v12652_v21  ;;  %v3937_v33 = vpop.f32.mrb[42].mxu0  ;;  %v5340_v52 = vshll.u32 %v9483_v13, 16  ;;  %v6649_v20 = vsel %vm418_vm0, %v7684_v34, 0  ;;  %v7665_v13 = vld [vmem:[%s12532_s1 + $0x1c] sm:$0x3]  ;;  %v5892_v6 = vshll.u32 %v7633_v31, 16 }
 0x348   : > { %v4034_v17 = vadd.f32 %v3937_v33, %v11259_v19  ;;  %v8769_v28 = vpop.f32.mrb[43].mxu0  ;;  %v11676_v24 = vadd.f32 %v4477_v46, %v4033_v44  ;;  %v5326_v46 = vor.u32 %v5325_v12, %v5322_v7  ;;  %v5334_v44 = vor.u32 %v5333_v53, %v5330_v51  ;;  %v9486_v34 = vld [vmem:[%s9703_s7 + $0x150] sm:$0xff]  }
 0x349   : > { %v4485_v5 = vpop.f32.mrb[44].mxu1  ;;  %v5886_v7 = vor.u32 %v5885_v32, %v5882_v36  ;;  %v5339_v51 = vrot.slane %v5337_v60, 2  ;;  %v5342_v12 = vrot.slane %v5340_v52, 3  ;;  %v5894_v52 = vrot.slane %v5892_v6, 4 }
 0x34a   : > { %v8842_v10 = vpop.f32.mrb[45].mxu1  ;;  %8947 = vmatmul.mubr.msk.bf16.gmra.mrb[148].mxu0 %vm366_vm2, %v4638_v27  ;;  %v11683_v33 = vadd.f32 %v4480_v56, %v4034_v17  ;;  %v5889_v56 = vshrl.u32 %v7633_v31, 16  ;;  %v5335_v17 = vsel %vm2689_vm9, %v5326_v46, %v5334_v44  ;;  %v5349_v6 = vshll.u32 %v9486_v34, 16 }
 0x34b   : > { %v4488_v19 = vpop.f32.mrb[46].mxu1  ;;  %9022 = vmatprep.mubr.msk.bf16.mxu0 %vm9607_vm1, %v12652_v21 }
 0x34c   : > { %v8843_v28 = vpop.f32.mrb[47].mxu1  ;;  %v5891_v32 = vrot.slane %v5889_v56, 3  ;;  %v5346_v56 = vshrl.u32 %v9486_v34, 16 }
 0x34d   : > { %v3942_v10 = vpop.f32.mrb[44].mxu0  ;;  %v11701_v28 = vld [vmem:[%s9703_s7 + $0x258] sm:$0xf] }
 0x34e   : > { %9093 = vmatmul.mubr.msk.bf16.vlgmr.msra.gmra.mrb[152].mxu1 %vm366_vm2, %v5878_v8  ;;  %v4035_v23 = vadd.f32 %v3942_v10, %v11277_v42  ;;  %v8772_v27 = vpop.f32.mrb[45].mxu0  ;;  %v11698_v8 = vld [vmem:[%s9703_s7 + $0x254] sm:$0xf]  ;;  %12781 = vst [vmem:[#allocation52_spill] sm:$0xff] %v11701_v28  ;;  %v6373_v42 = vsel %vm418_vm0, %v7665_v13, 0  ;;  %v5351_v10 = vrot.slane %v5349_v6, 3 }
 0x34f   : > { %9231 = vmatpush3.bf16.msra.mxu1 %v6649_v20  ;;  %9096 = vmatprep.mubr.msk.bf16.mxu1 %vm9607_vm1, %v12652_v21  ;;  %v3945_v53 = vpop.f32.mrb[46].mxu0  ;;  %12780 = vst [vmem:[#allocation51_spill] sm:$0xff] %v11698_v8  ;;  %v5887_v27 = vsel %vm3114_vm8, %v11657_v54, %v5886_v7 }
 0x350   : > { %v4036_v31 = vadd.f32 %v3945_v53, %v11281_v37  ;;  %v8773_v9 = vpop.f32.mrb[47].mxu0  ;;  %v11707_v36 = vadd.f32 %v4485_v5, %v4035_v23  ;;  %v7634_v37 = vcombine.low %v11369_v29, %v11390_v48  ;;  %v5343_v5 = vor.u32 %v5342_v12, %v5339_v51  ;;  %v11724_v51 = vld [vmem:[%s9703_s7 + $0x158] sm:$0xff]  }
 0x351   : > { %v4493_v20 = vpop.f32.mrb[48].mxu1  ;;  %v5895_v53 = vor.u32 %v5894_v52, %v5891_v32 }
 0x352   : > { %v8846_v60 = vpop.f32.mrb[49].mxu1  ;;  %9023 = vmatmul.mubr.msk.bf16.vlgmr.msra.gmra.mrb[152].mxu0 %vm366_vm2, %v5335_v17  ;;  %v11714_v9 = vadd.f32 %v4488_v19, %v4036_v31  ;;  %v5898_v19 = vshrl.u32 %v7634_v37, 16  ;;  %v5901_v31 = vshll.u32 %v7634_v37, 16 }
 0x353   : > { %v4496_v46 = vpop.f32.mrb[50].mxu1  ;;  %9161 = vmatpush3.bf16.msra.mxu0 %v6373_v42  ;;  %9026 = vmatprep.mubr.msk.bf16.mxu0 %vm9607_vm1, %v12652_v21  ;;  %v5344_v60 = vsel %vm2689_vm9, %v5334_v44, %v5343_v5  ;;  %v5896_v52 = vsel %vm3114_vm8, %v5886_v7, %v5895_v53  ;;  %v7635_v44 = vcombine.low %v11393_v50, %v11414_v0  ;;  %v5358_v7 = vshll.u32 %v11724_v51, 16 }
 0x354   : > { %v8847_v13 = vpop.f32.mrb[51].mxu1  ;;  %v5900_v37 = vrot.slane %v5898_v19, 3 }
 0x355   : > { %v3950_v23 = vpop.f32.mrb[48].mxu0  ;;  %v5348_v13 = vrot.slane %v5346_v56, 2 }
 0x356   : > { %9097 = vmatmul.mubr.msk.bf16.gmra.mrb[156].mxu1 %vm366_vm2, %v5887_v27  ;;  %v4037_v54 = vadd.f32 %v3950_v23, %v11302_v38  ;;  %v8776_v17 = vpop.f32.mrb[49].mxu0 }
 0x357   : > { %9100 = vmatprep.mubr.msk.bf16.mxu1 %vm9607_vm1, %v12652_v21  ;;  %v3953_v42 = vpop.f32.mrb[50].mxu0  ;;  %v5903_v17 = vrot.slane %v5901_v31, 4 }
 0x358   : > { %v4038_v12 = vadd.f32 %v3953_v42, %v11306_v39  ;;  %v8777_v34 = vpop.f32.mrb[51].mxu0  ;;  %v11727_v32 = vadd.f32 %v4493_v20, %v4037_v54  ;;  %v5352_v39 = vor.u32 %v5351_v10, %v5348_v13  ;;  %v5355_v20 = vshrl.u32 %v11724_v51, 16 }
 0x359   : > { %v4501_v27 = vpop.f32.mrb[52].mxu1  ;;  %v5907_v42 = vshrl.u32 %v7635_v44, 16  ;;  %v5360_v13 = vrot.slane %v5358_v7, 3 }
 0x35a   : > { %v8850_v38 = vpop.f32.mrb[53].mxu1  ;;  %9027 = vmatmul.mubr.msk.bf16.gmra.mrb[156].mxu0 %vm366_vm2, %v5344_v60  ;;  %v11733_v56 = vadd.f32 %v4496_v46, %v4038_v12  ;;  %v5904_v46 = vor.u32 %v5903_v17, %v5900_v37  ;;  %v5910_v60 = vshll.u32 %v7635_v44, 16  ;;  %v5353_v34 = vsel %vm2689_vm9, %v5343_v5, %v5352_v39 }
 0x35b   : > { %v4504_v23 = vpop.f32.mrb[54].mxu1  ;;  %9030 = vmatprep.mubr.msk.bf16.mxu0 %vm9607_vm1, %v12652_v21  ;;  %v5357_v10 = vrot.slane %v5355_v20, 2  ;;  %v11745_v38 = vld [vmem:[%s9703_s7 + $0x160] sm:$0xff]   ;;  %v5909_v5 = vrot.slane %v5907_v42, 3 }
 0x35c   : > { %v8851_v6 = vpop.f32.mrb[55].mxu1  ;;  %v5905_v17 = vsel %vm3114_vm8, %v5895_v53, %v5904_v46  ;;  %v5912_v44 = vrot.slane %v5910_v60, 4 }
 0x35d   : > { %v3958_v54 = vpop.f32.mrb[52].mxu0 }
 0x35e   : > { %9101 = vmatmul.mubr.msk.bf16.gmra.mrb[160].mxu1 %vm366_vm2, %v5896_v52  ;;  %v4039_v19 = vadd.f32 %v3958_v54, %v11326_v61  ;;  %v8780_v31 = vpop.f32.mrb[53].mxu0  ;;  %v7636_v54 = vcombine.low %v11417_v47, %v11438_v45 }
 0x35f   : > { %9104 = vmatprep.mubr.msk.bf16.mxu1 %vm9607_vm1, %v12652_v21  ;;  %v3961_v12 = vpop.f32.mrb[54].mxu0 }
 0x360   : > { %v4040_v6 = vadd.f32 %v3961_v12, %v11330_v4  ;;  %v8781_v0 = vpop.f32.mrb[55].mxu0  ;;  %v11748_v50 = vadd.f32 %v4501_v27, %v4039_v19  ;;  %v5361_v4 = vor.u32 %v5360_v13, %v5357_v10  ;;  %v5367_v27 = vshll.u32 %v11745_v38, 16 }
 0x361   : > { %v4509_v52 = vpop.f32.mrb[56].mxu1  ;;  %v5364_v0 = vshrl.u32 %v11745_v38, 16  ;;  %v5916_v31 = vshrl.u32 %v7636_v54, 16  ;;  %v5919_v12 = vshll.u32 %v7636_v54, 16 }
 0x362   : > { %v8854_v61 = vpop.f32.mrb[57].mxu1  ;;  %9031 = vmatmul.mubr.msk.bf16.gmra.mrb[160].mxu0 %vm366_vm2, %v5353_v34  ;;  %v11754_v20 = vadd.f32 %v4504_v23, %v4040_v6  ;;  %v5913_v23 = vor.u32 %v5912_v44, %v5909_v5  ;;  %v5362_v34 = vsel %vm2689_vm9, %v5352_v39, %v5361_v4  ;;  %v5369_v13 = vrot.slane %v5367_v27, 3  ;;  %v11766_v6 = vld [vmem:[%s9703_s7 + $0x168] sm:$0xff]  }
 0x363   : > { %v4512_v37 = vpop.f32.mrb[58].mxu1  ;;  %9034 = vmatprep.mubr.msk.bf16.mxu0 %vm9607_vm1, %v12652_v21  ;;  %v5366_v10 = vrot.slane %v5364_v0, 2  ;;  %v7637_v39 = vcombine.low %v11441_v11, %v11462_v41  ;;  %v5376_v27 = vshll.u32 %v11766_v6, 16 }
 0x364   : > { %v8855_v7 = vpop.f32.mrb[59].mxu1  ;;  %v5914_v5 = vsel %vm3114_vm8, %v5904_v46, %v5913_v23 }
 0x365   : > { %v3966_v19 = vpop.f32.mrb[56].mxu0 }
 0x366   : > { %9105 = vmatmul.mubr.msk.bf16.gmra.mrb[164].mxu1 %vm366_vm2, %v5905_v17  ;;  %v4041_v53 = vadd.f32 %v3966_v19, %v11350_v58  ;;  %v8784_v42 = vpop.f32.mrb[57].mxu0  ;;  %v5918_v58 = vrot.slane %v5916_v31, 3  ;;  %v5921_v19 = vrot.slane %v5919_v12, 4 }
 0x367   : > { %9108 = vmatprep.mubr.msk.bf16.mxu1 %vm9607_vm1, %v12652_v21  ;;  %v3969_v60 = vpop.f32.mrb[58].mxu0 }
 0x368   : > { %v4042_v61 = vadd.f32 %v3969_v60, %v11354_v49  ;;  %v8785_v7 = vpop.f32.mrb[59].mxu0  ;;  %v11769_v45 = vadd.f32 %v4509_v52, %v4041_v53  ;;  %v5370_v49 = vor.u32 %v5369_v13, %v5366_v10  ;;  %v5373_v52 = vshrl.u32 %v11766_v6, 16 }
 0x369   : > { %v4517_v17 = vpop.f32.mrb[60].mxu1  ;;  %v5922_v12 = vor.u32 %v5921_v19, %v5918_v58  ;;  %v5928_v60 = vshll.u32 %v7637_v39, 16  ;;  %v5378_v13 = vrot.slane %v5376_v27, 3  ;;  %v11787_v7 = vld [vmem:[%s9703_s7 + $0x170] sm:$0xff]  }
 0x36a   : > { %v8858_v54 = vpop.f32.mrb[61].mxu1  ;;  %9035 = vmatmul.mubr.msk.bf16.gmra.mrb[164].mxu0 %vm366_vm2, %v5362_v34  ;;  %v11775_v44 = vadd.f32 %v4512_v37, %v4042_v61  ;;  %v5925_v37 = vshrl.u32 %v7637_v39, 16  ;;  %v5371_v61 = vsel %vm2689_vm9, %v5361_v4, %v5370_v49  ;;  %v5375_v10 = vrot.slane %v5373_v52, 2  ;;  %12782 = vst [vmem:[#allocation53_spill] sm:$0xff] %v11787_v7 }
 0x36b   : > { %v4520_v42 = vpop.f32.mrb[62].mxu1  ;;  %9038 = vmatprep.mubr.msk.bf16.mxu0 %vm9607_vm1, %v12652_v21  ;;  %v12783_v54 = vld [vmem:[#allocation28_spill] sm:$0xff]  ;;  %v5923_v19 = vsel %vm3114_vm8, %v5913_v23, %v5922_v12  ;;  %v7638_v4 = vcombine.low %v11465_v40, %v11486_v43  ;;  %v5385_v23 = vshll.u32 %v11787_v7, 16  ;;  %v12786_v43 = vld [vmem:[#allocation31_spill] sm:$0xff] }
 0x36c   : > { %v8859_v0 = vpop.f32.mrb[63].mxu1  ;;  %v5927_v39 = vrot.slane %v5925_v37, 3  ;;  %v12784_v37 = vld [vmem:[#allocation30_spill] sm:$0xff] }
 0x36d   : > { %v3974_v31 = vpop.f32.mrb[60].mxu0 }
 0x36e   : > { %9109 = vmatmul.mubr.msk.bf16.gmra.mrb[168].mxu1 %vm366_vm2, %v5914_v5  ;;  %v4043_v46 = vadd.f32 %v3974_v31, %v11374_v14  ;;  %v8788_v53 = vpop.f32.mrb[61].mxu0 }
 0x36f   : > { %9112 = vmatprep.mubr.msk.bf16.mxu1 %vm9607_vm1, %v12652_v21  ;;  %v3977_v34 = vpop.f32.mrb[62].mxu0  ;;  %v5930_v53 = vrot.slane %v5928_v60, 4 }
 0x370   : > { %v4044_v0 = vadd.f32 %v3977_v34, %v12783_v54  ;;  %v8789_v41 = vpop.f32.mrb[63].mxu0  ;;  %v11790_v58 = vadd.f32 %v4517_v17, %v4043_v46  ;;  %v5382_v17 = vshrl.u32 %v11787_v7, 16  ;;  %v5937_v54 = vshll.u32 %v7638_v4, 16 }
 0x371   : > { %v4525_v5 = vpop.f32.mrb[64].mxu1  ;;  %v5379_v41 = vor.u32 %v5378_v13, %v5375_v10  ;;  %v5387_v13 = vrot.slane %v5385_v23, 3 }
 0x372   : > { %v8862_v14 = vpop.f32.mrb[65].mxu1  ;;  %9039 = vmatmul.mubr.msk.bf16.gmra.mrb[168].mxu0 %vm366_vm2, %v5371_v61  ;;  %v11796_v52 = vadd.f32 %v4520_v42, %v4044_v0  ;;  %v5931_v42 = vor.u32 %v5930_v53, %v5927_v39  ;;  %v5934_v61 = vshrl.u32 %v7638_v4, 16  ;;  %v5384_v10 = vrot.slane %v5382_v17, 2 }
 0x373   : > { %v4528_v31 = vpop.f32.mrb[66].mxu1  ;;  %9042 = vmatprep.mubr.msk.bf16.mxu0 %vm9607_vm1, %v12652_v21  ;;  %v5380_v14 = vsel %vm2689_vm9, %v5370_v49, %v5379_v41  ;;  %v5939_v4 = vrot.slane %v5937_v54, 4 }
 0x374   : > { %v8863_v27 = vpop.f32.mrb[67].mxu1  ;;  %v5932_v53 = vsel %vm3114_vm8, %v5922_v12, %v5931_v42  ;;  %v5936_v49 = vrot.slane %v5934_v61, 3  ;;  %v12787_v12 = vld [vmem:[#allocation33_spill] sm:$0xff] }
 0x375   : > { %v3982_v46 = vpop.f32.mrb[64].mxu0  ;;  %v11808_v27 = vld [vmem:[%s9703_s7 + $0x178] sm:$0xff]  }
 0x376   : > { %9113 = vmatmul.mubr.msk.bf16.gmra.mrb[172].mxu1 %vm366_vm2, %v5923_v19  ;;  %v4045_v60 = vadd.f32 %v3982_v46, %v12784_v37  ;;  %v8792_v34 = vpop.f32.mrb[65].mxu0  ;;  %12785 = vst [vmem:[#allocation28_spill] sm:$0xff] %v11808_v27  ;;  %v7639_v37 = vcombine.low %v11489_v22, %v11510_v16 }
 0x377   : > { %9116 = vmatprep.mubr.msk.bf16.mxu1 %vm9607_vm1, %v12652_v21  ;;  %v3985_v0 = vpop.f32.mrb[66].mxu0 }
 0x378   : > { %v4046_v40 = vadd.f32 %v3985_v0, %v12786_v43  ;;  %v8793_v11 = vpop.f32.mrb[67].mxu0  ;;  %v11811_v7 = vadd.f32 %v4525_v5, %v4045_v60  ;;  %v5391_v43 = vshrl.u32 %v11808_v27, 16  ;;  %v5394_v5 = vshll.u32 %v11808_v27, 16 }
 0x379   : > { %v4533_v19 = vpop.f32.mrb[68].mxu1  ;;  %v5388_v11 = vor.u32 %v5387_v13, %v5384_v10  ;;  %v5943_v34 = vshrl.u32 %v7639_v37, 16  ;;  %v5946_v0 = vshll.u32 %v7639_v37, 16 }
 0x37a   : > { %v8866_v46 = vpop.f32.mrb[69].mxu1  ;;  %9043 = vmatmul.mubr.msk.bf16.gmra.mrb[172].mxu0 %vm366_vm2, %v5380_v14  ;;  %v11817_v17 = vadd.f32 %v4528_v31, %v4046_v40  ;;  %v5940_v40 = vor.u32 %v5939_v4, %v5936_v49  ;;  %v5393_v10 = vrot.slane %v5391_v43, 2  ;;  %v5396_v13 = vrot.slane %v5394_v5, 3 }
 0x37b   : > { %v4536_v39 = vpop.f32.mrb[70].mxu1  ;;  %9046 = vmatprep.mubr.msk.bf16.mxu0 %vm9607_vm1, %v12652_v21  ;;  %v5389_v14 = vsel %vm2689_vm9, %v5379_v41, %v5388_v11  ;;  %v11829_v46 = vld [vmem:[%s9703_s7 + $0x180] sm:$0xff]   ;;  %v7640_v41 = vcombine.low %v11513_v57, %v11534_v1 }
 0x37c   : > { %v8867_v23 = vpop.f32.mrb[71].mxu1  ;;  %12788 = vst [vmem:[#allocation30_spill] sm:$0xff] %v11829_v46  ;;  %v5941_v49 = vsel %vm3114_vm8, %v5931_v42, %v5940_v40  ;;  %v5403_v5 = vshll.u32 %v11829_v46, 16  ;;  %v12790_v42 = vld [vmem:[#allocation6_spill] sm:$0xff] }
 0x37d   : > { %v3990_v60 = vpop.f32.mrb[68].mxu0  ;;  %v12789_v23 = vld [vmem:[#allocation34_spill] sm:$0xff] }
 0x37e   : > { %9117 = vmatmul.mubr.msk.bf16.gmra.mrb[176].mxu1 %vm366_vm2, %v5932_v53  ;;  %v4047_v61 = vadd.f32 %v3990_v60, %v12787_v12  ;;  %v8796_v54 = vpop.f32.mrb[69].mxu0  ;;  %v5945_v60 = vrot.slane %v5943_v34, 3  ;;  %v5948_v12 = vrot.slane %v5946_v0, 4 }
 0x37f   : > { %9120 = vmatprep.mubr.msk.bf16.mxu1 %vm9607_vm1, %v12652_v21  ;;  %v3993_v31 = vpop.f32.mrb[70].mxu0 }
 0x380   : > { %v4048_v16 = vadd.f32 %v3993_v31, %v12789_v23  ;;  %v8797_v22 = vpop.f32.mrb[71].mxu0  ;;  %v11832_v27 = vadd.f32 %v4533_v19, %v4047_v61  ;;  %v5400_v19 = vshrl.u32 %v11829_v46, 16  ;;  %v5949_v0 = vor.u32 %v5948_v12, %v5945_v60 }
 0x381   : > { %v4541_v53 = vpop.f32.mrb[72].mxu1  ;;  %v5397_v22 = vor.u32 %v5396_v13, %v5393_v10  ;;  %v5405_v13 = vrot.slane %v5403_v5, 3 }
 0x382   : > { %v8870_v37 = vpop.f32.mrb[73].mxu1  ;;  %9047 = vmatmul.mubr.msk.bf16.gmra.mrb[176].mxu0 %vm366_vm2, %v5389_v14  ;;  %v11838_v4 = vadd.f32 %v4536_v39, %v4048_v16  ;;  %v5952_v16 = vshrl.u32 %v7640_v41, 16  ;;  %v5955_v39 = vshll.u32 %v7640_v41, 16  ;;  %v5402_v10 = vrot.slane %v5400_v19, 2 }
 0x383   : > { %v4544_v54 = vpop.f32.mrb[74].mxu1  ;;  %9050 = vmatprep.mubr.msk.bf16.mxu0 %vm9607_vm1, %v12652_v21  ;;  %v5398_v23 = vsel %vm2689_vm9, %v5388_v11, %v5397_v22  ;;  %v11850_v37 = vld [vmem:[%s9703_s7 + $0x188] sm:$0xff]   ;;  %v7641_v11 = vcombine.low %v11537_v2, %v11558_v55 }
 0x384   : > { %v8871_v43 = vpop.f32.mrb[75].mxu1  ;;  %12791 = vst [vmem:[#allocation31_spill] sm:$0xff] %v11850_v37  ;;  %v5954_v41 = vrot.slane %v5952_v16, 3  ;;  %v12794_v16 = vld [vmem:[#allocation10_spill] sm:$0xff]  ;;  %v12796_v55 = vld [vmem:[#allocation11_spill] sm:$0xff] }
 0x385   : > { %v3998_v34 = vpop.f32.mrb[72].mxu0  ;;  %v12792_v43 = vld [vmem:[#allocation7_spill] sm:$0xff] }
 0x386   : > { %9121 = vmatmul.mubr.msk.bf16.gmra.mrb[180].mxu1 %vm366_vm2, %v5941_v49  ;;  %v4049_v61 = vadd.f32 %v3998_v34, %v12790_v42  ;;  %v8800_v31 = vpop.f32.mrb[73].mxu0  ;;  %v5950_v34 = vsel %vm3114_vm8, %v5940_v40, %v5949_v0  ;;  %v5412_v40 = vshll.u32 %v11850_v37, 16 }
 0x387   : > { %9124 = vmatprep.mubr.msk.bf16.mxu1 %vm9607_vm1, %v12652_v21  ;;  %v4001_v14 = vpop.f32.mrb[74].mxu0  ;;  %v5957_v31 = vrot.slane %v5955_v39, 4 }
 0x388   : > { %v4050_v1 = vadd.f32 %v4001_v14, %v12792_v43  ;;  %v8801_v57 = vpop.f32.mrb[75].mxu0  ;;  %v11853_v60 = vadd.f32 %v4541_v53, %v4049_v61  ;;  %v5409_v53 = vshrl.u32 %v11850_v37, 16 }
 0x389   : > { %v4549_v49 = vpop.f32.mrb[76].mxu1  ;;  %v5406_v57 = vor.u32 %v5405_v13, %v5402_v10  ;;  %v5414_v13 = vrot.slane %v5412_v40, 3 }
 0x38a   : > { %v8874_v12 = vpop.f32.mrb[77].mxu1  ;;  %9051 = vmatmul.mubr.msk.bf16.gmra.mrb[180].mxu0 %vm366_vm2, %v5398_v23  ;;  %v11859_v19 = vadd.f32 %v4544_v54, %v4050_v1  ;;  %v5958_v1 = vor.u32 %v5957_v31, %v5954_v41  ;;  %v5961_v54 = vshrl.u32 %v7641_v11, 16  ;;  %v5964_v23 = vshll.u32 %v7641_v11, 16 }
 0x38b   : > { %v4552_v42 = vpop.f32.mrb[78].mxu1  ;;  %9054 = vmatprep.mubr.msk.bf16.mxu0 %vm9607_vm1, %v12652_v21  ;;  %v5407_v12 = vsel %vm2689_vm9, %v5397_v22, %v5406_v57  ;;  %v5411_v10 = vrot.slane %v5409_v53, 2 }
 0x38c   : > { %12793 = vst [vmem:[#allocation33_spill] sm:$0xff] %v11859_v19  ;;  %v8875_v5 = vpop.f32.mrb[79].mxu1  ;;  %v5959_v31 = vsel %vm3114_vm8, %v5949_v0, %v5958_v1  ;;  %v5963_v22 = vrot.slane %v5961_v54, 3  ;;  %v5966_v11 = vrot.slane %v5964_v23, 4  ;;  %v12801_v0 = vld [vmem:[#allocation14_spill] sm:$0xff] }
 0x38d   : > { %v4006_v61 = vpop.f32.mrb[76].mxu0  ;;  %v11871_v5 = vld [vmem:[%s9703_s7 + $0x190] sm:$0xff]  }
 0x38e   : > { %9125 = vmatmul.mubr.msk.bf16.gmra.mrb[184].mxu1 %vm366_vm2, %v5950_v34  ;;  %v4051_v39 = vadd.f32 %v4006_v61, %v12794_v16  ;;  %v8804_v14 = vpop.f32.mrb[77].mxu0  ;;  %12795 = vst [vmem:[#allocation34_spill] sm:$0xff] %v11871_v5  ;;  %v12798_v16 = vld [vmem:[#allocation21_spill] sm:$0xff] }
 0x38f   : > { %9128 = vmatprep.mubr.msk.bf16.mxu1 %vm9607_vm1, %v12652_v21  ;;  %v4009_v43 = vpop.f32.mrb[78].mxu0  ;;  %v12799_v14 = vld [vmem:[#allocation20_spill] sm:$0xff] }
 0x390   : > { %v4052_v2 = vadd.f32 %v4009_v43, %v12796_v55  ;;  %v8805_v37 = vpop.f32.mrb[79].mxu0  ;;  %v11874_v46 = vadd.f32 %v4549_v49, %v4051_v39  ;;  %v7642_v19 = vcombine.low %v12799_v14, %v12798_v16  ;;  %v5415_v55 = vor.u32 %v5414_v13, %v5411_v10  ;;  %v12803_v16 = vld [vmem:[#allocation36_spill] sm:$0xff] }
 0x391   : > { %v4557_v34 = vpop.f32.mrb[80].mxu1  ;;  %v5418_v37 = vshrl.u32 %v11871_v5, 16  ;;  %v5421_v49 = vshll.u32 %v11871_v5, 16 }
 0x392   : > { %12797 = vst [vmem:[#allocation6_spill] sm:$0xff] %v11874_v46  ;;  %v8878_v61 = vpop.f32.mrb[81].mxu1  ;;  %9055 = vmatmul.mubr.msk.bf16.gmra.mrb[184].mxu0 %vm366_vm2, %v5407_v12  ;;  %v11880_v53 = vadd.f32 %v4552_v42, %v4052_v2  ;;  %v5970_v43 = vshrl.u32 %v7642_v19, 16  ;;  %v5973_v12 = vshll.u32 %v7642_v19, 16  ;;  %v5967_v2 = vor.u32 %v5966_v11, %v5963_v22  ;;  %v12804_v11 = vld [vmem:[#allocation24_spill] sm:$0xff] }
 0x393   : > { %v4560_v41 = vpop.f32.mrb[82].mxu1  ;;  %9058 = vmatprep.mubr.msk.bf16.mxu0 %vm9607_vm1, %v12652_v21  ;;  %v5416_v61 = vsel %vm2689_vm9, %v5406_v57, %v5415_v55  ;;  %v5420_v10 = vrot.slane %v5418_v37, 2  ;;  %v5423_v13 = vrot.slane %v5421_v49, 3  ;;  %v12805_v57 = vld [vmem:[#allocation22_spill] sm:$0xff] }
 0x394   : > { %12800 = vst [vmem:[#allocation7_spill] sm:$0xff] %v11880_v53  ;;  %v8879_v40 = vpop.f32.mrb[83].mxu1  ;;  %v5968_v22 = vsel %vm3114_vm8, %v5958_v1, %v5967_v2  ;;  %v7643_v37 = vcombine.low %v12805_v57, %v12804_v11  ;;  %v12807_v1 = vld [vmem:[#allocation37_spill] sm:$0xff]  ;;  %v12809_v11 = vld [vmem:[#allocation38_spill] sm:$0xff] }
 0x395   : > { %v4014_v39 = vpop.f32.mrb[80].mxu0  ;;  %v11892_v40 = vld [vmem:[%s9703_s7 + $0x198] sm:$0xff]  }
 0x396   : > { %9129 = vmatmul.mubr.msk.bf16.gmra.mrb[188].mxu1 %vm366_vm2, %v5959_v31  ;;  %v4053_v54 = vadd.f32 %v4014_v39, %v12801_v0  ;;  %v8808_v23 = vpop.f32.mrb[81].mxu0  ;;  %12802 = vst [vmem:[#allocation10_spill] sm:$0xff] %v11892_v40  ;;  %v5972_v39 = vrot.slane %v5970_v43, 3  ;;  %v5975_v0 = vrot.slane %v5973_v12, 4 }
 0x397   : > { %9132 = vmatprep.mubr.msk.bf16.mxu1 %vm9607_vm1, %v12652_v21  ;;  %v4017_v42 = vpop.f32.mrb[82].mxu0 }
 0x398   : > { %v4054_v14 = vadd.f32 %v4017_v42, %v12803_v16  ;;  %v8809_v5 = vpop.f32.mrb[83].mxu0  ;;  %v11895_v53 = vadd.f32 %v4557_v34, %v4053_v54  ;;  %v5427_v34 = vshrl.u32 %v11892_v40, 16  ;;  %v5430_v16 = vshll.u32 %v11892_v40, 16 }
 0x399   : > { %v5025_v31 = vpop.f32.mrb[84].mxu1  ;;  %v5424_v5 = vor.u32 %v5423_v13, %v5420_v10  ;;  %v5976_v12 = vor.u32 %v5975_v0, %v5972_v39 }
 0x39a   : > { %v8954_v19 = vpop.f32.mrb[85].mxu1  ;;  %9059 = vmatmul.mubr.msk.bf16.gmra.mrb[188].mxu0 %vm366_vm2, %v5416_v61  ;;  %v11901_v49 = vadd.f32 %v4560_v41, %v4054_v14  ;;  %v5982_v14 = vshll.u32 %v7643_v37, 16  ;;  %v5429_v10 = vrot.slane %v5427_v34, 2  ;;  %v5432_v13 = vrot.slane %v5430_v16, 3 }
 0x39b   : > { %v5028_v23 = vpop.f32.mrb[86].mxu1  ;;  %9062 = vmatprep.mubr.msk.bf16.mxu0 %vm9607_vm1, %v12652_v21  ;;  %v5425_v61 = vsel %vm2689_vm9, %v5415_v55, %v5424_v5  ;;  %v11913_v19 = vld [vmem:[%s9703_s7 + $0x1a0] sm:$0xff]   ;;  %v12810_v55 = vld [vmem:[#allocation45_spill] sm:$0xff] }
 0x39c   : > { %12806 = vst [vmem:[#allocation11_spill] sm:$0xff] %v11901_v49  ;;  %v8955_v46 = vpop.f32.mrb[87].mxu1  ;;  %12808 = vst [vmem:[#allocation14_spill] sm:$0xff] %v11913_v19  ;;  %v7644_v34 = vcombine.low %v12810_v55, %v11637_v59  ;;  %v12814_v59 = vld [vmem:[#allocation40_spill] sm:$0xff] }
 0x39d   : > { %v4727_v43 = vpop.f32.mrb[84].mxu0  ;;  %v5979_v46 = vshrl.u32 %v7643_v37, 16 }
 0x39e   : > { %9133 = vmatmul.mubr.msk.bf16.gmra.mrb[192].mxu1 %vm366_vm2, %v5968_v22  ;;  %v4862_v54 = vadd.f32 %v4727_v43, %v12807_v1  ;;  %v8884_v42 = vpop.f32.mrb[85].mxu0  ;;  %v5977_v43 = vsel %vm3114_vm8, %v5967_v2, %v5976_v12  ;;  %v5439_v2 = vshll.u32 %v11913_v19, 16 }
 0x39f   : > { %9136 = vmatprep.mubr.msk.bf16.mxu1 %vm9607_vm1, %v12652_v21  ;;  %v4730_v41 = vpop.f32.mrb[86].mxu0  ;;  %v5981_v37 = vrot.slane %v5979_v46, 3  ;;  %v5984_v42 = vrot.slane %v5982_v14, 4 }
 0x3a0   : > { %v4863_v57 = vadd.f32 %v4730_v41, %v12809_v11  ;;  %v8885_v40 = vpop.f32.mrb[87].mxu0  ;;  %v11916_v39 = vadd.f32 %v5025_v31, %v4862_v54  ;;  %v5436_v31 = vshrl.u32 %v11913_v19, 16  ;;  %v12812_v54 = vld [vmem:[#allocation39_spill] sm:$0xff] }
 0x3a1   : > { %v5033_v22 = vpop.f32.mrb[88].mxu1  ;;  %v5433_v40 = vor.u32 %v5432_v13, %v5429_v10  ;;  %v5441_v13 = vrot.slane %v5439_v2, 3 }
 0x3a2   : > { %v8958_v0 = vpop.f32.mrb[89].mxu1  ;;  %9063 = vmatmul.mubr.msk.bf16.gmra.mrb[192].mxu0 %vm366_vm2, %v5425_v61  ;;  %v11922_v16 = vadd.f32 %v5028_v23, %v4863_v57  ;;  %v5985_v23 = vor.u32 %v5984_v42, %v5981_v37  ;;  %v5988_v57 = vshrl.u32 %v7644_v34, 16  ;;  %v5438_v10 = vrot.slane %v5436_v31, 2 }
 0x3a3   : > { %v5036_v1 = vpop.f32.mrb[90].mxu1  ;;  %9066 = vmatprep.mubr.msk.bf16.mxu0 %vm9607_vm1, %v12652_v21  ;;  %v5434_v61 = vsel %vm2689_vm9, %v5424_v5, %v5433_v40  ;;  %v11934_v0 = vld [vmem:[%s9703_s7 + $0x1a8] sm:$0xff]  }
 0x3a4   : > { %12811 = vst [vmem:[#allocation36_spill] sm:$0xff] %v11922_v16  ;;  %v8959_v49 = vpop.f32.mrb[91].mxu1  ;;  %12813 = vst [vmem:[#allocation37_spill] sm:$0xff] %v11934_v0  ;;  %v5986_v42 = vsel %vm3114_vm8, %v5976_v12, %v5985_v23  ;;  %v5990_v5 = vrot.slane %v5988_v57, 3  ;;  %v12815_v12 = vld [vmem:[#allocation41_spill] sm:$0xff] }
 0x3a5   : > { %v4735_v11 = vpop.f32.mrb[88].mxu0  ;;  %v5991_v49 = vshll.u32 %v7644_v34, 16 }
 0x3a6   : > { %9137 = vmatmul.mubr.msk.bf16.gmra.mrb[196].mxu1 %vm366_vm2, %v5977_v43  ;;  %v4864_v46 = vadd.f32 %v4735_v11, %v12812_v54  ;;  %v8888_v14 = vpop.f32.mrb[89].mxu0  ;;  %v7645_v54 = vcombine.low %v11640_v3, %v11665_v35 }
 0x3a7   : > { %9140 = vmatprep.mubr.msk.bf16.mxu1 %vm9607_vm1, %v12652_v21  ;;  %v4738_v41 = vpop.f32.mrb[90].mxu0  ;;  %v5993_v34 = vrot.slane %v5991_v49, 4 }
 0x3a8   : > { %v4865_v55 = vadd.f32 %v4738_v41, %v12814_v59  ;;  %v8889_v19 = vpop.f32.mrb[91].mxu0  ;;  %v11937_v16 = vadd.f32 %v5033_v22, %v4864_v46  ;;  %v5442_v59 = vor.u32 %v5441_v13, %v5438_v10  ;;  %v5448_v22 = vshll.u32 %v11934_v0, 16 }
 0x3a9   : > { %v5041_v43 = vpop.f32.mrb[92].mxu1  ;;  %v5445_v19 = vshrl.u32 %v11934_v0, 16  ;;  %v5997_v14 = vshrl.u32 %v7645_v54, 16  ;;  %v6000_v41 = vshll.u32 %v7645_v54, 16 }
 0x3aa   : > { %v8962_v11 = vpop.f32.mrb[93].mxu1  ;;  %9067 = vmatmul.mubr.msk.bf16.gmra.mrb[196].mxu0 %vm366_vm2, %v5434_v61  ;;  %v11943_v31 = vadd.f32 %v5036_v1, %v4865_v55  ;;  %v5994_v1 = vor.u32 %v5993_v34, %v5990_v5  ;;  %v5443_v61 = vsel %vm2689_vm9, %v5433_v40, %v5442_v59  ;;  %v5450_v13 = vrot.slane %v5448_v22, 3 }
 0x3ab   : > { %v5044_v37 = vpop.f32.mrb[94].mxu1  ;;  %9070 = vmatprep.mubr.msk.bf16.mxu0 %vm9607_vm1, %v12652_v21  ;;  %v5447_v10 = vrot.slane %v5445_v19, 2  ;;  %v11955_v11 = vld [vmem:[%s9703_s7 + $0x1b0] sm:$0xff]   ;;  %v7646_v40 = vcombine.low %v11668_v26, %v11698_v8 }
 0x3ac   : > { %v8963_v2 = vpop.f32.mrb[95].mxu1  ;;  %12816 = vst [vmem:[#allocation38_spill] sm:$0xff] %v11955_v11  ;;  %v5995_v5 = vsel %vm3114_vm8, %v5985_v23, %v5994_v1  ;;  %v5457_v22 = vshll.u32 %v11955_v11, 16  ;;  %v12818_v23 = vld [vmem:[#allocation43_spill] sm:$0xff] }
 0x3ad   : > { %v4743_v46 = vpop.f32.mrb[92].mxu0  ;;  %v12817_v2 = vld [vmem:[#allocation42_spill] sm:$0xff] }
 0x3ae   : > { %9141 = vmatmul.mubr.msk.bf16.gmra.mrb[200].mxu1 %vm366_vm2, %v5986_v42  ;;  %v4866_v57 = vadd.f32 %v4743_v46, %v12815_v12  ;;  %v8892_v49 = vpop.f32.mrb[93].mxu0  ;;  %v5999_v46 = vrot.slane %v5997_v14, 3  ;;  %v6002_v12 = vrot.slane %v6000_v41, 4 }
 0x3af   : > { %9144 = vmatprep.mubr.msk.bf16.mxu1 %vm9607_vm1, %v12652_v21  ;;  %v4746_v55 = vpop.f32.mrb[94].mxu0 }
 0x3b0   : > { %v4867_v35 = vadd.f32 %v4746_v55, %v12817_v2  ;;  %v8893_v3 = vpop.f32.mrb[95].mxu0  ;;  %v11958_v0 = vadd.f32 %v5041_v43, %v4866_v57  ;;  %v5454_v43 = vshrl.u32 %v11955_v11, 16  ;;  %v6003_v41 = vor.u32 %v6002_v12, %v5999_v46 }
 0x3b1   : > { %v5049_v42 = vpop.f32.mrb[96].mxu1  ;;  %v5451_v3 = vor.u32 %v5450_v13, %v5447_v10  ;;  %v5459_v13 = vrot.slane %v5457_v22, 3 }
 0x3b2   : > { %v8966_v54 = vpop.f32.mrb[97].mxu1  ;;  %9071 = vmatmul.mubr.msk.bf16.gmra.mrb[200].mxu0 %vm366_vm2, %v5443_v61  ;;  %v11964_v34 = vadd.f32 %v5044_v37, %v4867_v35  ;;  %v6006_v35 = vshrl.u32 %v7646_v40, 16  ;;  %v6009_v37 = vshll.u32 %v7646_v40, 16  ;;  %v5456_v10 = vrot.slane %v5454_v43, 2 }
 0x3b3   : > { %v5052_v49 = vpop.f32.mrb[98].mxu1  ;;  %9074 = vmatprep.mubr.msk.bf16.mxu0 %vm9607_vm1, %v12652_v21  ;;  %v5452_v2 = vsel %vm2689_vm9, %v5442_v59, %v5451_v3  ;;  %v11976_v54 = vld [vmem:[%s9703_s7 + $0x1b8] sm:$0xff]   ;;  %v7647_v59 = vcombine.low %v11701_v28, %v11701_v28  ;;  %v12823_v28 = vld [vmem:[#allocation47_spill] sm:$0xff] }
 0x3b4   : > { %v8967_v19 = vpop.f32.mrb[99].mxu1  ;;  %12819 = vst [vmem:[#allocation39_spill] sm:$0xff] %v11976_v54  ;;  %v6008_v40 = vrot.slane %v6006_v35, 3  ;;  %v12822_v35 = vld [vmem:[#allocation46_spill] sm:$0xff] }
 0x3b5   : > { %v4751_v14 = vpop.f32.mrb[96].mxu0  ;;  %v12820_v19 = vld [vmem:[#allocation44_spill] sm:$0xff] }
 0x3b6   : > { %9145 = vmatmul.mubr.msk.bf16.gmra.mrb[204].mxu1 %vm366_vm2, %v5995_v5  ;;  %v4868_v57 = vadd.f32 %v4751_v14, %v12818_v23  ;;  %v8896_v55 = vpop.f32.mrb[97].mxu0  ;;  %v6004_v14 = vsel %vm3114_vm8, %v5994_v1, %v6003_v41  ;;  %v5466_v1 = vshll.u32 %v11976_v54, 16 }
 0x3b7   : > { %9148 = vmatprep.mubr.msk.bf16.mxu1 %vm9607_vm1, %v12652_v21  ;;  %v4754_v61 = vpop.f32.mrb[98].mxu0  ;;  %v6011_v55 = vrot.slane %v6009_v37, 4 }
 0x3b8   : > { %v4869_v8 = vadd.f32 %v4754_v61, %v12820_v19  ;;  %v8897_v26 = vpop.f32.mrb[99].mxu0  ;;  %v11979_v46 = vadd.f32 %v5049_v42, %v4868_v57  ;;  %v5463_v42 = vshrl.u32 %v11976_v54, 16 }
 0x3b9   : > { %v5057_v5 = vpop.f32.mrb[100].mxu1  ;;  %v5460_v26 = vor.u32 %v5459_v13, %v5456_v10  ;;  %v5468_v13 = vrot.slane %v5466_v1, 3 }
 0x3ba   : > { %v8970_v12 = vpop.f32.mrb[101].mxu1  ;;  %9075 = vmatmul.mubr.msk.bf16.gmra.mrb[204].mxu0 %vm366_vm2, %v5452_v2  ;;  %v11985_v43 = vadd.f32 %v5052_v49, %v4869_v8  ;;  %v6012_v8 = vor.u32 %v6011_v55, %v6008_v40  ;;  %v6015_v49 = vshrl.u32 %v7647_v59, 16  ;;  %v6018_v2 = vshll.u32 %v7647_v59, 16 }
 0x3bb   : > { %v5060_v23 = vpop.f32.mrb[102].mxu1  ;;  %9078 = vmatprep.mubr.msk.bf16.mxu0 %vm9607_vm1, %v12652_v21  ;;  %v5461_v12 = vsel %vm2689_vm9, %v5451_v3, %v5460_v26  ;;  %v5465_v10 = vrot.slane %v5463_v42, 2 }
 0x3bc   : > { %12821 = vst [vmem:[#allocation40_spill] sm:$0xff] %v11985_v43  ;;  %v8971_v22 = vpop.f32.mrb[103].mxu1  ;;  %v6013_v40 = vsel %vm3114_vm8, %v6003_v41, %v6012_v8  ;;  %v6017_v55 = vrot.slane %v6015_v49, 3  ;;  %v6020_v59 = vrot.slane %v6018_v2, 4 }
 0x3bd   : > { %v4759_v57 = vpop.f32.mrb[100].mxu0  ;;  %v11997_v22 = vld [vmem:[%s9703_s7 + $0x1c0] ss:$0 sps:$4 sm:$0x77]   ;;  %v5469_v42 = vor.u32 %v5468_v13, %v5465_v10 }
 0x3be   : > { %9149 = vmatmul.mubr.msk.bf16.gmra.mrb[208].mxu1 %vm366_vm2, %v6004_v14  ;;  %v4870_v37 = vadd.f32 %v4759_v57, %v12822_v35  ;;  %v8900_v61 = vpop.f32.mrb[101].mxu0  ;;  %v6021_v41 = vor.u32 %v6020_v59, %v6017_v55 }
 0x3bf   : > { %9152 = vmatprep.mubr.msk.bf16.mxu1 %vm9607_vm1, %v12652_v21  ;;  %v4762_v19 = vpop.f32.mrb[102].mxu0 }
 0x3c0   : > { %v4871_v54 = vadd.f32 %v4762_v19, %v12823_v28  ;;  %v8901_v11 = vpop.f32.mrb[103].mxu0  ;;  %v12000_v43 = vadd.f32 %v5057_v5, %v4870_v37  ;;  %v5472_v28 = vshrl.u32 %v11997_v22, 16 }
 0x3c1   : > { %v5065_v14 = vpop.f32.mrb[104].mxu1  ;;  %v5475_v11 = vshll.u32 %v11997_v22, 16 }
 0x3c2   : > { %v8974_v57 = vpop.f32.mrb[105].mxu1  ;;  %9079 = vmatmul.mubr.msk.bf16.gmra.mrb[208].mxu0 %vm366_vm2, %v5461_v12  ;;  %v12004_v61 = vadd.f32 %v5060_v23, %v4871_v54  ;;  %v5470_v23 = vsel %vm2689_vm9, %v5460_v26, %v5469_v42  ;;  %v5474_v49 = vrot.slane %v5472_v28, 2 }
 0x3c3   : > { %v5068_v35 = vpop.f32.mrb[106].mxu1  ;;  %9082 = vmatprep.mubr.msk.bf16.mxu0 %vm9607_vm1, %v12652_v21  ;;  %v5477_v2 = vrot.slane %v5475_v11, 3 }
 0x3c4   : > { %v8975_v3 = vpop.f32.mrb[107].mxu1 }
 0x3c5   : > { %v4767_v5 = vpop.f32.mrb[104].mxu0  ;;  %v5478_v26 = vor.u32 %v5477_v2, %v5474_v49  ;;  %v6280_v3 = vld [vmem:[%s9703_s7 + $0x138] sm:$0x8] }
 0x3c6   : > { %9153 = vmatmul.mubr.msk.bf16.gmra.mrb[212].mxu1 %vm366_vm2, %v6013_v40  ;;  %v4872_v1 = vadd.f32 %v4767_v5, %v11645_v15  ;;  %v8904_v37 = vpop.f32.mrb[105].mxu0  ;;  %v6022_v40 = vsel %vm3114_vm8, %v6012_v8, %v6021_v41 }
 0x3c7   : > { %9156 = vmatprep.mubr.msk.bf16.mxu1 %vm9607_vm1, %v12652_v21  ;;  %v4770_v54 = vpop.f32.mrb[106].mxu0  ;;  %v5479_v8 = vsel %vm2689_vm9, %v5469_v42, %v5478_v26  ;;  %v9539_v42 = vld [vmem:[%s9703_s7 + $0x140] sm:$0xff]  }
 0x3c8   : > { %v4873_v19 = vadd.f32 %v4770_v54, %v11651_v63  ;;  %v8905_v12 = vpop.f32.mrb[107].mxu0  ;;  %v12016_v13 = vadd.f32 %v5065_v14, %v4872_v1 }
 0x3c9   : > { %v5073_v10 = vpop.f32.mrb[108].mxu1  ;;  %v6287_v12 = vrot.slane %v9539_v42, 3 }
 0x3ca   : > { %v8978_v57 = vpop.f32.mrb[109].mxu1  ;;  %9083 = vmatmul.mubr.msk.bf16.gmra.mrb[212].mxu0 %vm366_vm2, %v5470_v23  ;;  %v12020_v55 = vadd.f32 %v5068_v35, %v4873_v19  ;;  %v9538_v35 = vld [vmem:[%s9703_s7 + $0x13c] sm:$0xf] }
 0x3cb   : > { %v5076_v15 = vpop.f32.mrb[110].mxu1  ;;  %9086 = vmatprep.mubr.msk.bf16.mxu0 %vm9607_vm1, %v12652_v21  ;;  %v7666_v5 = vcombine.low %v6280_v3, %v9538_v35 }
 0x3cc   : > { %v8979_v59 = vpop.f32.mrb[111].mxu1 }
 0x3cd   : > { %v4775_v63 = vpop.f32.mrb[108].mxu0  ;;  %v6286_v19 = vrot.slane %v7666_v5, 3 }
 0x3ce   : > { %9157 = vmatmul.mubr.msk.bf16.gmra.mrb[216].mxu1 %vm366_vm2, %v6022_v40  ;;  %v4874_v14 = vadd.f32 %v4775_v63, %v11676_v24  ;;  %v8908_v28 = vpop.f32.mrb[109].mxu0  ;;  %v12824_v40 = vld [vmem:[#allocation25_spill] sm:$0xff] }
 0x3cf   : > { %9232 = vmatprep.mubr.msk.bf16.mxu1 %vm9607_vm1, %v12652_v21  ;;  %v4778_v11 = vpop.f32.mrb[110].mxu0  ;;  %v6288_v3 = vsel %vm2390_vm6, %v6286_v19, %v6287_v12 }
 0x3d0   : > { %v4875_v1 = vadd.f32 %v4778_v11, %v11683_v33  ;;  %v8909_v37 = vpop.f32.mrb[111].mxu0  ;;  %v12032_v54 = vadd.f32 %v5073_v10, %v4874_v14  ;;  %v12825_v33 = vld [vmem:[#allocation26_spill] sm:$0xff] }
 0x3d1   : > { %v5081_v41 = vpop.f32.mrb[112].mxu1  ;;  %v12826_v59 = vcombine.low %v12824_v40, %v12825_v33 }
 0x3d2   : > { %v8982_v23 = vpop.f32.mrb[113].mxu1  ;;  %9087 = vmatmul.mubr.msk.bf16.gmra.mrb[216].mxu0 %vm366_vm2, %v5479_v8  ;;  %v12035_v49 = vadd.f32 %v5076_v15, %v4875_v1  ;;  %v9540_v1 = vld [vmem:[%s9703_s7 + $0x148] sm:$0xff]  }
 0x3d3   : > { %v5084_v24 = vpop.f32.mrb[114].mxu1  ;;  %9162 = vmatprep.mubr.msk.bf16.mxu0 %vm9607_vm1, %v12652_v21  ;;  %v6289_v37 = vrot.slane %v9540_v1, 3 }
 0x3d4   : > { %v8983_v2 = vpop.f32.mrb[115].mxu1 }
 0x3d5   : > { %v4783_v57 = vpop.f32.mrb[112].mxu0  ;;  %v12827_v2 = vld [vmem:[#allocation27_spill] sm:$0xff]  ;;  %v6290_v42 = vsel %vm2390_vm6, %v6287_v12, %v6289_v37 }
 0x3d6   : > { %9233 = vmatmul.mubr.msk.bf16.vlgmr.msra.gmra.mrb[220].mxu1 %vm366_vm2, %v12826_v59  ;;  %v4876_v10 = vadd.f32 %v4783_v57, %v11707_v36  ;;  %v8912_v26 = vpop.f32.mrb[113].mxu0 }
 0x3d7   : > { %9236 = vmatprep.mubr.msk.bf16.mxu1 %vm9607_vm1, %v12652_v21  ;;  %v4786_v15 = vpop.f32.mrb[114].mxu0 }
 0x3d8   : > { %v4877_v63 = vadd.f32 %v4786_v15, %v11714_v9  ;;  %v8913_v14 = vpop.f32.mrb[115].mxu0  ;;  %v12049_v11 = vadd.f32 %v5081_v41, %v4876_v10  ;;  %v12828_v9 = vcombine.low %v12827_v2, %v11321_v18  ;;  %v9541_v15 = vld [vmem:[%s9703_s7 + $0x150] sm:$0xff]  }
 0x3d9   : > { %v5089_v28 = vpop.f32.mrb[116].mxu1 }
 0x3da   : > { %v8986_v8 = vpop.f32.mrb[117].mxu1  ;;  %9163 = vmatmul.mubr.msk.bf16.vlgmr.msra.gmra.mrb[220].mxu0 %vm366_vm2, %v6288_v3  ;;  %v12052_v5 = vadd.f32 %v5084_v24, %v4877_v63  ;;  %v6291_v3 = vrot.slane %v9541_v15, 3  ;;  %v12831_v15 = vld [vmem:[#allocation29_spill] sm:$0xff] }
 0x3db   : > { %v5092_v35 = vpop.f32.mrb[118].mxu1  ;;  %9166 = vmatprep.mubr.msk.bf16.mxu0 %vm9607_vm1, %v12652_v21 }
 0x3dc   : > { %v8987_v36 = vpop.f32.mrb[119].mxu1  ;;  %v6292_v8 = vsel %vm2390_vm6, %v6289_v37, %v6291_v3 }
 0x3dd   : > { %v4791_v23 = vpop.f32.mrb[116].mxu0 }
 0x3de   : > { %9237 = vmatmul.mubr.msk.bf16.gmra.mrb[224].mxu1 %vm366_vm2, %v12828_v9  ;;  %v4878_v41 = vadd.f32 %v4791_v23, %v11727_v32  ;;  %v8916_v19 = vpop.f32.mrb[117].mxu0  ;;  %v6293_v9 = vrot.slane %v11724_v51, 3 }
 0x3df   : > { %9240 = vmatprep.mubr.msk.bf16.mxu1 %vm9607_vm1, %v12652_v21  ;;  %v4794_v24 = vpop.f32.mrb[118].mxu0 }
 0x3e0   : > { %v4879_v57 = vadd.f32 %v4794_v24, %v11733_v56  ;;  %v8917_v40 = vpop.f32.mrb[119].mxu0  ;;  %v12066_v59 = vadd.f32 %v5089_v28, %v4878_v41  ;;  %v12829_v56 = vcombine.low %v11342_v62, %v11345_v25 }
 0x3e1   : > { %v5097_v33 = vpop.f32.mrb[120].mxu1 }
 0x3e2   : > { %v8990_v10 = vpop.f32.mrb[121].mxu1  ;;  %9167 = vmatmul.mubr.msk.bf16.gmra.mrb[224].mxu0 %vm366_vm2, %v6290_v42  ;;  %v12069_v26 = vadd.f32 %v5092_v35, %v4879_v57  ;;  %v6294_v42 = vsel %vm2390_vm6, %v6291_v3, %v6293_v9 }
 0x3e3   : > { %v5100_v18 = vpop.f32.mrb[122].mxu1  ;;  %9170 = vmatprep.mubr.msk.bf16.mxu0 %vm9607_vm1, %v12652_v21 }
 0x3e4   : > { %v8991_v32 = vpop.f32.mrb[123].mxu1 }
 0x3e5   : > { %v4799_v63 = vpop.f32.mrb[120].mxu0 }
 0x3e6   : > { %9241 = vmatmul.mubr.msk.bf16.gmra.mrb[228].mxu1 %vm366_vm2, %v12829_v56  ;;  %v4880_v12 = vadd.f32 %v4799_v63, %v11748_v50  ;;  %v8920_v14 = vpop.f32.mrb[121].mxu0 }
 0x3e7   : > { %9244 = vmatprep.mubr.msk.bf16.mxu1 %vm9607_vm1, %v12652_v21  ;;  %v4802_v28 = vpop.f32.mrb[122].mxu0 }
 0x3e8   : > { %v4881_v35 = vadd.f32 %v4802_v28, %v11754_v20  ;;  %v8921_v36 = vpop.f32.mrb[123].mxu0  ;;  %v12083_v23 = vadd.f32 %v5097_v33, %v4880_v12  ;;  %v12830_v20 = vcombine.low %v11366_v30, %v11369_v29 }
 0x3e9   : > { %v5105_v1 = vpop.f32.mrb[124].mxu1 }
 0x3ea   : > { %v8994_v2 = vpop.f32.mrb[125].mxu1  ;;  %9171 = vmatmul.mubr.msk.bf16.gmra.mrb[228].mxu0 %vm366_vm2, %v6292_v8  ;;  %v12086_v25 = vadd.f32 %v5100_v18, %v4881_v35  ;;  %v6295_v18 = vrot.slane %v11745_v38, 3 }
 0x3eb   : > { %v5108_v62 = vpop.f32.mrb[126].mxu1  ;;  %9174 = vmatprep.mubr.msk.bf16.mxu0 %vm9607_vm1, %v12652_v21 }
 0x3ec   : > { %v8995_v50 = vpop.f32.mrb[127].mxu1  ;;  %v6296_v12 = vsel %vm2390_vm6, %v6293_v9, %v6295_v18 }
 0x3ed   : > { %v4807_v41 = vpop.f32.mrb[124].mxu0 }
 0x3ee   : > { %9245 = vmatmul.mubr.msk.bf16.gmra.mrb[232].mxu1 %vm366_vm2, %v12830_v20  ;;  %v4882_v37 = vadd.f32 %v4807_v41, %v11769_v45  ;;  %v8924_v19 = vpop.f32.mrb[125].mxu0 }
 0x3ef   : > { %9248 = vmatprep.mubr.msk.bf16.mxu1 %vm9607_vm1, %v12652_v21  ;;  %v4810_v24 = vpop.f32.mrb[126].mxu0 }
 0x3f0   : > { %v4883_v57 = vadd.f32 %v4810_v24, %v11775_v44  ;;  %v8925_v40 = vpop.f32.mrb[127].mxu0  ;;  %v12100_v51 = vadd.f32 %v5105_v1, %v4882_v37  ;;  %v12832_v44 = vcombine.low %v11390_v48, %v12831_v15  ;;  %v6297_v1 = vrot.slane %v11766_v6, 3 }
 0x3f1   : > { %v5113_v33 = vpop.f32.mrb[128].mxu1  ;;  %v12835_v40 = vld [vmem:[#allocation53_spill] sm:$0xff] }
 0x3f2   : > { %v8998_v10 = vpop.f32.mrb[129].mxu1  ;;  %9175 = vmatmul.mubr.msk.bf16.gmra.mrb[232].mxu0 %vm366_vm2, %v6294_v42  ;;  %v12103_v29 = vadd.f32 %v5108_v62, %v4883_v57  ;;  %v12833_v62 = vld [vmem:[#allocation32_spill] sm:$0xff]  ;;  %v6298_v20 = vsel %vm2390_vm6, %v6295_v18, %v6297_v1 }
 0x3f3   : > { %v5116_v30 = vpop.f32.mrb[130].mxu1  ;;  %9178 = vmatprep.mubr.msk.bf16.mxu0 %vm9607_vm1, %v12652_v21 }
 0x3f4   : > { %v8999_v45 = vpop.f32.mrb[131].mxu1 }
 0x3f5   : > { %v4815_v32 = vpop.f32.mrb[128].mxu0  ;;  %v12837_v45 = vld [vmem:[#allocation5_spill] sm:$0xff] }
 0x3f6   : > { %9249 = vmatmul.mubr.msk.bf16.gmra.mrb[236].mxu1 %vm366_vm2, %v12832_v44  ;;  %v4884_v3 = vadd.f32 %v4815_v32, %v11790_v58  ;;  %v8928_v63 = vpop.f32.mrb[129].mxu0 }
 0x3f7   : > { %9252 = vmatprep.mubr.msk.bf16.mxu1 %vm9607_vm1, %v12652_v21  ;;  %v4818_v56 = vpop.f32.mrb[130].mxu0 }
 0x3f8   : > { %v4885_v14 = vadd.f32 %v4818_v56, %v11796_v52  ;;  %v8929_v28 = vpop.f32.mrb[131].mxu0  ;;  %v12117_v38 = vadd.f32 %v5113_v33, %v4884_v3  ;;  %v12834_v52 = vcombine.low %v12833_v62, %v11417_v47  ;;  %v6299_v33 = vrot.slane %v12835_v40, 3  ;;  %v12844_v40 = vld [vmem:[#allocation30_spill] sm:$0xff] }
 0x3f9   : > { %v5121_v8 = vpop.f32.mrb[132].mxu1 }
 0x3fa   : > { %v9002_v35 = vpop.f32.mrb[133].mxu1  ;;  %9179 = vmatmul.mubr.msk.bf16.gmra.mrb[236].mxu0 %vm366_vm2, %v6296_v12  ;;  %v12120_v36 = vadd.f32 %v5116_v30, %v4885_v14  ;;  %v12836_v30 = vld [vmem:[#allocation35_spill] sm:$0xff]  ;;  %v6300_v44 = vsel %vm2390_vm6, %v6297_v1, %v6299_v33  ;;  %v12840_v1 = vld [vmem:[#allocation8_spill] sm:$0xff] }
 0x3fb   : > { %v5124_v48 = vpop.f32.mrb[134].mxu1  ;;  %9182 = vmatprep.mubr.msk.bf16.mxu0 %vm9607_vm1, %v12652_v21  ;;  %v12839_v35 = vld [vmem:[#allocation28_spill] sm:$0xff] }
 0x3fc   : > { %v9003_v58 = vpop.f32.mrb[135].mxu1 }
 0x3fd   : > { %v4823_v2 = vpop.f32.mrb[132].mxu0 }
 0x3fe   : > { %9253 = vmatmul.mubr.msk.bf16.gmra.mrb[240].mxu1 %vm366_vm2, %v12834_v52  ;;  %v4886_v50 = vadd.f32 %v4823_v2, %v11811_v7  ;;  %v8932_v9 = vpop.f32.mrb[133].mxu0  ;;  %v12841_v2 = vld [vmem:[#allocation9_spill] sm:$0xff] }
 0x3ff   : > { %9256 = vmatprep.mubr.msk.bf16.mxu1 %vm9607_vm1, %v12652_v21  ;;  %v4826_v41 = vpop.f32.mrb[134].mxu0 }
 0x400   : > { %v4887_v37 = vadd.f32 %v4826_v41, %v11817_v17  ;;  %v8933_v19 = vpop.f32.mrb[135].mxu0  ;;  %v12134_v6 = vadd.f32 %v5121_v8, %v4886_v50  ;;  %v12838_v17 = vcombine.low %v12836_v30, %v12837_v45  ;;  %v12843_v41 = vld [vmem:[#allocation33_spill] sm:$0xff] }
 0x401   : > { %v5129_v24 = vpop.f32.mrb[136].mxu1  ;;  %v12846_v45 = vld [vmem:[#allocation13_spill] sm:$0xff] }
 0x402   : > { %v9006_v42 = vpop.f32.mrb[137].mxu1  ;;  %9183 = vmatmul.mubr.msk.bf16.gmra.mrb[240].mxu0 %vm366_vm2, %v6298_v20  ;;  %v12137_v57 = vadd.f32 %v5124_v48, %v4887_v37  ;;  %v6301_v48 = vrot.slane %v12839_v35, 3 }
 0x403   : > { %v5132_v47 = vpop.f32.mrb[138].mxu1  ;;  %9186 = vmatprep.mubr.msk.bf16.mxu0 %vm9607_vm1, %v12652_v21 }
 0x404   : > { %v9007_v7 = vpop.f32.mrb[139].mxu1  ;;  %v6302_v9 = vsel %vm2390_vm6, %v6299_v33, %v6301_v48  ;;  %v12845_v33 = vld [vmem:[#allocation12_spill] sm:$0xff] }
 0x405   : > { %v4831_v10 = vpop.f32.mrb[136].mxu0 }
 0x406   : > { %9257 = vmatmul.mubr.msk.bf16.gmra.mrb[244].mxu1 %vm366_vm2, %v12838_v17  ;;  %v4888_v18 = vadd.f32 %v4831_v10, %v11832_v27  ;;  %v8936_v32 = vpop.f32.mrb[137].mxu0  ;;  %v6303_v10 = vrot.slane %v12844_v40, 3  ;;  %v12847_v17 = vcombine.low %v12845_v33, %v12846_v45 }
 0x407   : > { %9260 = vmatprep.mubr.msk.bf16.mxu1 %vm9607_vm1, %v12652_v21  ;;  %v4834_v15 = vpop.f32.mrb[138].mxu0 }
 0x408   : > { %v4889_v3 = vadd.f32 %v4834_v15, %v11838_v4  ;;  %v8937_v63 = vpop.f32.mrb[139].mxu0  ;;  %v12151_v12 = vadd.f32 %v5129_v24, %v4888_v18  ;;  %v12842_v4 = vcombine.low %v12840_v1, %v12841_v2  ;;  %v12848_v18 = vld [vmem:[#allocation6_spill] sm:$0xff] }
 0x409   : > { %v5137_v56 = vpop.f32.mrb[140].mxu1  ;;  %v12849_v63 = vld [vmem:[#allocation7_spill] sm:$0xff] }
 0x40a   : > { %v9010_v14 = vpop.f32.mrb[141].mxu1  ;;  %9187 = vmatmul.mubr.msk.bf16.gmra.mrb[244].mxu0 %vm366_vm2, %v6300_v44  ;;  %v12154_v8 = vadd.f32 %v5132_v47, %v4889_v3  ;;  %v6304_v3 = vsel %vm2390_vm6, %v6301_v48, %v6303_v10  ;;  %v12851_v48 = vld [vmem:[#allocation15_spill] sm:$0xff] }
 0x40b   : > { %v5140_v28 = vpop.f32.mrb[142].mxu1  ;;  %9190 = vmatprep.mubr.msk.bf16.mxu0 %vm9607_vm1, %v12652_v21 }
 0x40c   : > { %v9011_v27 = vpop.f32.mrb[143].mxu1 }
 0x40d   : > { %v4839_v58 = vpop.f32.mrb[140].mxu0 }
 0x40e   : > { %9261 = vmatmul.mubr.msk.bf16.gmra.mrb[248].mxu1 %vm366_vm2, %v12842_v4  ;;  %v4890_v62 = vadd.f32 %v4839_v58, %v11853_v60  ;;  %v8940_v52 = vpop.f32.mrb[141].mxu0  ;;  %v12850_v4 = vld [vmem:[#allocation31_spill] sm:$0xff] }
 0x40f   : > { %9264 = vmatprep.mubr.msk.bf16.mxu1 %vm9607_vm1, %v12652_v21  ;;  %v4842_v50 = vpop.f32.mrb[142].mxu0 }
 0x410   : > { %v4891_v20 = vadd.f32 %v4842_v50, %v12843_v41  ;;  %v8941_v37 = vpop.f32.mrb[143].mxu0  ;;  %v12168_v24 = vadd.f32 %v5137_v56, %v4890_v62  ;;  %v6305_v62 = vrot.slane %v12850_v4, 3  ;;  %v12852_v50 = vld [vmem:[#allocation16_spill] sm:$0xff] }
 0x411   : > { %v5145_v19 = vpop.f32.mrb[144].mxu1 }
 0x412   : > { %v9014_v42 = vpop.f32.mrb[145].mxu1  ;;  %9191 = vmatmul.mubr.msk.bf16.gmra.mrb[248].mxu0 %vm366_vm2, %v6302_v9  ;;  %v12171_v7 = vadd.f32 %v5140_v28, %v4891_v20  ;;  %v12853_v9 = vcombine.low %v12851_v48, %v12852_v50 }
 0x413   : > { %v5148_v47 = vpop.f32.mrb[146].mxu1  ;;  %9194 = vmatprep.mubr.msk.bf16.mxu0 %vm9607_vm1, %v12652_v21  ;;  %v12854_v42 = vld [vmem:[#allocation11_spill] sm:$0xff] }
 0x414   : > { %v9015_v60 = vpop.f32.mrb[147].mxu1 }
 0x415   : > { %v4847_v30 = vpop.f32.mrb[144].mxu0 }
 0x416   : > { %9265 = vmatmul.mubr.msk.bf16.gmra.mrb[252].mxu1 %vm366_vm2, %v12847_v17  ;;  %v4892_v32 = vadd.f32 %v4847_v30, %v12848_v18  ;;  %v8944_v15 = vpop.f32.mrb[145].mxu0  ;;  %v12855_v18 = vld [vmem:[#allocation34_spill] sm:$0xff] }
 0x417   : > { %9268 = vmatprep.mubr.msk.bf16.mxu1 %vm9607_vm1, %v12652_v21  ;;  %v4850_v44 = vpop.f32.mrb[146].mxu0 }
 0x418   : > { %v4893_v56 = vadd.f32 %v4850_v44, %v12849_v63  ;;  %v8945_v14 = vpop.f32.mrb[147].mxu0  ;;  %v12185_v27 = vadd.f32 %v5145_v19, %v4892_v32  ;;  %v6306_v19 = vsel %vm2390_vm6, %v6303_v10, %v6305_v62  ;;  %v6307_v32 = vrot.slane %v12855_v18, 3  ;;  %v12856_v10 = vld [vmem:[#allocation17_spill] sm:$0xff]  ;;  %v12857_v44 = vld [vmem:[#allocation18_spill] sm:$0xff] }
 0x419   : > { %v5153_v28 = vpop.f32.mrb[148].mxu1 }
 0x41a   : > { %v9018_v35 = vpop.f32.mrb[149].mxu1  ;;  %9195 = vmatmul.mubr.msk.bf16.gmra.mrb[252].mxu0 %vm366_vm2, %v6304_v3  ;;  %v12188_v1 = vadd.f32 %v5148_v47, %v4893_v56  ;;  %v12858_v3 = vcombine.low %v12856_v10, %v12857_v44 }
 0x41b   : > { %v5156_v58 = vpop.f32.mrb[150].mxu1  ;;  %9198 = vmatprep.mubr.msk.bf16.mxu0 %vm9607_vm1, %v12652_v21  ;;  %v12859_v35 = vld [vmem:[#allocation36_spill] sm:$0xff] }
 0x41c   : > { %v9019_v2 = vpop.f32.mrb[151].mxu1 }
 0x41d   : > { %v4855_v52 = vpop.f32.mrb[148].mxu0 }
 0x41e   : > { %9269 = vmatmul.mubr.msk.bf16.gmra.mrb[0].mxu1 %vm366_vm2, %v12853_v9  ;;  %v4894_v41 = vadd.f32 %v4855_v52, %v11895_v53  ;;  %v8948_v20 = vpop.f32.mrb[149].mxu0 }
 0x41f   : > { %9272 = vmatprep.mubr.msk.bf16.mxu1 %vm9607_vm1, %v12652_v21  ;;  %v4858_v37 = vpop.f32.mrb[150].mxu0 }
 0x420   : > { %v4895_v47 = vadd.f32 %v4858_v37, %v12854_v42  ;;  %v8949_v60 = vpop.f32.mrb[151].mxu0  ;;  %v12202_v30 = vadd.f32 %v5153_v28, %v4894_v41  ;;  %v6308_v28 = vsel %vm2390_vm6, %v6305_v62, %v6307_v32  ;;  %v12860_v41 = vld [vmem:[#allocation10_spill] sm:$0xff]  ;;  %v12861_v62 = vld [vmem:[#allocation19_spill] sm:$0xff] }
 0x421   : > { %v6111_v40 = vpop.f32.mrb[152].mxu1  ;;  %v6309_v20 = vrot.slane %v12860_v41, 3 }
 0x422   : > { %v9094_v33 = vpop.f32.mrb[153].mxu1  ;;  %9199 = vmatmul.mubr.msk.bf16.gmra.mrb[0].mxu0 %vm366_vm2, %v6306_v19  ;;  %v12205_v17 = vadd.f32 %v5156_v58, %v4895_v47  ;;  %v12862_v19 = vld [vmem:[#allocation20_spill] sm:$0xff] }
 0x423   : > { %v6114_v45 = vpop.f32.mrb[154].mxu1  ;;  %9202 = vmatprep.mubr.msk.bf16.mxu0 %vm9607_vm1, %v12652_v21  ;;  %v12863_v42 = vcombine.low %v12861_v62, %v12862_v19  ;;  %v6310_v33 = vsel %vm2390_vm6, %v6307_v32, %v6309_v20  ;;  %v12865_v32 = vld [vmem:[#allocation21_spill] sm:$0xff] }
 0x424   : > { %v9095_v53 = vpop.f32.mrb[155].mxu1 }
 0x425   : > { %v5568_v15 = vpop.f32.mrb[152].mxu0 }
 0x426   : > { %9273 = vmatmul.mubr.msk.bf16.gmra.mrb[4].mxu1 %vm366_vm2, %v12858_v3  ;;  %v5703_v63 = vadd.f32 %v5568_v15, %v11916_v39  ;;  %v9024_v56 = vpop.f32.mrb[153].mxu0 }
 0x427   : > { %9276 = vmatprep.mubr.msk.bf16.mxu1 %vm9607_vm1, %v12652_v21  ;;  %v5571_v14 = vpop.f32.mrb[154].mxu0 }
 0x428   : > { %v5704_v58 = vadd.f32 %v5571_v14, %v12859_v35  ;;  %v9025_v2 = vpop.f32.mrb[155].mxu0  ;;  %v12219_v52 = vadd.f32 %v6111_v40, %v5703_v63  ;;  %v12864_v63 = vld [vmem:[#allocation14_spill] sm:$0xff] }
 0x429   : > { %v6119_v4 = vpop.f32.mrb[156].mxu1  ;;  %v6311_v56 = vrot.slane %v12864_v63, 3 }
 0x42a   : > { %v9098_v48 = vpop.f32.mrb[157].mxu1  ;;  %9203 = vmatmul.mubr.msk.bf16.gmra.mrb[4].mxu0 %vm366_vm2, %v6308_v28  ;;  %v12222_v9 = vadd.f32 %v6114_v45, %v5704_v58  ;;  %v12866_v28 = vld [vmem:[#allocation22_spill] sm:$0xff] }
 0x42b   : > { %v6122_v50 = vpop.f32.mrb[158].mxu1  ;;  %9206 = vmatprep.mubr.msk.bf16.mxu0 %vm9607_vm1, %v12652_v21 }
 0x42c   : > { %v9099_v39 = vpop.f32.mrb[159].mxu1 }
 0x42d   : > { %v5576_v37 = vpop.f32.mrb[156].mxu0 }
 0x42e   : > { %9277 = vmatmul.mubr.msk.bf16.gmra.mrb[8].mxu1 %vm366_vm2, %v12863_v42  ;;  %v5705_v47 = vadd.f32 %v5576_v37, %v11937_v16  ;;  %v9028_v60 = vpop.f32.mrb[157].mxu0  ;;  %v12868_v42 = vld [vmem:[#allocation37_spill] sm:$0xff] }
 0x42f   : > { %9280 = vmatprep.mubr.msk.bf16.mxu1 %vm9607_vm1, %v12652_v21  ;;  %v5579_v40 = vpop.f32.mrb[158].mxu0 }
 0x430   : > { %v5706_v45 = vadd.f32 %v5579_v40, %v11943_v31  ;;  %v9029_v53 = vpop.f32.mrb[159].mxu0  ;;  %v12236_v15 = vadd.f32 %v6119_v4, %v5705_v47  ;;  %v12867_v31 = vcombine.low %v12865_v32, %v12866_v28  ;;  %v6312_v4 = vsel %vm2390_vm6, %v6309_v20, %v6311_v56  ;;  %v12869_v20 = vld [vmem:[#allocation24_spill] sm:$0xff]  ;;  %v12870_v40 = vld [vmem:[#allocation45_spill] sm:$0xff] }
 0x431   : > { %v6127_v18 = vpop.f32.mrb[160].mxu1  ;;  %v6313_v47 = vrot.slane %v12868_v42, 3 }
 0x432   : > { %v9102_v10 = vpop.f32.mrb[161].mxu1  ;;  %9207 = vmatmul.mubr.msk.bf16.gmra.mrb[8].mxu0 %vm366_vm2, %v6310_v33  ;;  %v12239_v3 = vadd.f32 %v6122_v50, %v5706_v45 }
 0x433   : > { %v6130_v44 = vpop.f32.mrb[162].mxu1  ;;  %9210 = vmatprep.mubr.msk.bf16.mxu0 %vm9607_vm1, %v12652_v21  ;;  %v12872_v10 = vld [vmem:[#allocation40_spill] sm:$0xff] }
 0x434   : > { %v9103_v16 = vpop.f32.mrb[163].mxu1 }
 0x435   : > { %v5584_v14 = vpop.f32.mrb[160].mxu0 }
 0x436   : > { %9281 = vmatmul.mubr.msk.bf16.gmra.mrb[12].mxu1 %vm366_vm2, %v12867_v31  ;;  %v5707_v35 = vadd.f32 %v5584_v14, %v11958_v0  ;;  %v9032_v58 = vpop.f32.mrb[161].mxu0 }
 0x437   : > { %9284 = vmatprep.mubr.msk.bf16.mxu1 %vm9607_vm1, %v12652_v21  ;;  %v5587_v2 = vpop.f32.mrb[162].mxu0 }
 0x438   : > { %v5708_v48 = vadd.f32 %v5587_v2, %v11964_v34  ;;  %v9033_v50 = vpop.f32.mrb[163].mxu0  ;;  %v12253_v41 = vadd.f32 %v6127_v18, %v5707_v35  ;;  %v12871_v34 = vcombine.low %v12869_v20, %v12870_v40  ;;  %v6314_v18 = vsel %vm2390_vm6, %v6311_v56, %v6313_v47  ;;  %v12873_v35 = vld [vmem:[#allocation38_spill] sm:$0xff]  ;;  %v12874_v56 = vld [vmem:[#allocation23_spill] sm:$0xff] }
 0x439   : > { %v6135_v39 = vpop.f32.mrb[164].mxu1  ;;  %v6315_v58 = vrot.slane %v12873_v35, 3 }
 0x43a   : > { %v9106_v37 = vpop.f32.mrb[165].mxu1  ;;  %9211 = vmatmul.mubr.msk.bf16.gmra.mrb[12].mxu0 %vm366_vm2, %v6312_v4  ;;  %v12256_v19 = vadd.f32 %v6130_v44, %v5708_v48  ;;  %v12875_v4 = vld [vmem:[#allocation48_spill] sm:$0xff] }
 0x43b   : > { %v6138_v62 = vpop.f32.mrb[166].mxu1  ;;  %9214 = vmatprep.mubr.msk.bf16.mxu0 %vm9607_vm1, %v12652_v21  ;;  %v12876_v48 = vcombine.low %v12874_v56, %v12875_v4 }
 0x43c   : > { %v9107_v0 = vpop.f32.mrb[167].mxu1 }
 0x43d   : > { %v5592_v60 = vpop.f32.mrb[164].mxu0 }
 0x43e   : > { %9285 = vmatmul.mubr.msk.bf16.gmra.mrb[16].mxu1 %vm366_vm2, %v12871_v34  ;;  %v5709_v33 = vadd.f32 %v5592_v60, %v11979_v46  ;;  %v9036_v45 = vpop.f32.mrb[165].mxu0 }
 0x43f   : > { %9288 = vmatprep.mubr.msk.bf16.mxu1 %vm9607_vm1, %v12652_v21  ;;  %v5595_v53 = vpop.f32.mrb[166].mxu0  ;;  %v12877_v45 = vld [vmem:[#allocation39_spill] sm:$0xff] }
 0x440   : > { %v5710_v44 = vadd.f32 %v5595_v53, %v12872_v10  ;;  %v9037_v16 = vpop.f32.mrb[167].mxu0  ;;  %v12270_v14 = vadd.f32 %v6135_v39, %v5709_v33  ;;  %v6317_v53 = vrot.slane %v12877_v45, 3  ;;  %v12879_v10 = vld [vmem:[#allocation50_spill] sm:$0xff] }
 0x441   : > { %v6143_v63 = vpop.f32.mrb[168].mxu1 }
 0x442   : > { %v9110_v32 = vpop.f32.mrb[169].mxu1  ;;  %9215 = vmatmul.mubr.msk.bf16.gmra.mrb[16].mxu0 %vm366_vm2, %v6314_v18  ;;  %v12273_v31 = vadd.f32 %v6138_v62, %v5710_v44  ;;  %v6316_v62 = vsel %vm2390_vm6, %v6313_v47, %v6315_v58  ;;  %v12878_v47 = vld [vmem:[#allocation49_spill] sm:$0xff] }
 0x443   : > { %v6146_v28 = vpop.f32.mrb[170].mxu1  ;;  %9218 = vmatprep.mubr.msk.bf16.mxu0 %vm9607_vm1, %v12652_v21  ;;  %v6318_v32 = vsel %vm2390_vm6, %v6315_v58, %v6317_v53  ;;  %v12881_v58 = vld [vmem:[#allocation51_spill] sm:$0xff] }
 0x444   : > { %v9111_v46 = vpop.f32.mrb[171].mxu1 }
 0x445   : > { %v5600_v2 = vpop.f32.mrb[168].mxu0 }
 0x446   : > { %9289 = vmatmul.mubr.msk.bf16.gmra.mrb[20].mxu1 %vm366_vm2, %v12876_v48  ;;  %v5711_v50 = vadd.f32 %v5600_v2, %v12000_v43  ;;  %v9040_v39 = vpop.f32.mrb[169].mxu0 }
 0x447   : > { %9292 = vmatprep.mubr.msk.bf16.mxu1 %vm9607_vm1, %v12652_v21  ;;  %v5603_v37 = vpop.f32.mrb[170].mxu0 }
 0x448   : > { %v5712_v0 = vadd.f32 %v5603_v37, %v12004_v61  ;;  %v9041_v42 = vpop.f32.mrb[171].mxu0  ;;  %v12287_v20 = vadd.f32 %v6143_v63, %v5711_v50  ;;  %v12880_v61 = vcombine.low %v12878_v47, %v12879_v10  ;;  %v6319_v50 = vrot.slane %v11997_v22, 3  ;;  %v12882_v37 = vld [vmem:[#allocation52_spill] sm:$0xff] }
 0x449   : > { %v6151_v60 = vpop.f32.mrb[172].mxu1 }
 0x44a   : > { %v9114_v40 = vpop.f32.mrb[173].mxu1  ;;  %9219 = vmatmul.mubr.msk.bf16.gmra.mrb[20].mxu0 %vm366_vm2, %v6316_v62  ;;  %v12290_v33 = vadd.f32 %v6146_v28, %v5712_v0 }
 0x44b   : > { %v6154_v34 = vpop.f32.mrb[174].mxu1  ;;  %9222 = vmatprep.mubr.msk.bf16.mxu0 %vm9607_vm1, %v12652_v21 }
 0x44c   : > { %v9115_v43 = vpop.f32.mrb[175].mxu1 }
 0x44d   : > { %v5608_v18 = vpop.f32.mrb[172].mxu0 }
 0x44e   : > { %9293 = vmatmul.mubr.msk.bf16.gmra.mrb[24].mxu1 %vm366_vm2, %v12880_v61  ;;  %v5713_v44 = vadd.f32 %v5608_v18, %v12016_v13  ;;  %v9044_v16 = vpop.f32.mrb[173].mxu0 }
 0x44f   : > { %9296 = vmatprep.mubr.msk.bf16.mxu1 %vm9607_vm1, %v12652_v21  ;;  %v5611_v63 = vpop.f32.mrb[174].mxu0 }
 0x450   : > { %v5714_v28 = vadd.f32 %v5611_v63, %v12020_v55  ;;  %v9045_v46 = vpop.f32.mrb[175].mxu0  ;;  %v12304_v2 = vadd.f32 %v6151_v60, %v5713_v44  ;;  %v12883_v55 = vcombine.low %v12881_v58, %v12882_v37  ;;  %v6320_v60 = vsel %vm2390_vm6, %v6317_v53, %v6319_v50 }
 0x451   : > { %v6159_v35 = vpop.f32.mrb[176].mxu1 }
 0x452   : > { %v9118_v56 = vpop.f32.mrb[177].mxu1  ;;  %9223 = vmatmul.mubr.msk.bf16.gmra.mrb[24].mxu0 %vm366_vm2, %v6318_v32  ;;  %v12307_v48 = vadd.f32 %v6154_v34, %v5714_v28 }
 0x453   : > { %v6162_v4 = vpop.f32.mrb[178].mxu1  ;;  %9226 = vmatprep.mubr.msk.bf16.mxu0 %vm9607_vm1, %v12652_v21 }
 0x454   : > { %v9119_v13 = vpop.f32.mrb[179].mxu1 }
 0x455   : > { %v5616_v39 = vpop.f32.mrb[176].mxu0 }
 0x456   : > { %9297 = vmatmul.mubr.msk.bf16.gmra.mrb[28].mxu1 %vm366_vm2, %v12883_v55  ;;  %v5715_v62 = vadd.f32 %v5616_v39, %v12032_v54  ;;  %v9048_v0 = vpop.f32.mrb[177].mxu0 }
 0x457   : > { %v5619_v42 = vpop.f32.mrb[178].mxu0 }
 0x458   : > { %v5716_v40 = vadd.f32 %v5619_v42, %v12035_v49  ;;  %v9049_v34 = vpop.f32.mrb[179].mxu0  ;;  %v12319_v45 = vadd.f32 %v6159_v35, %v5715_v62 }
 0x459   : > { %v6167_v43 = vpop.f32.mrb[180].mxu1 }
 0x45a   : > { %v9122_v21 = vpop.f32.mrb[181].mxu1  ;;  %9227 = vmatmul.mubr.msk.bf16.gmra.mrb[28].mxu0 %vm366_vm2, %v6320_v60  ;;  %v12322_v18 = vadd.f32 %v6162_v4, %v5716_v40 }
 0x45b   : > { %v6170_v22 = vpop.f32.mrb[182].mxu1 }
 0x45c   : > { %v9123_v47 = vpop.f32.mrb[183].mxu1 }
 0x45d   : > { %v5624_v10 = vpop.f32.mrb[180].mxu0 }
 0x45e   : > { %v5717_v54 = vadd.f32 %v5624_v10, %v12049_v11  ;;  %v9052_v61 = vpop.f32.mrb[181].mxu0 }
 0x45f   : > { %v5627_v44 = vpop.f32.mrb[182].mxu0 }
 0x460   : > { %v5718_v53 = vadd.f32 %v5627_v44, %v12052_v5  ;;  %v9053_v16 = vpop.f32.mrb[183].mxu0  ;;  %v12326_v63 = vadd.f32 %v6167_v43, %v5717_v54 }
 0x461   : > { %v6175_v49 = vpop.f32.mrb[184].mxu1 }
 0x462   : > { %v9126_v32 = vpop.f32.mrb[185].mxu1  ;;  %v12328_v46 = vadd.f32 %v6170_v22, %v5718_v53 }
 0x463   : > { %v6178_v28 = vpop.f32.mrb[186].mxu1 }
 0x464   : > { %v9127_v35 = vpop.f32.mrb[187].mxu1 }
 0x465   : > { %v5632_v56 = vpop.f32.mrb[184].mxu0 }
 0x466   : > { %v5719_v4 = vadd.f32 %v5632_v56, %v12066_v59  ;;  %v9056_v13 = vpop.f32.mrb[185].mxu0 }
 0x467   : > { %v5635_v50 = vpop.f32.mrb[186].mxu0 }
 0x468   : > { %v5720_v11 = vadd.f32 %v5635_v50, %v12069_v26  ;;  %v9057_v39 = vpop.f32.mrb[187].mxu0  ;;  %v12332_v37 = vadd.f32 %v6175_v49, %v5719_v4 }
 0x469   : > { %v6183_v58 = vpop.f32.mrb[188].mxu1 }
 0x46a   : > { %v9130_v5 = vpop.f32.mrb[189].mxu1  ;;  %v12334_v62 = vadd.f32 %v6178_v28, %v5720_v11 }
 0x46b   : > { %v6186_v55 = vpop.f32.mrb[190].mxu1 }
 0x46c   : > { %v9131_v0 = vpop.f32.mrb[191].mxu1 }
 0x46d   : > { %v5640_v42 = vpop.f32.mrb[188].mxu0 }
 0x46e   : > { %v5721_v60 = vadd.f32 %v5640_v42, %v12083_v23  ;;  %v9060_v40 = vpop.f32.mrb[189].mxu0 }
 0x46f   : > { %v5643_v34 = vpop.f32.mrb[190].mxu0 }
 0x470   : > { %v5722_v59 = vadd.f32 %v5643_v34, %v12086_v25  ;;  %v9061_v43 = vpop.f32.mrb[191].mxu0  ;;  %v12338_v22 = vadd.f32 %v6183_v58, %v5721_v60 }
 0x471   : > { %v6191_v21 = vpop.f32.mrb[192].mxu1 }
 0x472   : > { %v9134_v26 = vpop.f32.mrb[193].mxu1  ;;  %v12340_v10 = vadd.f32 %v6186_v55, %v5722_v59 }
 0x473   : > { %v6194_v47 = vpop.f32.mrb[194].mxu1 }
 0x474   : > { %v9135_v54 = vpop.f32.mrb[195].mxu1 }
 0x475   : > { %v5648_v61 = vpop.f32.mrb[192].mxu0 }
 0x476   : > { %v5723_v44 = vadd.f32 %v5648_v61, %v12100_v51  ;;  %v9064_v53 = vpop.f32.mrb[193].mxu0 }
 0x477   : > { %v5651_v16 = vpop.f32.mrb[194].mxu0 }
 0x478   : > { %v5724_v23 = vadd.f32 %v5651_v16, %v12103_v29  ;;  %v9065_v49 = vpop.f32.mrb[195].mxu0  ;;  %v12344_v28 = vadd.f32 %v6191_v21, %v5723_v44 }
 0x479   : > { %v6199_v32 = vpop.f32.mrb[196].mxu1 }
 0x47a   : > { %v9138_v25 = vpop.f32.mrb[197].mxu1  ;;  %v12346_v56 = vadd.f32 %v6194_v47, %v5724_v23 }
 0x47b   : > { %v6202_v35 = vpop.f32.mrb[198].mxu1 }
 0x47c   : > { %v9139_v4 = vpop.f32.mrb[199].mxu1 }
 0x47d   : > { %v5656_v13 = vpop.f32.mrb[196].mxu0 }
 0x47e   : > { %v5725_v50 = vadd.f32 %v5656_v13, %v12117_v38  ;;  %v9068_v11 = vpop.f32.mrb[197].mxu0 }
 0x47f   : > { %v5659_v39 = vpop.f32.mrb[198].mxu0 }
 0x480   : > { %v5726_v51 = vadd.f32 %v5659_v39, %v12120_v36  ;;  %v9069_v58 = vpop.f32.mrb[199].mxu0  ;;  %v12350_v55 = vadd.f32 %v6199_v32, %v5725_v50 }
 0x481   : > { %v6207_v5 = vpop.f32.mrb[200].mxu1 }
 0x482   : > { %v9142_v29 = vpop.f32.mrb[201].mxu1  ;;  %v12352_v42 = vadd.f32 %v6202_v35, %v5726_v51 }
 0x483   : > { %v6210_v0 = vpop.f32.mrb[202].mxu1 }
 0x484   : > { %v9143_v60 = vpop.f32.mrb[203].mxu1 }
 0x485   : > { %v5664_v40 = vpop.f32.mrb[200].mxu0 }
 0x486   : > { %v5727_v34 = vadd.f32 %v5664_v40, %v12134_v6  ;;  %v9072_v59 = vpop.f32.mrb[201].mxu0 }
 0x487   : > { %v5667_v43 = vpop.f32.mrb[202].mxu0 }
 0x488   : > { %v5728_v38 = vadd.f32 %v5667_v43, %v12137_v57  ;;  %v9073_v21 = vpop.f32.mrb[203].mxu0  ;;  %v12356_v47 = vadd.f32 %v6207_v5, %v5727_v34 }
 0x489   : > { %v6215_v26 = vpop.f32.mrb[204].mxu1 }
 0x48a   : > { %v9146_v36 = vpop.f32.mrb[205].mxu1  ;;  %v12358_v61 = vadd.f32 %v6210_v0, %v5728_v38 }
 0x48b   : > { %v6218_v54 = vpop.f32.mrb[206].mxu1 }
 0x48c   : > { %v9147_v44 = vpop.f32.mrb[207].mxu1 }
 0x48d   : > { %v5672_v53 = vpop.f32.mrb[204].mxu0 }
 0x48e   : > { %v5729_v16 = vadd.f32 %v5672_v53, %v12151_v12  ;;  %v9076_v23 = vpop.f32.mrb[205].mxu0 }
 0x48f   : > { %v5675_v49 = vpop.f32.mrb[206].mxu0 }
 0x490   : > { %v5730_v6 = vadd.f32 %v5675_v49, %v12154_v8  ;;  %v9077_v32 = vpop.f32.mrb[207].mxu0  ;;  %v12362_v35 = vadd.f32 %v6215_v26, %v5729_v16 }
 0x491   : > { %v6223_v25 = vpop.f32.mrb[208].mxu1 }
 0x492   : > { %v9150_v57 = vpop.f32.mrb[209].mxu1  ;;  %v12364_v13 = vadd.f32 %v6218_v54, %v5730_v6 }
 0x493   : > { %v6226_v4 = vpop.f32.mrb[210].mxu1 }
 0x494   : > { %v9151_v50 = vpop.f32.mrb[211].mxu1 }
 0x495   : > { %v5680_v11 = vpop.f32.mrb[208].mxu0 }
 0x496   : > { %v5731_v39 = vadd.f32 %v5680_v11, %v12168_v24  ;;  %v9080_v51 = vpop.f32.mrb[209].mxu0 }
 0x497   : > { %v5683_v58 = vpop.f32.mrb[210].mxu0 }
 0x498   : > { %v5732_v12 = vadd.f32 %v5683_v58, %v12171_v7  ;;  %v9081_v5 = vpop.f32.mrb[211].mxu0  ;;  %v12368_v0 = vadd.f32 %v6223_v25, %v5731_v39 }
 0x499   : > { %v6231_v29 = vpop.f32.mrb[212].mxu1 }
 0x49a   : > { %v9154_v8 = vpop.f32.mrb[213].mxu1  ;;  %v12370_v40 = vadd.f32 %v6226_v4, %v5732_v12 }
 0x49b   : > { %v6234_v60 = vpop.f32.mrb[214].mxu1 }
 0x49c   : > { %v9155_v34 = vpop.f32.mrb[215].mxu1 }
 0x49d   : > { %v5688_v59 = vpop.f32.mrb[212].mxu0 }
 0x49e   : > { %v5733_v43 = vadd.f32 %v5688_v59, %v12185_v27  ;;  %v9084_v38 = vpop.f32.mrb[213].mxu0 }
 0x49f   : > { %v5691_v21 = vpop.f32.mrb[214].mxu0 }
 0x4a0   : > { %v5734_v24 = vadd.f32 %v5691_v21, %v12188_v1  ;;  %v9085_v26 = vpop.f32.mrb[215].mxu0  ;;  %v12374_v54 = vadd.f32 %v6231_v29, %v5733_v43 }
 0x4a1   : > { %v6239_v36 = vpop.f32.mrb[216].mxu1 }
 0x4a2   : > { %v9158_v7 = vpop.f32.mrb[217].mxu1  ;;  %v12376_v53 = vadd.f32 %v6234_v60, %v5734_v24 }
 0x4a3   : > { %v6242_v44 = vpop.f32.mrb[218].mxu1 }
 0x4a4   : > { %v9159_v16 = vpop.f32.mrb[219].mxu1 }
 0x4a5   : > { %v5696_v23 = vpop.f32.mrb[216].mxu0 }
 0x4a6   : > { %v5735_v49 = vadd.f32 %v5696_v23, %v12202_v30  ;;  %v9088_v6 = vpop.f32.mrb[217].mxu0  ;;  %v12388_v30 = vld [vmem:[%s12533_s2] ss:$0 sm:$0xff] }
 0x4a7   : > { %v5699_v32 = vpop.f32.mrb[218].mxu0 }
 0x4a8   : > { %v5736_v27 = vadd.f32 %v5699_v32, %v12205_v17  ;;  %v9089_v25 = vpop.f32.mrb[219].mxu0  ;;  %v12380_v1 = vadd.f32 %v6239_v36, %v5735_v49 }
 0x4a9   : > { %v6685_v57 = vpop.f32.mrb[220].mxu1 }
 0x4aa   : > { %v9234_v4 = vpop.f32.mrb[221].mxu1  ;;  %v12382_v11 = vadd.f32 %v6242_v44, %v5736_v27 }
 0x4ab   : > { %v6688_v50 = vpop.f32.mrb[222].mxu1 }
 0x4ac   : > { %v9235_v39 = vpop.f32.mrb[223].mxu1 }
 0x4ad   : > { %v6409_v51 = vpop.f32.mrb[220].mxu0 }
 0x4ae   : > { %v6544_v58 = vadd.f32 %v6409_v51, %v12219_v52  ;;  %v9164_v12 = vpop.f32.mrb[221].mxu0 }
 0x4af   : > { %v6412_v17 = vpop.f32.mrb[222].mxu0 }
 0x4b0   : > { %v6820_v5 = vadd.f32 %v6685_v57, %v6544_v58  ;;  %v6545_v29 = vadd.f32 %v6412_v17, %v12222_v9  ;;  %v9165_v8 = vpop.f32.mrb[223].mxu0 }
 0x4b1   : > { %v6693_v60 = vpop.f32.mrb[224].mxu1 }
 0x4b2   : > { %v9238_v34 = vpop.f32.mrb[225].mxu1  ;;  %v6861_v59 = vadd.f32 %v12388_v30, %v6820_v5  ;;  %v6821_v43 = vadd.f32 %v6688_v50, %v6545_v29 }
 0x4b3   : > { %v6696_v38 = vpop.f32.mrb[226].mxu1 }
 0x4b4   : > { %v9239_v21 = vpop.f32.mrb[227].mxu1  ;;  %v6929_v52 = vmul.f32 0.2, %v6861_v59  ;;  %v6862_v24 = vadd.f32 %v12388_v30, %v6821_v43  ;;  %vm6895_vm10 = vcmp.gt.f32.partialorder %v6861_v59, 0.0 }
 0x4b5   : > { %v6417_v26 = vpop.f32.mrb[224].mxu0 }
 0x4b6   : > { %vm6896_vm11 = vcmp.gt.f32.partialorder %v6862_v24, 0.0  ;;  %v6930_v36 = vmul.f32 0.2, %v6862_v24  ;;  %v6546_v9 = vadd.f32 %v6417_v26, %v12236_v15  ;;  %v9168_v7 = vpop.f32.mrb[225].mxu0  ;;  %v6963_v16 = vsel %vm6895_vm10, %v6861_v59, %v6929_v52 }
 0x4b7   : > { %v6420_v44 = vpop.f32.mrb[226].mxu0 }
 0x4b8   : > { %v6964_v23 = vsel %vm6896_vm11, %v6862_v24, %v6930_v36  ;;  %v6822_v49 = vadd.f32 %v6693_v60, %v6546_v9  ;;  %v6547_v6 = vadd.f32 %v6420_v44, %v12239_v3  ;;  %v9169_v32 = vpop.f32.mrb[227].mxu0 }
 0x4b9   : > { %v6701_v27 = vpop.f32.mrb[228].mxu1  ;;  %v7794_v25 = vpack.c.bf16 %v6964_v23, %v6963_v16 }
 0x4ba   : > { %v9242_v57 = vpop.f32.mrb[229].mxu1  ;;  %v6863_v4 = vadd.f32 %v12388_v30, %v6822_v49  ;;  %v6823_v50 = vadd.f32 %v6696_v38, %v6547_v6 }
 0x4bb   : > { %v6704_v39 = vpop.f32.mrb[230].mxu1  ;;  %7795 = vst [vmem:[%s12399_s29] sm:$0xff] %v7794_v25  }
 0x4bc   : > { %v9243_v15 = vpop.f32.mrb[231].mxu1  ;;  %v6931_v51 = vmul.f32 0.2, %v6863_v4  ;;  %v6864_v58 = vadd.f32 %v12388_v30, %v6823_v50  ;;  %vm6897_vm12 = vcmp.gt.f32.partialorder %v6863_v4, 0.0 }
 0x4bd   : > { %v6425_v12 = vpop.f32.mrb[228].mxu0 }
 0x4be   : > { %vm6898_vm13 = vcmp.gt.f32.partialorder %v6864_v58, 0.0  ;;  %v6932_v3 = vmul.f32 0.2, %v6864_v58  ;;  %v6548_v17 = vadd.f32 %v6425_v12, %v12253_v41  ;;  %v9172_v5 = vpop.f32.mrb[229].mxu0  ;;  %v6965_v8 = vsel %vm6897_vm12, %v6863_v4, %v6931_v51 }
 0x4bf   : > { %v6428_v29 = vpop.f32.mrb[230].mxu0 }
 0x4c0   : > { %v6966_v60 = vsel %vm6898_vm13, %v6864_v58, %v6932_v3  ;;  %v6824_v34 = vadd.f32 %v6701_v27, %v6548_v17  ;;  %v6549_v59 = vadd.f32 %v6428_v29, %v12256_v19  ;;  %v9173_v43 = vpop.f32.mrb[231].mxu0 }
 0x4c1   : > { %v6709_v38 = vpop.f32.mrb[232].mxu1  ;;  %v7799_v21 = vpack.c.bf16 %v6966_v60, %v6965_v8 }
 0x4c2   : > { %v9246_v52 = vpop.f32.mrb[233].mxu1  ;;  %v6865_v24 = vadd.f32 %v12388_v30, %v6824_v34  ;;  %v6825_v26 = vadd.f32 %v6704_v39, %v6549_v59 }
 0x4c3   : > { %v6712_v36 = vpop.f32.mrb[234].mxu1  ;;  %7876 = vst [vmem:[%s12399_s29 + $0x8] sm:$0xff] %v7799_v21  }
 0x4c4   : > { %v9247_v9 = vpop.f32.mrb[235].mxu1  ;;  %v6933_v7 = vmul.f32 0.2, %v6865_v24  ;;  %v6866_v41 = vadd.f32 %v12388_v30, %v6825_v26  ;;  %vm6899_vm14 = vcmp.gt.f32.partialorder %v6865_v24, 0.0 }
 0x4c5   : > { %v6433_v44 = vpop.f32.mrb[232].mxu0 }
 0x4c6   : > { %vm6900_vm15 = vcmp.gt.f32.partialorder %v6866_v41, 0.0  ;;  %v6934_v16 = vmul.f32 0.2, %v6866_v41  ;;  %v6550_v19 = vadd.f32 %v6433_v44, %v12270_v14  ;;  %v9176_v23 = vpop.f32.mrb[233].mxu0  ;;  %v6967_v6 = vsel %vm6899_vm14, %v6865_v24, %v6933_v7 }
 0x4c7   : > { %v6436_v49 = vpop.f32.mrb[234].mxu0 }
 0x4c8   : > { %v6968_v32 = vsel %vm6900_vm15, %v6866_v41, %v6934_v16  ;;  %v6826_v27 = vadd.f32 %v6709_v38, %v6550_v19  ;;  %v6551_v25 = vadd.f32 %v6436_v49, %v12273_v31  ;;  %v9177_v57 = vpop.f32.mrb[235].mxu0 }
 0x4c9   : > { %v6717_v4 = vpop.f32.mrb[236].mxu1  ;;  %v7804_v50 = vpack.c.bf16 %v6968_v32, %v6967_v6 }
 0x4ca   : > { %v9250_v39 = vpop.f32.mrb[237].mxu1  ;;  %v6867_v15 = vadd.f32 %v12388_v30, %v6826_v27  ;;  %v6827_v51 = vadd.f32 %v6712_v36, %v6551_v25 }
 0x4cb   : > { %v6720_v58 = vpop.f32.mrb[238].mxu1  ;;  %7877 = vst [vmem:[%s12399_s29 + $0x10] sm:$0xff] %v7804_v50  }
 0x4cc   : > { %v9251_v12 = vpop.f32.mrb[239].mxu1  ;;  %v6935_v3 = vmul.f32 0.2, %v6867_v15  ;;  %v6868_v14 = vadd.f32 %v12388_v30, %v6827_v51  ;;  %vm6901_vm0 = vcmp.gt.f32.partialorder %v6867_v15, 0.0 }
 0x4cd   : > { %v6441_v17 = vpop.f32.mrb[236].mxu0 }
 0x4ce   : > { %vm6902_vm1 = vcmp.gt.f32.partialorder %v6868_v14, 0.0  ;;  %v6936_v5 = vmul.f32 0.2, %v6868_v14  ;;  %v6552_v31 = vadd.f32 %v6441_v17, %v12287_v20  ;;  %v9180_v29 = vpop.f32.mrb[237].mxu0  ;;  %v6969_v60 = vsel %vm6901_vm0, %v6867_v15, %v6935_v3 }
 0x4cf   : > { %v6444_v8 = vpop.f32.mrb[238].mxu0 }
 0x4d0   : > { %v6970_v34 = vsel %vm6902_vm1, %v6868_v14, %v6936_v5  ;;  %v6828_v59 = vadd.f32 %v6717_v4, %v6552_v31  ;;  %v6553_v43 = vadd.f32 %v6444_v8, %v12290_v33  ;;  %v9181_v38 = vpop.f32.mrb[239].mxu0 }
 0x4d1   : > { %v6725_v21 = vpop.f32.mrb[240].mxu1  ;;  %v7809_v52 = vpack.c.bf16 %v6970_v34, %v6969_v60 }
 0x4d2   : > { %v9254_v24 = vpop.f32.mrb[241].mxu1  ;;  %v6869_v26 = vadd.f32 %v12388_v30, %v6828_v59  ;;  %v6829_v36 = vadd.f32 %v6720_v58, %v6553_v43 }
 0x4d3   : > { %v6728_v9 = vpop.f32.mrb[242].mxu1  ;;  %7878 = vst [vmem:[%s12399_s29 + $0x18] sm:$0xff] %v7809_v52  }
 0x4d4   : > { %v9255_v7 = vpop.f32.mrb[243].mxu1  ;;  %v6937_v41 = vmul.f32 0.2, %v6869_v26  ;;  %v6870_v20 = vadd.f32 %v12388_v30, %v6829_v36  ;;  %vm6903_vm2 = vcmp.gt.f32.partialorder %v6869_v26, 0.0 }
 0x4d5   : > { %v6449_v44 = vpop.f32.mrb[240].mxu0 }
 0x4d6   : > { %vm6904_vm3 = vcmp.gt.f32.partialorder %v6870_v20, 0.0  ;;  %v6938_v16 = vmul.f32 0.2, %v6870_v20  ;;  %v6554_v33 = vadd.f32 %v6449_v44, %v12304_v2  ;;  %v9184_v19 = vpop.f32.mrb[241].mxu0  ;;  %v6971_v49 = vsel %vm6903_vm2, %v6869_v26, %v6937_v41 }
 0x4d7   : > { %v6452_v23 = vpop.f32.mrb[242].mxu0 }
 0x4d8   : > { %v6972_v6 = vsel %vm6904_vm3, %v6870_v20, %v6938_v16  ;;  %v6830_v32 = vadd.f32 %v6725_v21, %v6554_v33  ;;  %v6555_v27 = vadd.f32 %v6452_v23, %v12307_v48  ;;  %v9185_v25 = vpop.f32.mrb[243].mxu0 }
 0x4d9   : > { %v6733_v57 = vpop.f32.mrb[244].mxu1  ;;  %v7814_v4 = vpack.c.bf16 %v6972_v6, %v6971_v49 }
 0x4da   : > { %v9258_v50 = vpop.f32.mrb[245].mxu1  ;;  %v6871_v39 = vadd.f32 %v12388_v30, %v6830_v32  ;;  %v6831_v15 = vadd.f32 %v6728_v9, %v6555_v27 }
 0x4db   : > { %v6736_v51 = vpop.f32.mrb[246].mxu1  ;;  %7879 = vst [vmem:[%s12399_s29 + $0x20] sm:$0xff] %v7814_v4  }
 0x4dc   : > { %v9259_v58 = vpop.f32.mrb[247].mxu1  ;;  %v6939_v12 = vmul.f32 0.2, %v6871_v39  ;;  %v6872_v2 = vadd.f32 %v12388_v30, %v6831_v15  ;;  %vm6905_vm4 = vcmp.gt.f32.partialorder %v6871_v39, 0.0 }
 0x4dd   : > { %v6457_v3 = vpop.f32.mrb[244].mxu0 }
 0x4de   : > { %vm6906_vm5 = vcmp.gt.f32.partialorder %v6872_v2, 0.0  ;;  %v6940_v14 = vmul.f32 0.2, %v6872_v2  ;;  %v6556_v48 = vadd.f32 %v6457_v3, %v12319_v45  ;;  %v9188_v17 = vpop.f32.mrb[245].mxu0  ;;  %v6973_v31 = vsel %vm6905_vm4, %v6871_v39, %v6939_v12 }
 0x4df   : > { %v6460_v5 = vpop.f32.mrb[246].mxu0 }
 0x4e0   : > { %v6974_v29 = vsel %vm6906_vm5, %v6872_v2, %v6940_v14  ;;  %v6832_v8 = vadd.f32 %v6733_v57, %v6556_v48  ;;  %v6557_v60 = vadd.f32 %v6460_v5, %v12322_v18  ;;  %v9189_v34 = vpop.f32.mrb[247].mxu0 }
 0x4e1   : > { %v6741_v59 = vpop.f32.mrb[248].mxu1  ;;  %v7819_v43 = vpack.c.bf16 %v6974_v29, %v6973_v31 }
 0x4e2   : > { %v9262_v38 = vpop.f32.mrb[249].mxu1  ;;  %v6873_v21 = vadd.f32 %v12388_v30, %v6832_v8  ;;  %v6833_v52 = vadd.f32 %v6736_v51, %v6557_v60 }
 0x4e3   : > { %v6744_v24 = vpop.f32.mrb[250].mxu1  ;;  %7880 = vst [vmem:[%s12399_s29 + $0x28] sm:$0xff] %v7819_v43  }
 0x4e4   : > { %v9263_v26 = vpop.f32.mrb[251].mxu1  ;;  %v6941_v36 = vmul.f32 0.2, %v6873_v21  ;;  %v6874_v45 = vadd.f32 %v12388_v30, %v6833_v52  ;;  %vm6907_vm6 = vcmp.gt.f32.partialorder %v6873_v21, 0.0 }
 0x4e5   : > { %v6465_v9 = vpop.f32.mrb[248].mxu0 }
 0x4e6   : > { %vm6908_vm7 = vcmp.gt.f32.partialorder %v6874_v45, 0.0  ;;  %v6942_v7 = vmul.f32 0.2, %v6874_v45  ;;  %v6558_v18 = vadd.f32 %v6465_v9, %v12326_v63  ;;  %v9192_v41 = vpop.f32.mrb[249].mxu0  ;;  %v6975_v44 = vsel %vm6907_vm6, %v6873_v21, %v6941_v36 }
 0x4e7   : > { %v6468_v20 = vpop.f32.mrb[250].mxu0 }
 0x4e8   : > { %v6976_v16 = vsel %vm6908_vm7, %v6874_v45, %v6942_v7  ;;  %v6834_v33 = vadd.f32 %v6741_v59, %v6558_v18  ;;  %v6559_v19 = vadd.f32 %v6468_v20, %v12328_v46  ;;  %v9193_v23 = vpop.f32.mrb[251].mxu0 }
 0x4e9   : > { %v6749_v49 = vpop.f32.mrb[252].mxu1  ;;  %v7824_v6 = vpack.c.bf16 %v6976_v16, %v6975_v44 }
 0x4ea   : > { %v9266_v32 = vpop.f32.mrb[253].mxu1  ;;  %v6875_v27 = vadd.f32 %v12388_v30, %v6834_v33  ;;  %v6835_v25 = vadd.f32 %v6744_v24, %v6559_v19 }
 0x4eb   : > { %v6752_v57 = vpop.f32.mrb[254].mxu1  ;;  %7881 = vst [vmem:[%s12399_s29 + $0x30] sm:$0xff] %v7824_v6  }
 0x4ec   : > { %v9267_v4 = vpop.f32.mrb[255].mxu1  ;;  %v6943_v50 = vmul.f32 0.2, %v6875_v27  ;;  %v6876_v63 = vadd.f32 %v12388_v30, %v6835_v25  ;;  %vm6909_vm8 = vcmp.gt.f32.partialorder %v6875_v27, 0.0 }
 0x4ed   : > { %v6473_v39 = vpop.f32.mrb[252].mxu0 }
 0x4ee   : > { %vm6910_vm9 = vcmp.gt.f32.partialorder %v6876_v63, 0.0  ;;  %v6944_v15 = vmul.f32 0.2, %v6876_v63  ;;  %v6560_v46 = vadd.f32 %v6473_v39, %v12332_v37  ;;  %v9196_v51 = vpop.f32.mrb[253].mxu0  ;;  %v6977_v12 = vsel %vm6909_vm8, %v6875_v27, %v6943_v50 }
 0x4ef   : > { %v6476_v58 = vpop.f32.mrb[254].mxu0 }
 0x4f0   : > { %v6978_v2 = vsel %vm6910_vm9, %v6876_v63, %v6944_v15  ;;  %v6836_v3 = vadd.f32 %v6749_v49, %v6560_v46  ;;  %v6561_v14 = vadd.f32 %v6476_v58, %v12334_v62  ;;  %v9197_v48 = vpop.f32.mrb[255].mxu0 }
 0x4f1   : > { %v6757_v17 = vpop.f32.mrb[0].mxu1  ;;  %v7829_v5 = vpack.c.bf16 %v6978_v2, %v6977_v12 }
 0x4f2   : > { %v9270_v31 = vpop.f32.mrb[1].mxu1  ;;  %v6877_v29 = vadd.f32 %v12388_v30, %v6836_v3  ;;  %v6837_v8 = vadd.f32 %v6752_v57, %v6561_v14 }
 0x4f3   : > { %v6760_v60 = vpop.f32.mrb[2].mxu1  ;;  %7882 = vst [vmem:[%s12399_s29 + $0x38] sm:$0xff] %v7829_v5  }
 0x4f4   : > { %v9271_v34 = vpop.f32.mrb[3].mxu1  ;;  %v6945_v59 = vmul.f32 0.2, %v6877_v29  ;;  %v6878_v37 = vadd.f32 %v12388_v30, %v6837_v8  ;;  %vm6911_vm10 = vcmp.gt.f32.partialorder %v6877_v29, 0.0 }
 0x4f5   : > { %v6481_v43 = vpop.f32.mrb[0].mxu0 }
 0x4f6   : > { %vm6912_vm11 = vcmp.gt.f32.partialorder %v6878_v37, 0.0  ;;  %v6946_v38 = vmul.f32 0.2, %v6878_v37  ;;  %v6562_v62 = vadd.f32 %v6481_v43, %v12338_v22  ;;  %v9200_v21 = vpop.f32.mrb[1].mxu0  ;;  %v6979_v24 = vsel %vm6911_vm10, %v6877_v29, %v6945_v59 }
 0x4f7   : > { %v6484_v52 = vpop.f32.mrb[2].mxu0 }
 0x4f8   : > { %v6980_v26 = vsel %vm6912_vm11, %v6878_v37, %v6946_v38  ;;  %v6838_v36 = vadd.f32 %v6757_v17, %v6562_v62  ;;  %v6563_v45 = vadd.f32 %v6484_v52, %v12340_v10  ;;  %v9201_v9 = vpop.f32.mrb[3].mxu0 }
 0x4f9   : > { %v6765_v7 = vpop.f32.mrb[4].mxu1  ;;  %v7834_v18 = vpack.c.bf16 %v6980_v26, %v6979_v24 }
 0x4fa   : > { %v9274_v41 = vpop.f32.mrb[5].mxu1  ;;  %v6879_v20 = vadd.f32 %v12388_v30, %v6838_v36  ;;  %v6839_v44 = vadd.f32 %v6760_v60, %v6563_v45 }
 0x4fb   : > { %v6768_v16 = vpop.f32.mrb[6].mxu1  ;;  %7883 = vst [vmem:[%s12399_s29 + $0x40] sm:$0xff] %v7834_v18  }
 0x4fc   : > { %v9275_v33 = vpop.f32.mrb[7].mxu1  ;;  %v6947_v19 = vmul.f32 0.2, %v6879_v20  ;;  %v6880_v22 = vadd.f32 %v12388_v30, %v6839_v44  ;;  %vm6913_vm12 = vcmp.gt.f32.partialorder %v6879_v20, 0.0 }
 0x4fd   : > { %v6489_v23 = vpop.f32.mrb[4].mxu0 }
 0x4fe   : > { %vm6914_vm13 = vcmp.gt.f32.partialorder %v6880_v22, 0.0  ;;  %v6948_v49 = vmul.f32 0.2, %v6880_v22  ;;  %v6564_v10 = vadd.f32 %v6489_v23, %v12344_v28  ;;  %v9204_v6 = vpop.f32.mrb[5].mxu0  ;;  %v6981_v27 = vsel %vm6913_vm12, %v6879_v20, %v6947_v19 }
 0x4ff   : > { %v6492_v32 = vpop.f32.mrb[6].mxu0 }
 0x500   : > { %v6982_v25 = vsel %vm6914_vm13, %v6880_v22, %v6948_v49  ;;  %v6840_v57 = vadd.f32 %v6765_v7, %v6564_v10  ;;  %v6565_v4 = vadd.f32 %v6492_v32, %v12346_v56  ;;  %v9205_v50 = vpop.f32.mrb[7].mxu0 }
 0x501   : > { %v6773_v63 = vpop.f32.mrb[8].mxu1  ;;  %v7839_v39 = vpack.c.bf16 %v6982_v25, %v6981_v27 }
 0x502   : > { %v9278_v15 = vpop.f32.mrb[9].mxu1  ;;  %v6881_v46 = vadd.f32 %v12388_v30, %v6840_v57  ;;  %v6841_v51 = vadd.f32 %v6768_v16, %v6565_v4 }
 0x503   : > { %v6776_v58 = vpop.f32.mrb[10].mxu1  ;;  %7884 = vst [vmem:[%s12399_s29 + $0x48] sm:$0xff] %v7839_v39  }
 0x504   : > { %v9279_v12 = vpop.f32.mrb[11].mxu1  ;;  %v6949_v2 = vmul.f32 0.2, %v6881_v46  ;;  %v6882_v28 = vadd.f32 %v12388_v30, %v6841_v51  ;;  %vm6915_vm14 = vcmp.gt.f32.partialorder %v6881_v46, 0.0 }
 0x505   : > { %v6497_v3 = vpop.f32.mrb[8].mxu0 }
 0x506   : > { %vm6916_vm15 = vcmp.gt.f32.partialorder %v6882_v28, 0.0  ;;  %v6950_v14 = vmul.f32 0.2, %v6882_v28  ;;  %v6566_v56 = vadd.f32 %v6497_v3, %v12350_v55  ;;  %v9208_v48 = vpop.f32.mrb[9].mxu0  ;;  %v6983_v5 = vsel %vm6915_vm14, %v6881_v46, %v6949_v2 }
 0x507   : > { %v6500_v17 = vpop.f32.mrb[10].mxu0 }
 0x508   : > { %v6984_v31 = vsel %vm6916_vm15, %v6882_v28, %v6950_v14  ;;  %v6842_v29 = vadd.f32 %v6773_v63, %v6566_v56  ;;  %v6567_v8 = vadd.f32 %v6500_v17, %v12352_v42  ;;  %v9209_v60 = vpop.f32.mrb[11].mxu0 }
 0x509   : > { %v6781_v34 = vpop.f32.mrb[12].mxu1  ;;  %v7844_v59 = vpack.c.bf16 %v6984_v31, %v6983_v5 }
 0x50a   : > { %v9282_v37 = vpop.f32.mrb[13].mxu1  ;;  %v6883_v43 = vadd.f32 %v12388_v30, %v6842_v29  ;;  %v6843_v38 = vadd.f32 %v6776_v58, %v6567_v8 }
 0x50b   : > { %v6784_v62 = vpop.f32.mrb[14].mxu1  ;;  %7885 = vst [vmem:[%s12399_s29 + $0x50] sm:$0xff] %v7844_v59  }
 0x50c   : > { %v9283_v21 = vpop.f32.mrb[15].mxu1  ;;  %v6951_v52 = vmul.f32 0.2, %v6883_v43  ;;  %v6884_v55 = vadd.f32 %v12388_v30, %v6843_v38  ;;  %vm6917_vm0 = vcmp.gt.f32.partialorder %v6883_v43, 0.0 }
 0x50d   : > { %v6505_v24 = vpop.f32.mrb[12].mxu0 }
 0x50e   : > { %vm6918_vm1 = vcmp.gt.f32.partialorder %v6884_v55, 0.0  ;;  %v6952_v26 = vmul.f32 0.2, %v6884_v55  ;;  %v6568_v42 = vadd.f32 %v6505_v24, %v12356_v47  ;;  %v9212_v36 = vpop.f32.mrb[13].mxu0  ;;  %v6985_v9 = vsel %vm6917_vm0, %v6883_v43, %v6951_v52 }
 0x50f   : > { %v6508_v45 = vpop.f32.mrb[14].mxu0 }
 0x510   : > { %v6986_v7 = vsel %vm6918_vm1, %v6884_v55, %v6952_v26  ;;  %v6844_v18 = vadd.f32 %v6781_v34, %v6568_v42  ;;  %v6569_v41 = vadd.f32 %v6508_v45, %v12358_v61  ;;  %v9213_v20 = vpop.f32.mrb[15].mxu0 }
 0x511   : > { %v6789_v44 = vpop.f32.mrb[16].mxu1  ;;  %v7849_v16 = vpack.c.bf16 %v6986_v7, %v6985_v9 }
 0x512   : > { %v9286_v33 = vpop.f32.mrb[17].mxu1  ;;  %v6885_v19 = vadd.f32 %v12388_v30, %v6844_v18  ;;  %v6845_v22 = vadd.f32 %v6784_v62, %v6569_v41 }
 0x513   : > { %v6792_v23 = vpop.f32.mrb[18].mxu1  ;;  %7886 = vst [vmem:[%s12399_s29 + $0x58] sm:$0xff] %v7849_v16  }
 0x514   : > { %v9287_v49 = vpop.f32.mrb[19].mxu1  ;;  %v6953_v10 = vmul.f32 0.2, %v6885_v19  ;;  %v6886_v47 = vadd.f32 %v12388_v30, %v6845_v22  ;;  %vm6919_vm2 = vcmp.gt.f32.partialorder %v6885_v19, 0.0 }
 0x515   : > { %v6513_v6 = vpop.f32.mrb[16].mxu0 }
 0x516   : > { %vm6920_vm3 = vcmp.gt.f32.partialorder %v6886_v47, 0.0  ;;  %v6954_v32 = vmul.f32 0.2, %v6886_v47  ;;  %v6570_v61 = vadd.f32 %v6513_v6, %v12362_v35  ;;  %v9216_v27 = vpop.f32.mrb[17].mxu0  ;;  %v6987_v57 = vsel %vm6919_vm2, %v6885_v19, %v6953_v10 }
 0x517   : > { %v6516_v25 = vpop.f32.mrb[18].mxu0 }
 0x518   : > { %v6988_v4 = vsel %vm6920_vm3, %v6886_v47, %v6954_v32  ;;  %v6846_v50 = vadd.f32 %v6789_v44, %v6570_v61  ;;  %v6571_v63 = vadd.f32 %v6516_v25, %v12364_v13  ;;  %v9217_v39 = vpop.f32.mrb[19].mxu0 }
 0x519   : > { %v6797_v15 = vpop.f32.mrb[20].mxu1  ;;  %v7854_v46 = vpack.c.bf16 %v6988_v4, %v6987_v57 }
 0x51a   : > { %v9290_v51 = vpop.f32.mrb[21].mxu1  ;;  %v6887_v58 = vadd.f32 %v12388_v30, %v6846_v50  ;;  %v6847_v12 = vadd.f32 %v6792_v23, %v6571_v63 }
 0x51b   : > { %v6800_v2 = vpop.f32.mrb[22].mxu1  ;;  %7887 = vst [vmem:[%s12399_s29 + $0x60] sm:$0xff] %v7854_v46  }
 0x51c   : > { %v9291_v28 = vpop.f32.mrb[23].mxu1  ;;  %v6955_v3 = vmul.f32 0.2, %v6887_v58  ;;  %v6888_v35 = vadd.f32 %v12388_v30, %v6847_v12  ;;  %vm6921_vm4 = vcmp.gt.f32.partialorder %v6887_v58, 0.0 }
 0x51d   : > { %v6521_v14 = vpop.f32.mrb[20].mxu0 }
 0x51e   : > { %vm6922_vm5 = vcmp.gt.f32.partialorder %v6888_v35, 0.0  ;;  %v6956_v56 = vmul.f32 0.2, %v6888_v35  ;;  %v6572_v13 = vadd.f32 %v6521_v14, %v12368_v0  ;;  %v9220_v48 = vpop.f32.mrb[21].mxu0  ;;  %v6989_v5 = vsel %vm6921_vm4, %v6887_v58, %v6955_v3 }
 0x51f   : > { %v6524_v17 = vpop.f32.mrb[22].mxu0 }
 0x520   : > { %v6990_v31 = vsel %vm6922_vm5, %v6888_v35, %v6956_v56  ;;  %v6848_v29 = vadd.f32 %v6797_v15, %v6572_v13  ;;  %v6573_v8 = vadd.f32 %v6524_v17, %v12370_v40  ;;  %v9221_v60 = vpop.f32.mrb[23].mxu0 }
 0x521   : > { %v6805_v34 = vpop.f32.mrb[24].mxu1  ;;  %v7859_v59 = vpack.c.bf16 %v6990_v31, %v6989_v5 }
 0x522   : > { %v9294_v37 = vpop.f32.mrb[25].mxu1  ;;  %v6889_v43 = vadd.f32 %v12388_v30, %v6848_v29  ;;  %v6849_v38 = vadd.f32 %v6800_v2, %v6573_v8 }
 0x523   : > { %v6808_v62 = vpop.f32.mrb[26].mxu1  ;;  %7888 = vst [vmem:[%s12399_s29 + $0x68] sm:$0xff] %v7859_v59  }
 0x524   : > { %v9295_v21 = vpop.f32.mrb[27].mxu1  ;;  %v6957_v52 = vmul.f32 0.2, %v6889_v43  ;;  %v6890_v0 = vadd.f32 %v12388_v30, %v6849_v38  ;;  %vm6923_vm6 = vcmp.gt.f32.partialorder %v6889_v43, 0.0 }
 0x525   : > { %v6529_v55 = vpop.f32.mrb[24].mxu0 }
 0x526   : > { %vm6924_vm7 = vcmp.gt.f32.partialorder %v6890_v0, 0.0  ;;  %v6958_v24 = vmul.f32 0.2, %v6890_v0  ;;  %v6574_v40 = vadd.f32 %v6529_v55, %v12374_v54  ;;  %v9224_v26 = vpop.f32.mrb[25].mxu0  ;;  %v6991_v36 = vsel %vm6923_vm6, %v6889_v43, %v6957_v52 }
 0x527   : > { %v6532_v42 = vpop.f32.mrb[26].mxu0 }
 0x528   : > { %v6992_v45 = vsel %vm6924_vm7, %v6890_v0, %v6958_v24  ;;  %v6850_v9 = vadd.f32 %v6805_v34, %v6574_v40  ;;  %v6575_v7 = vadd.f32 %v6532_v42, %v12376_v53  ;;  %v9225_v18 = vpop.f32.mrb[27].mxu0 }
 0x529   : > { %v6813_v41 = vpop.f32.mrb[28].mxu1  ;;  %v7864_v20 = vpack.c.bf16 %v6992_v45, %v6991_v36 }
 0x52a   : > { %v9298_v44 = vpop.f32.mrb[29].mxu1  ;;  %v6891_v16 = vadd.f32 %v12388_v30, %v6850_v9  ;;  %v6851_v33 = vadd.f32 %v6808_v62, %v6575_v7 }
 0x52b   : > { %v6816_v19 = vpop.f32.mrb[30].mxu1  ;;  %7889 = vst [vmem:[%s12399_s29 + $0x70] sm:$0xff] %v7864_v20  }
 0x52c   : > { %v9299_v22 = vpop.f32.mrb[31].mxu1  ;;  %v6959_v23 = vmul.f32 0.2, %v6891_v16  ;;  %v6892_v54 = vadd.f32 %v12388_v30, %v6851_v33  ;;  %vm6925_vm8 = vcmp.gt.f32.partialorder %v6891_v16, 0.0 }
 0x52d   : > { %v6537_v49 = vpop.f32.mrb[28].mxu0 }
 0x52e   : > { %vm6926_vm9 = vcmp.gt.f32.partialorder %v6892_v54, 0.0  ;;  %v6960_v10 = vmul.f32 0.2, %v6892_v54  ;;  %v6576_v53 = vadd.f32 %v6537_v49, %v12380_v1  ;;  %v9228_v47 = vpop.f32.mrb[29].mxu0  ;;  %v6993_v32 = vsel %vm6925_vm8, %v6891_v16, %v6959_v23 }
 0x52f   : > { %v6540_v6 = vpop.f32.mrb[30].mxu0 }
 0x530   : > { %v6994_v61 = vsel %vm6926_vm9, %v6892_v54, %v6960_v10  ;;  %v6852_v27 = vadd.f32 %v6813_v41, %v6576_v53  ;;  %v6577_v25 = vadd.f32 %v6540_v6, %v12382_v11  ;;  %v9229_v57 = vpop.f32.mrb[31].mxu0 }
 0x531   : > { %v7869_v4 = vpack.c.bf16 %v6994_v61, %v6993_v32 }
 0x532   : > { %v6893_v50 = vadd.f32 %v12388_v30, %v6852_v27  ;;  %v6853_v63 = vadd.f32 %v6816_v19, %v6577_v25 }
 0x533   : > { %7890 = vst [vmem:[%s12399_s29 + $0x78] sm:$0xff] %v7869_v4  }
 0x534   : > { %v6961_v39 = vmul.f32 0.2, %v6893_v50  ;;  %v6894_v1 = vadd.f32 %v12388_v30, %v6853_v63  ;;  %vm6927_vm10 = vcmp.gt.f32.partialorder %v6893_v50, 0.0 }
 0x536   : > { %vm6928_vm11 = vcmp.gt.f32.partialorder %v6894_v1, 0.0  ;;  %v6962_v15 = vmul.f32 0.2, %v6894_v1  ;;  %v6995_v46 = vsel %vm6927_vm10, %v6893_v50, %v6961_v39 }
 0x538   : > { %v6996_v51 = vsel %vm6928_vm11, %v6894_v1, %v6962_v15 }
 0x539   : > { %v7874_v11 = vpack.c.bf16 %v6996_v51, %v6995_v46 }
 0x53b   : > { %7891 = vst [vmem:[%s12399_s29 + $0x80] sm:$0xff] %v7874_v11  }
 0x53c   : > { %9555 = shalt.err (!%p9552_p3)
}
 0x53d   : > { %s9556_s19 = scalar_lea.hbm %s12483_s8, 2176  ;;  %s9560_s25 = scalar_lea.hbm %s12534_s3, 4352 }
 0x53e   : > { %p9557_p4 = scmp.ne.s32.totalorder %s12483_s8, %s9556_s19  ;;  %p9561_p9 = scmp.lt.u32.totalorder %s12483_s8, %s12534_s3 }
 0x53f   : > { %p9562_p10 = scmp.lt.u32.totalorder %s9560_s25, %s9556_s19  ;;  %p9564_p12 = scmp.lt.u32.totalorder %s9556_s19, %s12483_s8 }
 0x540   : > { %p9558_p7 = pnand %p9557_p4, %p9669_p5 }
 0x541   : > { %p9563_p11 = por %p9562_p10, %p9561_p9 }
 0x542   : > { %p9559_p8 = pneg %p9558_p7 }
 0x543   : > { %p9565_p13 = por %p9564_p12, %p9563_p11 }
 0x545   : > { %p9566_p0 = pnand %p9565_p13, %p9559_p8 }
 0x547   : > { %9569 = shalt.err (!%p9566_p0)
}
 0x548   : > { %s9609_s27 = smov 64   ;;  %s9610_s28 = smov 4  }
 0x549   : > { %9303 = dma.vmem_to_hbm [thread:$0]  (%p9669_p5), %s12485_s4, 2176, %s12483_s8, %s12490_s16, %s9609_s27, %s9609_s27, %s9610_s28  }
 0x54a PF: > { %p9309_p1 = scmp.ge.s32.totalorder %s9604_s15, 2  ;;  %s7196_s29 = sand.u32 1, %s9592_s12  }
 0x54b   : > { %s7197_s30 = scalar_lea.sflag [#allocation3], %s7196_s29 }
 0x54c   : > { %p9306_p2 = pnand %p9309_p1, %p9673_p6 }
 0x54e   : > { %9587 = dma.done.wait (!%p9306_p2), %s7197_s30, 2176  }
 0x54f   : > { %9589 = vsyncadd (!%p9306_p2), %s7197_s30, 4294965120  ;;  %p13_p3 = scmp.ge.s32.totalorder %s9656_s18, 4   ;;  %s12884_s12 = smov %s9596_s13 }
 0x550   : > { %s12885_s13 = smov %s9600_s14  ;;  %s12886_s14 = smov %s9667_s21 }
 0x551   : > { %s12887_s15 = smov %s9656_s18  ;;  %15 = sbr.rel (!%p13_p3) target bundleno = 3 (0x3), region = 82 }
 0x558   :  { %7202 = vsyncpa [#allocation3], 1 }
 0x559   :  { %7204 = vsyncpa [#allocation3 + $0x1], 1 }

</bundles_post_ra>
